<compile_context>
chip_gen: v7x
topology: tpu7x:2x2x1
jax: 0.10.0
libtpu: 0.0.40
codegen_flags: <defaults>
</compile_context>

<pallas_src>
import functools
import math

import jax
import jax.numpy as jnp
from jax.experimental import pallas as pl
from jax.experimental.pallas import tpu as pltpu  # noqa: F401

# ----------------------------- small config -----------------------------------
EMB = 32          # emb_dim
D_FF = 64         # d_ff
N_LAYERS = 2      # n_layers
N_HEAD = 4        # n_head
D_K = EMB // N_HEAD
SEQ = 8
BATCH = 2
SRC_VOCAB = 20
TRG_VOCAB = 20
PAD_IDX = 0
MAX_SEQ = 16
LN_EPS = 1e-12                      # module's layernorm_epsilon default
ATTN_SCALE = 1.0 / math.sqrt(D_K)
MXU_DTYPE = jnp.bfloat16            # MXU operand dtype (f32 accumulation everywhere)
PAD_V = 128                         # lane-padded width of the output projection


# ------------------------- in-kernel helper functions ---------------------------
def _mm(x, w):
    """Matmul with bf16 MXU operands and f32 accumulation (w already MXU_DTYPE)."""
    return jnp.dot(x.astype(MXU_DTYPE), w, preferred_element_type=jnp.float32)


def _ln(v, g, b):
    mu = jnp.mean(v, axis=-1, keepdims=True)
    var = jnp.mean((v - mu) ** 2, axis=-1, keepdims=True)
    return (v - mu) * jax.lax.rsqrt(var + LN_EPS) * g + b


def _split_heads(x3, off):
    """(B, S, C) -> (H*B, S, D_K), head-major on the leading axis.

    Uses lane slices at D_K boundaries + a leading-axis concat (no lane-dim
    splitting reshapes / 4-D transposes inside the kernel).
    """
    return jnp.concatenate(
        [x3[:, :, off + h * D_K: off + (h + 1) * D_K] for h in range(N_HEAD)],
        axis=0)


def _merge_heads(x3):
    """(H*B, S, D_K) -> (B*S, E): leading-axis slices + one lane-axis concat."""
    b = x3.shape[0] // N_HEAD
    heads = [x3[h * b:(h + 1) * b] for h in range(N_HEAD)]
    return jnp.concatenate(heads, axis=-1).reshape(b * x3.shape[1], EMB)


def _mha(q3, q_off, kv3, k_off, v_off, bias):
    """Head-batched attention.

    q3:  (B, Sq, *) query columns for all heads start at q_off
    kv3: (B, Sk, *) key columns start at k_off, value columns at v_off
    bias: (H*B, Sq, Sk) additive mask bias (0 or -1e9), head-major.
    Returns ctx (B*Sq, E) and probs (H*B, Sq, Sk) (f32).
    """
    q = _split_heads(q3, q_off)                       # (H*B, Sq, D_K)
    k = _split_heads(kv3, k_off)                      # (H*B, Sk, D_K)
    v = _split_heads(kv3, v_off)                      # (H*B, Sk, D_K)

    s = jnp.einsum('bqd,bkd->bqk', q.astype(MXU_DTYPE), k.astype(MXU_DTYPE),
                   preferred_element_type=jnp.float32)
    s = s * ATTN_SCALE + bias                         # additive mask (no where/select)

    m = jnp.max(s, axis=-1, keepdims=True)
    e = jnp.exp(s - m)
    p = e * pl.reciprocal(jnp.sum(e, axis=-1, keepdims=True), approx=True)

    ctx = jnp.einsum('bqk,bkd->bqd', p.astype(MXU_DTYPE), v.astype(MXU_DTYPE),
                     preferred_element_type=jnp.float32)
    return _merge_heads(ctx), p


# ----------------------------- fused Pallas kernel ------------------------------
def _transformer_kernel(
    # activations & additive mask biases
    enc_x_ref, dec_x_ref, enc_bias_ref, dec_self_bias_ref, dec_cross_bias_ref,
    # encoder stacked weights (leading dim = N_LAYERS)
    e_wqkv, e_bqkv, e_wo, e_bo, e_ln1g, e_ln1b,
    e_ffw1, e_ffb1, e_ffw2, e_ffb2, e_ln2g, e_ln2b,
    # decoder stacked weights
    d_swqkv, d_sbqkv, d_swo, d_sbo, d_ln1g, d_ln1b,
    d_cwq, d_cbq, d_cwkv, d_cbkv, d_cwo, d_cbo, d_ln2g, d_ln2b,
    d_ffw1, d_ffb1, d_ffw2, d_ffb2, d_ln3g, d_ln3b,
    # lane-padded output projection
    out_w, out_b,
    # outputs
    logits_ref, enc_prob_ref, dec_self_prob_ref, dec_cross_prob_ref,
    *, batch, seq_dec, seq_enc):

    # ------------------------------ encoder stack ------------------------------
    x = enc_x_ref[...]                                        # (B*Se, E) f32
    enc_bias = enc_bias_ref[...]                              # (H*B, Se, Se)
    for l in range(N_LAYERS):
        qkv3 = (_mm(x, e_wqkv[l]) + e_bqkv[l]).reshape(batch, seq_enc, 3 * EMB)
        ctx, p = _mha(qkv3, 0, qkv3, EMB, 2 * EMB, enc_bias)
        enc_prob_ref[l] = p                                   # (H*B, Se, Se)
        attn = _mm(ctx, e_wo[l]) + e_bo[l]
        h1 = _ln(x + attn, e_ln1g[l], e_ln1b[l])
        hid = jnp.maximum(_mm(h1, e_ffw1[l]) + e_ffb1[l], 0.0)
        ff = _mm(hid, e_ffw2[l]) + e_ffb2[l]
        x = _ln(h1 + ff, e_ln2g[l], e_ln2b[l])
    enc_out = x                                               # stays VMEM-resident

    # ------------------------------ decoder stack ------------------------------
    y = dec_x_ref[...]                                        # (B*Sd, E) f32
    sbias = dec_self_bias_ref[...]                            # (H*B, Sd, Sd)
    cbias = dec_cross_bias_ref[...]                           # (H*B, Sd, Se)
    for l in range(N_LAYERS):
        # masked self-attention
        qkv3 = (_mm(y, d_swqkv[l]) + d_sbqkv[l]).reshape(batch, seq_dec, 3 * EMB)
        ctx, p = _mha(qkv3, 0, qkv3, EMB, 2 * EMB, sbias)
        dec_self_prob_ref[l] = p
        attn = _mm(ctx, d_swo[l]) + d_sbo[l]
        h1 = _ln(y + attn, d_ln1g[l], d_ln1b[l])

        # cross-attention (queries from h1, K/V from VMEM-resident encoder output)
        q3 = (_mm(h1, d_cwq[l]) + d_cbq[l]).reshape(batch, seq_dec, EMB)
        kv3 = (_mm(enc_out, d_cwkv[l]) + d_cbkv[l]).reshape(batch, seq_enc, 2 * EMB)
        cctx, cp = _mha(q3, 0, kv3, 0, EMB, cbias)
        dec_cross_prob_ref[l] = cp
        cattn = _mm(cctx, d_cwo[l]) + d_cbo[l]
        h2 = _ln(h1 + cattn, d_ln2g[l], d_ln2b[l])

        # position-wise FFN
        hid = jnp.maximum(_mm(h2, d_ffw1[l]) + d_ffb1[l], 0.0)
        ff = _mm(hid, d_ffw2[l]) + d_ffb2[l]
        y = _ln(h2 + ff, d_ln3g[l], d_ln3b[l])

    # ------------------- output projection (lane-dense store) -------------------
    logits_ref[...] = _mm(y, out_w[...]) + out_b[...]          # (B*Sd, 128) full-lane vst


# ----------------------------- model glue (host/JAX) ----------------------------
def attn_pad_mask(q_tokens, k_tokens, pad_idx):
    B, Sq = q_tokens.shape
    Sk = k_tokens.shape[1]
    pad = (k_tokens == pad_idx)[:, None, :]           # (B, 1, Sk)
    return jnp.broadcast_to(pad, (B, Sq, Sk))


def subsequent_mask(S):
    return jnp.triu(jnp.ones((S, S), dtype=bool), k=1)


def _attn_bias(mask_bool):
    """bool (B, Sq, Sk) -> additive bias (H*B, Sq, Sk), head-major."""
    bias = jnp.where(mask_bool, -1e9, 0.0).astype(jnp.float32)
    return jnp.tile(bias, (N_HEAD, 1, 1))


def sinusoid_table(max_len, d):
    pos = jnp.arange(max_len, dtype=jnp.float32)[:, None]
    i = jnp.arange(d, dtype=jnp.float32)[None, :]
    angle = pos / jnp.power(10000.0, (2.0 * jnp.floor(i / 2.0)) / d)
    return jnp.where((jnp.arange(d)[None, :] % 2) == 0,
                     jnp.sin(angle), jnp.cos(angle)).astype(jnp.float32)


def transformer_forward(params, enc_input, dec_input):
    B, S_enc = enc_input.shape
    _, S_dec = dec_input.shape
    enc = params["encoder"]
    dec = params["decoder"]

    # token embedding + positional encoding (tiny gathers; pos_dropout = identity)
    enc_x = (enc["tok_emb"][enc_input] + enc["pos_table"][:S_enc][None]).reshape(B * S_enc, EMB)
    dec_x = (dec["tok_emb"][dec_input] + dec["pos_table"][:S_dec][None]).reshape(B * S_dec, EMB)

    # additive attention biases (computed once, loaded once by the fused kernel)
    enc_bias = _attn_bias(attn_pad_mask(enc_input, enc_input, PAD_IDX))
    dec_self_bias = _attn_bias(attn_pad_mask(dec_input, dec_input, PAD_IDX)
                               | subsequent_mask(S_dec)[None])
    dec_cross_bias = _attn_bias(attn_pad_mask(dec_input, enc_input, PAD_IDX))

    e = params["enc_stack"]
    d = params["dec_stack"]

    logits_pad, enc_p, dec_sp, dec_cp = pl.pallas_call(
        functools.partial(_transformer_kernel,
                          batch=B, seq_dec=S_dec, seq_enc=S_enc),
        out_shape=[
            jax.ShapeDtypeStruct((B * S_dec, PAD_V), jnp.float32),
            jax.ShapeDtypeStruct((N_LAYERS, N_HEAD * B, S_enc, S_enc), jnp.float32),
            jax.ShapeDtypeStruct((N_LAYERS, N_HEAD * B, S_dec, S_dec), jnp.float32),
            jax.ShapeDtypeStruct((N_LAYERS, N_HEAD * B, S_dec, S_enc), jnp.float32),
        ],
    )(enc_x, dec_x, enc_bias, dec_self_bias, dec_cross_bias,
      e["wqkv"], e["bqkv"], e["wo"], e["bo"], e["ln1_g"], e["ln1_b"],
      e["ff_w1"], e["ff_b1"], e["ff_w2"], e["ff_b2"], e["ln2_g"], e["ln2_b"],
      d["s_wqkv"], d["s_bqkv"], d["s_wo"], d["s_bo"], d["ln1_g"], d["ln1_b"],
      d["c_wq"], d["c_bq"], d["c_wkv"], d["c_bkv"], d["c_wo"], d["c_bo"],
      d["ln2_g"], d["ln2_b"],
      d["ff_w1"], d["ff_b1"], d["ff_w2"], d["ff_b2"], d["ln3_g"], d["ln3_b"],
      params["out_w"], params["out_b"])

    output = logits_pad[:, :TRG_VOCAB].reshape(B, S_dec, TRG_VOCAB)

    def _to_lbhqk(p, sq, sk):          # (L, H*B, Sq, Sk) -> (L, B, H, Sq, Sk)
        return p.reshape(N_LAYERS, N_HEAD, B, sq, sk).transpose(0, 2, 1, 3, 4)

    return (output,
            _to_lbhqk(enc_p, S_enc, S_enc),
            _to_lbhqk(dec_sp, S_dec, S_dec),
            _to_lbhqk(dec_cp, S_dec, S_enc))


# ----------------------------- parameter init -----------------------------------
def _init_linear(key, in_dim, out_dim):
    k1, k2 = jax.random.split(key)
    bound = 1.0 / math.sqrt(in_dim)
    w = jax.random.uniform(k1, (in_dim, out_dim), jnp.float32, -bound, bound)
    b = jax.random.uniform(k2, (out_dim,), jnp.float32, -bound, bound)
    return w, b


def _ln_params():
    return jnp.ones((1, EMB), jnp.float32), jnp.zeros((1, EMB), jnp.float32)


def _init_enc_layer(key):
    ks = jax.random.split(key, 6)
    wq, bq = _init_linear(ks[0], EMB, EMB)
    wk, bk = _init_linear(ks[1], EMB, EMB)
    wv, bv = _init_linear(ks[2], EMB, EMB)
    wo, bo = _init_linear(ks[3], EMB, EMB)
    w1, b1 = _init_linear(ks[4], EMB, D_FF)
    w2, b2 = _init_linear(ks[5], D_FF, EMB)
    g1, be1 = _ln_params()
    g2, be2 = _ln_params()
    return dict(
        wqkv=jnp.concatenate([wq, wk, wv], axis=1),            # (E, 3E)
        bqkv=jnp.concatenate([bq, bk, bv]).reshape(1, 3 * EMB),
        wo=wo, bo=bo.reshape(1, EMB),
        ln1_g=g1, ln1_b=be1,
        ff_w1=w1, ff_b1=b1.reshape(1, D_FF),
        ff_w2=w2, ff_b2=b2.reshape(1, EMB),
        ln2_g=g2, ln2_b=be2)


def _init_dec_layer(key):
    ks = jax.random.split(key, 10)
    swq, sbq = _init_linear(ks[0], EMB, EMB)
    swk, sbk = _init_linear(ks[1], EMB, EMB)
    swv, sbv = _init_linear(ks[2], EMB, EMB)
    swo, sbo = _init_linear(ks[3], EMB, EMB)
    cwq, cbq = _init_linear(ks[4], EMB, EMB)
    cwk, cbk = _init_linear(ks[5], EMB, EMB)
    cwv, cbv = _init_linear(ks[6], EMB, EMB)
    cwo, cbo = _init_linear(ks[7], EMB, EMB)
    w1, b1 = _init_linear(ks[8], EMB, D_FF)
    w2, b2 = _init_linear(ks[9], D_FF, EMB)
    g1, be1 = _ln_params()
    g2, be2 = _ln_params()
    g3, be3 = _ln_params()
    return dict(
        s_wqkv=jnp.concatenate([swq, swk, swv], axis=1),       # (E, 3E)
        s_bqkv=jnp.concatenate([sbq, sbk, sbv]).reshape(1, 3 * EMB),
        s_wo=swo, s_bo=sbo.reshape(1, EMB),
        ln1_g=g1, ln1_b=be1,
        c_wq=cwq, c_bq=cbq.reshape(1, EMB),
        c_wkv=jnp.concatenate([cwk, cwv], axis=1),             # (E, 2E)
        c_bkv=jnp.concatenate([cbk, cbv]).reshape(1, 2 * EMB),
        c_wo=cwo, c_bo=cbo.reshape(1, EMB),
        ln2_g=g2, ln2_b=be2,
        ff_w1=w1, ff_b1=b1.reshape(1, D_FF),
        ff_w2=w2, ff_b2=b2.reshape(1, EMB),
        ln3_g=g3, ln3_b=be3)


_ENC_MXU_KEYS = ("wqkv", "wo", "ff_w1", "ff_w2")
_DEC_MXU_KEYS = ("s_wqkv", "s_wo", "c_wq", "c_wkv", "c_wo", "ff_w1", "ff_w2")


def _stack_layers(layers, mxu_keys):
    """Stack per-layer dicts into leading-L arrays; matmul weights cast to bf16."""
    out = {}
    for k in layers[0]:
        arr = jnp.stack([lp[k] for lp in layers])
        if k in mxu_keys:
            arr = arr.astype(MXU_DTYPE)
        out[k] = arr
    return out


def init_params(key):
    k_enc, k_dec, k_out, k_eemb, k_demb = jax.random.split(key, 5)
    pos_table = sinusoid_table(MAX_SEQ, EMB)

    enc_emb = 0.02 * jax.random.normal(k_eemb, (SRC_VOCAB, EMB), jnp.float32)
    enc_emb = enc_emb.at[PAD_IDX].set(0.0)       # nn.Embedding padding_idx behavior
    dec_emb = 0.02 * jax.random.normal(k_demb, (TRG_VOCAB, EMB), jnp.float32)
    dec_emb = dec_emb.at[PAD_IDX].set(0.0)

    enc_layers = [_init_enc_layer(k) for k in jax.random.split(k_enc, N_LAYERS)]
    dec_layers = [_init_dec_layer(k) for k in jax.random.split(k_dec, N_LAYERS)]

    out_w, out_b = _init_linear(k_out, EMB, TRG_VOCAB)
    out_w_pad = (jnp.zeros((EMB, PAD_V), jnp.float32)
                 .at[:, :TRG_VOCAB].set(out_w).astype(MXU_DTYPE))
    out_b_pad = jnp.zeros((1, PAD_V), jnp.float32).at[0, :TRG_VOCAB].set(out_b)

    return dict(
        encoder=dict(tok_emb=enc_emb, pos_table=pos_table),
        decoder=dict(tok_emb=dec_emb, pos_table=pos_table),
        enc_stack=_stack_layers(enc_layers, _ENC_MXU_KEYS),
        dec_stack=_stack_layers(dec_layers, _DEC_MXU_KEYS),
        out_w=out_w_pad, out_b=out_b_pad)


# ----------------------------- main ----------------------------------------------
if __name__ == "__main__":
    key = jax.random.PRNGKey(0)
    k_p, k_e, k_d = jax.random.split(key, 3)

    params = init_params(k_p)

    enc_input = jax.random.randint(k_e, (BATCH, SEQ), 1, SRC_VOCAB, dtype=jnp.int32)
    dec_input = jax.random.randint(k_d, (BATCH, SEQ), 1, TRG_VOCAB, dtype=jnp.int32)
    # add some padding tokens so the pad masks are exercised
    enc_input = enc_input.at[1, -2:].set(PAD_IDX)
    dec_input = dec_input.at[1, -3:].set(PAD_IDX)

    fwd = jax.jit(transformer_forward)
    output, enc_self_prob, dec_self_prob, dec_enc_prob = fwd(params, enc_input, dec_input)
    jax.block_until_ready((output, enc_self_prob, dec_self_prob, dec_enc_prob))

    assert output.shape == (BATCH, SEQ, TRG_VOCAB)
    assert enc_self_prob.shape == (N_LAYERS, BATCH, N_HEAD, SEQ, SEQ)
    assert dec_self_prob.shape == (N_LAYERS, BATCH, N_HEAD, SEQ, SEQ)
    assert dec_enc_prob.shape == (N_LAYERS, BATCH, N_HEAD, SEQ, SEQ)
    assert bool(jnp.all(jnp.isfinite(output)))
    assert bool(jnp.all(jnp.isfinite(enc_self_prob)))
    # softmax rows ~ 1 (approx reciprocal => loose tolerance)
    row_sums = jnp.sum(enc_self_prob, axis=-1)
    assert bool(jnp.all(jnp.abs(row_sums - 1.0) < 1e-2))

    print("KERNEL_OK")
</pallas_src>

<mosaic_0001>
module attributes {stable_mosaic.version = 11 : i64} {
  func.func @_transformer_kernel(%arg0: memref<16x32xf32, #tpu.memory_space<vmem>>, %arg1: memref<16x32xf32, #tpu.memory_space<vmem>>, %arg2: memref<8x8x8xf32, #tpu.memory_space<vmem>>, %arg3: memref<8x8x8xf32, #tpu.memory_space<vmem>>, %arg4: memref<8x8x8xf32, #tpu.memory_space<vmem>>, %arg5: memref<2x32x96xbf16, #tpu.memory_space<vmem>>, %arg6: memref<2x1x96xf32, #tpu.memory_space<vmem>>, %arg7: memref<2x32x32xbf16, #tpu.memory_space<vmem>>, %arg8: memref<2x1x32xf32, #tpu.memory_space<vmem>>, %arg9: memref<2x1x32xf32, #tpu.memory_space<vmem>>, %arg10: memref<2x1x32xf32, #tpu.memory_space<vmem>>, %arg11: memref<2x32x64xbf16, #tpu.memory_space<vmem>>, %arg12: memref<2x1x64xf32, #tpu.memory_space<vmem>>, %arg13: memref<2x64x32xbf16, #tpu.memory_space<vmem>>, %arg14: memref<2x1x32xf32, #tpu.memory_space<vmem>>, %arg15: memref<2x1x32xf32, #tpu.memory_space<vmem>>, %arg16: memref<2x1x32xf32, #tpu.memory_space<vmem>>, %arg17: memref<2x32x96xbf16, #tpu.memory_space<vmem>>, %arg18: memref<2x1x96xf32, #tpu.memory_space<vmem>>, %arg19: memref<2x32x32xbf16, #tpu.memory_space<vmem>>, %arg20: memref<2x1x32xf32, #tpu.memory_space<vmem>>, %arg21: memref<2x1x32xf32, #tpu.memory_space<vmem>>, %arg22: memref<2x1x32xf32, #tpu.memory_space<vmem>>, %arg23: memref<2x32x32xbf16, #tpu.memory_space<vmem>>, %arg24: memref<2x1x32xf32, #tpu.memory_space<vmem>>, %arg25: memref<2x32x64xbf16, #tpu.memory_space<vmem>>, %arg26: memref<2x1x64xf32, #tpu.memory_space<vmem>>, %arg27: memref<2x32x32xbf16, #tpu.memory_space<vmem>>, %arg28: memref<2x1x32xf32, #tpu.memory_space<vmem>>, %arg29: memref<2x1x32xf32, #tpu.memory_space<vmem>>, %arg30: memref<2x1x32xf32, #tpu.memory_space<vmem>>, %arg31: memref<2x32x64xbf16, #tpu.memory_space<vmem>>, %arg32: memref<2x1x64xf32, #tpu.memory_space<vmem>>, %arg33: memref<2x64x32xbf16, #tpu.memory_space<vmem>>, %arg34: memref<2x1x32xf32, #tpu.memory_space<vmem>>, %arg35: memref<2x1x32xf32, #tpu.memory_space<vmem>>, %arg36: memref<2x1x32xf32, #tpu.memory_space<vmem>>, %arg37: memref<32x128xbf16, #tpu.memory_space<vmem>>, %arg38: memref<1x128xf32, #tpu.memory_space<vmem>>, %arg39: memref<16x128xf32, #tpu.memory_space<vmem>>, %arg40: memref<2x8x8x8xf32, #tpu.memory_space<vmem>>, %arg41: memref<2x8x8x8xf32, #tpu.memory_space<vmem>>, %arg42: memref<2x8x8x8xf32, #tpu.memory_space<vmem>>) attributes {dimension_semantics = [], scalar_prefetch = 0 : i64, scratch_operands = 0 : i64, tpu.core_type = #tpu.core_type<tc>} {
    %c0 = arith.constant 0 : index
    %c0_0 = arith.constant 0 : index
    %0 = vector.load %arg0[%c0, %c0_0] : memref<16x32xf32, #tpu.memory_space<vmem>>, vector<16x32xf32>
    %c0_1 = arith.constant 0 : index
    %c0_2 = arith.constant 0 : index
    %c0_3 = arith.constant 0 : index
    %1 = vector.load %arg2[%c0_1, %c0_2, %c0_3] : memref<8x8x8xf32, #tpu.memory_space<vmem>>, vector<8x8x8xf32>
    %c0_4 = arith.constant 0 : index
    %c0_5 = arith.constant 0 : index
    %c0_6 = arith.constant 0 : index
    %2 = vector.load %arg5[%c0_4, %c0_5, %c0_6] : memref<2x32x96xbf16, #tpu.memory_space<vmem>>, vector<1x32x96xbf16>
    %3 = vector.shape_cast %2 : vector<1x32x96xbf16> to vector<32x96xbf16>
    %4 = arith.truncf %0 : vector<16x32xf32> to vector<16x32xbf16>
    %cst = arith.constant dense<0.000000e+00> : vector<16x96xf32>
    %5 = tpu.matmul %4, %3, %cst {dimension_numbers = #tpu.dot_dimension_numbers<[1], [0], [0], [1], [0, 0, 1, 1], [], []>} : vector<16x32xbf16>, vector<32x96xbf16>, vector<16x96xf32> -> vector<16x96xf32>
    %c0_7 = arith.constant 0 : index
    %c0_8 = arith.constant 0 : index
    %c0_9 = arith.constant 0 : index
    %6 = vector.load %arg6[%c0_7, %c0_8, %c0_9] : memref<2x1x96xf32, #tpu.memory_space<vmem>>, vector<1x1x96xf32>
    %7 = vector.shape_cast %6 : vector<1x1x96xf32> to vector<1x96xf32>
    %8 = vector.broadcast %7 : vector<1x96xf32> to vector<16x96xf32>
    %9 = arith.addf %5, %8 : vector<16x96xf32>
    %10 = vector.shape_cast %9 : vector<16x96xf32> to vector<2x8x96xf32>
    %11 = vector.extract_strided_slice %10 {offsets = [0, 0, 0], sizes = [2, 8, 8], strides = [1, 1, 1]} : vector<2x8x96xf32> to vector<2x8x8xf32>
    %12 = vector.extract_strided_slice %10 {offsets = [0, 0, 8], sizes = [2, 8, 8], strides = [1, 1, 1]} : vector<2x8x96xf32> to vector<2x8x8xf32>
    %13 = vector.extract_strided_slice %10 {offsets = [0, 0, 16], sizes = [2, 8, 8], strides = [1, 1, 1]} : vector<2x8x96xf32> to vector<2x8x8xf32>
    %14 = vector.extract_strided_slice %10 {offsets = [0, 0, 24], sizes = [2, 8, 8], strides = [1, 1, 1]} : vector<2x8x96xf32> to vector<2x8x8xf32>
    %15 = tpu.concatenate %11, %12, %13, %14 in 0 : vector<2x8x8xf32>, vector<2x8x8xf32>, vector<2x8x8xf32>, vector<2x8x8xf32> -> vector<8x8x8xf32>
    %16 = vector.extract_strided_slice %10 {offsets = [0, 0, 32], sizes = [2, 8, 8], strides = [1, 1, 1]} : vector<2x8x96xf32> to vector<2x8x8xf32>
    %17 = vector.extract_strided_slice %10 {offsets = [0, 0, 40], sizes = [2, 8, 8], strides = [1, 1, 1]} : vector<2x8x96xf32> to vector<2x8x8xf32>
    %18 = vector.extract_strided_slice %10 {offsets = [0, 0, 48], sizes = [2, 8, 8], strides = [1, 1, 1]} : vector<2x8x96xf32> to vector<2x8x8xf32>
    %19 = vector.extract_strided_slice %10 {offsets = [0, 0, 56], sizes = [2, 8, 8], strides = [1, 1, 1]} : vector<2x8x96xf32> to vector<2x8x8xf32>
    %20 = tpu.concatenate %16, %17, %18, %19 in 0 : vector<2x8x8xf32>, vector<2x8x8xf32>, vector<2x8x8xf32>, vector<2x8x8xf32> -> vector<8x8x8xf32>
    %21 = vector.extract_strided_slice %10 {offsets = [0, 0, 64], sizes = [2, 8, 8], strides = [1, 1, 1]} : vector<2x8x96xf32> to vector<2x8x8xf32>
    %22 = vector.extract_strided_slice %10 {offsets = [0, 0, 72], sizes = [2, 8, 8], strides = [1, 1, 1]} : vector<2x8x96xf32> to vector<2x8x8xf32>
    %23 = vector.extract_strided_slice %10 {offsets = [0, 0, 80], sizes = [2, 8, 8], strides = [1, 1, 1]} : vector<2x8x96xf32> to vector<2x8x8xf32>
    %24 = vector.extract_strided_slice %10 {offsets = [0, 0, 88], sizes = [2, 8, 8], strides = [1, 1, 1]} : vector<2x8x96xf32> to vector<2x8x8xf32>
    %25 = tpu.concatenate %21, %22, %23, %24 in 0 : vector<2x8x8xf32>, vector<2x8x8xf32>, vector<2x8x8xf32>, vector<2x8x8xf32> -> vector<8x8x8xf32>
    %26 = arith.truncf %15 : vector<8x8x8xf32> to vector<8x8x8xbf16>
    %27 = arith.truncf %20 : vector<8x8x8xf32> to vector<8x8x8xbf16>
    "tpu.trace_start"() <{level = 10 : i32, message = "bqd,bkd->bqk"}> : () -> ()
    %cst_10 = arith.constant dense<0.000000e+00> : vector<8x8x8xf32>
    %28 = tpu.matmul %26, %27, %cst_10 {dimension_numbers = #tpu.dot_dimension_numbers<[2], [2], [1], [1], [0, 0, 0, 1, 1, 1], [0], [0]>} : vector<8x8x8xbf16>, vector<8x8x8xbf16>, vector<8x8x8xf32> -> vector<8x8x8xf32>
    "tpu.trace_stop"() : () -> ()
    %cst_11 = arith.constant 0.353553385 : f32
    %29 = vector.broadcast %cst_11 : f32 to vector<8x8x8xf32>
    %30 = arith.mulf %28, %29 : vector<8x8x8xf32>
    %31 = arith.addf %30, %1 : vector<8x8x8xf32>
    %cst_12 = arith.constant dense<0xFF800000> : vector<8x8xf32>
    %32 = vector.multi_reduction <maximumf>, %31, %cst_12 [2] : vector<8x8x8xf32> to vector<8x8xf32>
    %33 = vector.shape_cast %32 : vector<8x8xf32> to vector<8x8x1xf32>
    %34 = vector.broadcast %33 : vector<8x8x1xf32> to vector<8x8x8xf32>
    %35 = arith.subf %31, %34 : vector<8x8x8xf32>
    %36 = math.exp %35 : vector<8x8x8xf32>
    %cst_13 = arith.constant dense<0.000000e+00> : vector<8x8xf32>
    %37 = vector.multi_reduction <add>, %36, %cst_13 [2] : vector<8x8x8xf32> to vector<8x8xf32>
    %38 = vector.shape_cast %37 : vector<8x8xf32> to vector<8x8x1xf32>
    %39 = tpu.reciprocal %38 {approx = true} : vector<8x8x1xf32> -> vector<8x8x1xf32>
    %40 = vector.broadcast %39 : vector<8x8x1xf32> to vector<8x8x8xf32>
    %41 = arith.mulf %36, %40 : vector<8x8x8xf32>
    %42 = arith.truncf %41 : vector<8x8x8xf32> to vector<8x8x8xbf16>
    %43 = arith.truncf %25 : vector<8x8x8xf32> to vector<8x8x8xbf16>
    "tpu.trace_start"() <{level = 10 : i32, message = "bqk,bkd->bqd"}> : () -> ()
    %cst_14 = arith.constant dense<0.000000e+00> : vector<8x8x8xf32>
    %44 = tpu.matmul %42, %43, %cst_14 {dimension_numbers = #tpu.dot_dimension_numbers<[2], [1], [1], [2], [0, 0, 0, 1, 1, 2], [0], [0]>} : vector<8x8x8xbf16>, vector<8x8x8xbf16>, vector<8x8x8xf32> -> vector<8x8x8xf32>
    "tpu.trace_stop"() : () -> ()
    %45 = vector.extract_strided_slice %44 {offsets = [0, 0, 0], sizes = [2, 8, 8], strides = [1, 1, 1]} : vector<8x8x8xf32> to vector<2x8x8xf32>
    %46 = vector.extract_strided_slice %44 {offsets = [2, 0, 0], sizes = [2, 8, 8], strides = [1, 1, 1]} : vector<8x8x8xf32> to vector<2x8x8xf32>
    %47 = vector.extract_strided_slice %44 {offsets = [4, 0, 0], sizes = [2, 8, 8], strides = [1, 1, 1]} : vector<8x8x8xf32> to vector<2x8x8xf32>
    %48 = vector.extract_strided_slice %44 {offsets = [6, 0, 0], sizes = [2, 8, 8], strides = [1, 1, 1]} : vector<8x8x8xf32> to vector<2x8x8xf32>
    %49 = tpu.concatenate %45, %46, %47, %48 in 2 : vector<2x8x8xf32>, vector<2x8x8xf32>, vector<2x8x8xf32>, vector<2x8x8xf32> -> vector<2x8x32xf32>
    %50 = vector.shape_cast %49 : vector<2x8x32xf32> to vector<16x32xf32>
    %c0_15 = arith.constant 0 : index
    %c0_16 = arith.constant 0 : index
    %c0_17 = arith.constant 0 : index
    %c0_18 = arith.constant 0 : index
    %51 = vector.load %arg40[%c0_15, %c0_16, %c0_17, %c0_18] : memref<2x8x8x8xf32, #tpu.memory_space<vmem>>, vector<1x8x8x8xf32>
    %52 = vector.shape_cast %51 : vector<1x8x8x8xf32> to vector<8x8x8xf32>
    %53 = vector.shape_cast %41 : vector<8x8x8xf32> to vector<1x8x8x8xf32>
    tpu.vector_store %arg40[%c0_15, %c0_16, %c0_17, %c0_18], %53 {strides = array<i32>} : memref<2x8x8x8xf32, #tpu.memory_space<vmem>>, vector<1x8x8x8xf32>,
    %c0_19 = arith.constant 0 : index
    %c0_20 = arith.constant 0 : index
    %c0_21 = arith.constant 0 : index
    %54 = vector.load %arg7[%c0_19, %c0_20, %c0_21] : memref<2x32x32xbf16, #tpu.memory_space<vmem>>, vector<1x32x32xbf16>
    %55 = vector.shape_cast %54 : vector<1x32x32xbf16> to vector<32x32xbf16>
    %56 = arith.truncf %50 : vector<16x32xf32> to vector<16x32xbf16>
    %cst_22 = arith.constant dense<0.000000e+00> : vector<16x32xf32>
    %57 = tpu.matmul %56, %55, %cst_22 {dimension_numbers = #tpu.dot_dimension_numbers<[1], [0], [0], [1], [0, 0, 1, 1], [], []>} : vector<16x32xbf16>, vector<32x32xbf16>, vector<16x32xf32> -> vector<16x32xf32>
    %c0_23 = arith.constant 0 : index
    %c0_24 = arith.constant 0 : index
    %c0_25 = arith.constant 0 : index
    %58 = vector.load %arg8[%c0_23, %c0_24, %c0_25] : memref<2x1x32xf32, #tpu.memory_space<vmem>>, vector<1x1x32xf32>
    %59 = vector.shape_cast %58 : vector<1x1x32xf32> to vector<1x32xf32>
    %60 = vector.broadcast %59 : vector<1x32xf32> to vector<16x32xf32>
    %61 = arith.addf %57, %60 : vector<16x32xf32>
    %62 = arith.addf %0, %61 : vector<16x32xf32>
    %c0_26 = arith.constant 0 : index
    %c0_27 = arith.constant 0 : index
    %c0_28 = arith.constant 0 : index
    %63 = vector.load %arg9[%c0_26, %c0_27, %c0_28] : memref<2x1x32xf32, #tpu.memory_space<vmem>>, vector<1x1x32xf32>
    %64 = vector.shape_cast %63 : vector<1x1x32xf32> to vector<1x32xf32>
    %c0_29 = arith.constant 0 : index
    %c0_30 = arith.constant 0 : index
    %c0_31 = arith.constant 0 : index
    %65 = vector.load %arg10[%c0_29, %c0_30, %c0_31] : memref<2x1x32xf32, #tpu.memory_space<vmem>>, vector<1x1x32xf32>
    %66 = vector.shape_cast %65 : vector<1x1x32xf32> to vector<1x32xf32>
    %cst_32 = arith.constant dense<0.000000e+00> : vector<16xf32>
    %67 = vector.multi_reduction <add>, %62, %cst_32 [1] : vector<16x32xf32> to vector<16xf32>
    %68 = vector.shape_cast %67 : vector<16xf32> to vector<16x1xf32>
    %cst_33 = arith.constant 3.200000e+01 : f32
    %69 = vector.broadcast %cst_33 : f32 to vector<16x1xf32>
    %70 = arith.divf %68, %69 : vector<16x1xf32>
    %71 = vector.broadcast %70 : vector<16x1xf32> to vector<16x32xf32>
    %72 = arith.subf %62, %71 : vector<16x32xf32>
    %73 = arith.mulf %72, %72 : vector<16x32xf32>
    %cst_34 = arith.constant dense<0.000000e+00> : vector<16xf32>
    %74 = vector.multi_reduction <add>, %73, %cst_34 [1] : vector<16x32xf32> to vector<16xf32>
    %75 = vector.shape_cast %74 : vector<16xf32> to vector<16x1xf32>
    %cst_35 = arith.constant 3.200000e+01 : f32
    %76 = vector.broadcast %cst_35 : f32 to vector<16x1xf32>
    %77 = arith.divf %75, %76 : vector<16x1xf32>
    %78 = vector.broadcast %70 : vector<16x1xf32> to vector<16x32xf32>
    %79 = arith.subf %62, %78 : vector<16x32xf32>
    %cst_36 = arith.constant 9.99999996E-13 : f32
    %80 = vector.broadcast %cst_36 : f32 to vector<16x1xf32>
    %81 = arith.addf %77, %80 : vector<16x1xf32>
    %82 = math.rsqrt %81 : vector<16x1xf32>
    %83 = vector.broadcast %82 : vector<16x1xf32> to vector<16x32xf32>
    %84 = arith.mulf %79, %83 : vector<16x32xf32>
    %85 = vector.broadcast %64 : vector<1x32xf32> to vector<16x32xf32>
    %86 = arith.mulf %84, %85 : vector<16x32xf32>
    %87 = vector.broadcast %66 : vector<1x32xf32> to vector<16x32xf32>
    %88 = arith.addf %86, %87 : vector<16x32xf32>
    %c0_37 = arith.constant 0 : index
    %c0_38 = arith.constant 0 : index
    %c0_39 = arith.constant 0 : index
    %89 = vector.load %arg11[%c0_37, %c0_38, %c0_39] : memref<2x32x64xbf16, #tpu.memory_space<vmem>>, vector<1x32x64xbf16>
    %90 = vector.shape_cast %89 : vector<1x32x64xbf16> to vector<32x64xbf16>
    %91 = arith.truncf %88 : vector<16x32xf32> to vector<16x32xbf16>
    %cst_40 = arith.constant dense<0.000000e+00> : vector<16x64xf32>
    %92 = tpu.matmul %91, %90, %cst_40 {dimension_numbers = #tpu.dot_dimension_numbers<[1], [0], [0], [1], [0, 0, 1, 1], [], []>} : vector<16x32xbf16>, vector<32x64xbf16>, vector<16x64xf32> -> vector<16x64xf32>
    %c0_41 = arith.constant 0 : index
    %c0_42 = arith.constant 0 : index
    %c0_43 = arith.constant 0 : index
    %93 = vector.load %arg12[%c0_41, %c0_42, %c0_43] : memref<2x1x64xf32, #tpu.memory_space<vmem>>, vector<1x1x64xf32>
    %94 = vector.shape_cast %93 : vector<1x1x64xf32> to vector<1x64xf32>
    %95 = vector.broadcast %94 : vector<1x64xf32> to vector<16x64xf32>
    %96 = arith.addf %92, %95 : vector<16x64xf32>
    %cst_44 = arith.constant 0.000000e+00 : f32
    %97 = vector.broadcast %cst_44 : f32 to vector<16x64xf32>
    %98 = arith.maximumf %96, %97 : vector<16x64xf32>
    %c0_45 = arith.constant 0 : index
    %c0_46 = arith.constant 0 : index
    %c0_47 = arith.constant 0 : index
    %99 = vector.load %arg13[%c0_45, %c0_46, %c0_47] : memref<2x64x32xbf16, #tpu.memory_space<vmem>>, vector<1x64x32xbf16>
    %100 = vector.shape_cast %99 : vector<1x64x32xbf16> to vector<64x32xbf16>
    %101 = arith.truncf %98 : vector<16x64xf32> to vector<16x64xbf16>
    %cst_48 = arith.constant dense<0.000000e+00> : vector<16x32xf32>
    %102 = tpu.matmul %101, %100, %cst_48 {dimension_numbers = #tpu.dot_dimension_numbers<[1], [0], [0], [1], [0, 0, 1, 1], [], []>} : vector<16x64xbf16>, vector<64x32xbf16>, vector<16x32xf32> -> vector<16x32xf32>
    %c0_49 = arith.constant 0 : index
    %c0_50 = arith.constant 0 : index
    %c0_51 = arith.constant 0 : index
    %103 = vector.load %arg14[%c0_49, %c0_50, %c0_51] : memref<2x1x32xf32, #tpu.memory_space<vmem>>, vector<1x1x32xf32>
    %104 = vector.shape_cast %103 : vector<1x1x32xf32> to vector<1x32xf32>
    %105 = vector.broadcast %104 : vector<1x32xf32> to vector<16x32xf32>
    %106 = arith.addf %102, %105 : vector<16x32xf32>
    %107 = arith.addf %88, %106 : vector<16x32xf32>
    %c0_52 = arith.constant 0 : index
    %c0_53 = arith.constant 0 : index
    %c0_54 = arith.constant 0 : index
    %108 = vector.load %arg15[%c0_52, %c0_53, %c0_54] : memref<2x1x32xf32, #tpu.memory_space<vmem>>, vector<1x1x32xf32>
    %109 = vector.shape_cast %108 : vector<1x1x32xf32> to vector<1x32xf32>
    %c0_55 = arith.constant 0 : index
    %c0_56 = arith.constant 0 : index
    %c0_57 = arith.constant 0 : index
    %110 = vector.load %arg16[%c0_55, %c0_56, %c0_57] : memref<2x1x32xf32, #tpu.memory_space<vmem>>, vector<1x1x32xf32>
    %111 = vector.shape_cast %110 : vector<1x1x32xf32> to vector<1x32xf32>
    %cst_58 = arith.constant dense<0.000000e+00> : vector<16xf32>
    %112 = vector.multi_reduction <add>, %107, %cst_58 [1] : vector<16x32xf32> to vector<16xf32>
    %113 = vector.shape_cast %112 : vector<16xf32> to vector<16x1xf32>
    %cst_59 = arith.constant 3.200000e+01 : f32
    %114 = vector.broadcast %cst_59 : f32 to vector<16x1xf32>
    %115 = arith.divf %113, %114 : vector<16x1xf32>
    %116 = vector.broadcast %115 : vector<16x1xf32> to vector<16x32xf32>
    %117 = arith.subf %107, %116 : vector<16x32xf32>
    %118 = arith.mulf %117, %117 : vector<16x32xf32>
    %cst_60 = arith.constant dense<0.000000e+00> : vector<16xf32>
    %119 = vector.multi_reduction <add>, %118, %cst_60 [1] : vector<16x32xf32> to vector<16xf32>
    %120 = vector.shape_cast %119 : vector<16xf32> to vector<16x1xf32>
    %cst_61 = arith.constant 3.200000e+01 : f32
    %121 = vector.broadcast %cst_61 : f32 to vector<16x1xf32>
    %122 = arith.divf %120, %121 : vector<16x1xf32>
    %123 = vector.broadcast %115 : vector<16x1xf32> to vector<16x32xf32>
    %124 = arith.subf %107, %123 : vector<16x32xf32>
    %cst_62 = arith.constant 9.99999996E-13 : f32
    %125 = vector.broadcast %cst_62 : f32 to vector<16x1xf32>
    %126 = arith.addf %122, %125 : vector<16x1xf32>
    %127 = math.rsqrt %126 : vector<16x1xf32>
    %128 = vector.broadcast %127 : vector<16x1xf32> to vector<16x32xf32>
    %129 = arith.mulf %124, %128 : vector<16x32xf32>
    %130 = vector.broadcast %109 : vector<1x32xf32> to vector<16x32xf32>
    %131 = arith.mulf %129, %130 : vector<16x32xf32>
    %132 = vector.broadcast %111 : vector<1x32xf32> to vector<16x32xf32>
    %133 = arith.addf %131, %132 : vector<16x32xf32>
    %c1 = arith.constant 1 : index
    %c0_63 = arith.constant 0 : index
    %c0_64 = arith.constant 0 : index
    %134 = vector.load %arg5[%c1, %c0_63, %c0_64] : memref<2x32x96xbf16, #tpu.memory_space<vmem>>, vector<1x32x96xbf16>
    %135 = vector.shape_cast %134 : vector<1x32x96xbf16> to vector<32x96xbf16>
    %136 = arith.truncf %133 : vector<16x32xf32> to vector<16x32xbf16>
    %cst_65 = arith.constant dense<0.000000e+00> : vector<16x96xf32>
    %137 = tpu.matmul %136, %135, %cst_65 {dimension_numbers = #tpu.dot_dimension_numbers<[1], [0], [0], [1], [0, 0, 1, 1], [], []>} : vector<16x32xbf16>, vector<32x96xbf16>, vector<16x96xf32> -> vector<16x96xf32>
    %c1_66 = arith.constant 1 : index
    %c0_67 = arith.constant 0 : index
    %c0_68 = arith.constant 0 : index
    %138 = vector.load %arg6[%c1_66, %c0_67, %c0_68] : memref<2x1x96xf32, #tpu.memory_space<vmem>>, vector<1x1x96xf32>
    %139 = vector.shape_cast %138 : vector<1x1x96xf32> to vector<1x96xf32>
    %140 = vector.broadcast %139 : vector<1x96xf32> to vector<16x96xf32>
    %141 = arith.addf %137, %140 : vector<16x96xf32>
    %142 = vector.shape_cast %141 : vector<16x96xf32> to vector<2x8x96xf32>
    %143 = vector.extract_strided_slice %142 {offsets = [0, 0, 0], sizes = [2, 8, 8], strides = [1, 1, 1]} : vector<2x8x96xf32> to vector<2x8x8xf32>
    %144 = vector.extract_strided_slice %142 {offsets = [0, 0, 8], sizes = [2, 8, 8], strides = [1, 1, 1]} : vector<2x8x96xf32> to vector<2x8x8xf32>
    %145 = vector.extract_strided_slice %142 {offsets = [0, 0, 16], sizes = [2, 8, 8], strides = [1, 1, 1]} : vector<2x8x96xf32> to vector<2x8x8xf32>
    %146 = vector.extract_strided_slice %142 {offsets = [0, 0, 24], sizes = [2, 8, 8], strides = [1, 1, 1]} : vector<2x8x96xf32> to vector<2x8x8xf32>
    %147 = tpu.concatenate %143, %144, %145, %146 in 0 : vector<2x8x8xf32>, vector<2x8x8xf32>, vector<2x8x8xf32>, vector<2x8x8xf32> -> vector<8x8x8xf32>
    %148 = vector.extract_strided_slice %142 {offsets = [0, 0, 32], sizes = [2, 8, 8], strides = [1, 1, 1]} : vector<2x8x96xf32> to vector<2x8x8xf32>
    %149 = vector.extract_strided_slice %142 {offsets = [0, 0, 40], sizes = [2, 8, 8], strides = [1, 1, 1]} : vector<2x8x96xf32> to vector<2x8x8xf32>
    %150 = vector.extract_strided_slice %142 {offsets = [0, 0, 48], sizes = [2, 8, 8], strides = [1, 1, 1]} : vector<2x8x96xf32> to vector<2x8x8xf32>
    %151 = vector.extract_strided_slice %142 {offsets = [0, 0, 56], sizes = [2, 8, 8], strides = [1, 1, 1]} : vector<2x8x96xf32> to vector<2x8x8xf32>
    %152 = tpu.concatenate %148, %149, %150, %151 in 0 : vector<2x8x8xf32>, vector<2x8x8xf32>, vector<2x8x8xf32>, vector<2x8x8xf32> -> vector<8x8x8xf32>
    %153 = vector.extract_strided_slice %142 {offsets = [0, 0, 64], sizes = [2, 8, 8], strides = [1, 1, 1]} : vector<2x8x96xf32> to vector<2x8x8xf32>
    %154 = vector.extract_strided_slice %142 {offsets = [0, 0, 72], sizes = [2, 8, 8], strides = [1, 1, 1]} : vector<2x8x96xf32> to vector<2x8x8xf32>
    %155 = vector.extract_strided_slice %142 {offsets = [0, 0, 80], sizes = [2, 8, 8], strides = [1, 1, 1]} : vector<2x8x96xf32> to vector<2x8x8xf32>
    %156 = vector.extract_strided_slice %142 {offsets = [0, 0, 88], sizes = [2, 8, 8], strides = [1, 1, 1]} : vector<2x8x96xf32> to vector<2x8x8xf32>
    %157 = tpu.concatenate %153, %154, %155, %156 in 0 : vector<2x8x8xf32>, vector<2x8x8xf32>, vector<2x8x8xf32>, vector<2x8x8xf32> -> vector<8x8x8xf32>
    %158 = arith.truncf %147 : vector<8x8x8xf32> to vector<8x8x8xbf16>
    %159 = arith.truncf %152 : vector<8x8x8xf32> to vector<8x8x8xbf16>
    "tpu.trace_start"() <{level = 10 : i32, message = "bqd,bkd->bqk"}> : () -> ()
    %cst_69 = arith.constant dense<0.000000e+00> : vector<8x8x8xf32>
    %160 = tpu.matmul %158, %159, %cst_69 {dimension_numbers = #tpu.dot_dimension_numbers<[2], [2], [1], [1], [0, 0, 0, 1, 1, 1], [0], [0]>} : vector<8x8x8xbf16>, vector<8x8x8xbf16>, vector<8x8x8xf32> -> vector<8x8x8xf32>
    "tpu.trace_stop"() : () -> ()
    %cst_70 = arith.constant 0.353553385 : f32
    %161 = vector.broadcast %cst_70 : f32 to vector<8x8x8xf32>
    %162 = arith.mulf %160, %161 : vector<8x8x8xf32>
    %163 = arith.addf %162, %1 : vector<8x8x8xf32>
    %cst_71 = arith.constant dense<0xFF800000> : vector<8x8xf32>
    %164 = vector.multi_reduction <maximumf>, %163, %cst_71 [2] : vector<8x8x8xf32> to vector<8x8xf32>
    %165 = vector.shape_cast %164 : vector<8x8xf32> to vector<8x8x1xf32>
    %166 = vector.broadcast %165 : vector<8x8x1xf32> to vector<8x8x8xf32>
    %167 = arith.subf %163, %166 : vector<8x8x8xf32>
    %168 = math.exp %167 : vector<8x8x8xf32>
    %cst_72 = arith.constant dense<0.000000e+00> : vector<8x8xf32>
    %169 = vector.multi_reduction <add>, %168, %cst_72 [2] : vector<8x8x8xf32> to vector<8x8xf32>
    %170 = vector.shape_cast %169 : vector<8x8xf32> to vector<8x8x1xf32>
    %171 = tpu.reciprocal %170 {approx = true} : vector<8x8x1xf32> -> vector<8x8x1xf32>
    %172 = vector.broadcast %171 : vector<8x8x1xf32> to vector<8x8x8xf32>
    %173 = arith.mulf %168, %172 : vector<8x8x8xf32>
    %174 = arith.truncf %173 : vector<8x8x8xf32> to vector<8x8x8xbf16>
    %175 = arith.truncf %157 : vector<8x8x8xf32> to vector<8x8x8xbf16>
    "tpu.trace_start"() <{level = 10 : i32, message = "bqk,bkd->bqd"}> : () -> ()
    %cst_73 = arith.constant dense<0.000000e+00> : vector<8x8x8xf32>
    %176 = tpu.matmul %174, %175, %cst_73 {dimension_numbers = #tpu.dot_dimension_numbers<[2], [1], [1], [2], [0, 0, 0, 1, 1, 2], [0], [0]>} : vector<8x8x8xbf16>, vector<8x8x8xbf16>, vector<8x8x8xf32> -> vector<8x8x8xf32>
    "tpu.trace_stop"() : () -> ()
    %177 = vector.extract_strided_slice %176 {offsets = [0, 0, 0], sizes = [2, 8, 8], strides = [1, 1, 1]} : vector<8x8x8xf32> to vector<2x8x8xf32>
    %178 = vector.extract_strided_slice %176 {offsets = [2, 0, 0], sizes = [2, 8, 8], strides = [1, 1, 1]} : vector<8x8x8xf32> to vector<2x8x8xf32>
    %179 = vector.extract_strided_slice %176 {offsets = [4, 0, 0], sizes = [2, 8, 8], strides = [1, 1, 1]} : vector<8x8x8xf32> to vector<2x8x8xf32>
    %180 = vector.extract_strided_slice %176 {offsets = [6, 0, 0], sizes = [2, 8, 8], strides = [1, 1, 1]} : vector<8x8x8xf32> to vector<2x8x8xf32>
    %181 = tpu.concatenate %177, %178, %179, %180 in 2 : vector<2x8x8xf32>, vector<2x8x8xf32>, vector<2x8x8xf32>, vector<2x8x8xf32> -> vector<2x8x32xf32>
    %182 = vector.shape_cast %181 : vector<2x8x32xf32> to vector<16x32xf32>
    %c1_74 = arith.constant 1 : index
    %c0_75 = arith.constant 0 : index
    %c0_76 = arith.constant 0 : index
    %c0_77 = arith.constant 0 : index
    %183 = vector.load %arg40[%c1_74, %c0_75, %c0_76, %c0_77] : memref<2x8x8x8xf32, #tpu.memory_space<vmem>>, vector<1x8x8x8xf32>
    %184 = vector.shape_cast %183 : vector<1x8x8x8xf32> to vector<8x8x8xf32>
    %185 = vector.shape_cast %173 : vector<8x8x8xf32> to vector<1x8x8x8xf32>
    tpu.vector_store %arg40[%c1_74, %c0_75, %c0_76, %c0_77], %185 {strides = array<i32>} : memref<2x8x8x8xf32, #tpu.memory_space<vmem>>, vector<1x8x8x8xf32>,
    %c1_78 = arith.constant 1 : index
    %c0_79 = arith.constant 0 : index
    %c0_80 = arith.constant 0 : index
    %186 = vector.load %arg7[%c1_78, %c0_79, %c0_80] : memref<2x32x32xbf16, #tpu.memory_space<vmem>>, vector<1x32x32xbf16>
    %187 = vector.shape_cast %186 : vector<1x32x32xbf16> to vector<32x32xbf16>
    %188 = arith.truncf %182 : vector<16x32xf32> to vector<16x32xbf16>
    %cst_81 = arith.constant dense<0.000000e+00> : vector<16x32xf32>
    %189 = tpu.matmul %188, %187, %cst_81 {dimension_numbers = #tpu.dot_dimension_numbers<[1], [0], [0], [1], [0, 0, 1, 1], [], []>} : vector<16x32xbf16>, vector<32x32xbf16>, vector<16x32xf32> -> vector<16x32xf32>
    %c1_82 = arith.constant 1 : index
    %c0_83 = arith.constant 0 : index
    %c0_84 = arith.constant 0 : index
    %190 = vector.load %arg8[%c1_82, %c0_83, %c0_84] : memref<2x1x32xf32, #tpu.memory_space<vmem>>, vector<1x1x32xf32>
    %191 = vector.shape_cast %190 : vector<1x1x32xf32> to vector<1x32xf32>
    %192 = vector.broadcast %191 : vector<1x32xf32> to vector<16x32xf32>
    %193 = arith.addf %189, %192 : vector<16x32xf32>
    %194 = arith.addf %133, %193 : vector<16x32xf32>
    %c1_85 = arith.constant 1 : index
    %c0_86 = arith.constant 0 : index
    %c0_87 = arith.constant 0 : index
    %195 = vector.load %arg9[%c1_85, %c0_86, %c0_87] : memref<2x1x32xf32, #tpu.memory_space<vmem>>, vector<1x1x32xf32>
    %196 = vector.shape_cast %195 : vector<1x1x32xf32> to vector<1x32xf32>
    %c1_88 = arith.constant 1 : index
    %c0_89 = arith.constant 0 : index
    %c0_90 = arith.constant 0 : index
    %197 = vector.load %arg10[%c1_88, %c0_89, %c0_90] : memref<2x1x32xf32, #tpu.memory_space<vmem>>, vector<1x1x32xf32>
    %198 = vector.shape_cast %197 : vector<1x1x32xf32> to vector<1x32xf32>
    %cst_91 = arith.constant dense<0.000000e+00> : vector<16xf32>
    %199 = vector.multi_reduction <add>, %194, %cst_91 [1] : vector<16x32xf32> to vector<16xf32>
    %200 = vector.shape_cast %199 : vector<16xf32> to vector<16x1xf32>
    %cst_92 = arith.constant 3.200000e+01 : f32
    %201 = vector.broadcast %cst_92 : f32 to vector<16x1xf32>
    %202 = arith.divf %200, %201 : vector<16x1xf32>
    %203 = vector.broadcast %202 : vector<16x1xf32> to vector<16x32xf32>
    %204 = arith.subf %194, %203 : vector<16x32xf32>
    %205 = arith.mulf %204, %204 : vector<16x32xf32>
    %cst_93 = arith.constant dense<0.000000e+00> : vector<16xf32>
    %206 = vector.multi_reduction <add>, %205, %cst_93 [1] : vector<16x32xf32> to vector<16xf32>
    %207 = vector.shape_cast %206 : vector<16xf32> to vector<16x1xf32>
    %cst_94 = arith.constant 3.200000e+01 : f32
    %208 = vector.broadcast %cst_94 : f32 to vector<16x1xf32>
    %209 = arith.divf %207, %208 : vector<16x1xf32>
    %210 = vector.broadcast %202 : vector<16x1xf32> to vector<16x32xf32>
    %211 = arith.subf %194, %210 : vector<16x32xf32>
    %cst_95 = arith.constant 9.99999996E-13 : f32
    %212 = vector.broadcast %cst_95 : f32 to vector<16x1xf32>
    %213 = arith.addf %209, %212 : vector<16x1xf32>
    %214 = math.rsqrt %213 : vector<16x1xf32>
    %215 = vector.broadcast %214 : vector<16x1xf32> to vector<16x32xf32>
    %216 = arith.mulf %211, %215 : vector<16x32xf32>
    %217 = vector.broadcast %196 : vector<1x32xf32> to vector<16x32xf32>
    %218 = arith.mulf %216, %217 : vector<16x32xf32>
    %219 = vector.broadcast %198 : vector<1x32xf32> to vector<16x32xf32>
    %220 = arith.addf %218, %219 : vector<16x32xf32>
    %c1_96 = arith.constant 1 : index
    %c0_97 = arith.constant 0 : index
    %c0_98 = arith.constant 0 : index
    %221 = vector.load %arg11[%c1_96, %c0_97, %c0_98] : memref<2x32x64xbf16, #tpu.memory_space<vmem>>, vector<1x32x64xbf16>
    %222 = vector.shape_cast %221 : vector<1x32x64xbf16> to vector<32x64xbf16>
    %223 = arith.truncf %220 : vector<16x32xf32> to vector<16x32xbf16>
    %cst_99 = arith.constant dense<0.000000e+00> : vector<16x64xf32>
    %224 = tpu.matmul %223, %222, %cst_99 {dimension_numbers = #tpu.dot_dimension_numbers<[1], [0], [0], [1], [0, 0, 1, 1], [], []>} : vector<16x32xbf16>, vector<32x64xbf16>, vector<16x64xf32> -> vector<16x64xf32>
    %c1_100 = arith.constant 1 : index
    %c0_101 = arith.constant 0 : index
    %c0_102 = arith.constant 0 : index
    %225 = vector.load %arg12[%c1_100, %c0_101, %c0_102] : memref<2x1x64xf32, #tpu.memory_space<vmem>>, vector<1x1x64xf32>
    %226 = vector.shape_cast %225 : vector<1x1x64xf32> to vector<1x64xf32>
    %227 = vector.broadcast %226 : vector<1x64xf32> to vector<16x64xf32>
    %228 = arith.addf %224, %227 : vector<16x64xf32>
    %cst_103 = arith.constant 0.000000e+00 : f32
    %229 = vector.broadcast %cst_103 : f32 to vector<16x64xf32>
    %230 = arith.maximumf %228, %229 : vector<16x64xf32>
    %c1_104 = arith.constant 1 : index
    %c0_105 = arith.constant 0 : index
    %c0_106 = arith.constant 0 : index
    %231 = vector.load %arg13[%c1_104, %c0_105, %c0_106] : memref<2x64x32xbf16, #tpu.memory_space<vmem>>, vector<1x64x32xbf16>
    %232 = vector.shape_cast %231 : vector<1x64x32xbf16> to vector<64x32xbf16>
    %233 = arith.truncf %230 : vector<16x64xf32> to vector<16x64xbf16>
    %cst_107 = arith.constant dense<0.000000e+00> : vector<16x32xf32>
    %234 = tpu.matmul %233, %232, %cst_107 {dimension_numbers = #tpu.dot_dimension_numbers<[1], [0], [0], [1], [0, 0, 1, 1], [], []>} : vector<16x64xbf16>, vector<64x32xbf16>, vector<16x32xf32> -> vector<16x32xf32>
    %c1_108 = arith.constant 1 : index
    %c0_109 = arith.constant 0 : index
    %c0_110 = arith.constant 0 : index
    %235 = vector.load %arg14[%c1_108, %c0_109, %c0_110] : memref<2x1x32xf32, #tpu.memory_space<vmem>>, vector<1x1x32xf32>
    %236 = vector.shape_cast %235 : vector<1x1x32xf32> to vector<1x32xf32>
    %237 = vector.broadcast %236 : vector<1x32xf32> to vector<16x32xf32>
    %238 = arith.addf %234, %237 : vector<16x32xf32>
    %239 = arith.addf %220, %238 : vector<16x32xf32>
    %c1_111 = arith.constant 1 : index
    %c0_112 = arith.constant 0 : index
    %c0_113 = arith.constant 0 : index
    %240 = vector.load %arg15[%c1_111, %c0_112, %c0_113] : memref<2x1x32xf32, #tpu.memory_space<vmem>>, vector<1x1x32xf32>
    %241 = vector.shape_cast %240 : vector<1x1x32xf32> to vector<1x32xf32>
    %c1_114 = arith.constant 1 : index
    %c0_115 = arith.constant 0 : index
    %c0_116 = arith.constant 0 : index
    %242 = vector.load %arg16[%c1_114, %c0_115, %c0_116] : memref<2x1x32xf32, #tpu.memory_space<vmem>>, vector<1x1x32xf32>
    %243 = vector.shape_cast %242 : vector<1x1x32xf32> to vector<1x32xf32>
    %cst_117 = arith.constant dense<0.000000e+00> : vector<16xf32>
    %244 = vector.multi_reduction <add>, %239, %cst_117 [1] : vector<16x32xf32> to vector<16xf32>
    %245 = vector.shape_cast %244 : vector<16xf32> to vector<16x1xf32>
    %cst_118 = arith.constant 3.200000e+01 : f32
    %246 = vector.broadcast %cst_118 : f32 to vector<16x1xf32>
    %247 = arith.divf %245, %246 : vector<16x1xf32>
    %248 = vector.broadcast %247 : vector<16x1xf32> to vector<16x32xf32>
    %249 = arith.subf %239, %248 : vector<16x32xf32>
    %250 = arith.mulf %249, %249 : vector<16x32xf32>
    %cst_119 = arith.constant dense<0.000000e+00> : vector<16xf32>
    %251 = vector.multi_reduction <add>, %250, %cst_119 [1] : vector<16x32xf32> to vector<16xf32>
    %252 = vector.shape_cast %251 : vector<16xf32> to vector<16x1xf32>
    %cst_120 = arith.constant 3.200000e+01 : f32
    %253 = vector.broadcast %cst_120 : f32 to vector<16x1xf32>
    %254 = arith.divf %252, %253 : vector<16x1xf32>
    %255 = vector.broadcast %247 : vector<16x1xf32> to vector<16x32xf32>
    %256 = arith.subf %239, %255 : vector<16x32xf32>
    %cst_121 = arith.constant 9.99999996E-13 : f32
    %257 = vector.broadcast %cst_121 : f32 to vector<16x1xf32>
    %258 = arith.addf %254, %257 : vector<16x1xf32>
    %259 = math.rsqrt %258 : vector<16x1xf32>
    %260 = vector.broadcast %259 : vector<16x1xf32> to vector<16x32xf32>
    %261 = arith.mulf %256, %260 : vector<16x32xf32>
    %262 = vector.broadcast %241 : vector<1x32xf32> to vector<16x32xf32>
    %263 = arith.mulf %261, %262 : vector<16x32xf32>
    %264 = vector.broadcast %243 : vector<1x32xf32> to vector<16x32xf32>
    %265 = arith.addf %263, %264 : vector<16x32xf32>
    %c0_122 = arith.constant 0 : index
    %c0_123 = arith.constant 0 : index
    %266 = vector.load %arg1[%c0_122, %c0_123] : memref<16x32xf32, #tpu.memory_space<vmem>>, vector<16x32xf32>
    %c0_124 = arith.constant 0 : index
    %c0_125 = arith.constant 0 : index
    %c0_126 = arith.constant 0 : index
    %267 = vector.load %arg3[%c0_124, %c0_125, %c0_126] : memref<8x8x8xf32, #tpu.memory_space<vmem>>, vector<8x8x8xf32>
    %c0_127 = arith.constant 0 : index
    %c0_128 = arith.constant 0 : index
    %c0_129 = arith.constant 0 : index
    %268 = vector.load %arg4[%c0_127, %c0_128, %c0_129] : memref<8x8x8xf32, #tpu.memory_space<vmem>>, vector<8x8x8xf32>
    %c0_130 = arith.constant 0 : index
    %c0_131 = arith.constant 0 : index
    %c0_132 = arith.constant 0 : index
    %269 = vector.load %arg17[%c0_130, %c0_131, %c0_132] : memref<2x32x96xbf16, #tpu.memory_space<vmem>>, vector<1x32x96xbf16>
    %270 = vector.shape_cast %269 : vector<1x32x96xbf16> to vector<32x96xbf16>
    %271 = arith.truncf %266 : vector<16x32xf32> to vector<16x32xbf16>
    %cst_133 = arith.constant dense<0.000000e+00> : vector<16x96xf32>
    %272 = tpu.matmul %271, %270, %cst_133 {dimension_numbers = #tpu.dot_dimension_numbers<[1], [0], [0], [1], [0, 0, 1, 1], [], []>} : vector<16x32xbf16>, vector<32x96xbf16>, vector<16x96xf32> -> vector<16x96xf32>
    %c0_134 = arith.constant 0 : index
    %c0_135 = arith.constant 0 : index
    %c0_136 = arith.constant 0 : index
    %273 = vector.load %arg18[%c0_134, %c0_135, %c0_136] : memref<2x1x96xf32, #tpu.memory_space<vmem>>, vector<1x1x96xf32>
    %274 = vector.shape_cast %273 : vector<1x1x96xf32> to vector<1x96xf32>
    %275 = vector.broadcast %274 : vector<1x96xf32> to vector<16x96xf32>
    %276 = arith.addf %272, %275 : vector<16x96xf32>
    %277 = vector.shape_cast %276 : vector<16x96xf32> to vector<2x8x96xf32>
    %278 = vector.extract_strided_slice %277 {offsets = [0, 0, 0], sizes = [2, 8, 8], strides = [1, 1, 1]} : vector<2x8x96xf32> to vector<2x8x8xf32>
    %279 = vector.extract_strided_slice %277 {offsets = [0, 0, 8], sizes = [2, 8, 8], strides = [1, 1, 1]} : vector<2x8x96xf32> to vector<2x8x8xf32>
    %280 = vector.extract_strided_slice %277 {offsets = [0, 0, 16], sizes = [2, 8, 8], strides = [1, 1, 1]} : vector<2x8x96xf32> to vector<2x8x8xf32>
    %281 = vector.extract_strided_slice %277 {offsets = [0, 0, 24], sizes = [2, 8, 8], strides = [1, 1, 1]} : vector<2x8x96xf32> to vector<2x8x8xf32>
    %282 = tpu.concatenate %278, %279, %280, %281 in 0 : vector<2x8x8xf32>, vector<2x8x8xf32>, vector<2x8x8xf32>, vector<2x8x8xf32> -> vector<8x8x8xf32>
    %283 = vector.extract_strided_slice %277 {offsets = [0, 0, 32], sizes = [2, 8, 8], strides = [1, 1, 1]} : vector<2x8x96xf32> to vector<2x8x8xf32>
    %284 = vector.extract_strided_slice %277 {offsets = [0, 0, 40], sizes = [2, 8, 8], strides = [1, 1, 1]} : vector<2x8x96xf32> to vector<2x8x8xf32>
    %285 = vector.extract_strided_slice %277 {offsets = [0, 0, 48], sizes = [2, 8, 8], strides = [1, 1, 1]} : vector<2x8x96xf32> to vector<2x8x8xf32>
    %286 = vector.extract_strided_slice %277 {offsets = [0, 0, 56], sizes = [2, 8, 8], strides = [1, 1, 1]} : vector<2x8x96xf32> to vector<2x8x8xf32>
    %287 = tpu.concatenate %283, %284, %285, %286 in 0 : vector<2x8x8xf32>, vector<2x8x8xf32>, vector<2x8x8xf32>, vector<2x8x8xf32> -> vector<8x8x8xf32>
    %288 = vector.extract_strided_slice %277 {offsets = [0, 0, 64], sizes = [2, 8, 8], strides = [1, 1, 1]} : vector<2x8x96xf32> to vector<2x8x8xf32>
    %289 = vector.extract_strided_slice %277 {offsets = [0, 0, 72], sizes = [2, 8, 8], strides = [1, 1, 1]} : vector<2x8x96xf32> to vector<2x8x8xf32>
    %290 = vector.extract_strided_slice %277 {offsets = [0, 0, 80], sizes = [2, 8, 8], strides = [1, 1, 1]} : vector<2x8x96xf32> to vector<2x8x8xf32>
    %291 = vector.extract_strided_slice %277 {offsets = [0, 0, 88], sizes = [2, 8, 8], strides = [1, 1, 1]} : vector<2x8x96xf32> to vector<2x8x8xf32>
    %292 = tpu.concatenate %288, %289, %290, %291 in 0 : vector<2x8x8xf32>, vector<2x8x8xf32>, vector<2x8x8xf32>, vector<2x8x8xf32> -> vector<8x8x8xf32>
    %293 = arith.truncf %282 : vector<8x8x8xf32> to vector<8x8x8xbf16>
    %294 = arith.truncf %287 : vector<8x8x8xf32> to vector<8x8x8xbf16>
    "tpu.trace_start"() <{level = 10 : i32, message = "bqd,bkd->bqk"}> : () -> ()
    %cst_137 = arith.constant dense<0.000000e+00> : vector<8x8x8xf32>
    %295 = tpu.matmul %293, %294, %cst_137 {dimension_numbers = #tpu.dot_dimension_numbers<[2], [2], [1], [1], [0, 0, 0, 1, 1, 1], [0], [0]>} : vector<8x8x8xbf16>, vector<8x8x8xbf16>, vector<8x8x8xf32> -> vector<8x8x8xf32>
    "tpu.trace_stop"() : () -> ()
    %cst_138 = arith.constant 0.353553385 : f32
    %296 = vector.broadcast %cst_138 : f32 to vector<8x8x8xf32>
    %297 = arith.mulf %295, %296 : vector<8x8x8xf32>
    %298 = arith.addf %297, %267 : vector<8x8x8xf32>
    %cst_139 = arith.constant dense<0xFF800000> : vector<8x8xf32>
    %299 = vector.multi_reduction <maximumf>, %298, %cst_139 [2] : vector<8x8x8xf32> to vector<8x8xf32>
    %300 = vector.shape_cast %299 : vector<8x8xf32> to vector<8x8x1xf32>
    %301 = vector.broadcast %300 : vector<8x8x1xf32> to vector<8x8x8xf32>
    %302 = arith.subf %298, %301 : vector<8x8x8xf32>
    %303 = math.exp %302 : vector<8x8x8xf32>
    %cst_140 = arith.constant dense<0.000000e+00> : vector<8x8xf32>
    %304 = vector.multi_reduction <add>, %303, %cst_140 [2] : vector<8x8x8xf32> to vector<8x8xf32>
    %305 = vector.shape_cast %304 : vector<8x8xf32> to vector<8x8x1xf32>
    %306 = tpu.reciprocal %305 {approx = true} : vector<8x8x1xf32> -> vector<8x8x1xf32>
    %307 = vector.broadcast %306 : vector<8x8x1xf32> to vector<8x8x8xf32>
    %308 = arith.mulf %303, %307 : vector<8x8x8xf32>
    %309 = arith.truncf %308 : vector<8x8x8xf32> to vector<8x8x8xbf16>
    %310 = arith.truncf %292 : vector<8x8x8xf32> to vector<8x8x8xbf16>
    "tpu.trace_start"() <{level = 10 : i32, message = "bqk,bkd->bqd"}> : () -> ()
    %cst_141 = arith.constant dense<0.000000e+00> : vector<8x8x8xf32>
    %311 = tpu.matmul %309, %310, %cst_141 {dimension_numbers = #tpu.dot_dimension_numbers<[2], [1], [1], [2], [0, 0, 0, 1, 1, 2], [0], [0]>} : vector<8x8x8xbf16>, vector<8x8x8xbf16>, vector<8x8x8xf32> -> vector<8x8x8xf32>
    "tpu.trace_stop"() : () -> ()
    %312 = vector.extract_strided_slice %311 {offsets = [0, 0, 0], sizes = [2, 8, 8], strides = [1, 1, 1]} : vector<8x8x8xf32> to vector<2x8x8xf32>
    %313 = vector.extract_strided_slice %311 {offsets = [2, 0, 0], sizes = [2, 8, 8], strides = [1, 1, 1]} : vector<8x8x8xf32> to vector<2x8x8xf32>
    %314 = vector.extract_strided_slice %311 {offsets = [4, 0, 0], sizes = [2, 8, 8], strides = [1, 1, 1]} : vector<8x8x8xf32> to vector<2x8x8xf32>
    %315 = vector.extract_strided_slice %311 {offsets = [6, 0, 0], sizes = [2, 8, 8], strides = [1, 1, 1]} : vector<8x8x8xf32> to vector<2x8x8xf32>
    %316 = tpu.concatenate %312, %313, %314, %315 in 2 : vector<2x8x8xf32>, vector<2x8x8xf32>, vector<2x8x8xf32>, vector<2x8x8xf32> -> vector<2x8x32xf32>
    %317 = vector.shape_cast %316 : vector<2x8x32xf32> to vector<16x32xf32>
    %c0_142 = arith.constant 0 : index
    %c0_143 = arith.constant 0 : index
    %c0_144 = arith.constant 0 : index
    %c0_145 = arith.constant 0 : index
    %318 = vector.load %arg41[%c0_142, %c0_143, %c0_144, %c0_145] : memref<2x8x8x8xf32, #tpu.memory_space<vmem>>, vector<1x8x8x8xf32>
    %319 = vector.shape_cast %318 : vector<1x8x8x8xf32> to vector<8x8x8xf32>
    %320 = vector.shape_cast %308 : vector<8x8x8xf32> to vector<1x8x8x8xf32>
    tpu.vector_store %arg41[%c0_142, %c0_143, %c0_144, %c0_145], %320 {strides = array<i32>} : memref<2x8x8x8xf32, #tpu.memory_space<vmem>>, vector<1x8x8x8xf32>,
    %c0_146 = arith.constant 0 : index
    %c0_147 = arith.constant 0 : index
    %c0_148 = arith.constant 0 : index
    %321 = vector.load %arg19[%c0_146, %c0_147, %c0_148] : memref<2x32x32xbf16, #tpu.memory_space<vmem>>, vector<1x32x32xbf16>
    %322 = vector.shape_cast %321 : vector<1x32x32xbf16> to vector<32x32xbf16>
    %323 = arith.truncf %317 : vector<16x32xf32> to vector<16x32xbf16>
    %cst_149 = arith.constant dense<0.000000e+00> : vector<16x32xf32>
    %324 = tpu.matmul %323, %322, %cst_149 {dimension_numbers = #tpu.dot_dimension_numbers<[1], [0], [0], [1], [0, 0, 1, 1], [], []>} : vector<16x32xbf16>, vector<32x32xbf16>, vector<16x32xf32> -> vector<16x32xf32>
    %c0_150 = arith.constant 0 : index
    %c0_151 = arith.constant 0 : index
    %c0_152 = arith.constant 0 : index
    %325 = vector.load %arg20[%c0_150, %c0_151, %c0_152] : memref<2x1x32xf32, #tpu.memory_space<vmem>>, vector<1x1x32xf32>
    %326 = vector.shape_cast %325 : vector<1x1x32xf32> to vector<1x32xf32>
    %327 = vector.broadcast %326 : vector<1x32xf32> to vector<16x32xf32>
    %328 = arith.addf %324, %327 : vector<16x32xf32>
    %329 = arith.addf %266, %328 : vector<16x32xf32>
    %c0_153 = arith.constant 0 : index
    %c0_154 = arith.constant 0 : index
    %c0_155 = arith.constant 0 : index
    %330 = vector.load %arg21[%c0_153, %c0_154, %c0_155] : memref<2x1x32xf32, #tpu.memory_space<vmem>>, vector<1x1x32xf32>
    %331 = vector.shape_cast %330 : vector<1x1x32xf32> to vector<1x32xf32>
    %c0_156 = arith.constant 0 : index
    %c0_157 = arith.constant 0 : index
    %c0_158 = arith.constant 0 : index
    %332 = vector.load %arg22[%c0_156, %c0_157, %c0_158] : memref<2x1x32xf32, #tpu.memory_space<vmem>>, vector<1x1x32xf32>
    %333 = vector.shape_cast %332 : vector<1x1x32xf32> to vector<1x32xf32>
    %cst_159 = arith.constant dense<0.000000e+00> : vector<16xf32>
    %334 = vector.multi_reduction <add>, %329, %cst_159 [1] : vector<16x32xf32> to vector<16xf32>
    %335 = vector.shape_cast %334 : vector<16xf32> to vector<16x1xf32>
    %cst_160 = arith.constant 3.200000e+01 : f32
    %336 = vector.broadcast %cst_160 : f32 to vector<16x1xf32>
    %337 = arith.divf %335, %336 : vector<16x1xf32>
    %338 = vector.broadcast %337 : vector<16x1xf32> to vector<16x32xf32>
    %339 = arith.subf %329, %338 : vector<16x32xf32>
    %340 = arith.mulf %339, %339 : vector<16x32xf32>
    %cst_161 = arith.constant dense<0.000000e+00> : vector<16xf32>
    %341 = vector.multi_reduction <add>, %340, %cst_161 [1] : vector<16x32xf32> to vector<16xf32>
    %342 = vector.shape_cast %341 : vector<16xf32> to vector<16x1xf32>
    %cst_162 = arith.constant 3.200000e+01 : f32
    %343 = vector.broadcast %cst_162 : f32 to vector<16x1xf32>
    %344 = arith.divf %342, %343 : vector<16x1xf32>
    %345 = vector.broadcast %337 : vector<16x1xf32> to vector<16x32xf32>
    %346 = arith.subf %329, %345 : vector<16x32xf32>
    %cst_163 = arith.constant 9.99999996E-13 : f32
    %347 = vector.broadcast %cst_163 : f32 to vector<16x1xf32>
    %348 = arith.addf %344, %347 : vector<16x1xf32>
    %349 = math.rsqrt %348 : vector<16x1xf32>
    %350 = vector.broadcast %349 : vector<16x1xf32> to vector<16x32xf32>
    %351 = arith.mulf %346, %350 : vector<16x32xf32>
    %352 = vector.broadcast %331 : vector<1x32xf32> to vector<16x32xf32>
    %353 = arith.mulf %351, %352 : vector<16x32xf32>
    %354 = vector.broadcast %333 : vector<1x32xf32> to vector<16x32xf32>
    %355 = arith.addf %353, %354 : vector<16x32xf32>
    %c0_164 = arith.constant 0 : index
    %c0_165 = arith.constant 0 : index
    %c0_166 = arith.constant 0 : index
    %356 = vector.load %arg23[%c0_164, %c0_165, %c0_166] : memref<2x32x32xbf16, #tpu.memory_space<vmem>>, vector<1x32x32xbf16>
    %357 = vector.shape_cast %356 : vector<1x32x32xbf16> to vector<32x32xbf16>
    %358 = arith.truncf %355 : vector<16x32xf32> to vector<16x32xbf16>
    %cst_167 = arith.constant dense<0.000000e+00> : vector<16x32xf32>
    %359 = tpu.matmul %358, %357, %cst_167 {dimension_numbers = #tpu.dot_dimension_numbers<[1], [0], [0], [1], [0, 0, 1, 1], [], []>} : vector<16x32xbf16>, vector<32x32xbf16>, vector<16x32xf32> -> vector<16x32xf32>
    %c0_168 = arith.constant 0 : index
    %c0_169 = arith.constant 0 : index
    %c0_170 = arith.constant 0 : index
    %360 = vector.load %arg24[%c0_168, %c0_169, %c0_170] : memref<2x1x32xf32, #tpu.memory_space<vmem>>, vector<1x1x32xf32>
    %361 = vector.shape_cast %360 : vector<1x1x32xf32> to vector<1x32xf32>
    %362 = vector.broadcast %361 : vector<1x32xf32> to vector<16x32xf32>
    %363 = arith.addf %359, %362 : vector<16x32xf32>
    %364 = vector.shape_cast %363 : vector<16x32xf32> to vector<2x8x32xf32>
    %c0_171 = arith.constant 0 : index
    %c0_172 = arith.constant 0 : index
    %c0_173 = arith.constant 0 : index
    %365 = vector.load %arg25[%c0_171, %c0_172, %c0_173] : memref<2x32x64xbf16, #tpu.memory_space<vmem>>, vector<1x32x64xbf16>
    %366 = vector.shape_cast %365 : vector<1x32x64xbf16> to vector<32x64xbf16>
    %367 = arith.truncf %265 : vector<16x32xf32> to vector<16x32xbf16>
    %cst_174 = arith.constant dense<0.000000e+00> : vector<16x64xf32>
    %368 = tpu.matmul %367, %366, %cst_174 {dimension_numbers = #tpu.dot_dimension_numbers<[1], [0], [0], [1], [0, 0, 1, 1], [], []>} : vector<16x32xbf16>, vector<32x64xbf16>, vector<16x64xf32> -> vector<16x64xf32>
    %c0_175 = arith.constant 0 : index
    %c0_176 = arith.constant 0 : index
    %c0_177 = arith.constant 0 : index
    %369 = vector.load %arg26[%c0_175, %c0_176, %c0_177] : memref<2x1x64xf32, #tpu.memory_space<vmem>>, vector<1x1x64xf32>
    %370 = vector.shape_cast %369 : vector<1x1x64xf32> to vector<1x64xf32>
    %371 = vector.broadcast %370 : vector<1x64xf32> to vector<16x64xf32>
    %372 = arith.addf %368, %371 : vector<16x64xf32>
    %373 = vector.shape_cast %372 : vector<16x64xf32> to vector<2x8x64xf32>
    %374 = vector.extract_strided_slice %364 {offsets = [0, 0, 0], sizes = [2, 8, 8], strides = [1, 1, 1]} : vector<2x8x32xf32> to vector<2x8x8xf32>
    %375 = vector.extract_strided_slice %364 {offsets = [0, 0, 8], sizes = [2, 8, 8], strides = [1, 1, 1]} : vector<2x8x32xf32> to vector<2x8x8xf32>
    %376 = vector.extract_strided_slice %364 {offsets = [0, 0, 16], sizes = [2, 8, 8], strides = [1, 1, 1]} : vector<2x8x32xf32> to vector<2x8x8xf32>
    %377 = vector.extract_strided_slice %364 {offsets = [0, 0, 24], sizes = [2, 8, 8], strides = [1, 1, 1]} : vector<2x8x32xf32> to vector<2x8x8xf32>
    %378 = tpu.concatenate %374, %375, %376, %377 in 0 : vector<2x8x8xf32>, vector<2x8x8xf32>, vector<2x8x8xf32>, vector<2x8x8xf32> -> vector<8x8x8xf32>
    %379 = vector.extract_strided_slice %373 {offsets = [0, 0, 0], sizes = [2, 8, 8], strides = [1, 1, 1]} : vector<2x8x64xf32> to vector<2x8x8xf32>
    %380 = vector.extract_strided_slice %373 {offsets = [0, 0, 8], sizes = [2, 8, 8], strides = [1, 1, 1]} : vector<2x8x64xf32> to vector<2x8x8xf32>
    %381 = vector.extract_strided_slice %373 {offsets = [0, 0, 16], sizes = [2, 8, 8], strides = [1, 1, 1]} : vector<2x8x64xf32> to vector<2x8x8xf32>
    %382 = vector.extract_strided_slice %373 {offsets = [0, 0, 24], sizes = [2, 8, 8], strides = [1, 1, 1]} : vector<2x8x64xf32> to vector<2x8x8xf32>
    %383 = tpu.concatenate %379, %380, %381, %382 in 0 : vector<2x8x8xf32>, vector<2x8x8xf32>, vector<2x8x8xf32>, vector<2x8x8xf32> -> vector<8x8x8xf32>
    %384 = vector.extract_strided_slice %373 {offsets = [0, 0, 32], sizes = [2, 8, 8], strides = [1, 1, 1]} : vector<2x8x64xf32> to vector<2x8x8xf32>
    %385 = vector.extract_strided_slice %373 {offsets = [0, 0, 40], sizes = [2, 8, 8], strides = [1, 1, 1]} : vector<2x8x64xf32> to vector<2x8x8xf32>
    %386 = vector.extract_strided_slice %373 {offsets = [0, 0, 48], sizes = [2, 8, 8], strides = [1, 1, 1]} : vector<2x8x64xf32> to vector<2x8x8xf32>
    %387 = vector.extract_strided_slice %373 {offsets = [0, 0, 56], sizes = [2, 8, 8], strides = [1, 1, 1]} : vector<2x8x64xf32> to vector<2x8x8xf32>
    %388 = tpu.concatenate %384, %385, %386, %387 in 0 : vector<2x8x8xf32>, vector<2x8x8xf32>, vector<2x8x8xf32>, vector<2x8x8xf32> -> vector<8x8x8xf32>
    %389 = arith.truncf %378 : vector<8x8x8xf32> to vector<8x8x8xbf16>
    %390 = arith.truncf %383 : vector<8x8x8xf32> to vector<8x8x8xbf16>
    "tpu.trace_start"() <{level = 10 : i32, message = "bqd,bkd->bqk"}> : () -> ()
    %cst_178 = arith.constant dense<0.000000e+00> : vector<8x8x8xf32>
    %391 = tpu.matmul %389, %390, %cst_178 {dimension_numbers = #tpu.dot_dimension_numbers<[2], [2], [1], [1], [0, 0, 0, 1, 1, 1], [0], [0]>} : vector<8x8x8xbf16>, vector<8x8x8xbf16>, vector<8x8x8xf32> -> vector<8x8x8xf32>
    "tpu.trace_stop"() : () -> ()
    %cst_179 = arith.constant 0.353553385 : f32
    %392 = vector.broadcast %cst_179 : f32 to vector<8x8x8xf32>
    %393 = arith.mulf %391, %392 : vector<8x8x8xf32>
    %394 = arith.addf %393, %268 : vector<8x8x8xf32>
    %cst_180 = arith.constant dense<0xFF800000> : vector<8x8xf32>
    %395 = vector.multi_reduction <maximumf>, %394, %cst_180 [2] : vector<8x8x8xf32> to vector<8x8xf32>
    %396 = vector.shape_cast %395 : vector<8x8xf32> to vector<8x8x1xf32>
    %397 = vector.broadcast %396 : vector<8x8x1xf32> to vector<8x8x8xf32>
    %398 = arith.subf %394, %397 : vector<8x8x8xf32>
    %399 = math.exp %398 : vector<8x8x8xf32>
    %cst_181 = arith.constant dense<0.000000e+00> : vector<8x8xf32>
    %400 = vector.multi_reduction <add>, %399, %cst_181 [2] : vector<8x8x8xf32> to vector<8x8xf32>
    %401 = vector.shape_cast %400 : vector<8x8xf32> to vector<8x8x1xf32>
    %402 = tpu.reciprocal %401 {approx = true} : vector<8x8x1xf32> -> vector<8x8x1xf32>
    %403 = vector.broadcast %402 : vector<8x8x1xf32> to vector<8x8x8xf32>
    %404 = arith.mulf %399, %403 : vector<8x8x8xf32>
    %405 = arith.truncf %404 : vector<8x8x8xf32> to vector<8x8x8xbf16>
    %406 = arith.truncf %388 : vector<8x8x8xf32> to vector<8x8x8xbf16>
    "tpu.trace_start"() <{level = 10 : i32, message = "bqk,bkd->bqd"}> : () -> ()
    %cst_182 = arith.constant dense<0.000000e+00> : vector<8x8x8xf32>
    %407 = tpu.matmul %405, %406, %cst_182 {dimension_numbers = #tpu.dot_dimension_numbers<[2], [1], [1], [2], [0, 0, 0, 1, 1, 2], [0], [0]>} : vector<8x8x8xbf16>, vector<8x8x8xbf16>, vector<8x8x8xf32> -> vector<8x8x8xf32>
    "tpu.trace_stop"() : () -> ()
    %408 = vector.extract_strided_slice %407 {offsets = [0, 0, 0], sizes = [2, 8, 8], strides = [1, 1, 1]} : vector<8x8x8xf32> to vector<2x8x8xf32>
    %409 = vector.extract_strided_slice %407 {offsets = [2, 0, 0], sizes = [2, 8, 8], strides = [1, 1, 1]} : vector<8x8x8xf32> to vector<2x8x8xf32>
    %410 = vector.extract_strided_slice %407 {offsets = [4, 0, 0], sizes = [2, 8, 8], strides = [1, 1, 1]} : vector<8x8x8xf32> to vector<2x8x8xf32>
    %411 = vector.extract_strided_slice %407 {offsets = [6, 0, 0], sizes = [2, 8, 8], strides = [1, 1, 1]} : vector<8x8x8xf32> to vector<2x8x8xf32>
    %412 = tpu.concatenate %408, %409, %410, %411 in 2 : vector<2x8x8xf32>, vector<2x8x8xf32>, vector<2x8x8xf32>, vector<2x8x8xf32> -> vector<2x8x32xf32>
    %413 = vector.shape_cast %412 : vector<2x8x32xf32> to vector<16x32xf32>
    %c0_183 = arith.constant 0 : index
    %c0_184 = arith.constant 0 : index
    %c0_185 = arith.constant 0 : index
    %c0_186 = arith.constant 0 : index
    %414 = vector.load %arg42[%c0_183, %c0_184, %c0_185, %c0_186] : memref<2x8x8x8xf32, #tpu.memory_space<vmem>>, vector<1x8x8x8xf32>
    %415 = vector.shape_cast %414 : vector<1x8x8x8xf32> to vector<8x8x8xf32>
    %416 = vector.shape_cast %404 : vector<8x8x8xf32> to vector<1x8x8x8xf32>
    tpu.vector_store %arg42[%c0_183, %c0_184, %c0_185, %c0_186], %416 {strides = array<i32>} : memref<2x8x8x8xf32, #tpu.memory_space<vmem>>, vector<1x8x8x8xf32>,
    %c0_187 = arith.constant 0 : index
    %c0_188 = arith.constant 0 : index
    %c0_189 = arith.constant 0 : index
    %417 = vector.load %arg27[%c0_187, %c0_188, %c0_189] : memref<2x32x32xbf16, #tpu.memory_space<vmem>>, vector<1x32x32xbf16>
    %418 = vector.shape_cast %417 : vector<1x32x32xbf16> to vector<32x32xbf16>
    %419 = arith.truncf %413 : vector<16x32xf32> to vector<16x32xbf16>
    %cst_190 = arith.constant dense<0.000000e+00> : vector<16x32xf32>
    %420 = tpu.matmul %419, %418, %cst_190 {dimension_numbers = #tpu.dot_dimension_numbers<[1], [0], [0], [1], [0, 0, 1, 1], [], []>} : vector<16x32xbf16>, vector<32x32xbf16>, vector<16x32xf32> -> vector<16x32xf32>
    %c0_191 = arith.constant 0 : index
    %c0_192 = arith.constant 0 : index
    %c0_193 = arith.constant 0 : index
    %421 = vector.load %arg28[%c0_191, %c0_192, %c0_193] : memref<2x1x32xf32, #tpu.memory_space<vmem>>, vector<1x1x32xf32>
    %422 = vector.shape_cast %421 : vector<1x1x32xf32> to vector<1x32xf32>
    %423 = vector.broadcast %422 : vector<1x32xf32> to vector<16x32xf32>
    %424 = arith.addf %420, %423 : vector<16x32xf32>
    %425 = arith.addf %355, %424 : vector<16x32xf32>
    %c0_194 = arith.constant 0 : index
    %c0_195 = arith.constant 0 : index
    %c0_196 = arith.constant 0 : index
    %426 = vector.load %arg29[%c0_194, %c0_195, %c0_196] : memref<2x1x32xf32, #tpu.memory_space<vmem>>, vector<1x1x32xf32>
    %427 = vector.shape_cast %426 : vector<1x1x32xf32> to vector<1x32xf32>
    %c0_197 = arith.constant 0 : index
    %c0_198 = arith.constant 0 : index
    %c0_199 = arith.constant 0 : index
    %428 = vector.load %arg30[%c0_197, %c0_198, %c0_199] : memref<2x1x32xf32, #tpu.memory_space<vmem>>, vector<1x1x32xf32>
    %429 = vector.shape_cast %428 : vector<1x1x32xf32> to vector<1x32xf32>
    %cst_200 = arith.constant dense<0.000000e+00> : vector<16xf32>
    %430 = vector.multi_reduction <add>, %425, %cst_200 [1] : vector<16x32xf32> to vector<16xf32>
    %431 = vector.shape_cast %430 : vector<16xf32> to vector<16x1xf32>
    %cst_201 = arith.constant 3.200000e+01 : f32
    %432 = vector.broadcast %cst_201 : f32 to vector<16x1xf32>
    %433 = arith.divf %431, %432 : vector<16x1xf32>
    %434 = vector.broadcast %433 : vector<16x1xf32> to vector<16x32xf32>
    %435 = arith.subf %425, %434 : vector<16x32xf32>
    %436 = arith.mulf %435, %435 : vector<16x32xf32>
    %cst_202 = arith.constant dense<0.000000e+00> : vector<16xf32>
    %437 = vector.multi_reduction <add>, %436, %cst_202 [1] : vector<16x32xf32> to vector<16xf32>
    %438 = vector.shape_cast %437 : vector<16xf32> to vector<16x1xf32>
    %cst_203 = arith.constant 3.200000e+01 : f32
    %439 = vector.broadcast %cst_203 : f32 to vector<16x1xf32>
    %440 = arith.divf %438, %439 : vector<16x1xf32>
    %441 = vector.broadcast %433 : vector<16x1xf32> to vector<16x32xf32>
    %442 = arith.subf %425, %441 : vector<16x32xf32>
    %cst_204 = arith.constant 9.99999996E-13 : f32
    %443 = vector.broadcast %cst_204 : f32 to vector<16x1xf32>
    %444 = arith.addf %440, %443 : vector<16x1xf32>
    %445 = math.rsqrt %444 : vector<16x1xf32>
    %446 = vector.broadcast %445 : vector<16x1xf32> to vector<16x32xf32>
    %447 = arith.mulf %442, %446 : vector<16x32xf32>
    %448 = vector.broadcast %427 : vector<1x32xf32> to vector<16x32xf32>
    %449 = arith.mulf %447, %448 : vector<16x32xf32>
    %450 = vector.broadcast %429 : vector<1x32xf32> to vector<16x32xf32>
    %451 = arith.addf %449, %450 : vector<16x32xf32>
    %c0_205 = arith.constant 0 : index
    %c0_206 = arith.constant 0 : index
    %c0_207 = arith.constant 0 : index
    %452 = vector.load %arg31[%c0_205, %c0_206, %c0_207] : memref<2x32x64xbf16, #tpu.memory_space<vmem>>, vector<1x32x64xbf16>
    %453 = vector.shape_cast %452 : vector<1x32x64xbf16> to vector<32x64xbf16>
    %454 = arith.truncf %451 : vector<16x32xf32> to vector<16x32xbf16>
    %cst_208 = arith.constant dense<0.000000e+00> : vector<16x64xf32>
    %455 = tpu.matmul %454, %453, %cst_208 {dimension_numbers = #tpu.dot_dimension_numbers<[1], [0], [0], [1], [0, 0, 1, 1], [], []>} : vector<16x32xbf16>, vector<32x64xbf16>, vector<16x64xf32> -> vector<16x64xf32>
    %c0_209 = arith.constant 0 : index
    %c0_210 = arith.constant 0 : index
    %c0_211 = arith.constant 0 : index
    %456 = vector.load %arg32[%c0_209, %c0_210, %c0_211] : memref<2x1x64xf32, #tpu.memory_space<vmem>>, vector<1x1x64xf32>
    %457 = vector.shape_cast %456 : vector<1x1x64xf32> to vector<1x64xf32>
    %458 = vector.broadcast %457 : vector<1x64xf32> to vector<16x64xf32>
    %459 = arith.addf %455, %458 : vector<16x64xf32>
    %cst_212 = arith.constant 0.000000e+00 : f32
    %460 = vector.broadcast %cst_212 : f32 to vector<16x64xf32>
    %461 = arith.maximumf %459, %460 : vector<16x64xf32>
    %c0_213 = arith.constant 0 : index
    %c0_214 = arith.constant 0 : index
    %c0_215 = arith.constant 0 : index
    %462 = vector.load %arg33[%c0_213, %c0_214, %c0_215] : memref<2x64x32xbf16, #tpu.memory_space<vmem>>, vector<1x64x32xbf16>
    %463 = vector.shape_cast %462 : vector<1x64x32xbf16> to vector<64x32xbf16>
    %464 = arith.truncf %461 : vector<16x64xf32> to vector<16x64xbf16>
    %cst_216 = arith.constant dense<0.000000e+00> : vector<16x32xf32>
    %465 = tpu.matmul %464, %463, %cst_216 {dimension_numbers = #tpu.dot_dimension_numbers<[1], [0], [0], [1], [0, 0, 1, 1], [], []>} : vector<16x64xbf16>, vector<64x32xbf16>, vector<16x32xf32> -> vector<16x32xf32>
    %c0_217 = arith.constant 0 : index
    %c0_218 = arith.constant 0 : index
    %c0_219 = arith.constant 0 : index
    %466 = vector.load %arg34[%c0_217, %c0_218, %c0_219] : memref<2x1x32xf32, #tpu.memory_space<vmem>>, vector<1x1x32xf32>
    %467 = vector.shape_cast %466 : vector<1x1x32xf32> to vector<1x32xf32>
    %468 = vector.broadcast %467 : vector<1x32xf32> to vector<16x32xf32>
    %469 = arith.addf %465, %468 : vector<16x32xf32>
    %470 = arith.addf %451, %469 : vector<16x32xf32>
    %c0_220 = arith.constant 0 : index
    %c0_221 = arith.constant 0 : index
    %c0_222 = arith.constant 0 : index
    %471 = vector.load %arg35[%c0_220, %c0_221, %c0_222] : memref<2x1x32xf32, #tpu.memory_space<vmem>>, vector<1x1x32xf32>
    %472 = vector.shape_cast %471 : vector<1x1x32xf32> to vector<1x32xf32>
    %c0_223 = arith.constant 0 : index
    %c0_224 = arith.constant 0 : index
    %c0_225 = arith.constant 0 : index
    %473 = vector.load %arg36[%c0_223, %c0_224, %c0_225] : memref<2x1x32xf32, #tpu.memory_space<vmem>>, vector<1x1x32xf32>
    %474 = vector.shape_cast %473 : vector<1x1x32xf32> to vector<1x32xf32>
    %cst_226 = arith.constant dense<0.000000e+00> : vector<16xf32>
    %475 = vector.multi_reduction <add>, %470, %cst_226 [1] : vector<16x32xf32> to vector<16xf32>
    %476 = vector.shape_cast %475 : vector<16xf32> to vector<16x1xf32>
    %cst_227 = arith.constant 3.200000e+01 : f32
    %477 = vector.broadcast %cst_227 : f32 to vector<16x1xf32>
    %478 = arith.divf %476, %477 : vector<16x1xf32>
    %479 = vector.broadcast %478 : vector<16x1xf32> to vector<16x32xf32>
    %480 = arith.subf %470, %479 : vector<16x32xf32>
    %481 = arith.mulf %480, %480 : vector<16x32xf32>
    %cst_228 = arith.constant dense<0.000000e+00> : vector<16xf32>
    %482 = vector.multi_reduction <add>, %481, %cst_228 [1] : vector<16x32xf32> to vector<16xf32>
    %483 = vector.shape_cast %482 : vector<16xf32> to vector<16x1xf32>
    %cst_229 = arith.constant 3.200000e+01 : f32
    %484 = vector.broadcast %cst_229 : f32 to vector<16x1xf32>
    %485 = arith.divf %483, %484 : vector<16x1xf32>
    %486 = vector.broadcast %478 : vector<16x1xf32> to vector<16x32xf32>
    %487 = arith.subf %470, %486 : vector<16x32xf32>
    %cst_230 = arith.constant 9.99999996E-13 : f32
    %488 = vector.broadcast %cst_230 : f32 to vector<16x1xf32>
    %489 = arith.addf %485, %488 : vector<16x1xf32>
    %490 = math.rsqrt %489 : vector<16x1xf32>
    %491 = vector.broadcast %490 : vector<16x1xf32> to vector<16x32xf32>
    %492 = arith.mulf %487, %491 : vector<16x32xf32>
    %493 = vector.broadcast %472 : vector<1x32xf32> to vector<16x32xf32>
    %494 = arith.mulf %492, %493 : vector<16x32xf32>
    %495 = vector.broadcast %474 : vector<1x32xf32> to vector<16x32xf32>
    %496 = arith.addf %494, %495 : vector<16x32xf32>
    %c1_231 = arith.constant 1 : index
    %c0_232 = arith.constant 0 : index
    %c0_233 = arith.constant 0 : index
    %497 = vector.load %arg17[%c1_231, %c0_232, %c0_233] : memref<2x32x96xbf16, #tpu.memory_space<vmem>>, vector<1x32x96xbf16>
    %498 = vector.shape_cast %497 : vector<1x32x96xbf16> to vector<32x96xbf16>
    %499 = arith.truncf %496 : vector<16x32xf32> to vector<16x32xbf16>
    %cst_234 = arith.constant dense<0.000000e+00> : vector<16x96xf32>
    %500 = tpu.matmul %499, %498, %cst_234 {dimension_numbers = #tpu.dot_dimension_numbers<[1], [0], [0], [1], [0, 0, 1, 1], [], []>} : vector<16x32xbf16>, vector<32x96xbf16>, vector<16x96xf32> -> vector<16x96xf32>
    %c1_235 = arith.constant 1 : index
    %c0_236 = arith.constant 0 : index
    %c0_237 = arith.constant 0 : index
    %501 = vector.load %arg18[%c1_235, %c0_236, %c0_237] : memref<2x1x96xf32, #tpu.memory_space<vmem>>, vector<1x1x96xf32>
    %502 = vector.shape_cast %501 : vector<1x1x96xf32> to vector<1x96xf32>
    %503 = vector.broadcast %502 : vector<1x96xf32> to vector<16x96xf32>
    %504 = arith.addf %500, %503 : vector<16x96xf32>
    %505 = vector.shape_cast %504 : vector<16x96xf32> to vector<2x8x96xf32>
    %506 = vector.extract_strided_slice %505 {offsets = [0, 0, 0], sizes = [2, 8, 8], strides = [1, 1, 1]} : vector<2x8x96xf32> to vector<2x8x8xf32>
    %507 = vector.extract_strided_slice %505 {offsets = [0, 0, 8], sizes = [2, 8, 8], strides = [1, 1, 1]} : vector<2x8x96xf32> to vector<2x8x8xf32>
    %508 = vector.extract_strided_slice %505 {offsets = [0, 0, 16], sizes = [2, 8, 8], strides = [1, 1, 1]} : vector<2x8x96xf32> to vector<2x8x8xf32>
    %509 = vector.extract_strided_slice %505 {offsets = [0, 0, 24], sizes = [2, 8, 8], strides = [1, 1, 1]} : vector<2x8x96xf32> to vector<2x8x8xf32>
    %510 = tpu.concatenate %506, %507, %508, %509 in 0 : vector<2x8x8xf32>, vector<2x8x8xf32>, vector<2x8x8xf32>, vector<2x8x8xf32> -> vector<8x8x8xf32>
    %511 = vector.extract_strided_slice %505 {offsets = [0, 0, 32], sizes = [2, 8, 8], strides = [1, 1, 1]} : vector<2x8x96xf32> to vector<2x8x8xf32>
    %512 = vector.extract_strided_slice %505 {offsets = [0, 0, 40], sizes = [2, 8, 8], strides = [1, 1, 1]} : vector<2x8x96xf32> to vector<2x8x8xf32>
    %513 = vector.extract_strided_slice %505 {offsets = [0, 0, 48], sizes = [2, 8, 8], strides = [1, 1, 1]} : vector<2x8x96xf32> to vector<2x8x8xf32>
    %514 = vector.extract_strided_slice %505 {offsets = [0, 0, 56], sizes = [2, 8, 8], strides = [1, 1, 1]} : vector<2x8x96xf32> to vector<2x8x8xf32>
    %515 = tpu.concatenate %511, %512, %513, %514 in 0 : vector<2x8x8xf32>, vector<2x8x8xf32>, vector<2x8x8xf32>, vector<2x8x8xf32> -> vector<8x8x8xf32>
    %516 = vector.extract_strided_slice %505 {offsets = [0, 0, 64], sizes = [2, 8, 8], strides = [1, 1, 1]} : vector<2x8x96xf32> to vector<2x8x8xf32>
    %517 = vector.extract_strided_slice %505 {offsets = [0, 0, 72], sizes = [2, 8, 8], strides = [1, 1, 1]} : vector<2x8x96xf32> to vector<2x8x8xf32>
    %518 = vector.extract_strided_slice %505 {offsets = [0, 0, 80], sizes = [2, 8, 8], strides = [1, 1, 1]} : vector<2x8x96xf32> to vector<2x8x8xf32>
    %519 = vector.extract_strided_slice %505 {offsets = [0, 0, 88], sizes = [2, 8, 8], strides = [1, 1, 1]} : vector<2x8x96xf32> to vector<2x8x8xf32>
    %520 = tpu.concatenate %516, %517, %518, %519 in 0 : vector<2x8x8xf32>, vector<2x8x8xf32>, vector<2x8x8xf32>, vector<2x8x8xf32> -> vector<8x8x8xf32>
    %521 = arith.truncf %510 : vector<8x8x8xf32> to vector<8x8x8xbf16>
    %522 = arith.truncf %515 : vector<8x8x8xf32> to vector<8x8x8xbf16>
    "tpu.trace_start"() <{level = 10 : i32, message = "bqd,bkd->bqk"}> : () -> ()
    %cst_238 = arith.constant dense<0.000000e+00> : vector<8x8x8xf32>
    %523 = tpu.matmul %521, %522, %cst_238 {dimension_numbers = #tpu.dot_dimension_numbers<[2], [2], [1], [1], [0, 0, 0, 1, 1, 1], [0], [0]>} : vector<8x8x8xbf16>, vector<8x8x8xbf16>, vector<8x8x8xf32> -> vector<8x8x8xf32>
    "tpu.trace_stop"() : () -> ()
    %cst_239 = arith.constant 0.353553385 : f32
    %524 = vector.broadcast %cst_239 : f32 to vector<8x8x8xf32>
    %525 = arith.mulf %523, %524 : vector<8x8x8xf32>
    %526 = arith.addf %525, %267 : vector<8x8x8xf32>
    %cst_240 = arith.constant dense<0xFF800000> : vector<8x8xf32>
    %527 = vector.multi_reduction <maximumf>, %526, %cst_240 [2] : vector<8x8x8xf32> to vector<8x8xf32>
    %528 = vector.shape_cast %527 : vector<8x8xf32> to vector<8x8x1xf32>
    %529 = vector.broadcast %528 : vector<8x8x1xf32> to vector<8x8x8xf32>
    %530 = arith.subf %526, %529 : vector<8x8x8xf32>
    %531 = math.exp %530 : vector<8x8x8xf32>
    %cst_241 = arith.constant dense<0.000000e+00> : vector<8x8xf32>
    %532 = vector.multi_reduction <add>, %531, %cst_241 [2] : vector<8x8x8xf32> to vector<8x8xf32>
    %533 = vector.shape_cast %532 : vector<8x8xf32> to vector<8x8x1xf32>
    %534 = tpu.reciprocal %533 {approx = true} : vector<8x8x1xf32> -> vector<8x8x1xf32>
    %535 = vector.broadcast %534 : vector<8x8x1xf32> to vector<8x8x8xf32>
    %536 = arith.mulf %531, %535 : vector<8x8x8xf32>
    %537 = arith.truncf %536 : vector<8x8x8xf32> to vector<8x8x8xbf16>
    %538 = arith.truncf %520 : vector<8x8x8xf32> to vector<8x8x8xbf16>
    "tpu.trace_start"() <{level = 10 : i32, message = "bqk,bkd->bqd"}> : () -> ()
    %cst_242 = arith.constant dense<0.000000e+00> : vector<8x8x8xf32>
    %539 = tpu.matmul %537, %538, %cst_242 {dimension_numbers = #tpu.dot_dimension_numbers<[2], [1], [1], [2], [0, 0, 0, 1, 1, 2], [0], [0]>} : vector<8x8x8xbf16>, vector<8x8x8xbf16>, vector<8x8x8xf32> -> vector<8x8x8xf32>
    "tpu.trace_stop"() : () -> ()
    %540 = vector.extract_strided_slice %539 {offsets = [0, 0, 0], sizes = [2, 8, 8], strides = [1, 1, 1]} : vector<8x8x8xf32> to vector<2x8x8xf32>
    %541 = vector.extract_strided_slice %539 {offsets = [2, 0, 0], sizes = [2, 8, 8], strides = [1, 1, 1]} : vector<8x8x8xf32> to vector<2x8x8xf32>
    %542 = vector.extract_strided_slice %539 {offsets = [4, 0, 0], sizes = [2, 8, 8], strides = [1, 1, 1]} : vector<8x8x8xf32> to vector<2x8x8xf32>
    %543 = vector.extract_strided_slice %539 {offsets = [6, 0, 0], sizes = [2, 8, 8], strides = [1, 1, 1]} : vector<8x8x8xf32> to vector<2x8x8xf32>
    %544 = tpu.concatenate %540, %541, %542, %543 in 2 : vector<2x8x8xf32>, vector<2x8x8xf32>, vector<2x8x8xf32>, vector<2x8x8xf32> -> vector<2x8x32xf32>
    %545 = vector.shape_cast %544 : vector<2x8x32xf32> to vector<16x32xf32>
    %c1_243 = arith.constant 1 : index
    %c0_244 = arith.constant 0 : index
    %c0_245 = arith.constant 0 : index
    %c0_246 = arith.constant 0 : index
    %546 = vector.load %arg41[%c1_243, %c0_244, %c0_245, %c0_246] : memref<2x8x8x8xf32, #tpu.memory_space<vmem>>, vector<1x8x8x8xf32>
    %547 = vector.shape_cast %546 : vector<1x8x8x8xf32> to vector<8x8x8xf32>
    %548 = vector.shape_cast %536 : vector<8x8x8xf32> to vector<1x8x8x8xf32>
    tpu.vector_store %arg41[%c1_243, %c0_244, %c0_245, %c0_246], %548 {strides = array<i32>} : memref<2x8x8x8xf32, #tpu.memory_space<vmem>>, vector<1x8x8x8xf32>,
    %c1_247 = arith.constant 1 : index
    %c0_248 = arith.constant 0 : index
    %c0_249 = arith.constant 0 : index
    %549 = vector.load %arg19[%c1_247, %c0_248, %c0_249] : memref<2x32x32xbf16, #tpu.memory_space<vmem>>, vector<1x32x32xbf16>
    %550 = vector.shape_cast %549 : vector<1x32x32xbf16> to vector<32x32xbf16>
    %551 = arith.truncf %545 : vector<16x32xf32> to vector<16x32xbf16>
    %cst_250 = arith.constant dense<0.000000e+00> : vector<16x32xf32>
    %552 = tpu.matmul %551, %550, %cst_250 {dimension_numbers = #tpu.dot_dimension_numbers<[1], [0], [0], [1], [0, 0, 1, 1], [], []>} : vector<16x32xbf16>, vector<32x32xbf16>, vector<16x32xf32> -> vector<16x32xf32>
    %c1_251 = arith.constant 1 : index
    %c0_252 = arith.constant 0 : index
    %c0_253 = arith.constant 0 : index
    %553 = vector.load %arg20[%c1_251, %c0_252, %c0_253] : memref<2x1x32xf32, #tpu.memory_space<vmem>>, vector<1x1x32xf32>
    %554 = vector.shape_cast %553 : vector<1x1x32xf32> to vector<1x32xf32>
    %555 = vector.broadcast %554 : vector<1x32xf32> to vector<16x32xf32>
    %556 = arith.addf %552, %555 : vector<16x32xf32>
    %557 = arith.addf %496, %556 : vector<16x32xf32>
    %c1_254 = arith.constant 1 : index
    %c0_255 = arith.constant 0 : index
    %c0_256 = arith.constant 0 : index
    %558 = vector.load %arg21[%c1_254, %c0_255, %c0_256] : memref<2x1x32xf32, #tpu.memory_space<vmem>>, vector<1x1x32xf32>
    %559 = vector.shape_cast %558 : vector<1x1x32xf32> to vector<1x32xf32>
    %c1_257 = arith.constant 1 : index
    %c0_258 = arith.constant 0 : index
    %c0_259 = arith.constant 0 : index
    %560 = vector.load %arg22[%c1_257, %c0_258, %c0_259] : memref<2x1x32xf32, #tpu.memory_space<vmem>>, vector<1x1x32xf32>
    %561 = vector.shape_cast %560 : vector<1x1x32xf32> to vector<1x32xf32>
    %cst_260 = arith.constant dense<0.000000e+00> : vector<16xf32>
    %562 = vector.multi_reduction <add>, %557, %cst_260 [1] : vector<16x32xf32> to vector<16xf32>
    %563 = vector.shape_cast %562 : vector<16xf32> to vector<16x1xf32>
    %cst_261 = arith.constant 3.200000e+01 : f32
    %564 = vector.broadcast %cst_261 : f32 to vector<16x1xf32>
    %565 = arith.divf %563, %564 : vector<16x1xf32>
    %566 = vector.broadcast %565 : vector<16x1xf32> to vector<16x32xf32>
    %567 = arith.subf %557, %566 : vector<16x32xf32>
    %568 = arith.mulf %567, %567 : vector<16x32xf32>
    %cst_262 = arith.constant dense<0.000000e+00> : vector<16xf32>
    %569 = vector.multi_reduction <add>, %568, %cst_262 [1] : vector<16x32xf32> to vector<16xf32>
    %570 = vector.shape_cast %569 : vector<16xf32> to vector<16x1xf32>
    %cst_263 = arith.constant 3.200000e+01 : f32
    %571 = vector.broadcast %cst_263 : f32 to vector<16x1xf32>
    %572 = arith.divf %570, %571 : vector<16x1xf32>
    %573 = vector.broadcast %565 : vector<16x1xf32> to vector<16x32xf32>
    %574 = arith.subf %557, %573 : vector<16x32xf32>
    %cst_264 = arith.constant 9.99999996E-13 : f32
    %575 = vector.broadcast %cst_264 : f32 to vector<16x1xf32>
    %576 = arith.addf %572, %575 : vector<16x1xf32>
    %577 = math.rsqrt %576 : vector<16x1xf32>
    %578 = vector.broadcast %577 : vector<16x1xf32> to vector<16x32xf32>
    %579 = arith.mulf %574, %578 : vector<16x32xf32>
    %580 = vector.broadcast %559 : vector<1x32xf32> to vector<16x32xf32>
    %581 = arith.mulf %579, %580 : vector<16x32xf32>
    %582 = vector.broadcast %561 : vector<1x32xf32> to vector<16x32xf32>
    %583 = arith.addf %581, %582 : vector<16x32xf32>
    %c1_265 = arith.constant 1 : index
    %c0_266 = arith.constant 0 : index
    %c0_267 = arith.constant 0 : index
    %584 = vector.load %arg23[%c1_265, %c0_266, %c0_267] : memref<2x32x32xbf16, #tpu.memory_space<vmem>>, vector<1x32x32xbf16>
    %585 = vector.shape_cast %584 : vector<1x32x32xbf16> to vector<32x32xbf16>
    %586 = arith.truncf %583 : vector<16x32xf32> to vector<16x32xbf16>
    %cst_268 = arith.constant dense<0.000000e+00> : vector<16x32xf32>
    %587 = tpu.matmul %586, %585, %cst_268 {dimension_numbers = #tpu.dot_dimension_numbers<[1], [0], [0], [1], [0, 0, 1, 1], [], []>} : vector<16x32xbf16>, vector<32x32xbf16>, vector<16x32xf32> -> vector<16x32xf32>
    %c1_269 = arith.constant 1 : index
    %c0_270 = arith.constant 0 : index
    %c0_271 = arith.constant 0 : index
    %588 = vector.load %arg24[%c1_269, %c0_270, %c0_271] : memref<2x1x32xf32, #tpu.memory_space<vmem>>, vector<1x1x32xf32>
    %589 = vector.shape_cast %588 : vector<1x1x32xf32> to vector<1x32xf32>
    %590 = vector.broadcast %589 : vector<1x32xf32> to vector<16x32xf32>
    %591 = arith.addf %587, %590 : vector<16x32xf32>
    %592 = vector.shape_cast %591 : vector<16x32xf32> to vector<2x8x32xf32>
    %c1_272 = arith.constant 1 : index
    %c0_273 = arith.constant 0 : index
    %c0_274 = arith.constant 0 : index
    %593 = vector.load %arg25[%c1_272, %c0_273, %c0_274] : memref<2x32x64xbf16, #tpu.memory_space<vmem>>, vector<1x32x64xbf16>
    %594 = vector.shape_cast %593 : vector<1x32x64xbf16> to vector<32x64xbf16>
    %595 = arith.truncf %265 : vector<16x32xf32> to vector<16x32xbf16>
    %cst_275 = arith.constant dense<0.000000e+00> : vector<16x64xf32>
    %596 = tpu.matmul %595, %594, %cst_275 {dimension_numbers = #tpu.dot_dimension_numbers<[1], [0], [0], [1], [0, 0, 1, 1], [], []>} : vector<16x32xbf16>, vector<32x64xbf16>, vector<16x64xf32> -> vector<16x64xf32>
    %c1_276 = arith.constant 1 : index
    %c0_277 = arith.constant 0 : index
    %c0_278 = arith.constant 0 : index
    %597 = vector.load %arg26[%c1_276, %c0_277, %c0_278] : memref<2x1x64xf32, #tpu.memory_space<vmem>>, vector<1x1x64xf32>
    %598 = vector.shape_cast %597 : vector<1x1x64xf32> to vector<1x64xf32>
    %599 = vector.broadcast %598 : vector<1x64xf32> to vector<16x64xf32>
    %600 = arith.addf %596, %599 : vector<16x64xf32>
    %601 = vector.shape_cast %600 : vector<16x64xf32> to vector<2x8x64xf32>
    %602 = vector.extract_strided_slice %592 {offsets = [0, 0, 0], sizes = [2, 8, 8], strides = [1, 1, 1]} : vector<2x8x32xf32> to vector<2x8x8xf32>
    %603 = vector.extract_strided_slice %592 {offsets = [0, 0, 8], sizes = [2, 8, 8], strides = [1, 1, 1]} : vector<2x8x32xf32> to vector<2x8x8xf32>
    %604 = vector.extract_strided_slice %592 {offsets = [0, 0, 16], sizes = [2, 8, 8], strides = [1, 1, 1]} : vector<2x8x32xf32> to vector<2x8x8xf32>
    %605 = vector.extract_strided_slice %592 {offsets = [0, 0, 24], sizes = [2, 8, 8], strides = [1, 1, 1]} : vector<2x8x32xf32> to vector<2x8x8xf32>
    %606 = tpu.concatenate %602, %603, %604, %605 in 0 : vector<2x8x8xf32>, vector<2x8x8xf32>, vector<2x8x8xf32>, vector<2x8x8xf32> -> vector<8x8x8xf32>
    %607 = vector.extract_strided_slice %601 {offsets = [0, 0, 0], sizes = [2, 8, 8], strides = [1, 1, 1]} : vector<2x8x64xf32> to vector<2x8x8xf32>
    %608 = vector.extract_strided_slice %601 {offsets = [0, 0, 8], sizes = [2, 8, 8], strides = [1, 1, 1]} : vector<2x8x64xf32> to vector<2x8x8xf32>
    %609 = vector.extract_strided_slice %601 {offsets = [0, 0, 16], sizes = [2, 8, 8], strides = [1, 1, 1]} : vector<2x8x64xf32> to vector<2x8x8xf32>
    %610 = vector.extract_strided_slice %601 {offsets = [0, 0, 24], sizes = [2, 8, 8], strides = [1, 1, 1]} : vector<2x8x64xf32> to vector<2x8x8xf32>
    %611 = tpu.concatenate %607, %608, %609, %610 in 0 : vector<2x8x8xf32>, vector<2x8x8xf32>, vector<2x8x8xf32>, vector<2x8x8xf32> -> vector<8x8x8xf32>
    %612 = vector.extract_strided_slice %601 {offsets = [0, 0, 32], sizes = [2, 8, 8], strides = [1, 1, 1]} : vector<2x8x64xf32> to vector<2x8x8xf32>
    %613 = vector.extract_strided_slice %601 {offsets = [0, 0, 40], sizes = [2, 8, 8], strides = [1, 1, 1]} : vector<2x8x64xf32> to vector<2x8x8xf32>
    %614 = vector.extract_strided_slice %601 {offsets = [0, 0, 48], sizes = [2, 8, 8], strides = [1, 1, 1]} : vector<2x8x64xf32> to vector<2x8x8xf32>
    %615 = vector.extract_strided_slice %601 {offsets = [0, 0, 56], sizes = [2, 8, 8], strides = [1, 1, 1]} : vector<2x8x64xf32> to vector<2x8x8xf32>
    %616 = tpu.concatenate %612, %613, %614, %615 in 0 : vector<2x8x8xf32>, vector<2x8x8xf32>, vector<2x8x8xf32>, vector<2x8x8xf32> -> vector<8x8x8xf32>
    %617 = arith.truncf %606 : vector<8x8x8xf32> to vector<8x8x8xbf16>
    %618 = arith.truncf %611 : vector<8x8x8xf32> to vector<8x8x8xbf16>
    "tpu.trace_start"() <{level = 10 : i32, message = "bqd,bkd->bqk"}> : () -> ()
    %cst_279 = arith.constant dense<0.000000e+00> : vector<8x8x8xf32>
    %619 = tpu.matmul %617, %618, %cst_279 {dimension_numbers = #tpu.dot_dimension_numbers<[2], [2], [1], [1], [0, 0, 0, 1, 1, 1], [0], [0]>} : vector<8x8x8xbf16>, vector<8x8x8xbf16>, vector<8x8x8xf32> -> vector<8x8x8xf32>
    "tpu.trace_stop"() : () -> ()
    %cst_280 = arith.constant 0.353553385 : f32
    %620 = vector.broadcast %cst_280 : f32 to vector<8x8x8xf32>
    %621 = arith.mulf %619, %620 : vector<8x8x8xf32>
    %622 = arith.addf %621, %268 : vector<8x8x8xf32>
    %cst_281 = arith.constant dense<0xFF800000> : vector<8x8xf32>
    %623 = vector.multi_reduction <maximumf>, %622, %cst_281 [2] : vector<8x8x8xf32> to vector<8x8xf32>
    %624 = vector.shape_cast %623 : vector<8x8xf32> to vector<8x8x1xf32>
    %625 = vector.broadcast %624 : vector<8x8x1xf32> to vector<8x8x8xf32>
    %626 = arith.subf %622, %625 : vector<8x8x8xf32>
    %627 = math.exp %626 : vector<8x8x8xf32>
    %cst_282 = arith.constant dense<0.000000e+00> : vector<8x8xf32>
    %628 = vector.multi_reduction <add>, %627, %cst_282 [2] : vector<8x8x8xf32> to vector<8x8xf32>
    %629 = vector.shape_cast %628 : vector<8x8xf32> to vector<8x8x1xf32>
    %630 = tpu.reciprocal %629 {approx = true} : vector<8x8x1xf32> -> vector<8x8x1xf32>
    %631 = vector.broadcast %630 : vector<8x8x1xf32> to vector<8x8x8xf32>
    %632 = arith.mulf %627, %631 : vector<8x8x8xf32>
    %633 = arith.truncf %632 : vector<8x8x8xf32> to vector<8x8x8xbf16>
    %634 = arith.truncf %616 : vector<8x8x8xf32> to vector<8x8x8xbf16>
    "tpu.trace_start"() <{level = 10 : i32, message = "bqk,bkd->bqd"}> : () -> ()
    %cst_283 = arith.constant dense<0.000000e+00> : vector<8x8x8xf32>
    %635 = tpu.matmul %633, %634, %cst_283 {dimension_numbers = #tpu.dot_dimension_numbers<[2], [1], [1], [2], [0, 0, 0, 1, 1, 2], [0], [0]>} : vector<8x8x8xbf16>, vector<8x8x8xbf16>, vector<8x8x8xf32> -> vector<8x8x8xf32>
    "tpu.trace_stop"() : () -> ()
    %636 = vector.extract_strided_slice %635 {offsets = [0, 0, 0], sizes = [2, 8, 8], strides = [1, 1, 1]} : vector<8x8x8xf32> to vector<2x8x8xf32>
    %637 = vector.extract_strided_slice %635 {offsets = [2, 0, 0], sizes = [2, 8, 8], strides = [1, 1, 1]} : vector<8x8x8xf32> to vector<2x8x8xf32>
    %638 = vector.extract_strided_slice %635 {offsets = [4, 0, 0], sizes = [2, 8, 8], strides = [1, 1, 1]} : vector<8x8x8xf32> to vector<2x8x8xf32>
    %639 = vector.extract_strided_slice %635 {offsets = [6, 0, 0], sizes = [2, 8, 8], strides = [1, 1, 1]} : vector<8x8x8xf32> to vector<2x8x8xf32>
    %640 = tpu.concatenate %636, %637, %638, %639 in 2 : vector<2x8x8xf32>, vector<2x8x8xf32>, vector<2x8x8xf32>, vector<2x8x8xf32> -> vector<2x8x32xf32>
    %641 = vector.shape_cast %640 : vector<2x8x32xf32> to vector<16x32xf32>
    %c1_284 = arith.constant 1 : index
    %c0_285 = arith.constant 0 : index
    %c0_286 = arith.constant 0 : index
    %c0_287 = arith.constant 0 : index
    %642 = vector.load %arg42[%c1_284, %c0_285, %c0_286, %c0_287] : memref<2x8x8x8xf32, #tpu.memory_space<vmem>>, vector<1x8x8x8xf32>
    %643 = vector.shape_cast %642 : vector<1x8x8x8xf32> to vector<8x8x8xf32>
    %644 = vector.shape_cast %632 : vector<8x8x8xf32> to vector<1x8x8x8xf32>
    tpu.vector_store %arg42[%c1_284, %c0_285, %c0_286, %c0_287], %644 {strides = array<i32>} : memref<2x8x8x8xf32, #tpu.memory_space<vmem>>, vector<1x8x8x8xf32>,
    %c1_288 = arith.constant 1 : index
    %c0_289 = arith.constant 0 : index
    %c0_290 = arith.constant 0 : index
    %645 = vector.load %arg27[%c1_288, %c0_289, %c0_290] : memref<2x32x32xbf16, #tpu.memory_space<vmem>>, vector<1x32x32xbf16>
    %646 = vector.shape_cast %645 : vector<1x32x32xbf16> to vector<32x32xbf16>
    %647 = arith.truncf %641 : vector<16x32xf32> to vector<16x32xbf16>
    %cst_291 = arith.constant dense<0.000000e+00> : vector<16x32xf32>
    %648 = tpu.matmul %647, %646, %cst_291 {dimension_numbers = #tpu.dot_dimension_numbers<[1], [0], [0], [1], [0, 0, 1, 1], [], []>} : vector<16x32xbf16>, vector<32x32xbf16>, vector<16x32xf32> -> vector<16x32xf32>
    %c1_292 = arith.constant 1 : index
    %c0_293 = arith.constant 0 : index
    %c0_294 = arith.constant 0 : index
    %649 = vector.load %arg28[%c1_292, %c0_293, %c0_294] : memref<2x1x32xf32, #tpu.memory_space<vmem>>, vector<1x1x32xf32>
    %650 = vector.shape_cast %649 : vector<1x1x32xf32> to vector<1x32xf32>
    %651 = vector.broadcast %650 : vector<1x32xf32> to vector<16x32xf32>
    %652 = arith.addf %648, %651 : vector<16x32xf32>
    %653 = arith.addf %583, %652 : vector<16x32xf32>
    %c1_295 = arith.constant 1 : index
    %c0_296 = arith.constant 0 : index
    %c0_297 = arith.constant 0 : index
    %654 = vector.load %arg29[%c1_295, %c0_296, %c0_297] : memref<2x1x32xf32, #tpu.memory_space<vmem>>, vector<1x1x32xf32>
    %655 = vector.shape_cast %654 : vector<1x1x32xf32> to vector<1x32xf32>
    %c1_298 = arith.constant 1 : index
    %c0_299 = arith.constant 0 : index
    %c0_300 = arith.constant 0 : index
    %656 = vector.load %arg30[%c1_298, %c0_299, %c0_300] : memref<2x1x32xf32, #tpu.memory_space<vmem>>, vector<1x1x32xf32>
    %657 = vector.shape_cast %656 : vector<1x1x32xf32> to vector<1x32xf32>
    %cst_301 = arith.constant dense<0.000000e+00> : vector<16xf32>
    %658 = vector.multi_reduction <add>, %653, %cst_301 [1] : vector<16x32xf32> to vector<16xf32>
    %659 = vector.shape_cast %658 : vector<16xf32> to vector<16x1xf32>
    %cst_302 = arith.constant 3.200000e+01 : f32
    %660 = vector.broadcast %cst_302 : f32 to vector<16x1xf32>
    %661 = arith.divf %659, %660 : vector<16x1xf32>
    %662 = vector.broadcast %661 : vector<16x1xf32> to vector<16x32xf32>
    %663 = arith.subf %653, %662 : vector<16x32xf32>
    %664 = arith.mulf %663, %663 : vector<16x32xf32>
    %cst_303 = arith.constant dense<0.000000e+00> : vector<16xf32>
    %665 = vector.multi_reduction <add>, %664, %cst_303 [1] : vector<16x32xf32> to vector<16xf32>
    %666 = vector.shape_cast %665 : vector<16xf32> to vector<16x1xf32>
    %cst_304 = arith.constant 3.200000e+01 : f32
    %667 = vector.broadcast %cst_304 : f32 to vector<16x1xf32>
    %668 = arith.divf %666, %667 : vector<16x1xf32>
    %669 = vector.broadcast %661 : vector<16x1xf32> to vector<16x32xf32>
    %670 = arith.subf %653, %669 : vector<16x32xf32>
    %cst_305 = arith.constant 9.99999996E-13 : f32
    %671 = vector.broadcast %cst_305 : f32 to vector<16x1xf32>
    %672 = arith.addf %668, %671 : vector<16x1xf32>
    %673 = math.rsqrt %672 : vector<16x1xf32>
    %674 = vector.broadcast %673 : vector<16x1xf32> to vector<16x32xf32>
    %675 = arith.mulf %670, %674 : vector<16x32xf32>
    %676 = vector.broadcast %655 : vector<1x32xf32> to vector<16x32xf32>
    %677 = arith.mulf %675, %676 : vector<16x32xf32>
    %678 = vector.broadcast %657 : vector<1x32xf32> to vector<16x32xf32>
    %679 = arith.addf %677, %678 : vector<16x32xf32>
    %c1_306 = arith.constant 1 : index
    %c0_307 = arith.constant 0 : index
    %c0_308 = arith.constant 0 : index
    %680 = vector.load %arg31[%c1_306, %c0_307, %c0_308] : memref<2x32x64xbf16, #tpu.memory_space<vmem>>, vector<1x32x64xbf16>
    %681 = vector.shape_cast %680 : vector<1x32x64xbf16> to vector<32x64xbf16>
    %682 = arith.truncf %679 : vector<16x32xf32> to vector<16x32xbf16>
    %cst_309 = arith.constant dense<0.000000e+00> : vector<16x64xf32>
    %683 = tpu.matmul %682, %681, %cst_309 {dimension_numbers = #tpu.dot_dimension_numbers<[1], [0], [0], [1], [0, 0, 1, 1], [], []>} : vector<16x32xbf16>, vector<32x64xbf16>, vector<16x64xf32> -> vector<16x64xf32>
    %c1_310 = arith.constant 1 : index
    %c0_311 = arith.constant 0 : index
    %c0_312 = arith.constant 0 : index
    %684 = vector.load %arg32[%c1_310, %c0_311, %c0_312] : memref<2x1x64xf32, #tpu.memory_space<vmem>>, vector<1x1x64xf32>
    %685 = vector.shape_cast %684 : vector<1x1x64xf32> to vector<1x64xf32>
    %686 = vector.broadcast %685 : vector<1x64xf32> to vector<16x64xf32>
    %687 = arith.addf %683, %686 : vector<16x64xf32>
    %cst_313 = arith.constant 0.000000e+00 : f32
    %688 = vector.broadcast %cst_313 : f32 to vector<16x64xf32>
    %689 = arith.maximumf %687, %688 : vector<16x64xf32>
    %c1_314 = arith.constant 1 : index
    %c0_315 = arith.constant 0 : index
    %c0_316 = arith.constant 0 : index
    %690 = vector.load %arg33[%c1_314, %c0_315, %c0_316] : memref<2x64x32xbf16, #tpu.memory_space<vmem>>, vector<1x64x32xbf16>
    %691 = vector.shape_cast %690 : vector<1x64x32xbf16> to vector<64x32xbf16>
    %692 = arith.truncf %689 : vector<16x64xf32> to vector<16x64xbf16>
    %cst_317 = arith.constant dense<0.000000e+00> : vector<16x32xf32>
    %693 = tpu.matmul %692, %691, %cst_317 {dimension_numbers = #tpu.dot_dimension_numbers<[1], [0], [0], [1], [0, 0, 1, 1], [], []>} : vector<16x64xbf16>, vector<64x32xbf16>, vector<16x32xf32> -> vector<16x32xf32>
    %c1_318 = arith.constant 1 : index
    %c0_319 = arith.constant 0 : index
    %c0_320 = arith.constant 0 : index
    %694 = vector.load %arg34[%c1_318, %c0_319, %c0_320] : memref<2x1x32xf32, #tpu.memory_space<vmem>>, vector<1x1x32xf32>
    %695 = vector.shape_cast %694 : vector<1x1x32xf32> to vector<1x32xf32>
    %696 = vector.broadcast %695 : vector<1x32xf32> to vector<16x32xf32>
    %697 = arith.addf %693, %696 : vector<16x32xf32>
    %698 = arith.addf %679, %697 : vector<16x32xf32>
    %c1_321 = arith.constant 1 : index
    %c0_322 = arith.constant 0 : index
    %c0_323 = arith.constant 0 : index
    %699 = vector.load %arg35[%c1_321, %c0_322, %c0_323] : memref<2x1x32xf32, #tpu.memory_space<vmem>>, vector<1x1x32xf32>
    %700 = vector.shape_cast %699 : vector<1x1x32xf32> to vector<1x32xf32>
    %c1_324 = arith.constant 1 : index
    %c0_325 = arith.constant 0 : index
    %c0_326 = arith.constant 0 : index
    %701 = vector.load %arg36[%c1_324, %c0_325, %c0_326] : memref<2x1x32xf32, #tpu.memory_space<vmem>>, vector<1x1x32xf32>
    %702 = vector.shape_cast %701 : vector<1x1x32xf32> to vector<1x32xf32>
    %cst_327 = arith.constant dense<0.000000e+00> : vector<16xf32>
    %703 = vector.multi_reduction <add>, %698, %cst_327 [1] : vector<16x32xf32> to vector<16xf32>
    %704 = vector.shape_cast %703 : vector<16xf32> to vector<16x1xf32>
    %cst_328 = arith.constant 3.200000e+01 : f32
    %705 = vector.broadcast %cst_328 : f32 to vector<16x1xf32>
    %706 = arith.divf %704, %705 : vector<16x1xf32>
    %707 = vector.broadcast %706 : vector<16x1xf32> to vector<16x32xf32>
    %708 = arith.subf %698, %707 : vector<16x32xf32>
    %709 = arith.mulf %708, %708 : vector<16x32xf32>
    %cst_329 = arith.constant dense<0.000000e+00> : vector<16xf32>
    %710 = vector.multi_reduction <add>, %709, %cst_329 [1] : vector<16x32xf32> to vector<16xf32>
    %711 = vector.shape_cast %710 : vector<16xf32> to vector<16x1xf32>
    %cst_330 = arith.constant 3.200000e+01 : f32
    %712 = vector.broadcast %cst_330 : f32 to vector<16x1xf32>
    %713 = arith.divf %711, %712 : vector<16x1xf32>
    %714 = vector.broadcast %706 : vector<16x1xf32> to vector<16x32xf32>
    %715 = arith.subf %698, %714 : vector<16x32xf32>
    %cst_331 = arith.constant 9.99999996E-13 : f32
    %716 = vector.broadcast %cst_331 : f32 to vector<16x1xf32>
    %717 = arith.addf %713, %716 : vector<16x1xf32>
    %718 = math.rsqrt %717 : vector<16x1xf32>
    %719 = vector.broadcast %718 : vector<16x1xf32> to vector<16x32xf32>
    %720 = arith.mulf %715, %719 : vector<16x32xf32>
    %721 = vector.broadcast %700 : vector<1x32xf32> to vector<16x32xf32>
    %722 = arith.mulf %720, %721 : vector<16x32xf32>
    %723 = vector.broadcast %702 : vector<1x32xf32> to vector<16x32xf32>
    %724 = arith.addf %722, %723 : vector<16x32xf32>
    %c0_332 = arith.constant 0 : index
    %c0_333 = arith.constant 0 : index
    %725 = vector.load %arg37[%c0_332, %c0_333] : memref<32x128xbf16, #tpu.memory_space<vmem>>, vector<32x128xbf16>
    %726 = arith.truncf %724 : vector<16x32xf32> to vector<16x32xbf16>
    %cst_334 = arith.constant dense<0.000000e+00> : vector<16x128xf32>
    %727 = tpu.matmul %726, %725, %cst_334 {dimension_numbers = #tpu.dot_dimension_numbers<[1], [0], [0], [1], [0, 0, 1, 1], [], []>} : vector<16x32xbf16>, vector<32x128xbf16>, vector<16x128xf32> -> vector<16x128xf32>
    %c0_335 = arith.constant 0 : index
    %c0_336 = arith.constant 0 : index
    %728 = vector.load %arg38[%c0_335, %c0_336] : memref<1x128xf32, #tpu.memory_space<vmem>>, vector<1x128xf32>
    %729 = vector.broadcast %728 : vector<1x128xf32> to vector<16x128xf32>
    %730 = arith.addf %727, %729 : vector<16x128xf32>
    %c0_337 = arith.constant 0 : index
    %c0_338 = arith.constant 0 : index
    %731 = vector.load %arg39[%c0_337, %c0_338] : memref<16x128xf32, #tpu.memory_space<vmem>>, vector<16x128xf32>
    tpu.vector_store %arg39[%c0_337, %c0_338], %730 {strides = array<i32>} : memref<16x128xf32, #tpu.memory_space<vmem>>, vector<16x128xf32>,
    return
  }
}

</mosaic_0001>

<bundles_post_ra>
// kernel: transformer_forward.1
= control target key start
LH: loop header
LB: loop body
LE: loop exit
PB: predicated region body
PF: predicated region fallthrough
CT: control target
= control target key end

     0   :  { %v10067_v0 = vmov 0.0   ;;  %s10068_s3 = smov 5   ;;  %vm10069_vm0 = vmmov 0   ;;  %vm204_vm1 = vcmask 261120   ;;  %s10070_s10 = smov 6   ;;  %vm280_vm2 = vcmask 64512   ;;  %s12007_s0 = inlined_call_operand.smem [shape: u32[43], index: -1, kind: input, shape index: {}] }
   0x1   :  { %8722 = vmatprep.subr.bf16.mxu0 %v10067_v0  ;;  %s10125_s6 = sld [smem:[%s12007_s0 + %s10068_s3]]   ;;  %8726 = vmatprep.mubr.msk.bf16.mxu0 %vm10069_vm0, %v10067_v0  ;;  %s12018_s14 = smov 104   ;;  %vm787_vm3 = vcmask 1043456   ;;  %vm1193_vm4 = vcmask 130048   ;;  %vm1196_vm5 = vcmask 195584   ;;  %vm1432_vm6 = vcmask 523264  }
   0x2   :  { %s1_s9 = sld [smem:[%s12007_s0]]   ;;  %8730 = vmatprep.subr.bf16.mxu1 %v10067_v0  ;;  %8732 = vmatprep.mubr.msk.bf16.mxu1 %vm10069_vm0, %v10067_v0  ;;  %s12020_s15 = smov 120  }
   0x3   :  { %s10151_s13 = sld [smem:[%s12007_s0 + %s10070_s10]]   ;;  %s12016_s16 = smov 96  }
   0x4   :  { %s10074_s17 = smov 112   ;;  %s12014_s18 = smov 64  }
   0x5   :  { %s10076_s19 = smov 2   ;;  %s10077_s23 = smov 40  }
   0x6   :  { %s10238_s22 = sld [smem:[%s12007_s0 + %s10076_s19]]   ;;  %s12012_s27 = smov 8  }
   0x7   :  { %v9757_v1 = vld [vmem:[%s10125_s6] sm:$0xff]   ;;  %v9758_v2 = vld [vmem:[%s10125_s6 + $0x8] sm:$0xff]   ;;  %s10315_s26 = sld [smem:[%s12007_s0 + %s10077_s23]]   ;;  %s10079_s28 = smov 7  }
   0x8   :  { %8723 = vmatpush3.bf16.msra.mxu0 %v9757_v1  ;;  %v10137_v3 = vld [vmem:[%s1_s9] sm:$0xff]  ;;  %v10139_v4 = vld [vmem:[%s1_s9 + $0x8] sm:$0xff]  ;;  %s10381_s1 = sld [smem:[%s12007_s0 + %s10079_s28]]   ;;  %s12010_s2 = smov 16  }
   0x9   :  { %8724 = vmatprep.subr.bf16.mxu0 %v10067_v0  ;;  %v184_v5 = vpack.c.bf16 %v10139_v4, %v10137_v3  ;;  %v8140_v6 = vld [vmem:[%s10151_s13] ss:$0 sm:$0xff]  ;;  %s12008_s3 = smov 24   ;;  %s10402_s7 = sld [smem:[%s12007_s0 + %s12012_s27]]  }
   0xa   :  { %s10082_s8 = smov 11   ;;  %s10083_s12 = smov 13  }
   0xb   :  { %s10414_s11 = sld [smem:[%s12007_s0 + %s10082_s8]]   ;;  %s10084_s23 = smov 9  }
   0xc   :  { %8725 = vmatpush3.bf16.msra.mxu0 %v9758_v2  ;;  %v172_v52 = vld [vmem:[%s10238_s22] sm:$0xff]  ;;  %v173_v59 = vld [vmem:[%s10238_s22 + $0x8] sm:$0xff]  ;;  %s10423_s21 = sld [smem:[%s12007_s0 + %s10083_s12]]   ;;  %s10085_s29 = smov 10  }
   0xd   :  { %8736 = vmatprep.subr.bf16.mxu0 %v10067_v0  ;;  %s10432_s28 = sld [smem:[%s12007_s0 + %s10084_s23]]   ;;  %s10086_s8 = smov 12  }
   0xe   :  { %s10437_s5 = sld [smem:[%s12007_s0 + %s10085_s29]]   ;;  %s10087_s19 = smov 14  }
   0xf   :  { %8727 = vmatmul.mubr.msk.bf16.vlgmr.msra.gmra.mrb[0].mxu0 %vm204_vm1, %v184_v5  ;;  %s10451_s12 = sld [smem:[%s12007_s0 + %s10086_s8]]   ;;  %s10088_s25 = smov 15  }
  0x10   :  { %8738 = vmatprep.mubr.msk.bf16.mxu0 %vm10069_vm0, %v10067_v0  ;;  %s10460_s24 = sld [smem:[%s12007_s0 + %s10087_s19]]   ;;  %s10093_s30 = smov 41  }
  0x11   :  { %s10474_s4 = sld [smem:[%s12007_s0 + %s10088_s25]]   ;;  %s10097_s25 = smov 23  }
  0x12   :  { %s10480_s9 = sld [smem:[%s12007_s0 + %s12010_s2]]   ;;  %s10101_s8 = smov 4  }
  0x13   :  { %s10102_s10 = smov 42  }
  0xe2   :  { %v242_v7 = vpop.f32.mrb[0].mxu0 }
  0xe3   :  { %v8728_v8 = vpop.f32.mrb[1].mxu0  ;;  %v243_v10 = vadd.f32 %v8140_v6, %v242_v7 }
  0xe4   :  { %v245_v9 = vpop.f32.mrb[2].mxu0  ;;  %v174_v8 = vld [vmem:[%s10238_s22 + $0x10] sm:$0xff] }
  0xe5   :  { %v246_v11 = vadd.f32 %v8140_v6, %v245_v9  ;;  %v8729_v12 = vpop.f32.mrb[3].mxu0  ;;  %v269_v14 = vpack.c.bf16 %v243_v10, %v243_v10  ;;  %v175_v9 = vld [vmem:[%s10238_s22 + $0x18] sm:$0xff] }
  0xe7   :  { %v9557_v13 = vpack.i.bf16 %v246_v11, %v243_v10  ;;  %v270_v15 = vpack.c.bf16 %v246_v11, %v246_v11 }
  0xe9   :  { %9558 = vrot.lane.b32.xlu1 %v9557_v13, %s12018_s14  ;;  %9548 = vrot.lane.b32.xlu0 %v9557_v13, %s12020_s15 }
  0xed   :  { %278 = vrot.lane.b32.xlu1 %v269_v14, %s12016_s16  ;;  %9553 = vrot.lane.b32.xlu0 %v9557_v13, %s10074_s17 }
  0xf1   :  { %328 = vrot.lane.b32.xlu0 %v270_v15, %s12016_s16 }
 0x15b   :  { %v9559_v16 = vpop.permute.xlu1 %9558  ;;  %v9549_v17 = vpop.permute.xlu0 %9548 }
 0x15c   :  { %v9551_v18 = vunpack.i.h.bf16 %v9549_v17  ;;  %v9550_v19 = vunpack.i.l.bf16 %v9549_v17  ;;  %v9560_v27 = vunpack.i.l.bf16 %v9559_v16  ;;  %v9561_v30 = vunpack.i.h.bf16 %v9559_v16 }
 0x15e   :  { %v10159_v20 = vpack.c.bf16 %v9550_v19, %v9550_v19  ;;  %v10161_v21 = vpack.c.bf16 %v9551_v18, %v9551_v18  ;;  %v10178_v33 = vpack.c.bf16 %v9560_v27, %v9560_v27  ;;  %v10181_v34 = vpack.c.bf16 %v9561_v30, %v9561_v30  ;;  %v177_v27 = vld [vmem:[%s10238_s22 + $0x28] sm:$0xff] }
 0x15f   :  { %v279_v22 = vpop.permute.xlu1 %278  ;;  %v9554_v23 = vpop.permute.xlu0 %9553 }
 0x160   :  { %v9556_v24 = vunpack.i.h.bf16 %v9554_v23  ;;  %v9555_v25 = vunpack.i.l.bf16 %v9554_v23  ;;  %377 = vrot.lane.b32.xlu1 %v10159_v20, %s12016_s16  ;;  %426 = vrot.lane.b32.xlu0 %v10161_v21, %s12016_s16  ;;  %v285_v26 = vsel %vm280_vm2, %v279_v22, 0 }
 0x161   :  { %8731 = vmatpush3.bf16.xpose.msra.mxu1 %v285_v26  ;;  %v176_v26 = vld [vmem:[%s10238_s22 + $0x20] sm:$0xff] }
 0x162   :  { %v10168_v28 = vpack.c.bf16 %v9555_v25, %v9555_v25  ;;  %v10170_v29 = vpack.c.bf16 %v9556_v24, %v9556_v24  ;;  %8742 = vmatprep.subr.bf16.mxu1 %v10067_v0 }
 0x163   :  { %v329_v31 = vpop.permute.xlu0 %328 }
 0x164   :  { %v334_v32 = vsel %vm280_vm2, %v329_v31, 0  ;;  %475 = vrot.lane.b32.xlu1 %v10168_v28, %s12016_s16  ;;  %524 = vrot.lane.b32.xlu0 %v10170_v29, %s12016_s16 }
 0x165   :  { %8737 = vmatpush3.bf16.xpose.msra.mxu0 %v334_v32 }
 0x166   :  { %8748 = vmatprep.subr.bf16.mxu0 %v10067_v0 }
 0x168   :  { %8733 = vmatmul.mubr.msk.bf16.vlgmr.msra.gmra.mrb[0].mxu1 %vm280_vm2, %v269_v14  ;;  %573 = vrot.lane.b32.xlu1 %v10178_v33, %s12016_s16 }
 0x169   :  { %622 = vrot.lane.b32.xlu0 %v10181_v34, %s12016_s16  ;;  %8744 = vmatprep.mubr.msk.bf16.mxu1 %vm10069_vm0, %v10067_v0 }
 0x16c   :  { %831 = vrot.lane.b32.xlu1 %v270_v15, %s12014_s18  ;;  %8739 = vmatmul.mubr.msk.bf16.vlgmr.msra.gmra.mrb[4].mxu0 %vm280_vm2, %v270_v15 }
 0x16d   :  { %782 = vrot.lane.b32.xlu0 %v269_v14, %s12014_s18  ;;  %8750 = vmatprep.mubr.msk.bf16.mxu0 %vm10069_vm0, %v10067_v0 }
 0x1d2   :  { %v378_v35 = vpop.permute.xlu1 %377  ;;  %v427_v36 = vpop.permute.xlu0 %426 }
 0x1d3   :  { %v383_v37 = vsel %vm280_vm2, %v378_v35, 0  ;;  %v432_v38 = vsel %vm280_vm2, %v427_v36, 0 }
 0x1d4   :  { %8743 = vmatpush3.bf16.xpose.msra.mxu1 %v383_v37  ;;  %8749 = vmatpush3.bf16.xpose.msra.mxu0 %v432_v38 }
 0x1d5   :  { %8754 = vmatprep.subr.bf16.mxu1 %v10067_v0  ;;  %8760 = vmatprep.subr.bf16.mxu0 %v10067_v0 }
 0x1d6   :  { %v476_v39 = vpop.permute.xlu1 %475  ;;  %v525_v40 = vpop.permute.xlu0 %524 }
 0x1d7   :  { %v481_v41 = vsel %vm280_vm2, %v476_v39, 0  ;;  %v530_v42 = vsel %vm280_vm2, %v525_v40, 0 }
 0x1da   :  { %v574_v43 = vpop.permute.xlu1 %573 }
 0x1db   :  { %8745 = vmatmul.mubr.msk.bf16.vlgmr.msra.gmra.mrb[4].mxu1 %vm280_vm2, %v10159_v20  ;;  %8751 = vmatmul.mubr.msk.bf16.vlgmr.msra.gmra.mrb[8].mxu0 %vm280_vm2, %v10161_v21  ;;  %v623_v44 = vpop.permute.xlu0 %622  ;;  %v579_v45 = vsel %vm280_vm2, %v574_v43, 0 }
 0x1dc   :  { %8755 = vmatpush3.bf16.xpose.msra.mxu1 %v481_v41  ;;  %8761 = vmatpush3.bf16.xpose.msra.mxu0 %v530_v42  ;;  %v628_v46 = vsel %vm280_vm2, %v623_v44, 0 }
 0x1dd   :  { %8756 = vmatprep.mubr.msk.bf16.mxu1 %vm10069_vm0, %v10067_v0  ;;  %8762 = vmatprep.mubr.msk.bf16.mxu0 %vm10069_vm0, %v10067_v0 }
 0x1de   :  { %8766 = vmatprep.subr.bf16.mxu1 %v10067_v0  ;;  %8772 = vmatprep.subr.bf16.mxu0 %v10067_v0  ;;  %v832_v47 = vpop.permute.xlu1 %831 }
 0x1df   :  { %v783_v48 = vpop.permute.xlu0 %782  ;;  %v837_v49 = vsel %vm787_vm3, %v832_v47, 0  ;;  %v179_v47 = vld [vmem:[%s10238_s22 + $0x38] sm:$0xff] }
 0x1e0   :  { %v789_v50 = vsel %vm787_vm3, %v783_v48, 0 }
 0x1e3   :  { %8757 = vmatmul.mubr.msk.bf16.vlgmr.msra.gmra.mrb[8].mxu1 %vm280_vm2, %v10168_v28  ;;  %8763 = vmatmul.mubr.msk.bf16.vlgmr.msra.gmra.mrb[12].mxu0 %vm280_vm2, %v10170_v29 }
 0x1e4   :  { %8767 = vmatpush3.bf16.xpose.msra.mxu1 %v579_v45  ;;  %8773 = vmatpush3.bf16.xpose.msra.mxu0 %v628_v46  ;;  %v178_v46 = vld [vmem:[%s10238_s22 + $0x30] sm:$0xff] }
 0x1e5   :  { %8768 = vmatprep.mubr.msk.bf16.mxu1 %vm10069_vm0, %v10067_v0  ;;  %8774 = vmatprep.mubr.msk.bf16.mxu0 %vm10069_vm0, %v10067_v0 }
 0x1e6   :  { %8778 = vmatprep.subr.bf16.mxu1 %v10067_v0  ;;  %8784 = vmatprep.subr.bf16.mxu0 %v10067_v0 }
 0x1eb   :  { %8769 = vmatmul.mubr.msk.bf16.vlgmr.msra.gmra.mrb[12].mxu1 %vm280_vm2, %v10178_v33  ;;  %8775 = vmatmul.mubr.msk.bf16.vlgmr.msra.gmra.mrb[16].mxu0 %vm280_vm2, %v10181_v34 }
 0x1ec   :  { %8779 = vmatpush3.bf16.msra.mxu1 %v789_v50  ;;  %8785 = vmatpush3.bf16.msra.mxu0 %v837_v49 }
 0x1ed   :  { %8780 = vmatprep.mubr.msk.bf16.mxu1 %vm10069_vm0, %v10067_v0  ;;  %8786 = vmatprep.mubr.msk.bf16.mxu0 %vm10069_vm0, %v10067_v0 }
 0x1ee   :  { %8790 = vmatprep.subr.bf16.mxu1 %v10067_v0  ;;  %8796 = vmatprep.subr.bf16.mxu0 %v10067_v0 }
 0x23b   :  { %v321_v51 = vpop.f32.mrb[0].mxu1 }
 0x23c   :  { %v670_v53 = vmul.f32 0.35355338, %v321_v51  ;;  %v8734_v54 = vpop.f32.mrb[1].mxu1 }
 0x23d   :  { %v324_v55 = vpop.f32.mrb[2].mxu1 }
 0x23e   :  { %v8735_v56 = vpop.f32.mrb[3].mxu1  ;;  %v10241_v57 = vadd.f32 %v670_v53, %v172_v52 }
 0x23f   :  { %v370_v58 = vpop.f32.mrb[4].mxu0 }
 0x240   :  { %v671_v60 = vmul.f32 0.35355338, %v370_v58  ;;  %v8740_v61 = vpop.f32.mrb[5].mxu0  ;;  %v686_v62 = vsel %vm280_vm2, %v10241_v57, -inf }
 0x241   :  { %687 = vmax.xlane.f32.xlu1 %v686_v62  ;;  %v373_v63 = vpop.f32.mrb[6].mxu0 }
 0x242   :  { %v8741_v1 = vpop.f32.mrb[7].mxu0  ;;  %v10246_v2 = vadd.f32 %v671_v60, %v173_v59 }
 0x244   :  { %v689_v5 = vsel %vm280_vm2, %v10246_v2, -inf }
 0x245   :  { %690 = vmax.xlane.f32.xlu0 %v689_v5 }
 0x2ae   :  { %v419_v6 = vpop.f32.mrb[4].mxu1  ;;  %v468_v7 = vpop.f32.mrb[8].mxu0 }
 0x2af   :  { %v672_v10 = vmul.f32 0.35355338, %v419_v6  ;;  %v673_v11 = vmul.f32 0.35355338, %v468_v7  ;;  %v8746_v12 = vpop.f32.mrb[5].mxu1  ;;  %v8752_v13 = vpop.f32.mrb[9].mxu0 }
 0x2b0   :  { %v422_v14 = vpop.f32.mrb[6].mxu1  ;;  %v471_v15 = vpop.f32.mrb[10].mxu0 }
 0x2b1   :  { %v8747_v16 = vpop.f32.mrb[7].mxu1  ;;  %v8753_v17 = vpop.f32.mrb[11].mxu0  ;;  %v10252_v18 = vadd.f32 %v672_v10, %v174_v8  ;;  %v10254_v19 = vadd.f32 %v673_v11, %v175_v9 }
 0x2b3   :  { %v692_v22 = vsel %vm280_vm2, %v10252_v18, -inf  ;;  %v695_v23 = vsel %vm280_vm2, %v10254_v19, -inf }
 0x2b4   :  { %693 = vmax.xlane.f32.xlu0 %v692_v22  ;;  %696 = vmax.xlane.f32.xlu1 %v695_v23 }
 0x2b6   :  { %v517_v24 = vpop.f32.mrb[8].mxu1  ;;  %v566_v25 = vpop.f32.mrb[12].mxu0 }
 0x2b7   :  { %v674_v30 = vmul.f32 0.35355338, %v517_v24  ;;  %v675_v31 = vmul.f32 0.35355338, %v566_v25  ;;  %v8758_v32 = vpop.f32.mrb[9].mxu1  ;;  %v8764_v35 = vpop.f32.mrb[13].mxu0 }
 0x2b8   :  { %v520_v36 = vpop.f32.mrb[10].mxu1  ;;  %v569_v37 = vpop.f32.mrb[14].mxu0 }
 0x2b9   :  { %v8759_v38 = vpop.f32.mrb[11].mxu1  ;;  %v8765_v39 = vpop.f32.mrb[15].mxu0  ;;  %v10262_v40 = vadd.f32 %v674_v30, %v176_v26  ;;  %v683_v41 = vadd.f32 %v675_v31, %v177_v27 }
 0x2bb   :  { %v698_v42 = vsel %vm280_vm2, %v10262_v40, -inf  ;;  %v701_v43 = vsel %vm280_vm2, %v683_v41, -inf }
 0x2bc   :  { %699 = vmax.xlane.f32.xlu0 %v698_v42  ;;  %702 = vmax.xlane.f32.xlu1 %v701_v43 }
 0x2be   :  { %v615_v44 = vpop.f32.mrb[12].mxu1  ;;  %v664_v45 = vpop.f32.mrb[16].mxu0 }
 0x2bf   :  { %v676_v48 = vmul.f32 0.35355338, %v615_v44  ;;  %v677_v49 = vmul.f32 0.35355338, %v664_v45  ;;  %v8770_v50 = vpop.f32.mrb[13].mxu1  ;;  %v8776_v51 = vpop.f32.mrb[17].mxu0 }
 0x2c0   :  { %v618_v52 = vpop.f32.mrb[14].mxu1  ;;  %v667_v53 = vpop.f32.mrb[18].mxu0 }
 0x2c1   :  { %v8771_v54 = vpop.f32.mrb[15].mxu1  ;;  %v8777_v55 = vpop.f32.mrb[19].mxu0  ;;  %v684_v56 = vadd.f32 %v676_v48, %v178_v46  ;;  %v685_v58 = vadd.f32 %v677_v49, %v179_v47 }
 0x2c3   :  { %v704_v59 = vsel %vm280_vm2, %v684_v56, -inf  ;;  %v707_v60 = vsel %vm280_vm2, %v685_v58, -inf }
 0x2c4   :  { %705 = vmax.xlane.f32.xlu0 %v704_v59  ;;  %708 = vmax.xlane.f32.xlu1 %v707_v60 }
 0x2ce   :  { %v688_v61 = vpop.xlane.xlu1 %687 }
 0x2cf   :  { %v710_v63 = vsub.f32 %v10241_v57, %v688_v61 }
 0x2d1   :  { %v718_v5 = vmul.f32 1.442695, %v710_v63 }
 0x2d2   :  { %v691_v62 = vpop.xlane.xlu0 %690 }
 0x2d3   :  { %v711_v1 = vsub.f32 %v10246_v2, %v691_v62  ;;  %9811 = vpow2.f32 %v718_v5 }
 0x2d5   :  { %879 = vrot.lane.b32.xlu1 %v10159_v20, %s12014_s18  ;;  %v720_v6 = vmul.f32 1.442695, %v711_v1 }
 0x2d7   :  { %9813 = vpow2.f32 %v720_v6 }
 0x2da   :  { %927 = vrot.lane.b32.xlu0 %v10161_v21, %s12014_s18 }
 0x2dd   :  { %v9812_v7 = vpop.eup %9811 }
 0x2de   :  { %v734_v9 = vsel %vm280_vm2, %v9812_v7, 0.0 }
 0x2e1   :  { %v9814_v8 = vpop.eup %9813 }
 0x2e2   :  { %v737_v10 = vsel %vm280_vm2, %v9814_v8, 0.0 }
 0x2f9   :  { %735 = vadd.xlane.f32.xlu0 %v734_v9  ;;  %738 = vadd.xlane.f32.xlu1 %v737_v10 }
 0x30a   :  { %975 = vrot.lane.b32.xlu1 %v10168_v28, %s12014_s18 }
 0x341   :  { %v694_v20 = vpop.xlane.xlu0 %693  ;;  %v697_v21 = vpop.xlane.xlu1 %696 }
 0x342   :  { %v712_v57 = vsub.f32 %v10252_v18, %v694_v20  ;;  %v713_v2 = vsub.f32 %v10254_v19, %v697_v21 }
 0x344   :  { %v722_v11 = vmul.f32 1.442695, %v712_v57  ;;  %v724_v12 = vmul.f32 1.442695, %v713_v2 }
 0x346   :  { %9815 = vpow2.f32 %v722_v11 }
 0x347   :  { %9817 = vpow2.f32 %v724_v12 }
 0x349   :  { %v703_v13 = vpop.xlane.xlu1 %702  ;;  %v700_v30 = vpop.xlane.xlu0 %699 }
 0x34a   :  { %v715_v14 = vsub.f32 %v683_v41, %v703_v13  ;;  %v714_v31 = vsub.f32 %v10262_v40, %v700_v30 }
 0x34c   :  { %v728_v15 = vmul.f32 1.442695, %v715_v14  ;;  %v726_v35 = vmul.f32 1.442695, %v714_v31 }
 0x34e   :  { %9819 = vpow2.f32 %v728_v15 }
 0x350   :  { %v10283_v16 = vpop.eup %9815 }
 0x351   :  { %v10285_v17 = vpop.eup %9817  ;;  %v709_v22 = vpop.xlane.xlu1 %708  ;;  %v740_v28 = vsel %vm280_vm2, %v10283_v16, 0.0 }
 0x352   :  { %v717_v23 = vsub.f32 %v685_v58, %v709_v22  ;;  %741 = vadd.xlane.f32.xlu0 %v740_v28  ;;  %v743_v18 = vsel %vm280_vm2, %v10285_v17, 0.0  ;;  %v706_v32 = vpop.xlane.xlu0 %705 }
 0x353   :  { %744 = vadd.xlane.f32.xlu1 %v743_v18  ;;  %v716_v36 = vsub.f32 %v684_v56, %v706_v32 }
 0x354   :  { %v732_v19 = vmul.f32 1.442695, %v717_v23 }
 0x355   :  { %v730_v37 = vmul.f32 1.442695, %v716_v36  ;;  %v880_v39 = vpop.permute.xlu1 %879 }
 0x356   :  { %9821 = vpow2.f32 %v732_v19  ;;  %v928_v38 = vpop.permute.xlu0 %927  ;;  %v885_v50 = vsel %vm787_vm3, %v880_v39, 0 }
 0x357   :  { %9823 = vpow2.f32 %v726_v35  ;;  %v933_v51 = vsel %vm787_vm3, %v928_v38, 0 }
 0x358   :  { %v10291_v24 = vpop.eup %9819  ;;  %9825 = vpow2.f32 %v730_v37 }
 0x359   :  { %v749_v25 = vsel %vm280_vm2, %v10291_v24, 0.0 }
 0x35a   :  { %750 = vadd.xlane.f32.xlu1 %v749_v25 }
 0x360   :  { %v10295_v26 = vpop.eup %9821 }
 0x361   :  { %v755_v27 = vsel %vm280_vm2, %v10295_v26, 0.0  ;;  %v10304_v41 = vpop.eup %9823 }
 0x362   :  { %756 = vadd.xlane.f32.xlu1 %v755_v27  ;;  %v10308_v44 = vpop.eup %9825 }
 0x368   :  { %1023 = vrot.lane.b32.xlu0 %v10170_v29, %s12014_s18  ;;  %v746_v29 = vsel %vm280_vm2, %v10304_v41, 0.0 }
 0x373   :  { %1071 = vrot.lane.b32.xlu1 %v10178_v33, %s12014_s18  ;;  %v752_v33 = vsel %vm280_vm2, %v10308_v44, 0.0 }
 0x386   :  { %v736_v42 = vpop.xlane.xlu0 %735  ;;  %v739_v43 = vpop.xlane.xlu1 %738 }
 0x387   :  { %9827 = vrcp.f32 %v736_v42  ;;  %747 = vadd.xlane.f32.xlu0 %v746_v29 }
 0x388   :  { %9829 = vrcp.f32 %v739_v43 }
 0x38a   :  { %v976_v52 = vpop.permute.xlu1 %975 }
 0x38b   :  { %753 = vadd.xlane.f32.xlu0 %v752_v33  ;;  %v981_v63 = vsel %vm787_vm3, %v976_v52, 0 }
 0x391   :  { %v9828_v40 = vpop.eup %9827 }
 0x392   :  { %v9830_v45 = vpop.eup %9829  ;;  %v766_v46 = vmul.f32 %v9828_v40, %v9812_v7  ;;  %v9759_v40 = vld [vmem:[%s10381_s1] sm:$0xff]  }
 0x393   :  { %v767_v47 = vmul.f32 %v9830_v45, %v9814_v8 }
 0x394   :  { %1199 = vst.msk [vmem:[%s10315_s26] sm:$0xff] %vm280_vm2, %v766_v46  ;;  %v774_v48 = vpack.c.bf16 %v766_v46, %v766_v46 }
 0x395   :  { %1200 = vst.msk [vmem:[%s10315_s26 + $0x8] sm:$0xff] %vm280_vm2, %v767_v47  ;;  %v775_v49 = vpack.c.bf16 %v767_v47, %v767_v47 }
 0x396   :  { %8781 = vmatmul.mubr.msk.bf16.vlgmr.msra.gmra.mrb[16].mxu1 %vm280_vm2, %v774_v48 }
 0x397   :  { %8787 = vmatmul.mubr.msk.bf16.vlgmr.msra.gmra.mrb[20].mxu0 %vm280_vm2, %v775_v49  ;;  %8791 = vmatpush3.bf16.msra.mxu1 %v885_v50  ;;  %v9760_v50 = vld [vmem:[%s10381_s1 + $0x8] sm:$0xff]  }
 0x398   :  { %8797 = vmatpush3.bf16.msra.mxu0 %v933_v51  ;;  %8792 = vmatprep.mubr.msk.bf16.mxu1 %vm10069_vm0, %v10067_v0 }
 0x399   :  { %8798 = vmatprep.mubr.msk.bf16.mxu0 %vm10069_vm0, %v10067_v0  ;;  %8802 = vmatprep.subr.bf16.mxu1 %v10067_v0 }
 0x39a   :  { %8808 = vmatprep.subr.bf16.mxu0 %v10067_v0 }
 0x3a1   :  { %1119 = vrot.lane.b32.xlu0 %v10181_v34, %s12014_s18 }
 0x3df   :  { %v742_v53 = vpop.xlane.xlu0 %741 }
 0x3e0   :  { %9831 = vrcp.f32 %v742_v53  ;;  %v745_v54 = vpop.xlane.xlu1 %744 }
 0x3e1   :  { %9833 = vrcp.f32 %v745_v54 }
 0x3e3   :  { %v1024_v61 = vpop.permute.xlu0 %1023 }
 0x3e4   :  { %v1029_v1 = vsel %vm787_vm3, %v1024_v61, 0 }
 0x3e7   :  { %v751_v55 = vpop.xlane.xlu1 %750 }
 0x3e8   :  { %9835 = vrcp.f32 %v751_v55 }
 0x3ea   :  { %v9832_v56 = vpop.eup %9831 }
 0x3eb   :  { %v9834_v58 = vpop.eup %9833  ;;  %v768_v59 = vmul.f32 %v9832_v56, %v10283_v16 }
 0x3ec   :  { %v769_v60 = vmul.f32 %v9834_v58, %v10285_v17 }
 0x3ed   :  { %1201 = vst.msk [vmem:[%s10315_s26 + $0x10] sm:$0xff] %vm280_vm2, %v768_v59  ;;  %v776_v62 = vpack.c.bf16 %v768_v59, %v768_v59 }
 0x3ee   :  { %1202 = vst.msk [vmem:[%s10315_s26 + $0x18] sm:$0xff] %vm280_vm2, %v769_v60  ;;  %v777_v34 = vpack.c.bf16 %v769_v60, %v769_v60 }
 0x3ef   :  { %8793 = vmatmul.mubr.msk.bf16.vlgmr.msra.gmra.mrb[20].mxu1 %vm280_vm2, %v776_v62  ;;  %v757_v5 = vpop.xlane.xlu1 %756 }
 0x3f0   :  { %8799 = vmatmul.mubr.msk.bf16.vlgmr.msra.gmra.mrb[24].mxu0 %vm280_vm2, %v777_v34  ;;  %8803 = vmatpush3.bf16.msra.mxu1 %v981_v63  ;;  %9837 = vrcp.f32 %v757_v5 }
 0x3f1   :  { %8809 = vmatpush3.bf16.msra.mxu0 %v1029_v1  ;;  %8810 = vmatprep.mubr.msk.bf16.mxu0 %vm10069_vm0, %v10067_v0 }
 0x3f2   :  { %8820 = vmatprep.subr.bf16.mxu0 %v10067_v0  ;;  %8804 = vmatprep.mubr.msk.bf16.mxu1 %vm10069_vm0, %v10067_v0  ;;  %v9836_v6 = vpop.eup %9835 }
 0x3f3   :  { %8814 = vmatprep.subr.bf16.mxu1 %v10067_v0  ;;  %v771_v7 = vmul.f32 %v9836_v6, %v10291_v24  ;;  %v1072_v14 = vpop.permute.xlu1 %1071 }
 0x3f4   :  { %v1077_v17 = vsel %vm787_vm3, %v1072_v14, 0 }
 0x3f5   :  { %1204 = vst.msk [vmem:[%s10315_s26 + $0x28] sm:$0xff] %vm280_vm2, %v771_v7  ;;  %v779_v8 = vpack.c.bf16 %v771_v7, %v771_v7 }
 0x3f8   :  { %8811 = vmatmul.mubr.msk.bf16.vlgmr.msra.gmra.mrb[28].mxu0 %vm280_vm2, %v779_v8 }
 0x3f9   :  { %8822 = vmatprep.mubr.msk.bf16.mxu0 %vm10069_vm0, %v10067_v0 }
 0x3fa   :  { %v9838_v9 = vpop.eup %9837 }
 0x3fb   :  { %v773_v10 = vmul.f32 %v9838_v9, %v10295_v26 }
 0x3fd   :  { %1206 = vst.msk [vmem:[%s10315_s26 + $0x38] sm:$0xff] %vm280_vm2, %v773_v10  ;;  %v781_v12 = vpack.c.bf16 %v773_v10, %v773_v10 }
 0x414   :  { %v748_v20 = vpop.xlane.xlu0 %747 }
 0x415   :  { %9839 = vrcp.f32 %v748_v20 }
 0x418   :  { %v754_v21 = vpop.xlane.xlu0 %753 }
 0x419   :  { %9841 = vrcp.f32 %v754_v21 }
 0x41c   :  { %v1120_v57 = vpop.permute.xlu0 %1119 }
 0x41d   :  { %v1125_v2 = vsel %vm787_vm3, %v1120_v57, 0 }
 0x41e   :  { %8821 = vmatpush3.bf16.msra.mxu0 %v1125_v2 }
 0x41f   :  { %v9840_v11 = vpop.eup %9839  ;;  %8834 = vmatprep.subr.bf16.mxu0 %v10067_v0 }
 0x420   :  { %v770_v13 = vmul.f32 %v9840_v11, %v10304_v41 }
 0x421   :  { %8823 = vmatmul.mubr.msk.bf16.vlgmr.msra.gmra.mrb[32].mxu0 %vm280_vm2, %v781_v12  ;;  %v8160_v12 = vld [vmem:[%s10402_s7] ss:$0 sm:$0xff] }
 0x422   :  { %1203 = vst.msk [vmem:[%s10315_s26 + $0x20] sm:$0xff] %vm280_vm2, %v770_v13  ;;  %v778_v15 = vpack.c.bf16 %v770_v13, %v770_v13  ;;  %8838 = vmatprep.mubr.msk.bf16.mxu0 %vm10069_vm0, %v10067_v0 }
 0x423   :  { %v9842_v16 = vpop.eup %9841 }
 0x424   :  { %v772_v22 = vmul.f32 %v9842_v16, %v10308_v44  ;;  %8805 = vmatmul.mubr.msk.bf16.vlgmr.msra.gmra.mrb[24].mxu1 %vm280_vm2, %v778_v15 }
 0x425   :  { %8815 = vmatpush3.bf16.msra.mxu1 %v1077_v17  ;;  %8816 = vmatprep.mubr.msk.bf16.mxu1 %vm10069_vm0, %v10067_v0 }
 0x426   :  { %1205 = vst.msk [vmem:[%s10315_s26 + $0x30] sm:$0xff] %vm280_vm2, %v772_v22  ;;  %8826 = vmatprep.subr.bf16.mxu1 %v10067_v0  ;;  %v780_v28 = vpack.c.bf16 %v772_v22, %v772_v22 }
 0x42c   :  { %8817 = vmatmul.mubr.msk.bf16.vlgmr.msra.gmra.mrb[28].mxu1 %vm280_vm2, %v780_v28 }
 0x42d   :  { %8830 = vmatprep.mubr.msk.bf16.mxu1 %vm10069_vm0, %v10067_v0  ;;  %8827 = vmatpush3.bf16.msra.mxu1 %v9759_v40 }
 0x42e   :  { %8828 = vmatprep.subr.bf16.mxu1 %v10067_v0 }
 0x431   :  { %8829 = vmatpush3.bf16.msra.mxu1 %v9760_v50  ;;  %v8165_v50 = vld [vmem:[%s10437_s5] ss:$0 sm:$0xff] }
 0x432   :  { %8842 = vmatprep.subr.bf16.mxu1 %v10067_v0 }
 0x469   :  { %v825_v23 = vpop.f32.mrb[16].mxu1 }
 0x46a   :  { %v873_v18 = vpop.f32.mrb[20].mxu0  ;;  %v8782_v19 = vpop.f32.mrb[17].mxu1 }
 0x46b   :  { %v8788_v24 = vpop.f32.mrb[21].mxu0  ;;  %v828_v25 = vpop.f32.mrb[18].mxu1 }
 0x46c   :  { %v876_v26 = vpop.f32.mrb[22].mxu0  ;;  %v8783_v27 = vpop.f32.mrb[19].mxu1 }
 0x46d   :  { %v8789_v30 = vpop.f32.mrb[23].mxu0 }
 0x4c2   :  { %v921_v31 = vpop.f32.mrb[20].mxu1 }
 0x4c3   :  { %v969_v32 = vpop.f32.mrb[24].mxu0  ;;  %v8794_v35 = vpop.f32.mrb[21].mxu1 }
 0x4c4   :  { %v9562_v36 = vpack.i.bf16 %v969_v32, %v921_v31  ;;  %v8800_v37 = vpop.f32.mrb[25].mxu0  ;;  %v924_v38 = vpop.f32.mrb[22].mxu1 }
 0x4c5   :  { %v972_v39 = vpop.f32.mrb[26].mxu0  ;;  %v8795_v41 = vpop.f32.mrb[23].mxu1  ;;  %v9762_v37 = vld [vmem:[%s10414_s11 + $0x8] sm:$0xff]   ;;  %v9763_v38 = vld [vmem:[%s10423_s21] sm:$0xff]  }
 0x4c6   :  { %9563 = vrot.lane.b32.xlu1 %v9562_v36, %s12012_s27  ;;  %v8801_v42 = vpop.f32.mrb[27].mxu0  ;;  %v9764_v39 = vld [vmem:[%s10423_s21 + $0x8] sm:$0xff]  }
 0x4cb   :  { %v1065_v43 = vpop.f32.mrb[28].mxu0 }
 0x4cc   :  { %v8812_v29 = vpop.f32.mrb[29].mxu0 }
 0x4cd   :  { %v1068_v44 = vpop.f32.mrb[30].mxu0 }
 0x4ce   :  { %v8813_v33 = vpop.f32.mrb[31].mxu0 }
 0x4f4   :  { %v1161_v45 = vpop.f32.mrb[32].mxu0 }
 0x4f5   :  { %v8824_v46 = vpop.f32.mrb[33].mxu0 }
 0x4f6   :  { %v1164_v47 = vpop.f32.mrb[34].mxu0  ;;  %v8164_v46 = vld [vmem:[%s10432_s28] ss:$0 sm:$0xff] }
 0x4f7   :  { %v1017_v48 = vpop.f32.mrb[24].mxu1  ;;  %v8825_v49 = vpop.f32.mrb[35].mxu0 }
 0x4f8   :  { %v9567_v51 = vpack.i.bf16 %v1065_v43, %v1017_v48  ;;  %v8806_v52 = vpop.f32.mrb[25].mxu1 }
 0x4f9   :  { %v1020_v53 = vpop.f32.mrb[26].mxu1 }
 0x4fa   :  { %v8807_v54 = vpop.f32.mrb[27].mxu1  ;;  %9568 = vrot.lane.b32.xlu0 %v9567_v51, %s12010_s2 }
 0x4ff   :  { %v1113_v55 = vpop.f32.mrb[28].mxu1 }
 0x500   :  { %v9572_v56 = vpack.i.bf16 %v1161_v45, %v1113_v55  ;;  %v8818_v58 = vpop.f32.mrb[29].mxu1  ;;  %v9765_v55 = vld [vmem:[%s10423_s21 + $0x10] sm:$0xff]  }
 0x501   :  { %v1116_v59 = vpop.f32.mrb[30].mxu1  ;;  %v8166_v58 = vld [vmem:[%s10451_s12] ss:$0 sm:$0xff] }
 0x502   :  { %v8819_v60 = vpop.f32.mrb[31].mxu1  ;;  %9573 = vrot.lane.b32.xlu1 %v9572_v56, %s12008_s3  ;;  %v9766_v56 = vld [vmem:[%s10423_s21 + $0x18] sm:$0xff]  }
 0x538   :  { %v9564_v61 = vpop.permute.xlu1 %9563 }
 0x539   :  { %v9566_v34 = vunpack.i.h.bf16 %v9564_v61  ;;  %v9565_v63 = vunpack.i.l.bf16 %v9564_v61 }
 0x53b   :  { %v1192_v7 = vsel %vm280_vm2, %v873_v18, %v9566_v34  ;;  %v1191_v8 = vsel %vm280_vm2, %v825_v23, %v9565_v63 }
 0x56c   :  { %v9569_v62 = vpop.permute.xlu0 %9568 }
 0x56d   :  { %v9571_v1 = vunpack.i.h.bf16 %v9569_v62  ;;  %v9570_v5 = vunpack.i.l.bf16 %v9569_v62 }
 0x56f   :  { %v1195_v20 = vsel %vm1193_vm4, %v1192_v7, %v9571_v1  ;;  %v1194_v21 = vsel %vm1193_vm4, %v1191_v8, %v9570_v5  ;;  %v8170_v7 = vld [vmem:[%s10460_s24] ss:$0 sm:$0xff] }
 0x574   :  { %v9574_v6 = vpop.permute.xlu1 %9573 }
 0x575   :  { %v9576_v9 = vunpack.i.h.bf16 %v9574_v6  ;;  %v9575_v10 = vunpack.i.l.bf16 %v9574_v6 }
 0x577   :  { %v1198_v57 = vsel %vm1196_vm5, %v1195_v20, %v9576_v9  ;;  %v1197_v2 = vsel %vm1196_vm5, %v1194_v21, %v9575_v10 }
 0x578   :  { %v1211_v11 = vpack.c.bf16 %v1198_v57, %v1197_v2 }
 0x57a   :  { %8831 = vmatmul.mubr.msk.bf16.vlgmr.msra.gmra.mrb[32].mxu1 %vm204_vm1, %v1211_v11 }
 0x57b   :  { %8850 = vmatprep.mubr.msk.bf16.mxu1 %vm10069_vm0, %v10067_v0  ;;  %8843 = vmatpush3.bf16.msra.mxu1 %v9763_v38 }
 0x57c   :  { %8844 = vmatprep.subr.bf16.mxu1 %v10067_v0 }
 0x57f   :  { %8845 = vmatpush3.bf16.msra.mxu1 %v9764_v39 }
 0x580   :  { %8846 = vmatprep.subr.bf16.mxu1 %v10067_v0 }
 0x583   :  { %8847 = vmatpush3.bf16.msra.mxu1 %v9765_v55 }
 0x584   :  { %8848 = vmatprep.subr.bf16.mxu1 %v10067_v0 }
 0x587   :  { %8849 = vmatpush3.bf16.msra.mxu1 %v9766_v56 }
 0x588   :  { %8868 = vmatprep.subr.bf16.mxu1 %v10067_v0 }
 0x64d   :  { %v1268_v13 = vpop.f32.mrb[32].mxu1 }
 0x64e   :  { %v1269_v14 = vadd.f32 %v8160_v12, %v1268_v13  ;;  %v8832_v15 = vpop.f32.mrb[33].mxu1 }
 0x64f   :  { %v1271_v16 = vpop.f32.mrb[34].mxu1 }
 0x650   :  { %v1272_v17 = vadd.f32 %v8160_v12, %v1271_v16  ;;  %v8833_v22 = vpop.f32.mrb[35].mxu1  ;;  %v1275_v28 = vadd.f32 %v1269_v14, %v10137_v3 }
 0x652   :  { %v1279_v23 = vsel %vm204_vm1, %v1275_v28, 0.0  ;;  %v1276_v18 = vadd.f32 %v1272_v17, %v10139_v4  ;;  %v9761_v4 = vld [vmem:[%s10414_s11] sm:$0xff]  }
 0x653   :  { %1280 = vadd.xlane.f32.xlu0 %v1279_v23  ;;  %8835 = vmatpush3.bf16.msra.mxu0 %v9761_v4  ;;  %v8176_v4 = vld [vmem:[%s10474_s4] ss:$0 sm:$0xff] }
 0x654   :  { %v1282_v19 = vsel %vm204_vm1, %v1276_v18, 0.0  ;;  %8836 = vmatprep.subr.bf16.mxu0 %v10067_v0 }
 0x655   :  { %1283 = vadd.xlane.f32.xlu1 %v1282_v19 }
 0x657   :  { %8837 = vmatpush3.bf16.msra.mxu0 %v9762_v37 }
 0x658   :  { %8854 = vmatprep.subr.bf16.mxu0 %v10067_v0 }
 0x6e0   :  { %v1281_v24 = vpop.xlane.xlu0 %1280 }
 0x6e1   :  { %v1286_v25 = vmul.f32 0.03125, %v1281_v24 }
 0x6e2   :  { %v1284_v26 = vpop.xlane.xlu1 %1283 }
 0x6e3   :  { %v1288_v27 = vsub.f32 %v1275_v28, %v1286_v25  ;;  %v1287_v30 = vmul.f32 0.03125, %v1284_v26  ;;  %v9767_v25 = vld [vmem:[%s10125_s6 + $0x10] sm:$0xff]   ;;  %v9768_v26 = vld [vmem:[%s10125_s6 + $0x18] sm:$0xff]  }
 0x6e5   :  { %v1289_v31 = vsub.f32 %v1276_v18, %v1287_v30  ;;  %v1290_v32 = vmul.f32 %v1288_v27, %v1288_v27 }
 0x6e7   :  { %v1292_v35 = vsel %vm204_vm1, %v1290_v32, 0.0  ;;  %v1291_v36 = vmul.f32 %v1289_v31, %v1289_v31 }
 0x6e8   :  { %1293 = vadd.xlane.f32.xlu0 %v1292_v35 }
 0x6e9   :  { %v1295_v3 = vsel %vm204_vm1, %v1291_v36, 0.0 }
 0x6ec   :  { %1296 = vadd.xlane.f32.xlu0 %v1295_v3 }
 0x775   :  { %v1294_v41 = vpop.xlane.xlu0 %1293 }
 0x776   :  { %v1298_v42 = vmul.f32 0.03125, %v1294_v41 }
 0x778   :  { %v1300_v43 = vadd.f32 1e-12, %v1298_v42  ;;  %v8177_v42 = vld [vmem:[%s10480_s9] ss:$0 sm:$0xff] }
 0x779   :  { %v1297_v29 = vpop.xlane.xlu0 %1296 }
 0x77a   :  { %9843 = vrsqrt.f32 %v1300_v43  ;;  %v1299_v44 = vmul.f32 0.03125, %v1297_v29 }
 0x77c   :  { %v1301_v33 = vadd.f32 1e-12, %v1299_v44 }
 0x77e   :  { %9845 = vrsqrt.f32 %v1301_v33 }
 0x784   :  { %v9844_v40 = vpop.eup %9843 }
 0x785   :  { %v1304_v45 = vmul.f32 %v9844_v40, %v1288_v27  ;;  %v8183_v40 = vld [vmem:[%s10151_s13 + $0x1] ss:$0 sm:$0xff]  ;;  %s10089_s13 = smov 17  }
 0x787   :  { %v1312_v48 = vmul.f32 %v8164_v46, %v1304_v45 }
 0x788   :  { %v9846_v47 = vpop.eup %9845 }
 0x789   :  { %v1305_v49 = vmul.f32 %v9846_v47, %v1289_v31  ;;  %v1320_v52 = vadd.f32 %v8165_v50, %v1312_v48 }
 0x78b   :  { %v1313_v51 = vmul.f32 %v8164_v46, %v1305_v49 }
 0x78d   :  { %v1321_v53 = vadd.f32 %v8165_v50, %v1313_v51 }
 0x78f   :  { %v1326_v54 = vpack.c.bf16 %v1321_v53, %v1320_v52 }
 0x791   :  { %8839 = vmatmul.mubr.msk.bf16.vlgmr.msra.gmra.mrb[36].mxu0 %vm204_vm1, %v1326_v54 }
 0x792   :  { %8858 = vmatprep.mubr.msk.bf16.mxu0 %vm10069_vm0, %v10067_v0  ;;  %8855 = vmatpush3.bf16.msra.mxu0 %v9767_v25 }
 0x793   :  { %8856 = vmatprep.subr.bf16.mxu0 %v10067_v0 }
 0x796   :  { %8857 = vmatpush3.bf16.msra.mxu0 %v9768_v26 }
 0x797   :  { %8862 = vmatprep.subr.bf16.mxu0 %v10067_v0 }
 0x864   :  { %v1383_v59 = vpop.f32.mrb[36].mxu0 }
 0x865   :  { %v1384_v60 = vadd.f32 %v8166_v58, %v1383_v59  ;;  %v8840_v61 = vpop.f32.mrb[37].mxu0 }
 0x866   :  { %v1386_v62 = vpop.f32.mrb[38].mxu0 }
 0x867   :  { %v1387_v34 = vadd.f32 %v8166_v58, %v1386_v62  ;;  %v8841_v63 = vpop.f32.mrb[39].mxu0  ;;  %v1390_v1 = vmax.f32 %v1384_v60, 0.0 }
 0x869   :  { %v1391_v5 = vmax.f32 %v1387_v34, 0.0 }
 0x86b   :  { %v1400_v6 = vpack.c.bf16 %v1391_v5, %v1390_v1 }
 0x86d   :  { %8851 = vmatmul.mubr.msk.bf16.vlgmr.msra.gmra.mrb[36].mxu1 %vm1432_vm6, %v1400_v6 }
 0x86e   :  { %8870 = vmatprep.mubr.msk.bf16.mxu1 %vm10069_vm0, %v10067_v0 }
 0x940   :  { %v1470_v8 = vpop.f32.mrb[36].mxu1 }
 0x941   :  { %v1471_v9 = vadd.f32 %v8170_v7, %v1470_v8  ;;  %v8852_v10 = vpop.f32.mrb[37].mxu1 }
 0x942   :  { %v1473_v20 = vpop.f32.mrb[38].mxu1 }
 0x943   :  { %v1474_v21 = vadd.f32 %v8170_v7, %v1473_v20  ;;  %v8853_v57 = vpop.f32.mrb[39].mxu1  ;;  %v1477_v2 = vadd.f32 %v1471_v9, %v1320_v52 }
 0x945   :  { %v1481_v11 = vsel %vm204_vm1, %v1477_v2, 0.0  ;;  %v1478_v12 = vadd.f32 %v1474_v21, %v1321_v53 }
 0x946   :  { %1482 = vadd.xlane.f32.xlu1 %v1481_v11 }
 0x947   :  { %v1484_v13 = vsel %vm204_vm1, %v1478_v12, 0.0 }
 0x948   :  { %1485 = vadd.xlane.f32.xlu0 %v1484_v13 }
 0x9d3   :  { %v1483_v14 = vpop.xlane.xlu1 %1482 }
 0x9d4   :  { %v1487_v15 = vmul.f32 0.03125, %v1483_v14 }
 0x9d5   :  { %v1486_v16 = vpop.xlane.xlu0 %1485 }
 0x9d6   :  { %v1489_v17 = vsub.f32 %v1477_v2, %v1487_v15  ;;  %v1488_v22 = vmul.f32 0.03125, %v1486_v16 }
 0x9d8   :  { %v1490_v28 = vsub.f32 %v1478_v12, %v1488_v22  ;;  %v1491_v23 = vmul.f32 %v1489_v17, %v1489_v17 }
 0x9da   :  { %v1493_v18 = vsel %vm204_vm1, %v1491_v23, 0.0  ;;  %v1492_v19 = vmul.f32 %v1490_v28, %v1490_v28 }
 0x9db   :  { %1494 = vadd.xlane.f32.xlu1 %v1493_v18 }
 0x9dc   :  { %v1496_v24 = vsel %vm204_vm1, %v1492_v19, 0.0 }
 0x9dd   :  { %1497 = vadd.xlane.f32.xlu0 %v1496_v24 }
 0xa68   :  { %v1495_v27 = vpop.xlane.xlu1 %1494 }
 0xa69   :  { %v1499_v30 = vmul.f32 0.03125, %v1495_v27 }
 0xa6a   :  { %v1498_v31 = vpop.xlane.xlu0 %1497 }
 0xa6b   :  { %v1501_v32 = vadd.f32 1e-12, %v1499_v30  ;;  %v1500_v35 = vmul.f32 0.03125, %v1498_v31 }
 0xa6d   :  { %9847 = vrsqrt.f32 %v1501_v32  ;;  %v1502_v36 = vadd.f32 1e-12, %v1500_v35 }
 0xa6f   :  { %9849 = vrsqrt.f32 %v1502_v36  ;;  %v10043_v36 = vld [vmem:[%s10238_s22 + $0x8] sm:$0xff] }
 0xa77   :  { %v9848_v3 = vpop.eup %9847 }
 0xa78   :  { %v1505_v37 = vmul.f32 %v9848_v3, %v1489_v17 }
 0xa79   :  { %v9850_v38 = vpop.eup %9849 }
 0xa7a   :  { %v1513_v39 = vmul.f32 %v8176_v4, %v1505_v37  ;;  %v1506_v41 = vmul.f32 %v9850_v38, %v1490_v28 }
 0xa7c   :  { %v1514_v43 = vmul.f32 %v8176_v4, %v1506_v41  ;;  %v10484_v29 = vadd.f32 %v8177_v42, %v1513_v39 }
 0xa7e   :  { %v10486_v44 = vadd.f32 %v8177_v42, %v1514_v43  ;;  %v10044_v42 = vld [vmem:[%s10238_s22] sm:$0xff] }
 0xa80   :  { %v1528_v33 = vpack.c.bf16 %v10486_v44, %v10484_v29 }
 0xa82   :  { %8859 = vmatmul.mubr.msk.bf16.vlgmr.msra.gmra.mrb[40].mxu0 %vm204_vm1, %v1528_v33 }
 0xa83   :  { %8864 = vmatprep.mubr.msk.bf16.mxu0 %vm10069_vm0, %v10067_v0 }
 0xb55   :  { %v1586_v45 = vpop.f32.mrb[40].mxu0 }
 0xb56   :  { %v8860_v46 = vpop.f32.mrb[41].mxu0  ;;  %v1587_v48 = vadd.f32 %v8183_v40, %v1586_v45 }
 0xb57   :  { %v1589_v47 = vpop.f32.mrb[42].mxu0 }
 0xb58   :  { %v1590_v49 = vadd.f32 %v8183_v40, %v1589_v47  ;;  %v8861_v50 = vpop.f32.mrb[43].mxu0  ;;  %v1613_v53 = vpack.c.bf16 %v1587_v48, %v1587_v48 }
 0xb5a   :  { %v9582_v51 = vpack.i.bf16 %v1590_v49, %v1587_v48  ;;  %v1614_v52 = vpack.c.bf16 %v1590_v49, %v1590_v49 }
 0xb5c   :  { %9583 = vrot.lane.b32.xlu0 %v9582_v51, %s10074_s17  ;;  %9578 = vrot.lane.b32.xlu1 %v9582_v51, %s12020_s15 }
 0xb60   :  { %9588 = vrot.lane.b32.xlu1 %v9582_v51, %s12018_s14  ;;  %1671 = vrot.lane.b32.xlu0 %v1614_v52, %s12016_s16 }
 0xb64   :  { %1622 = vrot.lane.b32.xlu1 %v1613_v53, %s12016_s16 }
 0xbce   :  { %v9584_v54 = vpop.permute.xlu0 %9583  ;;  %v9579_v55 = vpop.permute.xlu1 %9578 }
 0xbcf   :  { %v9581_v56 = vunpack.i.h.bf16 %v9579_v55  ;;  %v9580_v58 = vunpack.i.l.bf16 %v9579_v55  ;;  %v9586_v59 = vunpack.i.h.bf16 %v9584_v54  ;;  %v9585_v60 = vunpack.i.l.bf16 %v9584_v54  ;;  %v10045_v54 = vld [vmem:[%s10238_s22 + $0x18] sm:$0xff] }
 0xbd1   :  { %v10499_v61 = vpack.c.bf16 %v9580_v58, %v9580_v58  ;;  %v10501_v62 = vpack.c.bf16 %v9581_v56, %v9581_v56  ;;  %v10508_v7 = vpack.c.bf16 %v9585_v60, %v9585_v60  ;;  %v10510_v8 = vpack.c.bf16 %v9586_v59, %v9586_v59  ;;  %v10046_v56 = vld [vmem:[%s10238_s22 + $0x10] sm:$0xff] }
 0xbd2   :  { %v9589_v34 = vpop.permute.xlu1 %9588  ;;  %v1672_v63 = vpop.permute.xlu0 %1671 }
 0xbd3   :  { %v1677_v1 = vsel %vm280_vm2, %v1672_v63, 0  ;;  %1720 = vrot.lane.b32.xlu1 %v10499_v61, %s12016_s16  ;;  %1769 = vrot.lane.b32.xlu0 %v10501_v62, %s12016_s16  ;;  %v9591_v5 = vunpack.i.h.bf16 %v9589_v34  ;;  %v9590_v6 = vunpack.i.l.bf16 %v9589_v34 }
 0xbd4   :  { %8869 = vmatpush3.bf16.xpose.msra.mxu1 %v1677_v1 }
 0xbd5   :  { %8880 = vmatprep.subr.bf16.mxu1 %v10067_v0  ;;  %v10518_v20 = vpack.c.bf16 %v9590_v6, %v9590_v6  ;;  %v10520_v21 = vpack.c.bf16 %v9591_v5, %v9591_v5 }
 0xbd6   :  { %v1623_v9 = vpop.permute.xlu1 %1622 }
 0xbd7   :  { %v1628_v10 = vsel %vm280_vm2, %v1623_v9, 0  ;;  %1818 = vrot.lane.b32.xlu1 %v10508_v7, %s12016_s16  ;;  %1867 = vrot.lane.b32.xlu0 %v10510_v8, %s12016_s16 }
 0xbd8   :  { %8863 = vmatpush3.bf16.xpose.msra.mxu0 %v1628_v10 }
 0xbd9   :  { %8874 = vmatprep.subr.bf16.mxu0 %v10067_v0 }
 0xbdb   :  { %1916 = vrot.lane.b32.xlu1 %v10518_v20, %s12016_s16  ;;  %1965 = vrot.lane.b32.xlu0 %v10520_v21, %s12016_s16 }
 0xbdc   :  { %8871 = vmatmul.mubr.msk.bf16.vlgmr.msra.gmra.mrb[40].mxu1 %vm280_vm2, %v1614_v52 }
 0xbdd   :  { %8882 = vmatprep.mubr.msk.bf16.mxu1 %vm10069_vm0, %v10067_v0 }
 0xbdf   :  { %8865 = vmatmul.mubr.msk.bf16.vlgmr.msra.gmra.mrb[44].mxu0 %vm280_vm2, %v1613_v53  ;;  %2173 = vrot.lane.b32.xlu1 %v1614_v52, %s12014_s18 }
 0xbe0   :  { %2125 = vrot.lane.b32.xlu0 %v1613_v53, %s12014_s18  ;;  %8876 = vmatprep.mubr.msk.bf16.mxu0 %vm10069_vm0, %v10067_v0 }
 0xc45   :  { %v1721_v57 = vpop.permute.xlu1 %1720  ;;  %v1770_v2 = vpop.permute.xlu0 %1769 }
 0xc46   :  { %v1726_v11 = vsel %vm280_vm2, %v1721_v57, 0  ;;  %v1775_v12 = vsel %vm280_vm2, %v1770_v2, 0 }
 0xc47   :  { %8875 = vmatpush3.bf16.xpose.msra.mxu0 %v1726_v11  ;;  %8881 = vmatpush3.bf16.xpose.msra.mxu1 %v1775_v12  ;;  %v10047_v12 = vld [vmem:[%s10238_s22 + $0x28] sm:$0xff] }
 0xc48   :  { %8886 = vmatprep.subr.bf16.mxu0 %v10067_v0  ;;  %8892 = vmatprep.subr.bf16.mxu1 %v10067_v0 }
 0xc49   :  { %v1819_v13 = vpop.permute.xlu1 %1818  ;;  %v1868_v14 = vpop.permute.xlu0 %1867 }
 0xc4a   :  { %v1824_v15 = vsel %vm280_vm2, %v1819_v13, 0  ;;  %v1873_v16 = vsel %vm280_vm2, %v1868_v14, 0  ;;  %v10048_v14 = vld [vmem:[%s10238_s22 + $0x20] sm:$0xff] }
 0xc4d   :  { %v1917_v17 = vpop.permute.xlu1 %1916  ;;  %v1966_v22 = vpop.permute.xlu0 %1965 }
 0xc4e   :  { %8877 = vmatmul.mubr.msk.bf16.vlgmr.msra.gmra.mrb[48].mxu0 %vm280_vm2, %v10499_v61  ;;  %8883 = vmatmul.mubr.msk.bf16.vlgmr.msra.gmra.mrb[44].mxu1 %vm280_vm2, %v10501_v62  ;;  %v1922_v28 = vsel %vm280_vm2, %v1917_v17, 0  ;;  %v1971_v23 = vsel %vm280_vm2, %v1966_v22, 0 }
 0xc4f   :  { %8887 = vmatpush3.bf16.xpose.msra.mxu0 %v1824_v15  ;;  %8893 = vmatpush3.bf16.xpose.msra.mxu1 %v1873_v16 }
 0xc50   :  { %8888 = vmatprep.mubr.msk.bf16.mxu0 %vm10069_vm0, %v10067_v0  ;;  %8894 = vmatprep.mubr.msk.bf16.mxu1 %vm10069_vm0, %v10067_v0 }
 0xc51   :  { %8898 = vmatprep.subr.bf16.mxu0 %v10067_v0  ;;  %8904 = vmatprep.subr.bf16.mxu1 %v10067_v0  ;;  %v2174_v18 = vpop.permute.xlu1 %2173 }
 0xc52   :  { %v2126_v19 = vpop.permute.xlu0 %2125  ;;  %v2179_v24 = vsel %vm787_vm3, %v2174_v18, 0 }
 0xc53   :  { %v2131_v25 = vsel %vm787_vm3, %v2126_v19, 0 }
 0xc56   :  { %8889 = vmatmul.mubr.msk.bf16.vlgmr.msra.gmra.mrb[52].mxu0 %vm280_vm2, %v10508_v7  ;;  %8895 = vmatmul.mubr.msk.bf16.vlgmr.msra.gmra.mrb[48].mxu1 %vm280_vm2, %v10510_v8 }
 0xc57   :  { %8899 = vmatpush3.bf16.xpose.msra.mxu0 %v1922_v28  ;;  %8905 = vmatpush3.bf16.xpose.msra.mxu1 %v1971_v23 }
 0xc58   :  { %8900 = vmatprep.mubr.msk.bf16.mxu0 %vm10069_vm0, %v10067_v0  ;;  %8906 = vmatprep.mubr.msk.bf16.mxu1 %vm10069_vm0, %v10067_v0 }
 0xc59   :  { %8910 = vmatprep.subr.bf16.mxu0 %v10067_v0  ;;  %8916 = vmatprep.subr.bf16.mxu1 %v10067_v0 }
 0xc5e   :  { %8901 = vmatmul.mubr.msk.bf16.vlgmr.msra.gmra.mrb[56].mxu0 %vm280_vm2, %v10518_v20  ;;  %8907 = vmatmul.mubr.msk.bf16.vlgmr.msra.gmra.mrb[52].mxu1 %vm280_vm2, %v10520_v21 }
 0xc5f   :  { %8911 = vmatpush3.bf16.msra.mxu0 %v2131_v25  ;;  %8917 = vmatpush3.bf16.msra.mxu1 %v2179_v24 }
 0xc60   :  { %8912 = vmatprep.mubr.msk.bf16.mxu0 %vm10069_vm0, %v10067_v0  ;;  %8918 = vmatprep.mubr.msk.bf16.mxu1 %vm10069_vm0, %v10067_v0 }
 0xc61   :  { %8922 = vmatprep.subr.bf16.mxu0 %v10067_v0  ;;  %8928 = vmatprep.subr.bf16.mxu1 %v10067_v0 }
 0xcaf   :  { %v1713_v26 = vpop.f32.mrb[40].mxu1 }
 0xcb0   :  { %v2014_v27 = vmul.f32 0.35355338, %v1713_v26  ;;  %v8872_v30 = vpop.f32.mrb[41].mxu1 }
 0xcb1   :  { %v1716_v31 = vpop.f32.mrb[42].mxu1 }
 0xcb2   :  { %v8873_v32 = vpop.f32.mrb[43].mxu1  ;;  %v1664_v35 = vpop.f32.mrb[44].mxu0  ;;  %v10576_v3 = vadd.f32 %v10043_v36, %v2014_v27  ;;  %v10049_v31 = vld [vmem:[%s10238_s22 + $0x38] sm:$0xff] }
 0xcb3   :  { %v2013_v4 = vmul.f32 0.35355338, %v1664_v35  ;;  %v8866_v37 = vpop.f32.mrb[45].mxu0  ;;  %v10050_v35 = vld [vmem:[%s10238_s22 + $0x30] sm:$0xff]  ;;  %s10094_s22 = smov 19  }
 0xcb4   :  { %v2032_v38 = vsel %vm280_vm2, %v10576_v3, -inf  ;;  %v1667_v39 = vpop.f32.mrb[46].mxu0 }
 0xcb5   :  { %2033 = vmax.xlane.f32.xlu0 %v2032_v38  ;;  %v8867_v41 = vpop.f32.mrb[47].mxu0  ;;  %v10581_v43 = vadd.f32 %v10044_v42, %v2013_v4 }
 0xcb7   :  { %v2029_v33 = vsel %vm280_vm2, %v10581_v43, -inf }
 0xcb8   :  { %2030 = vmax.xlane.f32.xlu1 %v2029_v33 }
 0xd21   :  { %v1762_v40 = vpop.f32.mrb[48].mxu0  ;;  %v1811_v45 = vpop.f32.mrb[44].mxu1 }
 0xd22   :  { %v2015_v46 = vmul.f32 0.35355338, %v1762_v40  ;;  %v2016_v47 = vmul.f32 0.35355338, %v1811_v45  ;;  %v8878_v48 = vpop.f32.mrb[49].mxu0  ;;  %v8884_v49 = vpop.f32.mrb[45].mxu1 }
 0xd23   :  { %v1765_v50 = vpop.f32.mrb[50].mxu0  ;;  %v1814_v51 = vpop.f32.mrb[46].mxu1 }
 0xd24   :  { %v8879_v52 = vpop.f32.mrb[51].mxu0  ;;  %v8885_v53 = vpop.f32.mrb[47].mxu1  ;;  %v10586_v55 = vadd.f32 %v10045_v54, %v2016_v47  ;;  %v10589_v58 = vadd.f32 %v10046_v56, %v2015_v46 }
 0xd26   :  { %v2038_v59 = vsel %vm280_vm2, %v10586_v55, -inf  ;;  %v2035_v60 = vsel %vm280_vm2, %v10589_v58, -inf }
 0xd27   :  { %2039 = vmax.xlane.f32.xlu1 %v2038_v59  ;;  %2036 = vmax.xlane.f32.xlu0 %v2035_v60 }
 0xd29   :  { %v1860_v34 = vpop.f32.mrb[52].mxu0  ;;  %v1909_v63 = vpop.f32.mrb[48].mxu1 }
 0xd2a   :  { %v2017_v1 = vmul.f32 0.35355338, %v1860_v34  ;;  %v2018_v5 = vmul.f32 0.35355338, %v1909_v63  ;;  %v8890_v6 = vpop.f32.mrb[53].mxu0  ;;  %v8896_v9 = vpop.f32.mrb[49].mxu1 }
 0xd2b   :  { %v1863_v10 = vpop.f32.mrb[54].mxu0  ;;  %v1912_v57 = vpop.f32.mrb[50].mxu1 }
 0xd2c   :  { %v8891_v2 = vpop.f32.mrb[55].mxu0  ;;  %v8897_v11 = vpop.f32.mrb[51].mxu1  ;;  %v2026_v13 = vadd.f32 %v10047_v12, %v2018_v5  ;;  %v10597_v15 = vadd.f32 %v10048_v14, %v2017_v1 }
 0xd2e   :  { %v2044_v16 = vsel %vm280_vm2, %v2026_v13, -inf  ;;  %v2041_v17 = vsel %vm280_vm2, %v10597_v15, -inf }
 0xd2f   :  { %2045 = vmax.xlane.f32.xlu1 %v2044_v16  ;;  %2042 = vmax.xlane.f32.xlu0 %v2041_v17 }
 0xd31   :  { %v1958_v22 = vpop.f32.mrb[56].mxu0  ;;  %v2007_v28 = vpop.f32.mrb[52].mxu1 }
 0xd32   :  { %v2019_v23 = vmul.f32 0.35355338, %v1958_v22  ;;  %v2020_v18 = vmul.f32 0.35355338, %v2007_v28  ;;  %v8902_v19 = vpop.f32.mrb[57].mxu0  ;;  %v8908_v24 = vpop.f32.mrb[53].mxu1 }
 0xd33   :  { %v1961_v25 = vpop.f32.mrb[58].mxu0  ;;  %v2010_v26 = vpop.f32.mrb[54].mxu1 }
 0xd34   :  { %v8903_v27 = vpop.f32.mrb[59].mxu0  ;;  %v8909_v30 = vpop.f32.mrb[55].mxu1  ;;  %v2028_v32 = vadd.f32 %v10049_v31, %v2020_v18  ;;  %v2027_v36 = vadd.f32 %v10050_v35, %v2019_v23 }
 0xd36   :  { %v2050_v4 = vsel %vm280_vm2, %v2028_v32, -inf  ;;  %v2047_v37 = vsel %vm280_vm2, %v2027_v36, -inf }
 0xd37   :  { %2051 = vmax.xlane.f32.xlu1 %v2050_v4  ;;  %2048 = vmax.xlane.f32.xlu0 %v2047_v37 }
 0xd42   :  { %v2034_v38 = vpop.xlane.xlu0 %2033 }
 0xd43   :  { %v2054_v41 = vsub.f32 %v10576_v3, %v2034_v38 }
 0xd45   :  { %v2031_v39 = vpop.xlane.xlu1 %2030  ;;  %v2063_v33 = vmul.f32 1.442695, %v2054_v41 }
 0xd46   :  { %v2053_v42 = vsub.f32 %v10581_v43, %v2031_v39 }
 0xd47   :  { %9851 = vpow2.f32 %v2063_v33 }
 0xd48   :  { %2221 = vrot.lane.b32.xlu1 %v10499_v61, %s12014_s18  ;;  %v2061_v40 = vmul.f32 1.442695, %v2053_v42 }
 0xd4a   :  { %9853 = vpow2.f32 %v2061_v40 }
 0xd4d   :  { %2269 = vrot.lane.b32.xlu0 %v10501_v62, %s12014_s18 }
 0xd51   :  { %v9852_v45 = vpop.eup %9851 }
 0xd52   :  { %v2080_v47 = vsel %vm280_vm2, %v9852_v45, 0.0 }
 0xd54   :  { %v9854_v46 = vpop.eup %9853 }
 0xd55   :  { %v2077_v48 = vsel %vm280_vm2, %v9854_v46, 0.0 }
 0xd6c   :  { %2081 = vadd.xlane.f32.xlu1 %v2080_v47  ;;  %2078 = vadd.xlane.f32.xlu0 %v2077_v48 }
 0xd7d   :  { %2317 = vrot.lane.b32.xlu1 %v10508_v7, %s12014_s18 }
 0xdb4   :  { %v2040_v61 = vpop.xlane.xlu1 %2039  ;;  %v2037_v62 = vpop.xlane.xlu0 %2036 }
 0xdb5   :  { %v2056_v3 = vsub.f32 %v10586_v55, %v2040_v61  ;;  %v2055_v43 = vsub.f32 %v10589_v58, %v2037_v62 }
 0xdb7   :  { %v2067_v49 = vmul.f32 1.442695, %v2056_v3  ;;  %v2065_v50 = vmul.f32 1.442695, %v2055_v43 }
 0xdb9   :  { %9855 = vpow2.f32 %v2067_v49 }
 0xdba   :  { %9857 = vpow2.f32 %v2065_v50 }
 0xdbc   :  { %v2046_v51 = vpop.xlane.xlu1 %2045  ;;  %v2043_v6 = vpop.xlane.xlu0 %2042 }
 0xdbd   :  { %v2058_v52 = vsub.f32 %v2026_v13, %v2046_v51  ;;  %v2057_v9 = vsub.f32 %v10597_v15, %v2043_v6 }
 0xdbf   :  { %v2071_v53 = vmul.f32 1.442695, %v2058_v52  ;;  %v2069_v57 = vmul.f32 1.442695, %v2057_v9 }
 0xdc1   :  { %9859 = vpow2.f32 %v2071_v53 }
 0xdc3   :  { %v10618_v54 = vpop.eup %9855 }
 0xdc4   :  { %v10620_v56 = vpop.eup %9857  ;;  %v2052_v59 = vpop.xlane.xlu1 %2051  ;;  %v2086_v7 = vsel %vm280_vm2, %v10618_v54, 0.0 }
 0xdc5   :  { %v2060_v60 = vsub.f32 %v2028_v32, %v2052_v59  ;;  %2087 = vadd.xlane.f32.xlu1 %v2086_v7  ;;  %v2083_v55 = vsel %vm280_vm2, %v10620_v56, 0.0  ;;  %v2049_v10 = vpop.xlane.xlu0 %2048 }
 0xdc6   :  { %2084 = vadd.xlane.f32.xlu0 %v2083_v55  ;;  %v2059_v2 = vsub.f32 %v2027_v36, %v2049_v10 }
 0xdc7   :  { %v2075_v58 = vmul.f32 1.442695, %v2060_v60 }
 0xdc8   :  { %v2073_v11 = vmul.f32 1.442695, %v2059_v2  ;;  %v2222_v12 = vpop.permute.xlu1 %2221 }
 0xdc9   :  { %9861 = vpow2.f32 %v2075_v58  ;;  %v2270_v13 = vpop.permute.xlu0 %2269  ;;  %v2227_v26 = vsel %vm787_vm3, %v2222_v12, 0 }
 0xdca   :  { %9863 = vpow2.f32 %v2069_v57  ;;  %v2275_v25 = vsel %vm787_vm3, %v2270_v13, 0 }
 0xdcb   :  { %v10626_v34 = vpop.eup %9859  ;;  %9865 = vpow2.f32 %v2073_v11 }
 0xdcc   :  { %v2092_v63 = vsel %vm280_vm2, %v10626_v34, 0.0 }
 0xdcd   :  { %2093 = vadd.xlane.f32.xlu1 %v2092_v63 }
 0xdd3   :  { %v10630_v1 = vpop.eup %9861 }
 0xdd4   :  { %v2098_v5 = vsel %vm280_vm2, %v10630_v1, 0.0  ;;  %v10639_v14 = vpop.eup %9863 }
 0xdd5   :  { %2099 = vadd.xlane.f32.xlu1 %v2098_v5  ;;  %v2089_v15 = vsel %vm280_vm2, %v10639_v14, 0.0  ;;  %v10643_v17 = vpop.eup %9865 }
 0xddc   :  { %2365 = vrot.lane.b32.xlu0 %v10510_v8, %s12014_s18 }
 0xde6   :  { %2413 = vrot.lane.b32.xlu1 %v10518_v20, %s12014_s18  ;;  %v2095_v20 = vsel %vm280_vm2, %v10643_v17, 0.0 }
 0xdf9   :  { %v2082_v16 = vpop.xlane.xlu1 %2081  ;;  %v2079_v8 = vpop.xlane.xlu0 %2078 }
 0xdfa   :  { %9867 = vrcp.f32 %v2082_v16 }
 0xdfb   :  { %9869 = vrcp.f32 %v2079_v8  ;;  %2090 = vadd.xlane.f32.xlu0 %v2089_v15 }
 0xdfd   :  { %v2318_v27 = vpop.permute.xlu1 %2317 }
 0xdfe   :  { %v2323_v33 = vsel %vm787_vm3, %v2318_v27, 0 }
 0xdff   :  { %2096 = vadd.xlane.f32.xlu0 %v2095_v20 }
 0xe04   :  { %v9868_v22 = vpop.eup %9867 }
 0xe05   :  { %v9870_v28 = vpop.eup %9869  ;;  %v2110_v23 = vmul.f32 %v9868_v22, %v9852_v45  ;;  %v9769_v22 = vld [vmem:[%s10381_s1 + $0x10] sm:$0xff]  }
 0xe06   :  { %v2109_v18 = vmul.f32 %v9870_v28, %v9854_v46 }
 0xe07   :  { %8204 = vst.msk [vmem:[%s10315_s26 + $0x48] sm:$0xff] %vm280_vm2, %v2110_v23  ;;  %v2118_v19 = vpack.c.bf16 %v2110_v23, %v2110_v23 }
 0xe08   :  { %8203 = vst.msk [vmem:[%s10315_s26 + $0x40] sm:$0xff] %vm280_vm2, %v2109_v18  ;;  %v2117_v24 = vpack.c.bf16 %v2109_v18, %v2109_v18 }
 0xe09   :  { %8919 = vmatmul.mubr.msk.bf16.vlgmr.msra.gmra.mrb[56].mxu1 %vm280_vm2, %v2118_v19  ;;  %v9770_v19 = vld [vmem:[%s10381_s1 + $0x18] sm:$0xff]   ;;  %s10735_s1 = sld [smem:[%s12007_s0 + %s10089_s13]]  }
 0xe0a   :  { %8913 = vmatmul.mubr.msk.bf16.vlgmr.msra.gmra.mrb[60].mxu0 %vm280_vm2, %v2117_v24  ;;  %8929 = vmatpush3.bf16.msra.mxu1 %v2275_v25  ;;  %s10949_s13 = sld [smem:[%s12007_s0 + %s10093_s30]]   ;;  %s10103_s30 = smov 27  }
 0xe0b   :  { %8923 = vmatpush3.bf16.msra.mxu0 %v2227_v26  ;;  %8924 = vmatprep.mubr.msk.bf16.mxu0 %vm10069_vm0, %v10067_v0 }
 0xe0c   :  { %8930 = vmatprep.mubr.msk.bf16.mxu1 %vm10069_vm0, %v10067_v0  ;;  %8934 = vmatprep.subr.bf16.mxu0 %v10067_v0 }
 0xe0d   :  { %8940 = vmatprep.subr.bf16.mxu1 %v10067_v0 }
 0xe15   :  { %2461 = vrot.lane.b32.xlu0 %v10520_v21, %s12014_s18 }
 0xe52   :  { %v2088_v30 = vpop.xlane.xlu1 %2087 }
 0xe53   :  { %9871 = vrcp.f32 %v2088_v30  ;;  %v2085_v31 = vpop.xlane.xlu0 %2084 }
 0xe54   :  { %9873 = vrcp.f32 %v2085_v31 }
 0xe57   :  { %v2366_v38 = vpop.permute.xlu0 %2365 }
 0xe58   :  { %v2371_v41 = vsel %vm787_vm3, %v2366_v38, 0 }
 0xe5a   :  { %v2094_v32 = vpop.xlane.xlu1 %2093 }
 0xe5b   :  { %9875 = vrcp.f32 %v2094_v32 }
 0xe5d   :  { %v9872_v35 = vpop.eup %9871 }
 0xe5e   :  { %v9874_v36 = vpop.eup %9873  ;;  %v2112_v4 = vmul.f32 %v9872_v35, %v10618_v54 }
 0xe5f   :  { %v2111_v37 = vmul.f32 %v9874_v36, %v10620_v56 }
 0xe60   :  { %8206 = vst.msk [vmem:[%s10315_s26 + $0x58] sm:$0xff] %vm280_vm2, %v2112_v4  ;;  %v2120_v39 = vpack.c.bf16 %v2112_v4, %v2112_v4 }
 0xe61   :  { %8205 = vst.msk [vmem:[%s10315_s26 + $0x50] sm:$0xff] %vm280_vm2, %v2111_v37  ;;  %v2119_v21 = vpack.c.bf16 %v2111_v37, %v2111_v37 }
 0xe62   :  { %v2100_v42 = vpop.xlane.xlu1 %2099  ;;  %8931 = vmatmul.mubr.msk.bf16.vlgmr.msra.gmra.mrb[60].mxu1 %vm280_vm2, %v2120_v39 }
 0xe63   :  { %9877 = vrcp.f32 %v2100_v42  ;;  %8925 = vmatmul.mubr.msk.bf16.vlgmr.msra.gmra.mrb[64].mxu0 %vm280_vm2, %v2119_v21  ;;  %8941 = vmatpush3.bf16.msra.mxu1 %v2371_v41 }
 0xe64   :  { %8935 = vmatpush3.bf16.msra.mxu0 %v2323_v33  ;;  %8942 = vmatprep.mubr.msk.bf16.mxu1 %vm10069_vm0, %v10067_v0 }
 0xe65   :  { %v9876_v40 = vpop.eup %9875  ;;  %8952 = vmatprep.subr.bf16.mxu1 %v10067_v0  ;;  %8936 = vmatprep.mubr.msk.bf16.mxu0 %vm10069_vm0, %v10067_v0 }
 0xe66   :  { %v2114_v45 = vmul.f32 %v9876_v40, %v10626_v34  ;;  %8946 = vmatprep.subr.bf16.mxu0 %v10067_v0  ;;  %v2414_v52 = vpop.permute.xlu1 %2413 }
 0xe67   :  { %v2419_v56 = vsel %vm787_vm3, %v2414_v52, 0 }
 0xe68   :  { %8208 = vst.msk [vmem:[%s10315_s26 + $0x68] sm:$0xff] %vm280_vm2, %v2114_v45  ;;  %v2122_v46 = vpack.c.bf16 %v2114_v45, %v2114_v45 }
 0xe6a   :  { %8943 = vmatmul.mubr.msk.bf16.vlgmr.msra.gmra.mrb[64].mxu1 %vm280_vm2, %v2122_v46 }
 0xe6b   :  { %8954 = vmatprep.mubr.msk.bf16.mxu1 %vm10069_vm0, %v10067_v0 }
 0xe6d   :  { %v9878_v47 = vpop.eup %9877 }
 0xe6e   :  { %v2116_v48 = vmul.f32 %v9878_v47, %v10630_v1 }
 0xe70   :  { %8210 = vst.msk [vmem:[%s10315_s26 + $0x78] sm:$0xff] %vm280_vm2, %v2116_v48  ;;  %v2124_v50 = vpack.c.bf16 %v2116_v48, %v2116_v48 }
 0xe88   :  { %v2091_v61 = vpop.xlane.xlu0 %2090 }
 0xe89   :  { %9879 = vrcp.f32 %v2091_v61 }
 0xe8c   :  { %v2097_v62 = vpop.xlane.xlu0 %2096 }
 0xe8d   :  { %9881 = vrcp.f32 %v2097_v62 }
 0xe90   :  { %v2462_v3 = vpop.permute.xlu0 %2461 }
 0xe91   :  { %v2467_v43 = vsel %vm787_vm3, %v2462_v3, 0 }
 0xe92   :  { %8953 = vmatpush3.bf16.msra.mxu1 %v2467_v43 }
 0xe93   :  { %v9880_v49 = vpop.eup %9879  ;;  %8966 = vmatprep.subr.bf16.mxu1 %v10067_v0 }
 0xe94   :  { %v2113_v51 = vmul.f32 %v9880_v49, %v10639_v14 }
 0xe95   :  { %8955 = vmatmul.mubr.msk.bf16.vlgmr.msra.gmra.mrb[68].mxu1 %vm280_vm2, %v2124_v50  ;;  %v8216_v50 = vld [vmem:[%s10402_s7 + $0x1] ss:$0 sm:$0xff]  ;;  %s10090_s7 = smov 1  }
 0xe96   :  { %8207 = vst.msk [vmem:[%s10315_s26 + $0x60] sm:$0xff] %vm280_vm2, %v2113_v51  ;;  %v2121_v53 = vpack.c.bf16 %v2113_v51, %v2113_v51  ;;  %8970 = vmatprep.mubr.msk.bf16.mxu1 %vm10069_vm0, %v10067_v0  ;;  %s8098_s19 = sld [smem:[%s12007_s0 + %s10090_s7]]   ;;  %s10099_s7 = smov 22  }
 0xe97   :  { %v9882_v54 = vpop.eup %9881 }
 0xe98   :  { %v2115_v59 = vmul.f32 %v9882_v54, %v10643_v17  ;;  %8937 = vmatmul.mubr.msk.bf16.vlgmr.msra.gmra.mrb[68].mxu0 %vm280_vm2, %v2121_v53 }
 0xe99   :  { %8947 = vmatpush3.bf16.msra.mxu0 %v2419_v56  ;;  %8948 = vmatprep.mubr.msk.bf16.mxu0 %vm10069_vm0, %v10067_v0 }
 0xe9a   :  { %8209 = vst.msk [vmem:[%s10315_s26 + $0x70] sm:$0xff] %vm280_vm2, %v2115_v59  ;;  %8958 = vmatprep.subr.bf16.mxu0 %v10067_v0  ;;  %v2123_v7 = vpack.c.bf16 %v2115_v59, %v2115_v59 }
 0xea0   :  { %8949 = vmatmul.mubr.msk.bf16.vlgmr.msra.gmra.mrb[72].mxu0 %vm280_vm2, %v2123_v7 }
 0xea1   :  { %8962 = vmatprep.mubr.msk.bf16.mxu0 %vm10069_vm0, %v10067_v0  ;;  %8959 = vmatpush3.bf16.msra.mxu0 %v9769_v22 }
 0xea2   :  { %8960 = vmatprep.subr.bf16.mxu0 %v10067_v0 }
 0xea5   :  { %8961 = vmatpush3.bf16.msra.mxu0 %v9770_v19 }
 0xea6   :  { %8974 = vmatprep.subr.bf16.mxu0 %v10067_v0 }
 0xedc   :  { %v2215_v60 = vpop.f32.mrb[56].mxu1 }
 0xedd   :  { %v2167_v55 = vpop.f32.mrb[60].mxu0  ;;  %v8920_v58 = vpop.f32.mrb[57].mxu1 }
 0xede   :  { %v8914_v34 = vpop.f32.mrb[61].mxu0  ;;  %v2218_v63 = vpop.f32.mrb[58].mxu1 }
 0xedf   :  { %v2170_v1 = vpop.f32.mrb[62].mxu0  ;;  %v8921_v5 = vpop.f32.mrb[59].mxu1 }
 0xee0   :  { %v8915_v6 = vpop.f32.mrb[63].mxu0 }
 0xf35   :  { %v2311_v9 = vpop.f32.mrb[60].mxu1 }
 0xf36   :  { %v2263_v10 = vpop.f32.mrb[64].mxu0  ;;  %v8932_v57 = vpop.f32.mrb[61].mxu1 }
 0xf37   :  { %v9592_v2 = vpack.i.bf16 %v2311_v9, %v2263_v10  ;;  %v8926_v11 = vpop.f32.mrb[65].mxu0  ;;  %v2314_v12 = vpop.f32.mrb[62].mxu1 }
 0xf38   :  { %v2266_v13 = vpop.f32.mrb[66].mxu0  ;;  %v8933_v14 = vpop.f32.mrb[63].mxu1  ;;  %v9772_v11 = vld [vmem:[%s10414_s11 + $0x18] sm:$0xff]   ;;  %v9775_v12 = vld [vmem:[%s10423_s21 + $0x20] sm:$0xff]  }
 0xf39   :  { %9593 = vrot.lane.b32.xlu1 %v9592_v2, %s12012_s27  ;;  %v8927_v16 = vpop.f32.mrb[67].mxu0  ;;  %v9771_v2 = vld [vmem:[%s10414_s11 + $0x10] sm:$0xff]   ;;  %v9776_v13 = vld [vmem:[%s10423_s21 + $0x28] sm:$0xff]   ;;  %s11017_s11 = sld [smem:[%s12007_s0 + %s10094_s22]]  }
 0xf3a   :  { %8967 = vmatpush3.bf16.msra.mxu1 %v9771_v2  ;;  %s11348_s22 = sld [smem:[%s12007_s0 + %s10103_s30]]   ;;  %s10105_s30 = smov 31  }
 0xf3b   :  { %8968 = vmatprep.subr.bf16.mxu1 %v10067_v0 }
 0xf3d   :  { %v2407_v8 = vpop.f32.mrb[64].mxu1 }
 0xf3e   :  { %v8944_v15 = vpop.f32.mrb[65].mxu1  ;;  %8969 = vmatpush3.bf16.msra.mxu1 %v9772_v11 }
 0xf3f   :  { %v2410_v17 = vpop.f32.mrb[66].mxu1  ;;  %8986 = vmatprep.subr.bf16.mxu1 %v10067_v0 }
 0xf40   :  { %v8945_v20 = vpop.f32.mrb[67].mxu1 }
 0xf68   :  { %v2503_v28 = vpop.f32.mrb[68].mxu1 }
 0xf69   :  { %v8956_v23 = vpop.f32.mrb[69].mxu1 }
 0xf6a   :  { %v2506_v18 = vpop.f32.mrb[70].mxu1  ;;  %v8222_v23 = vld [vmem:[%s10432_s28 + $0x1] ss:$0 sm:$0xff]  ;;  %s10091_s28 = smov 18  }
 0xf6b   :  { %v2359_v24 = vpop.f32.mrb[68].mxu0  ;;  %v8957_v25 = vpop.f32.mrb[71].mxu1  ;;  %s10778_s23 = sld [smem:[%s12007_s0 + %s10091_s28]]  }
 0xf6c   :  { %v9597_v26 = vpack.i.bf16 %v2407_v8, %v2359_v24  ;;  %v8938_v27 = vpop.f32.mrb[69].mxu0  ;;  %v8223_v25 = vld [vmem:[%s10437_s5 + $0x1] ss:$0 sm:$0xff]  ;;  %s10096_s5 = smov 25  }
 0xf6d   :  { %v2362_v30 = vpop.f32.mrb[70].mxu0 }
 0xf6e   :  { %9598 = vrot.lane.b32.xlu0 %v9597_v26, %s12010_s2  ;;  %v8939_v31 = vpop.f32.mrb[71].mxu0 }
 0xf6f   :  { %v9773_v31 = vld [vmem:[%s10735_s1] sm:$0xff]  }
 0xf73   :  { %v2455_v32 = vpop.f32.mrb[72].mxu0 }
 0xf74   :  { %v9602_v35 = vpack.i.bf16 %v2503_v28, %v2455_v32  ;;  %v8950_v36 = vpop.f32.mrb[73].mxu0 }
 0xf75   :  { %v2458_v4 = vpop.f32.mrb[74].mxu0  ;;  %v10759_v36 = vld [vmem:[%s8098_s19] sm:$0xff] }
 0xf76   :  { %9603 = vrot.lane.b32.xlu1 %v9602_v35, %s12008_s3  ;;  %v8951_v37 = vpop.f32.mrb[75].mxu0  ;;  %v9774_v35 = vld [vmem:[%s10735_s1 + $0x8] sm:$0xff]  }
 0xf77   :  { %v10761_v4 = vld [vmem:[%s8098_s19 + $0x8] sm:$0xff]  ;;  %s11090_s19 = sld [smem:[%s12007_s0 + %s10099_s7]]   ;;  %s10104_s7 = smov 28  }
 0xf78   :  { %v2894_v37 = vpack.c.bf16 %v10761_v4, %v10759_v36  ;;  %s11368_s20 = sld [smem:[%s12007_s0 + %s10104_s7]]  }
 0xf79   :  { %s11380_s7 = sld [smem:[%s12007_s0 + %s10105_s30]]   ;;  %s10111_s30 = smov 35  }
 0xfab   :  { %v9594_v38 = vpop.permute.xlu1 %9593 }
 0xfac   :  { %v9596_v21 = vunpack.i.h.bf16 %v9594_v38  ;;  %v9595_v41 = vunpack.i.l.bf16 %v9594_v38  ;;  %v9777_v38 = vld [vmem:[%s10423_s21 + $0x30] sm:$0xff]  }
 0xfae   :  { %v2534_v45 = vsel %vm280_vm2, %v2215_v60, %v9596_v21  ;;  %v2533_v46 = vsel %vm280_vm2, %v2167_v55, %v9595_v41  ;;  %v8229_v21 = vld [vmem:[%s10451_s12 + $0x1] ss:$0 sm:$0xff]  ;;  %s11057_s12 = sld [smem:[%s12007_s0 + %s10096_s5]]   ;;  %s10100_s5 = smov 26  }
 0xfe0   :  { %v9599_v39 = vpop.permute.xlu0 %9598 }
 0xfe1   :  { %v9601_v42 = vunpack.i.h.bf16 %v9599_v39  ;;  %v9600_v33 = vunpack.i.l.bf16 %v9599_v39  ;;  %v9778_v39 = vld [vmem:[%s10423_s21 + $0x38] sm:$0xff]   ;;  %s10092_s21 = smov 3  }
 0xfe2   :  { %s10872_s29 = sld [smem:[%s12007_s0 + %s10092_s21]]  }
 0xfe3   :  { %v2536_v61 = vsel %vm1193_vm4, %v2534_v45, %v9601_v42  ;;  %v2535_v62 = vsel %vm1193_vm4, %v2533_v46, %v9600_v33  ;;  %s11276_s21 = sld [smem:[%s12007_s0 + %s10102_s10]]   ;;  %s10106_s10 = smov 33  }
 0xfe8   :  { %v9604_v40 = vpop.permute.xlu1 %9603 }
 0xfe9   :  { %v9606_v47 = vunpack.i.h.bf16 %v9604_v40  ;;  %v9605_v48 = vunpack.i.l.bf16 %v9604_v40 }
 0xfeb   :  { %v2538_v3 = vsel %vm1196_vm5, %v2536_v61, %v9606_v47  ;;  %v2537_v43 = vsel %vm1196_vm5, %v2535_v62, %v9605_v48  ;;  %v8252_v62 = vld [vmem:[%s10778_s23] ss:$0 sm:$0xff] }
 0xfec   :  { %v2553_v49 = vpack.c.bf16 %v2538_v3, %v2537_v43 }
 0xfee   :  { %8963 = vmatmul.mubr.msk.bf16.vlgmr.msra.gmra.mrb[76].mxu0 %vm204_vm1, %v2553_v49 }
 0xfef   :  { %8982 = vmatprep.mubr.msk.bf16.mxu0 %vm10069_vm0, %v10067_v0  ;;  %8975 = vmatpush3.bf16.msra.mxu0 %v9775_v12 }
 0xff0   :  { %8976 = vmatprep.subr.bf16.mxu0 %v10067_v0 }
 0xff3   :  { %8977 = vmatpush3.bf16.msra.mxu0 %v9776_v13 }
 0xff4   :  { %8978 = vmatprep.subr.bf16.mxu0 %v10067_v0 }
 0xff7   :  { %8979 = vmatpush3.bf16.msra.mxu0 %v9777_v38 }
 0xff8   :  { %8980 = vmatprep.subr.bf16.mxu0 %v10067_v0 }
 0xffb   :  { %8981 = vmatpush3.bf16.msra.mxu0 %v9778_v39 }
 0xffc   :  { %9000 = vmatprep.subr.bf16.mxu0 %v10067_v0 }
0x10c1   :  { %v2611_v51 = vpop.f32.mrb[76].mxu0 }
0x10c2   :  { %v2612_v52 = vadd.f32 %v8216_v50, %v2611_v51  ;;  %v8964_v53 = vpop.f32.mrb[77].mxu0 }
0x10c3   :  { %v2614_v54 = vpop.f32.mrb[78].mxu0 }
0x10c4   :  { %v2615_v56 = vadd.f32 %v8216_v50, %v2614_v54  ;;  %v8965_v59 = vpop.f32.mrb[79].mxu0  ;;  %v2618_v7 = vadd.f32 %v2612_v52, %v10484_v29 }
0x10c6   :  { %v2624_v60 = vsel %vm204_vm1, %v2618_v7, 0.0  ;;  %v2619_v55 = vadd.f32 %v2615_v56, %v10486_v44 }
0x10c7   :  { %2625 = vadd.xlane.f32.xlu0 %v2624_v60 }
0x10c8   :  { %v2627_v58 = vsel %vm204_vm1, %v2619_v55, 0.0 }
0x10c9   :  { %2628 = vadd.xlane.f32.xlu1 %v2627_v58 }
0x1154   :  { %v2626_v34 = vpop.xlane.xlu0 %2625 }
0x1155   :  { %v2630_v63 = vmul.f32 0.03125, %v2626_v34 }
0x1156   :  { %v2629_v1 = vpop.xlane.xlu1 %2628 }
0x1157   :  { %v2632_v5 = vsub.f32 %v2618_v7, %v2630_v63  ;;  %v2631_v6 = vmul.f32 0.03125, %v2629_v1 }
0x1159   :  { %v2633_v9 = vsub.f32 %v2619_v55, %v2631_v6  ;;  %v2634_v10 = vmul.f32 %v2632_v5, %v2632_v5 }
0x115b   :  { %v2636_v29 = vsel %vm204_vm1, %v2634_v10, 0.0  ;;  %v2635_v57 = vmul.f32 %v2633_v9, %v2633_v9 }
0x115c   :  { %2637 = vadd.xlane.f32.xlu0 %v2636_v29 }
0x115d   :  { %v2639_v44 = vsel %vm204_vm1, %v2635_v57, 0.0 }
0x1160   :  { %2640 = vadd.xlane.f32.xlu0 %v2639_v44 }
0x11e9   :  { %v2638_v14 = vpop.xlane.xlu0 %2637 }
0x11ea   :  { %v2642_v16 = vmul.f32 0.03125, %v2638_v14 }
0x11ec   :  { %v2644_v8 = vadd.f32 1e-12, %v2642_v16 }
0x11ed   :  { %v2641_v15 = vpop.xlane.xlu0 %2640 }
0x11ee   :  { %9883 = vrsqrt.f32 %v2644_v8  ;;  %v2643_v17 = vmul.f32 0.03125, %v2641_v15 }
0x11f0   :  { %v2645_v20 = vadd.f32 1e-12, %v2643_v17 }
0x11f2   :  { %9885 = vrsqrt.f32 %v2645_v20 }
0x11f8   :  { %v9884_v22 = vpop.eup %9883 }
0x11f9   :  { %v2648_v28 = vmul.f32 %v9884_v22, %v2632_v5 }
0x11fb   :  { %v2656_v19 = vmul.f32 %v8222_v23, %v2648_v28 }
0x11fc   :  { %v9886_v18 = vpop.eup %9885 }
0x11fd   :  { %v2649_v24 = vmul.f32 %v9886_v18, %v2633_v9  ;;  %v10748_v27 = vadd.f32 %v8223_v25, %v2656_v19 }
0x11ff   :  { %v2657_v26 = vmul.f32 %v8222_v23, %v2649_v24 }
0x1201   :  { %v10750_v30 = vadd.f32 %v8223_v25, %v2657_v26 }
0x1203   :  { %v2671_v32 = vpack.c.bf16 %v10750_v30, %v10748_v27 }
0x1205   :  { %8971 = vmatmul.mubr.msk.bf16.vlgmr.msra.gmra.mrb[72].mxu1 %vm204_vm1, %v2671_v32 }
0x1206   :  { %8987 = vmatpush3.bf16.msra.mxu1 %v9773_v31  ;;  %8990 = vmatprep.mubr.msk.bf16.mxu1 %vm10069_vm0, %v10067_v0 }
0x1207   :  { %8988 = vmatprep.subr.bf16.mxu1 %v10067_v0 }
0x120a   :  { %8989 = vmatpush3.bf16.msra.mxu1 %v9774_v35 }
0x120b   :  { %8994 = vmatprep.subr.bf16.mxu1 %v10067_v0 }
0x120d   :  { %8991 = vmatmul.mubr.msk.bf16.vlgmr.msra.gmra.mrb[76].mxu1 %vm204_vm1, %v2894_v37 }
0x120e   :  { %8996 = vmatprep.mubr.msk.bf16.mxu1 %vm10069_vm0, %v10067_v0 }
0x12d8   :  { %v2729_v41 = vpop.f32.mrb[72].mxu1 }
0x12d9   :  { %v2730_v42 = vadd.f32 %v8229_v21, %v2729_v41  ;;  %v8972_v33 = vpop.f32.mrb[73].mxu1 }
0x12da   :  { %v2732_v40 = vpop.f32.mrb[74].mxu1 }
0x12db   :  { %v2733_v45 = vadd.f32 %v8229_v21, %v2732_v40  ;;  %v8973_v46 = vpop.f32.mrb[75].mxu1  ;;  %v2736_v47 = vmax.f32 %v2730_v42, 0.0  ;;  %v2875_v21 = vld [vmem:[%s10872_s29 + $0x8] sm:$0xff] }
0x12dd   :  { %v2737_v48 = vmax.f32 %v2733_v45, 0.0 }
0x12df   :  { %v2747_v61 = vpack.c.bf16 %v2737_v48, %v2736_v47  ;;  %v2874_v47 = vld [vmem:[%s10872_s29] sm:$0xff] }
0x12e0   :  { %v2951_v3 = vpop.f32.mrb[76].mxu1 }
0x12e1   :  { %8983 = vmatmul.mubr.msk.bf16.vlgmr.msra.gmra.mrb[80].mxu0 %vm1432_vm6, %v2747_v61  ;;  %v8992_v43 = vpop.f32.mrb[77].mxu1  ;;  %v2952_v50 = vadd.f32 %v8252_v62, %v2951_v3 }
0x12e2   :  { %v2954_v49 = vpop.f32.mrb[78].mxu1  ;;  %9002 = vmatprep.mubr.msk.bf16.mxu0 %vm10069_vm0, %v10067_v0 }
0x12e3   :  { %v2955_v51 = vadd.f32 %v8252_v62, %v2954_v49  ;;  %v8993_v52 = vpop.f32.mrb[79].mxu1  ;;  %v2978_v56 = vpack.c.bf16 %v2952_v50, %v2952_v50 }
0x12e4   :  { %v2876_v52 = vld [vmem:[%s10872_s29 + $0x10] sm:$0xff] }
0x12e5   :  { %v9612_v53 = vpack.i.bf16 %v2955_v51, %v2952_v50  ;;  %v2979_v54 = vpack.c.bf16 %v2955_v51, %v2955_v51 }
0x12e7   :  { %9613 = vrot.lane.b32.xlu0 %v9612_v53, %s10074_s17  ;;  %9608 = vrot.lane.b32.xlu1 %v9612_v53, %s12020_s15 }
0x12eb   :  { %9618 = vrot.lane.b32.xlu1 %v9612_v53, %s12018_s14  ;;  %3036 = vrot.lane.b32.xlu0 %v2979_v54, %s12016_s16 }
0x12ef   :  { %2987 = vrot.lane.b32.xlu1 %v2978_v56, %s12016_s16 }
0x1359   :  { %v9614_v59 = vpop.permute.xlu0 %9613  ;;  %v9609_v7 = vpop.permute.xlu1 %9608 }
0x135a   :  { %v9611_v60 = vunpack.i.h.bf16 %v9609_v7  ;;  %v9610_v55 = vunpack.i.l.bf16 %v9609_v7  ;;  %v9616_v58 = vunpack.i.h.bf16 %v9614_v59  ;;  %v9615_v34 = vunpack.i.l.bf16 %v9614_v59 }
0x135c   :  { %v10789_v63 = vpack.c.bf16 %v9610_v55, %v9610_v55  ;;  %v10791_v1 = vpack.c.bf16 %v9611_v60, %v9611_v60  ;;  %v10798_v57 = vpack.c.bf16 %v9615_v34, %v9615_v34  ;;  %v10800_v44 = vpack.c.bf16 %v9616_v58, %v9616_v58 }
0x135d   :  { %v9619_v5 = vpop.permute.xlu1 %9618  ;;  %v3037_v6 = vpop.permute.xlu0 %3036 }
0x135e   :  { %v3042_v9 = vsel %vm280_vm2, %v3037_v6, 0  ;;  %3085 = vrot.lane.b32.xlu1 %v10789_v63, %s12016_s16  ;;  %3134 = vrot.lane.b32.xlu0 %v10791_v1, %s12016_s16  ;;  %v9621_v10 = vunpack.i.h.bf16 %v9619_v5  ;;  %v9620_v29 = vunpack.i.l.bf16 %v9619_v5 }
0x135f   :  { %9001 = vmatpush3.bf16.xpose.msra.mxu0 %v3042_v9 }
0x1360   :  { %9012 = vmatprep.subr.bf16.mxu0 %v10067_v0  ;;  %v10808_v12 = vpack.c.bf16 %v9621_v10, %v9621_v10  ;;  %v10810_v13 = vpack.c.bf16 %v9620_v29, %v9620_v29 }
0x1361   :  { %v2988_v2 = vpop.permute.xlu1 %2987 }
0x1362   :  { %v2993_v11 = vsel %vm280_vm2, %v2988_v2, 0  ;;  %3183 = vrot.lane.b32.xlu1 %v10798_v57, %s12016_s16  ;;  %3232 = vrot.lane.b32.xlu0 %v10800_v44, %s12016_s16 }
0x1363   :  { %8995 = vmatpush3.bf16.xpose.msra.mxu1 %v2993_v11  ;;  %v2878_v11 = vld [vmem:[%s10872_s29 + $0x20] sm:$0xff] }
0x1364   :  { %9006 = vmatprep.subr.bf16.mxu1 %v10067_v0 }
0x1366   :  { %3281 = vrot.lane.b32.xlu1 %v10810_v13, %s12016_s16  ;;  %3330 = vrot.lane.b32.xlu0 %v10808_v12, %s12016_s16 }
0x1367   :  { %9003 = vmatmul.mubr.msk.bf16.vlgmr.msra.gmra.mrb[84].mxu0 %vm280_vm2, %v2979_v54 }
0x1368   :  { %9014 = vmatprep.mubr.msk.bf16.mxu0 %vm10069_vm0, %v10067_v0 }
0x136a   :  { %8997 = vmatmul.mubr.msk.bf16.vlgmr.msra.gmra.mrb[80].mxu1 %vm280_vm2, %v2978_v56  ;;  %3538 = vrot.lane.b32.xlu1 %v2979_v54, %s12014_s18  ;;  %v2877_v54 = vld [vmem:[%s10872_s29 + $0x18] sm:$0xff] }
0x136b   :  { %3490 = vrot.lane.b32.xlu0 %v2978_v56, %s12014_s18  ;;  %9008 = vmatprep.mubr.msk.bf16.mxu1 %vm10069_vm0, %v10067_v0 }
0x13b4   :  { %v10825_v14 = vpop.f32.mrb[80].mxu0 }
0x13b5   :  { %v8984_v16 = vpop.f32.mrb[81].mxu0 }
0x13b6   :  { %v10827_v8 = vpop.f32.mrb[82].mxu0 }
0x13b7   :  { %v8985_v15 = vpop.f32.mrb[83].mxu0 }
0x13b8   :  { %v2879_v15 = vld [vmem:[%s10872_s29 + $0x28] sm:$0xff] }
0x13d0   :  { %v3086_v17 = vpop.permute.xlu1 %3085  ;;  %v3135_v20 = vpop.permute.xlu0 %3134 }
0x13d1   :  { %v3091_v22 = vsel %vm280_vm2, %v3086_v17, 0  ;;  %v3140_v28 = vsel %vm280_vm2, %v3135_v20, 0 }
0x13d2   :  { %9007 = vmatpush3.bf16.xpose.msra.mxu1 %v3091_v22  ;;  %9013 = vmatpush3.bf16.xpose.msra.mxu0 %v3140_v28 }
0x13d3   :  { %9018 = vmatprep.subr.bf16.mxu1 %v10067_v0  ;;  %9024 = vmatprep.subr.bf16.mxu0 %v10067_v0 }
0x13d4   :  { %v3184_v23 = vpop.permute.xlu1 %3183  ;;  %v3233_v18 = vpop.permute.xlu0 %3232 }
0x13d5   :  { %v3189_v19 = vsel %vm280_vm2, %v3184_v23, 0  ;;  %v3238_v24 = vsel %vm280_vm2, %v3233_v18, 0 }
0x13d8   :  { %v3282_v25 = vpop.permute.xlu1 %3281  ;;  %v3331_v26 = vpop.permute.xlu0 %3330 }
0x13d9   :  { %9009 = vmatmul.mubr.msk.bf16.vlgmr.msra.gmra.mrb[84].mxu1 %vm280_vm2, %v10789_v63  ;;  %9015 = vmatmul.mubr.msk.bf16.vlgmr.msra.gmra.mrb[88].mxu0 %vm280_vm2, %v10791_v1  ;;  %v3287_v31 = vsel %vm280_vm2, %v3282_v25, 0  ;;  %v3336_v32 = vsel %vm280_vm2, %v3331_v26, 0 }
0x13da   :  { %9019 = vmatpush3.bf16.xpose.msra.mxu1 %v3189_v19  ;;  %9025 = vmatpush3.bf16.xpose.msra.mxu0 %v3238_v24 }
0x13db   :  { %9020 = vmatprep.mubr.msk.bf16.mxu1 %vm10069_vm0, %v10067_v0  ;;  %9026 = vmatprep.mubr.msk.bf16.mxu0 %vm10069_vm0, %v10067_v0 }
0x13dc   :  { %9030 = vmatprep.subr.bf16.mxu1 %v10067_v0  ;;  %9036 = vmatprep.subr.bf16.mxu0 %v10067_v0  ;;  %v3539_v35 = vpop.permute.xlu1 %3538 }
0x13dd   :  { %v3491_v37 = vpop.permute.xlu0 %3490  ;;  %v3544_v38 = vsel %vm787_vm3, %v3539_v35, 0 }
0x13de   :  { %v3496_v39 = vsel %vm787_vm3, %v3491_v37, 0  ;;  %v2880_v37 = vld [vmem:[%s10872_s29 + $0x30] sm:$0xff] }
0x13e1   :  { %9021 = vmatmul.mubr.msk.bf16.vlgmr.msra.gmra.mrb[88].mxu1 %vm280_vm2, %v10798_v57  ;;  %9027 = vmatmul.mubr.msk.bf16.vlgmr.msra.gmra.mrb[92].mxu0 %vm280_vm2, %v10800_v44 }
0x13e2   :  { %9031 = vmatpush3.bf16.xpose.msra.mxu1 %v3287_v31  ;;  %9037 = vmatpush3.bf16.xpose.msra.mxu0 %v3336_v32 }
0x13e3   :  { %9032 = vmatprep.mubr.msk.bf16.mxu1 %vm10069_vm0, %v10067_v0  ;;  %9038 = vmatprep.mubr.msk.bf16.mxu0 %vm10069_vm0, %v10067_v0 }
0x13e4   :  { %9042 = vmatprep.subr.bf16.mxu1 %v10067_v0  ;;  %9048 = vmatprep.subr.bf16.mxu0 %v10067_v0 }
0x13e9   :  { %9033 = vmatmul.mubr.msk.bf16.vlgmr.msra.gmra.mrb[92].mxu1 %vm280_vm2, %v10810_v13  ;;  %9039 = vmatmul.mubr.msk.bf16.vlgmr.msra.gmra.mrb[96].mxu0 %vm280_vm2, %v10808_v12 }
0x13ea   :  { %9043 = vmatpush3.bf16.msra.mxu1 %v3496_v39  ;;  %9049 = vmatpush3.bf16.msra.mxu0 %v3544_v38  ;;  %v2881_v39 = vld [vmem:[%s10872_s29 + $0x38] sm:$0xff] }
0x13eb   :  { %9044 = vmatprep.mubr.msk.bf16.mxu1 %vm10069_vm0, %v10067_v0  ;;  %9050 = vmatprep.mubr.msk.bf16.mxu0 %vm10069_vm0, %v10067_v0 }
0x13ec   :  { %9054 = vmatprep.subr.bf16.mxu1 %v10067_v0  ;;  %9060 = vmatprep.subr.bf16.mxu0 %v10067_v0 }
0x143a   :  { %v3078_v41 = vpop.f32.mrb[84].mxu0 }
0x143b   :  { %v3379_v42 = vmul.f32 0.35355338, %v3078_v41  ;;  %v9004_v33 = vpop.f32.mrb[85].mxu0 }
0x143c   :  { %v3081_v40 = vpop.f32.mrb[86].mxu0 }
0x143d   :  { %v10875_v45 = vadd.f32 %v3379_v42, %v2875_v21  ;;  %v9005_v46 = vpop.f32.mrb[87].mxu0  ;;  %v3029_v48 = vpop.f32.mrb[80].mxu1 }
0x143e   :  { %v3378_v61 = vmul.f32 0.35355338, %v3029_v48  ;;  %v8998_v62 = vpop.f32.mrb[81].mxu1 }
0x143f   :  { %v3032_v3 = vpop.f32.mrb[82].mxu1  ;;  %v3397_v43 = vsel %vm280_vm2, %v10875_v45, -inf }
0x1440   :  { %v10880_v49 = vadd.f32 %v3378_v61, %v2874_v47  ;;  %3398 = vmax.xlane.f32.xlu0 %v3397_v43  ;;  %v8999_v50 = vpop.f32.mrb[83].mxu1 }
0x1442   :  { %v3394_v51 = vsel %vm280_vm2, %v10880_v49, -inf }
0x1443   :  { %3395 = vmax.xlane.f32.xlu1 %v3394_v51 }
0x14ac   :  { %v3127_v53 = vpop.f32.mrb[84].mxu1  ;;  %v3176_v56 = vpop.f32.mrb[88].mxu0 }
0x14ad   :  { %v3380_v59 = vmul.f32 0.35355338, %v3127_v53  ;;  %v3381_v7 = vmul.f32 0.35355338, %v3176_v56  ;;  %v9010_v60 = vpop.f32.mrb[85].mxu1  ;;  %v9016_v55 = vpop.f32.mrb[89].mxu0 }
0x14ae   :  { %v3130_v58 = vpop.f32.mrb[86].mxu1  ;;  %v3179_v34 = vpop.f32.mrb[90].mxu0 }
0x14af   :  { %v10886_v5 = vadd.f32 %v3380_v59, %v2876_v52  ;;  %v10888_v6 = vadd.f32 %v3381_v7, %v2877_v54  ;;  %v9011_v9 = vpop.f32.mrb[87].mxu1  ;;  %v9017_v10 = vpop.f32.mrb[91].mxu0 }
0x14b1   :  { %v3400_v29 = vsel %vm280_vm2, %v10886_v5, -inf  ;;  %v3403_v2 = vsel %vm280_vm2, %v10888_v6, -inf }
0x14b2   :  { %3401 = vmax.xlane.f32.xlu0 %v3400_v29  ;;  %3404 = vmax.xlane.f32.xlu1 %v3403_v2 }
0x14b4   :  { %v3225_v16 = vpop.f32.mrb[88].mxu1  ;;  %v3274_v17 = vpop.f32.mrb[92].mxu0 }
0x14b5   :  { %v3382_v20 = vmul.f32 0.35355338, %v3225_v16  ;;  %v3383_v22 = vmul.f32 0.35355338, %v3274_v17  ;;  %v9022_v28 = vpop.f32.mrb[89].mxu1  ;;  %v9028_v23 = vpop.f32.mrb[93].mxu0 }
0x14b6   :  { %v3228_v18 = vpop.f32.mrb[90].mxu1  ;;  %v3277_v19 = vpop.f32.mrb[94].mxu0 }
0x14b7   :  { %v10896_v24 = vadd.f32 %v3382_v20, %v2878_v11  ;;  %v3391_v25 = vadd.f32 %v3383_v22, %v2879_v15  ;;  %v9023_v26 = vpop.f32.mrb[91].mxu1  ;;  %v9029_v31 = vpop.f32.mrb[95].mxu0 }
0x14b9   :  { %v3406_v32 = vsel %vm280_vm2, %v10896_v24, -inf  ;;  %v3409_v35 = vsel %vm280_vm2, %v3391_v25, -inf }
0x14ba   :  { %3407 = vmax.xlane.f32.xlu0 %v3406_v32  ;;  %3410 = vmax.xlane.f32.xlu1 %v3409_v35 }
0x14bc   :  { %v3323_v38 = vpop.f32.mrb[92].mxu1  ;;  %v3372_v21 = vpop.f32.mrb[96].mxu0 }
0x14bd   :  { %v3384_v41 = vmul.f32 0.35355338, %v3323_v38  ;;  %v3385_v42 = vmul.f32 0.35355338, %v3372_v21  ;;  %v9034_v33 = vpop.f32.mrb[93].mxu1  ;;  %v9040_v40 = vpop.f32.mrb[97].mxu0 }
0x14be   :  { %v3326_v46 = vpop.f32.mrb[94].mxu1  ;;  %v3375_v47 = vpop.f32.mrb[98].mxu0 }
0x14bf   :  { %v3392_v48 = vadd.f32 %v3384_v41, %v2880_v37  ;;  %v3393_v61 = vadd.f32 %v3385_v42, %v2881_v39  ;;  %v9035_v62 = vpop.f32.mrb[95].mxu1  ;;  %v9041_v3 = vpop.f32.mrb[99].mxu0 }
0x14c1   :  { %v3412_v43 = vsel %vm280_vm2, %v3392_v48, -inf  ;;  %v3415_v50 = vsel %vm280_vm2, %v3393_v61, -inf }
0x14c2   :  { %3413 = vmax.xlane.f32.xlu0 %v3412_v43  ;;  %3416 = vmax.xlane.f32.xlu1 %v3415_v50 }
0x14cd   :  { %v3399_v51 = vpop.xlane.xlu0 %3398 }
0x14ce   :  { %v3419_v53 = vsub.f32 %v10875_v45, %v3399_v51 }
0x14d0   :  { %v3396_v52 = vpop.xlane.xlu1 %3395  ;;  %v3428_v56 = vmul.f32 1.442695, %v3419_v53 }
0x14d1   :  { %v3418_v54 = vsub.f32 %v10880_v49, %v3396_v52 }
0x14d2   :  { %9887 = vpow2.f32 %v3428_v56 }
0x14d3   :  { %3586 = vrot.lane.b32.xlu1 %v10789_v63, %s12014_s18  ;;  %v3426_v59 = vmul.f32 1.442695, %v3418_v54 }
0x14d5   :  { %9889 = vpow2.f32 %v3426_v59 }
0x14d8   :  { %3634 = vrot.lane.b32.xlu0 %v10791_v1, %s12014_s18 }
0x14dc   :  { %v9888_v7 = vpop.eup %9887 }
0x14dd   :  { %v3445_v58 = vsel %vm280_vm2, %v9888_v7, 0.0 }
0x14df   :  { %v9890_v60 = vpop.eup %9889 }
0x14e0   :  { %v3442_v55 = vsel %vm280_vm2, %v9890_v60, 0.0 }
0x14f7   :  { %3443 = vadd.xlane.f32.xlu0 %v3442_v55  ;;  %3446 = vadd.xlane.f32.xlu1 %v3445_v58 }
0x1508   :  { %3682 = vrot.lane.b32.xlu1 %v10798_v57, %s12014_s18 }
0x153f   :  { %v3402_v63 = vpop.xlane.xlu0 %3401  ;;  %v3405_v1 = vpop.xlane.xlu1 %3404 }
0x1540   :  { %v3420_v45 = vsub.f32 %v10886_v5, %v3402_v63  ;;  %v3421_v49 = vsub.f32 %v10888_v6, %v3405_v1 }
0x1542   :  { %v3430_v34 = vmul.f32 1.442695, %v3420_v45  ;;  %v3432_v9 = vmul.f32 1.442695, %v3421_v49 }
0x1544   :  { %9891 = vpow2.f32 %v3430_v34 }
0x1545   :  { %9893 = vpow2.f32 %v3432_v9 }
0x1547   :  { %v3411_v10 = vpop.xlane.xlu1 %3410  ;;  %v3408_v18 = vpop.xlane.xlu0 %3407 }
0x1548   :  { %v3423_v29 = vsub.f32 %v3391_v25, %v3411_v10  ;;  %v3422_v19 = vsub.f32 %v10896_v24, %v3408_v18 }
0x154a   :  { %v3436_v2 = vmul.f32 1.442695, %v3423_v29  ;;  %v3434_v26 = vmul.f32 1.442695, %v3422_v19 }
0x154c   :  { %9895 = vpow2.f32 %v3436_v2 }
0x154e   :  { %v10917_v11 = vpop.eup %9891 }
0x154f   :  { %v10919_v16 = vpop.eup %9893  ;;  %v3417_v15 = vpop.xlane.xlu1 %3416  ;;  %v3448_v57 = vsel %vm280_vm2, %v10917_v11, 0.0 }
0x1550   :  { %v3425_v17 = vsub.f32 %v3393_v61, %v3417_v15  ;;  %3449 = vadd.xlane.f32.xlu0 %v3448_v57  ;;  %v3451_v5 = vsel %vm280_vm2, %v10919_v16, 0.0  ;;  %v3414_v25 = vpop.xlane.xlu0 %3413 }
0x1551   :  { %3452 = vadd.xlane.f32.xlu1 %v3451_v5  ;;  %v3424_v31 = vsub.f32 %v3392_v48, %v3414_v25 }
0x1552   :  { %v3440_v6 = vmul.f32 1.442695, %v3425_v17 }
0x1553   :  { %v3438_v32 = vmul.f32 1.442695, %v3424_v31  ;;  %v3587_v37 = vpop.permute.xlu1 %3586 }
0x1554   :  { %9897 = vpow2.f32 %v3440_v6  ;;  %v3635_v35 = vpop.permute.xlu0 %3634  ;;  %v3592_v48 = vsel %vm787_vm3, %v3587_v37, 0 }
0x1555   :  { %9899 = vpow2.f32 %v3434_v26  ;;  %v3640_v61 = vsel %vm787_vm3, %v3635_v35, 0 }
0x1556   :  { %v10925_v20 = vpop.eup %9895  ;;  %9901 = vpow2.f32 %v3438_v32 }
0x1557   :  { %v3457_v22 = vsel %vm280_vm2, %v10925_v20, 0.0 }
0x1558   :  { %3458 = vadd.xlane.f32.xlu1 %v3457_v22 }
0x155e   :  { %v10929_v28 = vpop.eup %9897 }
0x155f   :  { %v3463_v23 = vsel %vm280_vm2, %v10929_v28, 0.0  ;;  %v10938_v38 = vpop.eup %9899 }
0x1560   :  { %3464 = vadd.xlane.f32.xlu1 %v3463_v23  ;;  %v10942_v41 = vpop.eup %9901 }
0x1566   :  { %3730 = vrot.lane.b32.xlu0 %v10800_v44, %s12014_s18  ;;  %v3454_v44 = vsel %vm280_vm2, %v10938_v38, 0.0 }
0x1571   :  { %3778 = vrot.lane.b32.xlu1 %v10810_v13, %s12014_s18  ;;  %v3460_v13 = vsel %vm280_vm2, %v10942_v41, 0.0 }
0x1584   :  { %v3444_v39 = vpop.xlane.xlu0 %3443  ;;  %v3447_v21 = vpop.xlane.xlu1 %3446 }
0x1585   :  { %9903 = vrcp.f32 %v3444_v39  ;;  %3455 = vadd.xlane.f32.xlu0 %v3454_v44 }
0x1586   :  { %9905 = vrcp.f32 %v3447_v21 }
0x1588   :  { %v3683_v62 = vpop.permute.xlu1 %3682 }
0x1589   :  { %3461 = vadd.xlane.f32.xlu0 %v3460_v13 }
0x158f   :  { %v9904_v24 = vpop.eup %9903 }
0x1590   :  { %v9906_v42 = vpop.eup %9905  ;;  %v3474_v33 = vmul.f32 %v9904_v24, %v9890_v60 }
0x1591   :  { %v3475_v40 = vmul.f32 %v9906_v42, %v9888_v7  ;;  %v3688_v7 = vsel %vm787_vm3, %v3683_v62, 0 }
0x1592   :  { %3904 = vst.msk [vmem:[%s10949_s13] sm:$0xff] %vm280_vm2, %v3474_v33  ;;  %v3482_v46 = vpack.c.bf16 %v3474_v33, %v3474_v33 }
0x1593   :  { %3905 = vst.msk [vmem:[%s10949_s13 + $0x8] sm:$0xff] %vm280_vm2, %v3475_v40  ;;  %v3483_v47 = vpack.c.bf16 %v3475_v40, %v3475_v40 }
0x1594   :  { %9045 = vmatmul.mubr.msk.bf16.vlgmr.msra.gmra.mrb[96].mxu1 %vm280_vm2, %v3482_v46  ;;  %v9779_v46 = vld [vmem:[%s11017_s11] sm:$0xff]  }
0x1595   :  { %9051 = vmatmul.mubr.msk.bf16.vlgmr.msra.gmra.mrb[100].mxu0 %vm280_vm2, %v3483_v47  ;;  %9055 = vmatpush3.bf16.msra.mxu1 %v3592_v48 }
0x1596   :  { %9061 = vmatpush3.bf16.msra.mxu0 %v3640_v61  ;;  %9056 = vmatprep.mubr.msk.bf16.mxu1 %vm10069_vm0, %v10067_v0 }
0x1597   :  { %9062 = vmatprep.mubr.msk.bf16.mxu0 %vm10069_vm0, %v10067_v0  ;;  %9066 = vmatprep.subr.bf16.mxu1 %v10067_v0 }
0x1598   :  { %9072 = vmatprep.subr.bf16.mxu0 %v10067_v0 }
0x159f   :  { %3826 = vrot.lane.b32.xlu0 %v10808_v12, %s12014_s18 }
0x15dd   :  { %v3450_v3 = vpop.xlane.xlu0 %3449 }
0x15de   :  { %9907 = vrcp.f32 %v3450_v3  ;;  %v3453_v43 = vpop.xlane.xlu1 %3452 }
0x15df   :  { %9909 = vrcp.f32 %v3453_v43  ;;  %v9780_v43 = vld [vmem:[%s11017_s11 + $0x8] sm:$0xff]  }
0x15e1   :  { %v3731_v56 = vpop.permute.xlu0 %3730 }
0x15e2   :  { %v3736_v60 = vsel %vm787_vm3, %v3731_v56, 0 }
0x15e5   :  { %v3459_v50 = vpop.xlane.xlu1 %3458 }
0x15e6   :  { %9911 = vrcp.f32 %v3459_v50 }
0x15e8   :  { %v9908_v51 = vpop.eup %9907 }
0x15e9   :  { %v9910_v52 = vpop.eup %9909  ;;  %v3476_v53 = vmul.f32 %v9908_v51, %v10917_v11 }
0x15ea   :  { %v3477_v54 = vmul.f32 %v9910_v52, %v10919_v16 }
0x15eb   :  { %3906 = vst.msk [vmem:[%s10949_s13 + $0x10] sm:$0xff] %vm280_vm2, %v3476_v53  ;;  %v3484_v59 = vpack.c.bf16 %v3476_v53, %v3476_v53 }
0x15ec   :  { %3907 = vst.msk [vmem:[%s10949_s13 + $0x18] sm:$0xff] %vm280_vm2, %v3477_v54  ;;  %v3485_v12 = vpack.c.bf16 %v3477_v54, %v3477_v54 }
0x15ed   :  { %9057 = vmatmul.mubr.msk.bf16.vlgmr.msra.gmra.mrb[100].mxu1 %vm280_vm2, %v3484_v59  ;;  %v3465_v55 = vpop.xlane.xlu1 %3464 }
0x15ee   :  { %9063 = vmatmul.mubr.msk.bf16.vlgmr.msra.gmra.mrb[104].mxu0 %vm280_vm2, %v3485_v12  ;;  %9067 = vmatpush3.bf16.msra.mxu1 %v3688_v7  ;;  %9913 = vrcp.f32 %v3465_v55 }
0x15ef   :  { %9073 = vmatpush3.bf16.msra.mxu0 %v3736_v60  ;;  %9074 = vmatprep.mubr.msk.bf16.mxu0 %vm10069_vm0, %v10067_v0  ;;  %v8242_v60 = vld [vmem:[%s10460_s24 + $0x1] ss:$0 sm:$0xff]  ;;  %s10095_s24 = smov 20  }
0x15f0   :  { %9084 = vmatprep.subr.bf16.mxu0 %v10067_v0  ;;  %9068 = vmatprep.mubr.msk.bf16.mxu1 %vm10069_vm0, %v10067_v0  ;;  %v9912_v58 = vpop.eup %9911  ;;  %v2818_v55 = vadd.f32 %v8242_v60, %v10825_v14  ;;  %s11046_s28 = sld [smem:[%s12007_s0 + %s10095_s24]]  }
0x15f1   :  { %9078 = vmatprep.subr.bf16.mxu1 %v10067_v0  ;;  %v3479_v63 = vmul.f32 %v9912_v58, %v10925_v20  ;;  %v3779_v15 = vpop.permute.xlu1 %3778  ;;  %s11189_s24 = sld [smem:[%s12007_s0 + %s10101_s8]]  }
0x15f2   :  { %v3784_v5 = vsel %vm787_vm3, %v3779_v15, 0  ;;  %v2824_v58 = vadd.f32 %v2818_v55, %v10748_v27  ;;  %v8250_v55 = vld [vmem:[%s10474_s4 + $0x1] ss:$0 sm:$0xff]  ;;  %s11076_s4 = sld [smem:[%s12007_s0 + %s10097_s25]]  }
0x15f3   :  { %3909 = vst.msk [vmem:[%s10949_s13 + $0x28] sm:$0xff] %vm280_vm2, %v3479_v63  ;;  %v3487_v1 = vpack.c.bf16 %v3479_v63, %v3479_v63  ;;  %s11106_s25 = sld [smem:[%s12007_s0 + %s10100_s5]]  }
0x15f4   :  { %v2830_v63 = vsel %vm204_vm1, %v2824_v58, 0.0 }
0x15f6   :  { %9075 = vmatmul.mubr.msk.bf16.vlgmr.msra.gmra.mrb[108].mxu0 %vm280_vm2, %v3487_v1  ;;  %v2821_v1 = vadd.f32 %v8242_v60, %v10827_v8 }
0x15f7   :  { %9086 = vmatprep.mubr.msk.bf16.mxu0 %vm10069_vm0, %v10067_v0 }
0x15f8   :  { %v9914_v45 = vpop.eup %9913 }
0x15f9   :  { %v3481_v49 = vmul.f32 %v9914_v45, %v10929_v28  ;;  %v2825_v45 = vadd.f32 %v2821_v1, %v10750_v30 }
0x15fb   :  { %3911 = vst.msk [vmem:[%s10949_s13 + $0x38] sm:$0xff] %vm280_vm2, %v3481_v49  ;;  %v3489_v11 = vpack.c.bf16 %v3481_v49, %v3481_v49  ;;  %v2833_v49 = vsel %vm204_vm1, %v2825_v45, 0.0 }
0x1612   :  { %v3456_v34 = vpop.xlane.xlu0 %3455 }
0x1613   :  { %9915 = vrcp.f32 %v3456_v34 }
0x1616   :  { %v3462_v9 = vpop.xlane.xlu0 %3461 }
0x1617   :  { %9917 = vrcp.f32 %v3462_v9 }
0x161a   :  { %v3827_v10 = vpop.permute.xlu0 %3826 }
0x161b   :  { %v3832_v29 = vsel %vm787_vm3, %v3827_v10, 0 }
0x161c   :  { %9085 = vmatpush3.bf16.msra.mxu0 %v3832_v29 }
0x161d   :  { %v9916_v2 = vpop.eup %9915  ;;  %9098 = vmatprep.subr.bf16.mxu0 %v10067_v0 }
0x161e   :  { %v3478_v16 = vmul.f32 %v9916_v2, %v10938_v38 }
0x161f   :  { %9087 = vmatmul.mubr.msk.bf16.vlgmr.msra.gmra.mrb[112].mxu0 %vm280_vm2, %v3489_v11 }
0x1620   :  { %3908 = vst.msk [vmem:[%s10949_s13 + $0x20] sm:$0xff] %vm280_vm2, %v3478_v16  ;;  %v3486_v57 = vpack.c.bf16 %v3478_v16, %v3478_v16  ;;  %9102 = vmatprep.mubr.msk.bf16.mxu0 %vm10069_vm0, %v10067_v0 }
0x1621   :  { %v9918_v17 = vpop.eup %9917 }
0x1622   :  { %v3480_v6 = vmul.f32 %v9918_v17, %v10942_v41  ;;  %9069 = vmatmul.mubr.msk.bf16.vlgmr.msra.gmra.mrb[104].mxu1 %vm280_vm2, %v3486_v57 }
0x1623   :  { %9079 = vmatpush3.bf16.msra.mxu1 %v3784_v5  ;;  %9080 = vmatprep.mubr.msk.bf16.mxu1 %vm10069_vm0, %v10067_v0 }
0x1624   :  { %3910 = vst.msk [vmem:[%s10949_s13 + $0x30] sm:$0xff] %vm280_vm2, %v3480_v6  ;;  %9090 = vmatprep.subr.bf16.mxu1 %v10067_v0  ;;  %v3488_v20 = vpack.c.bf16 %v3480_v6, %v3480_v6 }
0x162a   :  { %9081 = vmatmul.mubr.msk.bf16.vlgmr.msra.gmra.mrb[108].mxu1 %vm280_vm2, %v3488_v20 }
0x162b   :  { %9094 = vmatprep.mubr.msk.bf16.mxu1 %vm10069_vm0, %v10067_v0  ;;  %9091 = vmatpush3.bf16.msra.mxu1 %v9779_v46 }
0x162c   :  { %9092 = vmatprep.subr.bf16.mxu1 %v10067_v0 }
0x162f   :  { %9093 = vmatpush3.bf16.msra.mxu1 %v9780_v43 }
0x1630   :  { %9106 = vmatprep.subr.bf16.mxu1 %v10067_v0 }
0x1667   :  { %v11011_v22 = vpop.f32.mrb[96].mxu1 }
0x1668   :  { %v3580_v28 = vpop.f32.mrb[100].mxu0  ;;  %v9046_v23 = vpop.f32.mrb[97].mxu1 }
0x1669   :  { %v9052_v18 = vpop.f32.mrb[101].mxu0  ;;  %v3535_v19 = vpop.f32.mrb[98].mxu1 }
0x166a   :  { %v3583_v25 = vpop.f32.mrb[102].mxu0  ;;  %v9047_v26 = vpop.f32.mrb[99].mxu1 }
0x166b   :  { %v9053_v31 = vpop.f32.mrb[103].mxu0  ;;  %v8272_v25 = vld [vmem:[%s11046_s28] ss:$0 sm:$0xff] }
0x16c0   :  { %v3628_v32 = vpop.f32.mrb[100].mxu1 }
0x16c1   :  { %v3676_v35 = vpop.f32.mrb[104].mxu0  ;;  %v9058_v37 = vpop.f32.mrb[101].mxu1 }
0x16c2   :  { %v9622_v38 = vpack.i.bf16 %v3676_v35, %v3628_v32  ;;  %v9064_v39 = vpop.f32.mrb[105].mxu0  ;;  %v3631_v21 = vpop.f32.mrb[102].mxu1 }
0x16c3   :  { %v3679_v44 = vpop.f32.mrb[106].mxu0  ;;  %v9059_v41 = vpop.f32.mrb[103].mxu1 }
0x16c4   :  { %9623 = vrot.lane.b32.xlu1 %v9622_v38, %s12012_s27  ;;  %v9065_v13 = vpop.f32.mrb[107].mxu0 }
0x16c9   :  { %v3772_v24 = vpop.f32.mrb[108].mxu0 }
0x16ca   :  { %v9076_v42 = vpop.f32.mrb[109].mxu0 }
0x16cb   :  { %v3775_v33 = vpop.f32.mrb[110].mxu0 }
0x16cc   :  { %v9077_v40 = vpop.f32.mrb[111].mxu0 }
0x16f2   :  { %v3868_v47 = vpop.f32.mrb[112].mxu0 }
0x16f3   :  { %v9088_v48 = vpop.f32.mrb[113].mxu0 }
0x16f4   :  { %v3871_v61 = vpop.f32.mrb[114].mxu0 }
0x16f5   :  { %v3724_v62 = vpop.f32.mrb[104].mxu1  ;;  %v9089_v3 = vpop.f32.mrb[115].mxu0 }
0x16f6   :  { %v9627_v50 = vpack.i.bf16 %v3772_v24, %v3724_v62  ;;  %v9070_v51 = vpop.f32.mrb[105].mxu1 }
0x16f7   :  { %v3727_v52 = vpop.f32.mrb[106].mxu1 }
0x16f8   :  { %v9071_v53 = vpop.f32.mrb[107].mxu1  ;;  %9628 = vrot.lane.b32.xlu0 %v9627_v50, %s12010_s2 }
0x16fd   :  { %v3820_v54 = vpop.f32.mrb[108].mxu1 }
0x16fe   :  { %v9632_v56 = vpack.i.bf16 %v3868_v47, %v3820_v54  ;;  %v9082_v59 = vpop.f32.mrb[109].mxu1 }
0x16ff   :  { %v3823_v12 = vpop.f32.mrb[110].mxu1 }
0x1700   :  { %v9083_v7 = vpop.f32.mrb[111].mxu1  ;;  %9633 = vrot.lane.b32.xlu1 %v9632_v56, %s12008_s3 }
0x1717   :  { %2831 = vadd.xlane.f32.xlu0 %v2830_v63 }
0x1724   :  { %2834 = vadd.xlane.f32.xlu1 %v2833_v49 }
0x1736   :  { %v9624_v34 = vpop.permute.xlu1 %9623 }
0x1737   :  { %v9626_v10 = vunpack.i.h.bf16 %v9624_v34  ;;  %v9625_v29 = vunpack.i.l.bf16 %v9624_v34 }
0x1739   :  { %v3899_v14 = vsel %vm280_vm2, %v3580_v28, %v9626_v10  ;;  %v3898_v27 = vsel %vm280_vm2, %v11011_v22, %v9625_v29  ;;  %v9783_v29 = vld [vmem:[%s11076_s4] sm:$0xff]  }
0x173a   :  { %9099 = vmatpush3.bf16.msra.mxu0 %v9783_v29 }
0x173b   :  { %9100 = vmatprep.subr.bf16.mxu0 %v10067_v0 }
0x176a   :  { %v9629_v9 = vpop.permute.xlu0 %9628 }
0x176b   :  { %v9631_v2 = vunpack.i.h.bf16 %v9629_v9  ;;  %v9630_v11 = vunpack.i.l.bf16 %v9629_v9 }
0x176d   :  { %v3901_v8 = vsel %vm1193_vm4, %v3899_v14, %v9631_v2  ;;  %v3900_v30 = vsel %vm1193_vm4, %v3898_v27, %v9630_v11  ;;  %v9784_v2 = vld [vmem:[%s11076_s4 + $0x8] sm:$0xff]  }
0x176e   :  { %9101 = vmatpush3.bf16.msra.mxu0 %v9784_v2 }
0x176f   :  { %9114 = vmatprep.subr.bf16.mxu0 %v10067_v0 }
0x1772   :  { %v9634_v16 = vpop.permute.xlu1 %9633 }
0x1773   :  { %v9636_v15 = vunpack.i.h.bf16 %v9634_v16  ;;  %v9635_v57 = vunpack.i.l.bf16 %v9634_v16 }
0x1775   :  { %v3903_v17 = vsel %vm1196_vm5, %v3901_v8, %v9636_v15  ;;  %v3902_v5 = vsel %vm1196_vm5, %v3900_v30, %v9635_v57 }
0x1776   :  { %v3916_v6 = vpack.c.bf16 %v3903_v17, %v3902_v5 }
0x1778   :  { %9095 = vmatmul.mubr.msk.bf16.vlgmr.msra.gmra.mrb[112].mxu1 %vm204_vm1, %v3916_v6 }
0x1779   :  { %9110 = vmatprep.mubr.msk.bf16.mxu1 %vm10069_vm0, %v10067_v0 }
0x17a4   :  { %v2832_v20 = vpop.xlane.xlu0 %2831 }
0x17a5   :  { %v2836_v28 = vmul.f32 0.03125, %v2832_v20 }
0x17a7   :  { %v2838_v23 = vsub.f32 %v2824_v58, %v2836_v28  ;;  %v8277_v28 = vld [vmem:[%s11090_s19] ss:$0 sm:$0xff] }
0x17a9   :  { %v2840_v22 = vmul.f32 %v2838_v23, %v2838_v23 }
0x17ab   :  { %v2842_v18 = vsel %vm204_vm1, %v2840_v22, 0.0 }
0x17ac   :  { %2843 = vadd.xlane.f32.xlu1 %v2842_v18 }
0x17b1   :  { %v2835_v19 = vpop.xlane.xlu1 %2834 }
0x17b2   :  { %v2837_v31 = vmul.f32 0.03125, %v2835_v19 }
0x17b4   :  { %v2839_v44 = vsub.f32 %v2825_v45, %v2837_v31  ;;  %v8251_v45 = vld [vmem:[%s10480_s9 + $0x1] ss:$0 sm:$0xff]  ;;  %s10098_s9 = smov 21  }
0x17b5   :  { %s11085_s26 = sld [smem:[%s12007_s0 + %s10098_s9]]  }
0x17b6   :  { %v2841_v42 = vmul.f32 %v2839_v44, %v2839_v44  ;;  %s11122_s9 = sld [smem:[%s12007_s0 + %s12008_s3]]  }
0x17b8   :  { %v2845_v33 = vsel %vm204_vm1, %v2841_v42, 0.0 }
0x17bb   :  { %v8276_v17 = vld [vmem:[%s11085_s26] ss:$0 sm:$0xff] }
0x1839   :  { %v2844_v40 = vpop.xlane.xlu1 %2843 }
0x183a   :  { %v2848_v46 = vmul.f32 0.03125, %v2844_v40 }
0x183c   :  { %v2850_v61 = vadd.f32 1e-12, %v2848_v46 }
0x183e   :  { %9919 = vrsqrt.f32 %v2850_v61 }
0x1848   :  { %v9920_v7 = vpop.eup %9919 }
0x1849   :  { %v2854_v60 = vmul.f32 %v9920_v7, %v2838_v23 }
0x184b   :  { %v3973_v26 = vpop.f32.mrb[112].mxu1  ;;  %v2862_v63 = vmul.f32 %v8250_v55, %v2854_v60 }
0x184c   :  { %v3974_v32 = vadd.f32 %v8272_v25, %v3973_v26  ;;  %v9096_v35 = vpop.f32.mrb[113].mxu1 }
0x184d   :  { %v3976_v37 = vpop.f32.mrb[114].mxu1  ;;  %v2870_v34 = vadd.f32 %v8251_v45, %v2862_v63 }
0x184e   :  { %v3980_v38 = vadd.f32 %v3974_v32, %v10759_v36  ;;  %v3977_v39 = vadd.f32 %v8272_v25, %v3976_v37  ;;  %v9097_v21 = vpop.f32.mrb[115].mxu1  ;;  %v9781_v36 = vld [vmem:[%s11057_s12] sm:$0xff]  }
0x184f   :  { %9107 = vmatpush3.bf16.msra.mxu1 %v9781_v36  ;;  %v8282_v25 = vld [vmem:[%s11106_s25] ss:$0 sm:$0xff] }
0x1850   :  { %v3981_v41 = vadd.f32 %v3977_v39, %v10761_v4  ;;  %v3984_v13 = vsel %vm204_vm1, %v3980_v38, 0.0  ;;  %v9782_v4 = vld [vmem:[%s11057_s12 + $0x8] sm:$0xff]   ;;  %9108 = vmatprep.subr.bf16.mxu1 %v10067_v0 }
0x1851   :  { %3985 = vadd.xlane.f32.xlu0 %v3984_v13 }
0x1852   :  { %v3987_v24 = vsel %vm204_vm1, %v3981_v41, 0.0 }
0x1853   :  { %9109 = vmatpush3.bf16.msra.mxu1 %v9782_v4 }
0x1854   :  { %9120 = vmatprep.subr.bf16.mxu1 %v10067_v0 }
0x1855   :  { %3988 = vadd.xlane.f32.xlu0 %v3987_v24 }
0x1859   :  { %2846 = vadd.xlane.f32.xlu0 %v2845_v33  ;;  %v8278_v33 = vld [vmem:[%s11122_s9] ss:$0 sm:$0xff] }
0x18de   :  { %v3986_v47 = vpop.xlane.xlu0 %3985 }
0x18df   :  { %v3990_v48 = vmul.f32 0.03125, %v3986_v47 }
0x18e1   :  { %v3992_v62 = vsub.f32 %v3980_v38, %v3990_v48 }
0x18e2   :  { %v3989_v3 = vpop.xlane.xlu0 %3988 }
0x18e3   :  { %v3991_v43 = vmul.f32 0.03125, %v3989_v3  ;;  %v3994_v50 = vmul.f32 %v3992_v62, %v3992_v62 }
0x18e5   :  { %v3993_v51 = vsub.f32 %v3981_v41, %v3991_v43  ;;  %v3996_v52 = vsel %vm204_vm1, %v3994_v50, 0.0 }
0x18e6   :  { %3997 = vadd.xlane.f32.xlu1 %v3996_v52  ;;  %v2847_v53 = vpop.xlane.xlu0 %2846 }
0x18e7   :  { %v2849_v54 = vmul.f32 0.03125, %v2847_v53  ;;  %v3995_v56 = vmul.f32 %v3993_v51, %v3993_v51 }
0x18e9   :  { %v2851_v59 = vadd.f32 1e-12, %v2849_v54  ;;  %v3999_v12 = vsel %vm204_vm1, %v3995_v56, 0.0 }
0x18ea   :  { %4000 = vadd.xlane.f32.xlu0 %v3999_v12 }
0x18eb   :  { %9921 = vrsqrt.f32 %v2851_v59 }
0x18f5   :  { %v9922_v58 = vpop.eup %9921 }
0x18f6   :  { %v2855_v1 = vmul.f32 %v9922_v58, %v2839_v44 }
0x18f8   :  { %v2863_v49 = vmul.f32 %v8250_v55, %v2855_v1 }
0x18fa   :  { %v2871_v9 = vadd.f32 %v8251_v45, %v2863_v49 }
0x18fc   :  { %v11067_v10 = vpack.c.bf16 %v2871_v9, %v2870_v34 }
0x18fe   :  { %9111 = vmatmul.mubr.msk.bf16.vlgmr.msra.gmra.mrb[116].mxu1 %vm204_vm1, %v11067_v10 }
0x18ff   :  { %9122 = vmatprep.mubr.msk.bf16.mxu1 %vm10069_vm0, %v10067_v0 }
0x1973   :  { %v3998_v11 = vpop.xlane.xlu1 %3997 }
0x1974   :  { %v4002_v16 = vmul.f32 0.03125, %v3998_v11 }
0x1976   :  { %v4004_v14 = vadd.f32 1e-12, %v4002_v16 }
0x1977   :  { %v4001_v27 = vpop.xlane.xlu0 %4000 }
0x1978   :  { %9923 = vrsqrt.f32 %v4004_v14  ;;  %v4003_v15 = vmul.f32 0.03125, %v4001_v27 }
0x197a   :  { %v4005_v57 = vadd.f32 1e-12, %v4003_v15 }
0x197c   :  { %9925 = vrsqrt.f32 %v4005_v57 }
0x1982   :  { %v9924_v8 = vpop.eup %9923 }
0x1983   :  { %v4008_v30 = vmul.f32 %v9924_v8, %v3992_v62 }
0x1985   :  { %v4016_v6 = vmul.f32 %v8276_v17, %v4008_v30 }
0x1986   :  { %v9926_v5 = vpop.eup %9925 }
0x1987   :  { %v4009_v20 = vmul.f32 %v9926_v5, %v3993_v51  ;;  %v11094_v22 = vadd.f32 %v8277_v28, %v4016_v6 }
0x1989   :  { %v4017_v23 = vmul.f32 %v8276_v17, %v4009_v20 }
0x198b   :  { %v11096_v18 = vadd.f32 %v8277_v28, %v4017_v23 }
0x198d   :  { %v4030_v19 = vpack.c.bf16 %v11096_v18, %v11094_v22 }
0x198f   :  { %9103 = vmatmul.mubr.msk.bf16.vlgmr.msra.gmra.mrb[116].mxu0 %vm204_vm1, %v4030_v19 }
0x1990   :  { %9116 = vmatprep.mubr.msk.bf16.mxu0 %vm10069_vm0, %v10067_v0 }
0x19d1   :  { %v4155_v26 = vpop.f32.mrb[116].mxu1 }
0x19d2   :  { %v4156_v31 = vadd.f32 %v8282_v25, %v4155_v26  ;;  %v9112_v32 = vpop.f32.mrb[117].mxu1 }
0x19d3   :  { %v4158_v35 = vpop.f32.mrb[118].mxu1 }
0x19d4   :  { %v4159_v37 = vadd.f32 %v8282_v25, %v4158_v35  ;;  %v9113_v38 = vpop.f32.mrb[119].mxu1  ;;  %v4210_v39 = vpack.c.bf16 %v4156_v31, %v4156_v31  ;;  %v2882_v25 = vld [vmem:[%s11189_s24] sm:$0xff] }
0x19d5   :  { %v2883_v38 = vld [vmem:[%s11189_s24 + $0x8] sm:$0xff] }
0x19d6   :  { %v4222_v21 = vsel %vm280_vm2, %v4210_v39, 0  ;;  %v9637_v44 = vpack.i.bf16 %v4159_v37, %v4156_v31  ;;  %v11110_v41 = vpack.c.bf16 %v4159_v37, %v4159_v37 }
0x19d7   :  { %9115 = vmatpush3.bf16.xpose.msra.mxu0 %v4222_v21 }
0x19d8   :  { %9638 = vrot.lane.b32.xlu1 %v9637_v44, %s12020_s15  ;;  %v4268_v13 = vsel %vm280_vm2, %v11110_v41, 0  ;;  %9126 = vmatprep.subr.bf16.mxu0 %v10067_v0 }
0x19d9   :  { %9121 = vmatpush3.bf16.xpose.msra.mxu1 %v4268_v13 }
0x19da   :  { %9132 = vmatprep.subr.bf16.mxu1 %v10067_v0 }
0x19dc   :  { %9648 = vrot.lane.b32.xlu1 %v9637_v44, %s10074_s17 }
0x1a4a   :  { %v9639_v24 = vpop.permute.xlu1 %9638 }
0x1a4b   :  { %v9640_v42 = vunpack.i.l.bf16 %v9639_v24  ;;  %v9641_v36 = vunpack.i.h.bf16 %v9639_v24 }
0x1a4d   :  { %v11125_v4 = vpack.c.bf16 %v9640_v42, %v9640_v42  ;;  %v11127_v43 = vpack.c.bf16 %v9641_v36, %v9641_v36 }
0x1a4e   :  { %v9649_v54 = vpop.permute.xlu1 %9648 }
0x1a4f   :  { %v4314_v50 = vsel %vm280_vm2, %v11125_v4, 0  ;;  %v4360_v53 = vsel %vm280_vm2, %v11127_v43, 0  ;;  %v9651_v56 = vunpack.i.h.bf16 %v9649_v54  ;;  %v9650_v59 = vunpack.i.l.bf16 %v9649_v54 }
0x1a51   :  { %v11146_v7 = vpack.c.bf16 %v9651_v56, %v9651_v56  ;;  %v11148_v60 = vpack.c.bf16 %v9650_v59, %v9650_v59 }
0x1a53   :  { %v4406_v29 = vsel %vm280_vm2, %v11148_v60, 0  ;;  %v4452_v2 = vsel %vm280_vm2, %v11146_v7, 0 }
0x1a62   :  { %v4087_v40 = vpop.f32.mrb[116].mxu0 }
0x1a63   :  { %v4088_v46 = vadd.f32 %v8278_v33, %v4087_v40  ;;  %v9104_v47 = vpop.f32.mrb[117].mxu0 }
0x1a64   :  { %v4090_v48 = vpop.f32.mrb[118].mxu0 }
0x1a65   :  { %v4202_v61 = vpack.c.bf16 %v4088_v46, %v4088_v46  ;;  %v4091_v62 = vadd.f32 %v8278_v33, %v4090_v48  ;;  %v9105_v3 = vpop.f32.mrb[119].mxu0  ;;  %v2885_v48 = vld [vmem:[%s11189_s24 + $0x18] sm:$0xff] }
0x1a67   :  { %v4203_v51 = vpack.c.bf16 %v4091_v62, %v4091_v62  ;;  %9117 = vmatmul.mubr.msk.bf16.vlgmr.msra.gmra.mrb[120].mxu0 %vm280_vm2, %v4202_v61  ;;  %v9652_v52 = vpack.i.bf16 %v4091_v62, %v4088_v46  ;;  %v2884_v46 = vld [vmem:[%s11189_s24 + $0x10] sm:$0xff] }
0x1a68   :  { %9127 = vmatpush3.bf16.xpose.msra.mxu0 %v4314_v50  ;;  %9128 = vmatprep.mubr.msk.bf16.mxu0 %vm10069_vm0, %v10067_v0 }
0x1a69   :  { %9653 = vrot.lane.b32.xlu1 %v9652_v52, %s10074_s17  ;;  %9643 = vrot.lane.b32.xlu0 %v9652_v52, %s12020_s15 }
0x1a6a   :  { %9123 = vmatmul.mubr.msk.bf16.vlgmr.msra.gmra.mrb[120].mxu1 %vm280_vm2, %v4203_v51  ;;  %9138 = vmatprep.subr.bf16.mxu0 %v10067_v0 }
0x1a6b   :  { %9133 = vmatpush3.bf16.xpose.msra.mxu1 %v4360_v53  ;;  %9134 = vmatprep.mubr.msk.bf16.mxu1 %vm10069_vm0, %v10067_v0 }
0x1a6c   :  { %9144 = vmatprep.subr.bf16.mxu1 %v10067_v0 }
0x1a6d   :  { %9663 = vrot.lane.b32.xlu1 %v9652_v52, %s12018_s14  ;;  %9658 = vrot.lane.b32.xlu0 %v9637_v44, %s12018_s14  ;;  %s12022_s14 = smov 120  }
0x1a71   :  { %4699 = vrot.lane.b32.xlu1 %v4210_v39, %s12016_s16 }
0x1adb   :  { %v9644_v12 = vpop.permute.xlu0 %9643  ;;  %v9654_v45 = vpop.permute.xlu1 %9653 }
0x1adc   :  { %v9646_v55 = vunpack.i.h.bf16 %v9644_v12  ;;  %v9645_v58 = vunpack.i.l.bf16 %v9644_v12  ;;  %v9656_v11 = vunpack.i.h.bf16 %v9654_v45  ;;  %v9655_v16 = vunpack.i.l.bf16 %v9654_v45 }
0x1ade   :  { %v4205_v63 = vpack.c.bf16 %v9646_v55, %v9646_v55  ;;  %v4204_v1 = vpack.c.bf16 %v9645_v58, %v9645_v58  ;;  %v4207_v15 = vpack.c.bf16 %v9656_v11, %v9656_v11  ;;  %v4206_v57 = vpack.c.bf16 %v9655_v16, %v9655_v16  ;;  %v2886_v58 = vld [vmem:[%s11189_s24 + $0x20] sm:$0xff] }
0x1adf   :  { %v9659_v49 = vpop.permute.xlu0 %9658  ;;  %v9664_v8 = vpop.permute.xlu1 %9663 }
0x1ae0   :  { %v9661_v34 = vunpack.i.h.bf16 %v9659_v49  ;;  %v9660_v9 = vunpack.i.l.bf16 %v9659_v49  ;;  %9129 = vmatmul.mubr.msk.bf16.vlgmr.msra.gmra.mrb[124].mxu0 %vm280_vm2, %v4204_v1  ;;  %9135 = vmatmul.mubr.msk.bf16.vlgmr.msra.gmra.mrb[124].mxu1 %vm280_vm2, %v4205_v63  ;;  %v9666_v5 = vunpack.i.h.bf16 %v9664_v8  ;;  %v9665_v6 = vunpack.i.l.bf16 %v9664_v8  ;;  %v2887_v1 = vld [vmem:[%s11189_s24 + $0x28] sm:$0xff] }
0x1ae1   :  { %9139 = vmatpush3.bf16.xpose.msra.mxu0 %v4406_v29  ;;  %9145 = vmatpush3.bf16.xpose.msra.mxu1 %v4452_v2 }
0x1ae2   :  { %9140 = vmatprep.mubr.msk.bf16.mxu0 %vm10069_vm0, %v10067_v0  ;;  %9146 = vmatprep.mubr.msk.bf16.mxu1 %vm10069_vm0, %v10067_v0  ;;  %v11161_v14 = vpack.c.bf16 %v9661_v34, %v9661_v34  ;;  %v11163_v27 = vpack.c.bf16 %v9660_v9, %v9660_v9  ;;  %v4209_v28 = vpack.c.bf16 %v9666_v5, %v9666_v5 }
0x1ae3   :  { %9150 = vmatprep.subr.bf16.mxu0 %v10067_v0  ;;  %9156 = vmatprep.subr.bf16.mxu1 %v10067_v0  ;;  %v4700_v20 = vpop.permute.xlu1 %4699  ;;  %v4208_v23 = vpack.c.bf16 %v9665_v6, %v9665_v6  ;;  %v2888_v6 = vld [vmem:[%s11189_s24 + $0x30] sm:$0xff] }
0x1ae4   :  { %v4498_v30 = vsel %vm280_vm2, %v11163_v27, 0  ;;  %v4544_v17 = vsel %vm280_vm2, %v11161_v14, 0  ;;  %v4705_v19 = vsel %vm787_vm3, %v4700_v20, 0 }
0x1ae8   :  { %9141 = vmatmul.mubr.msk.bf16.vlgmr.msra.gmra.mrb[128].mxu0 %vm280_vm2, %v4206_v57  ;;  %9147 = vmatmul.mubr.msk.bf16.vlgmr.msra.gmra.mrb[128].mxu1 %vm280_vm2, %v4207_v15 }
0x1ae9   :  { %9151 = vmatpush3.bf16.xpose.msra.mxu0 %v4498_v30  ;;  %9157 = vmatpush3.bf16.xpose.msra.mxu1 %v4544_v17 }
0x1aea   :  { %9152 = vmatprep.mubr.msk.bf16.mxu0 %vm10069_vm0, %v10067_v0  ;;  %9158 = vmatprep.mubr.msk.bf16.mxu1 %vm10069_vm0, %v10067_v0 }
0x1aeb   :  { %9162 = vmatprep.subr.bf16.mxu0 %v10067_v0  ;;  %9168 = vmatprep.subr.bf16.mxu1 %v10067_v0 }
0x1af0   :  { %9153 = vmatmul.mubr.msk.bf16.vlgmr.msra.gmra.mrb[132].mxu0 %vm280_vm2, %v4208_v23  ;;  %9159 = vmatmul.mubr.msk.bf16.vlgmr.msra.gmra.mrb[132].mxu1 %vm280_vm2, %v4209_v28  ;;  %v2889_v28 = vld [vmem:[%s11189_s24 + $0x38] sm:$0xff] }
0x1af1   :  { %9163 = vmatpush3.bf16.msra.mxu0 %v4705_v19  ;;  %9170 = vmatprep.mubr.msk.bf16.mxu1 %vm10069_vm0, %v10067_v0 }
0x1af2   :  { %9164 = vmatprep.mubr.msk.bf16.mxu0 %vm10069_vm0, %v10067_v0  ;;  %9174 = vmatprep.subr.bf16.mxu0 %v10067_v0 }
0x1b3a   :  { %v4258_v26 = vpop.f32.mrb[120].mxu0 }
0x1b3b   :  { %v4586_v31 = vmul.f32 0.35355338, %v4258_v26  ;;  %v9118_v32 = vpop.f32.mrb[121].mxu0 }
0x1b3c   :  { %v4261_v35 = vpop.f32.mrb[122].mxu0 }
0x1b3d   :  { %v11192_v37 = vadd.f32 %v4586_v31, %v2882_v25  ;;  %v4304_v39 = vpop.f32.mrb[120].mxu1  ;;  %v9119_v21 = vpop.f32.mrb[123].mxu0 }
0x1b3e   :  { %v4587_v44 = vmul.f32 0.35355338, %v4304_v39  ;;  %v9124_v13 = vpop.f32.mrb[121].mxu1 }
0x1b3f   :  { %v4307_v24 = vpop.f32.mrb[122].mxu1  ;;  %v4602_v42 = vsel %vm280_vm2, %v11192_v37, -inf }
0x1b40   :  { %v11197_v33 = vadd.f32 %v4587_v44, %v2883_v38  ;;  %v9125_v36 = vpop.f32.mrb[123].mxu1  ;;  %4603 = vmax.xlane.f32.xlu0 %v4602_v42 }
0x1b42   :  { %v4605_v40 = vsel %vm280_vm2, %v11197_v33, -inf }
0x1b43   :  { %4606 = vmax.xlane.f32.xlu1 %v4605_v40 }
0x1bb3   :  { %v4350_v47 = vpop.f32.mrb[124].mxu0  ;;  %v4396_v61 = vpop.f32.mrb[124].mxu1 }
0x1bb4   :  { %v4588_v62 = vmul.f32 0.35355338, %v4350_v47  ;;  %v4589_v3 = vmul.f32 0.35355338, %v4396_v61  ;;  %v9130_v50 = vpop.f32.mrb[125].mxu0  ;;  %v9136_v51 = vpop.f32.mrb[125].mxu1 }
0x1bb5   :  { %v4353_v52 = vpop.f32.mrb[126].mxu0  ;;  %v4399_v53 = vpop.f32.mrb[126].mxu1 }
0x1bb6   :  { %v11203_v54 = vadd.f32 %v4588_v62, %v2884_v46  ;;  %v9131_v56 = vpop.f32.mrb[127].mxu0  ;;  %v9137_v59 = vpop.f32.mrb[127].mxu1  ;;  %v11205_v12 = vadd.f32 %v4589_v3, %v2885_v48 }
0x1bb8   :  { %v4608_v55 = vsel %vm280_vm2, %v11203_v54, -inf  ;;  %v4611_v49 = vsel %vm280_vm2, %v11205_v12, -inf }
0x1bb9   :  { %4609 = vmax.xlane.f32.xlu0 %v4608_v55 }
0x1bbb   :  { %v4442_v63 = vpop.f32.mrb[128].mxu0  ;;  %v4488_v45 = vpop.f32.mrb[128].mxu1 }
0x1bbc   :  { %v4590_v34 = vmul.f32 0.35355338, %v4442_v63  ;;  %v4591_v9 = vmul.f32 0.35355338, %v4488_v45  ;;  %v9142_v29 = vpop.f32.mrb[129].mxu0  ;;  %v9148_v2 = vpop.f32.mrb[129].mxu1 }
0x1bbd   :  { %v4491_v11 = vpop.f32.mrb[130].mxu1  ;;  %4612 = vmax.xlane.f32.xlu0 %v4611_v49  ;;  %v4445_v16 = vpop.f32.mrb[130].mxu0 }
0x1bbe   :  { %v11213_v15 = vadd.f32 %v4590_v34, %v2886_v58  ;;  %v11215_v57 = vadd.f32 %v4591_v9, %v2887_v1  ;;  %v9143_v8 = vpop.f32.mrb[131].mxu0  ;;  %v9149_v30 = vpop.f32.mrb[131].mxu1 }
0x1bc0   :  { %v4617_v17 = vsel %vm280_vm2, %v11215_v57, -inf  ;;  %v4614_v5 = vsel %vm280_vm2, %v11213_v15, -inf }
0x1bc1   :  { %4618 = vmax.xlane.f32.xlu0 %v4617_v17  ;;  %4615 = vmax.xlane.f32.xlu1 %v4614_v5 }
0x1bc3   :  { %v4534_v20 = vpop.f32.mrb[132].mxu0  ;;  %v4580_v23 = vpop.f32.mrb[132].mxu1 }
0x1bc4   :  { %v4592_v19 = vmul.f32 0.35355338, %v4534_v20  ;;  %v4593_v25 = vmul.f32 0.35355338, %v4580_v23  ;;  %v9154_v26 = vpop.f32.mrb[133].mxu0  ;;  %v9160_v31 = vpop.f32.mrb[133].mxu1 }
0x1bc5   :  { %v4537_v32 = vpop.f32.mrb[134].mxu0  ;;  %v4583_v35 = vpop.f32.mrb[134].mxu1 }
0x1bc6   :  { %v4600_v38 = vadd.f32 %v4592_v19, %v2888_v6  ;;  %v4601_v39 = vadd.f32 %v4593_v25, %v2889_v28  ;;  %v9155_v21 = vpop.f32.mrb[135].mxu0  ;;  %v9161_v44 = vpop.f32.mrb[135].mxu1 }
0x1bc8   :  { %v4623_v13 = vsel %vm280_vm2, %v4601_v39, -inf  ;;  %v4620_v24 = vsel %vm280_vm2, %v4600_v38, -inf }
0x1bc9   :  { %4624 = vmax.xlane.f32.xlu0 %v4623_v13  ;;  %4621 = vmax.xlane.f32.xlu1 %v4620_v24 }
0x1bcd   :  { %v4604_v40 = vpop.xlane.xlu0 %4603 }
0x1bce   :  { %v4626_v46 = vsub.f32 %v11192_v37, %v4604_v40 }
0x1bd0   :  { %v4607_v42 = vpop.xlane.xlu1 %4606  ;;  %v4634_v48 = vmul.f32 1.442695, %v4626_v46 }
0x1bd1   :  { %v4627_v36 = vsub.f32 %v11197_v33, %v4607_v42 }
0x1bd3   :  { %v4636_v47 = vmul.f32 1.442695, %v4627_v36 }
0x1bd5   :  { %9927 = vpow2.f32 %v4636_v47 }
0x1bd6   :  { %9929 = vpow2.f32 %v4634_v48 }
0x1bda   :  { %4797 = vrot.lane.b32.xlu1 %v11125_v4, %s12016_s16 }
0x1bde   :  { %4846 = vrot.lane.b32.xlu1 %v11127_v43, %s12016_s16 }
0x1bdf   :  { %4748 = vrot.lane.b32.xlu0 %v11110_v41, %s12016_s16  ;;  %v11233_v61 = vpop.eup %9927 }
0x1be0   :  { %v4653_v4 = vsel %vm280_vm2, %v11233_v61, 0.0  ;;  %v11237_v62 = vpop.eup %9929 }
0x1be1   :  { %v4650_v41 = vsel %vm280_vm2, %v11237_v62, 0.0 }
0x1bfe   :  { %4654 = vadd.xlane.f32.xlu0 %v4653_v4 }
0x1c02   :  { %4651 = vadd.xlane.f32.xlu1 %v4650_v41 }
0x1c46   :  { %v4610_v43 = vpop.xlane.xlu0 %4609 }
0x1c47   :  { %v4628_v33 = vsub.f32 %v11203_v54, %v4610_v43 }
0x1c49   :  { %v4638_v37 = vmul.f32 1.442695, %v4628_v33 }
0x1c4a   :  { %v4613_v3 = vpop.xlane.xlu0 %4612 }
0x1c4b   :  { %9931 = vpow2.f32 %v4638_v37  ;;  %v4629_v50 = vsub.f32 %v11205_v12, %v4613_v3 }
0x1c4d   :  { %v4640_v51 = vmul.f32 1.442695, %v4629_v50 }
0x1c4e   :  { %v4619_v52 = vpop.xlane.xlu0 %4618  ;;  %v4616_v12 = vpop.xlane.xlu1 %4615 }
0x1c4f   :  { %9933 = vpow2.f32 %v4640_v51  ;;  %v4630_v1 = vsub.f32 %v11213_v15, %v4616_v12  ;;  %v4631_v49 = vsub.f32 %v11215_v57, %v4619_v52 }
0x1c51   :  { %v4642_v34 = vmul.f32 1.442695, %v4630_v1  ;;  %v4644_v29 = vmul.f32 1.442695, %v4631_v49 }
0x1c53   :  { %9935 = vpow2.f32 %v4642_v34 }
0x1c54   :  { %9937 = vpow2.f32 %v4644_v29 }
0x1c55   :  { %v11243_v53 = vpop.eup %9931 }
0x1c56   :  { %v4625_v56 = vpop.xlane.xlu0 %4624  ;;  %v4656_v59 = vsel %vm280_vm2, %v11243_v53, 0.0  ;;  %v4622_v45 = vpop.xlane.xlu1 %4621 }
0x1c57   :  { %4657 = vadd.xlane.f32.xlu1 %v4656_v59  ;;  %v4632_v9 = vsub.f32 %v4600_v38, %v4622_v45  ;;  %v4633_v2 = vsub.f32 %v4601_v39, %v4625_v56 }
0x1c59   :  { %v11247_v55 = vpop.eup %9933  ;;  %v4646_v11 = vmul.f32 1.442695, %v4632_v9  ;;  %v4648_v16 = vmul.f32 1.442695, %v4633_v2 }
0x1c5a   :  { %v4749_v58 = vpop.permute.xlu0 %4748  ;;  %v4659_v54 = vsel %vm280_vm2, %v11247_v55, 0.0  ;;  %v4798_v8 = vpop.permute.xlu1 %4797 }
0x1c5b   :  { %v4754_v63 = vsel %vm787_vm3, %v4749_v58, 0  ;;  %4660 = vadd.xlane.f32.xlu0 %v4659_v54  ;;  %9939 = vpow2.f32 %v4646_v11  ;;  %v4803_v39 = vsel %vm787_vm3, %v4798_v8, 0 }
0x1c5c   :  { %9169 = vmatpush3.bf16.msra.mxu1 %v4754_v63  ;;  %9941 = vpow2.f32 %v4648_v16 }
0x1c5d   :  { %9180 = vmatprep.subr.bf16.mxu1 %v10067_v0 }
0x1c5e   :  { %v4847_v30 = vpop.permute.xlu1 %4846 }
0x1c5f   :  { %v4852_v32 = vsel %vm787_vm3, %v4847_v30, 0 }
0x1c68   :  { %4944 = vrot.lane.b32.xlu1 %v11146_v7, %s12016_s16  ;;  %v11259_v7 = vpop.eup %9935 }
0x1c69   :  { %v4662_v57 = vsel %vm280_vm2, %v11259_v7, 0.0 }
0x1c71   :  { %4895 = vrot.lane.b32.xlu0 %v11148_v60, %s12016_s16  ;;  %v11261_v60 = vpop.eup %9937 }
0x1c72   :  { %v11265_v17 = vpop.eup %9939  ;;  %v4665_v6 = vsel %vm280_vm2, %v11261_v60, 0.0 }
0x1c73   :  { %v4668_v20 = vsel %vm280_vm2, %v11265_v17, 0.0  ;;  %v11271_v28 = vpop.eup %9941 }
0x1c74   :  { %v4671_v23 = vsel %vm280_vm2, %v11271_v28, 0.0 }
0x1c8b   :  { %v4655_v15 = vpop.xlane.xlu0 %4654 }
0x1c8c   :  { %9943 = vrcp.f32 %v4655_v15  ;;  %4663 = vadd.xlane.f32.xlu1 %v4662_v57 }
0x1c8f   :  { %v4652_v5 = vpop.xlane.xlu1 %4651 }
0x1c90   :  { %9945 = vrcp.f32 %v4652_v5  ;;  %4666 = vadd.xlane.f32.xlu0 %v4665_v6  ;;  %4669 = vadd.xlane.f32.xlu1 %v4668_v20 }
0x1c94   :  { %4672 = vadd.xlane.f32.xlu0 %v4671_v23 }
0x1c96   :  { %v9944_v19 = vpop.eup %9943 }
0x1c97   :  { %v4683_v25 = vmul.f32 %v9944_v19, %v11233_v61 }
0x1c99   :  { %5121 = vst.msk [vmem:[%s11276_s21 + $0x8] sm:$0xff] %vm280_vm2, %v4683_v25  ;;  %v4691_v26 = vpack.c.bf16 %v4683_v25, %v4683_v25 }
0x1c9a   :  { %v9946_v31 = vpop.eup %9945 }
0x1c9b   :  { %v4682_v35 = vmul.f32 %v9946_v31, %v11237_v62  ;;  %9171 = vmatmul.mubr.msk.bf16.vlgmr.msra.gmra.mrb[136].mxu1 %vm280_vm2, %v4691_v26  ;;  %v9786_v31 = vld [vmem:[%s11348_s22 + $0x8] sm:$0xff]  }
0x1c9c   :  { %9181 = vmatpush3.bf16.msra.mxu1 %v4852_v32  ;;  %9182 = vmatprep.mubr.msk.bf16.mxu1 %vm10069_vm0, %v10067_v0 }
0x1c9d   :  { %5120 = vst.msk [vmem:[%s11276_s21] sm:$0xff] %vm280_vm2, %v4682_v35  ;;  %v4690_v38 = vpack.c.bf16 %v4682_v35, %v4682_v35  ;;  %9192 = vmatprep.subr.bf16.mxu1 %v10067_v0 }
0x1c9f   :  { %9165 = vmatmul.mubr.msk.bf16.vlgmr.msra.gmra.mrb[136].mxu0 %vm280_vm2, %v4690_v38 }
0x1ca0   :  { %9175 = vmatpush3.bf16.msra.mxu0 %v4803_v39  ;;  %9176 = vmatprep.mubr.msk.bf16.mxu0 %vm10069_vm0, %v10067_v0 }
0x1ca1   :  { %5042 = vrot.lane.b32.xlu1 %v11161_v14, %s12016_s16  ;;  %9186 = vmatprep.subr.bf16.mxu0 %v10067_v0 }
0x1caa   :  { %4993 = vrot.lane.b32.xlu0 %v11163_v27, %s12016_s16  ;;  %s12023_s16 = smov 104  }
0x1ce4   :  { %v4658_v21 = vpop.xlane.xlu1 %4657 }
0x1ce5   :  { %9947 = vrcp.f32 %v4658_v21 }
0x1ce8   :  { %v4661_v44 = vpop.xlane.xlu0 %4660  ;;  %v4945_v27 = vpop.permute.xlu1 %4944 }
0x1ce9   :  { %9949 = vrcp.f32 %v4661_v44  ;;  %v4950_v48 = vsel %vm787_vm3, %v4945_v27, 0 }
0x1cec   :  { %v4896_v42 = vpop.permute.xlu0 %4895 }
0x1ced   :  { %v4901_v46 = vsel %vm787_vm3, %v4896_v42, 0 }
0x1cef   :  { %v9948_v13 = vpop.eup %9947 }
0x1cf0   :  { %v4684_v24 = vmul.f32 %v9948_v13, %v11243_v53 }
0x1cf2   :  { %5122 = vst.msk [vmem:[%s11276_s21 + $0x10] sm:$0xff] %vm280_vm2, %v4684_v24  ;;  %v4692_v36 = vpack.c.bf16 %v4684_v24, %v4684_v24 }
0x1cf3   :  { %v9950_v40 = vpop.eup %9949 }
0x1cf4   :  { %v4685_v14 = vmul.f32 %v9950_v40, %v11247_v55  ;;  %9177 = vmatmul.mubr.msk.bf16.vlgmr.msra.gmra.mrb[140].mxu0 %vm280_vm2, %v4692_v36 }
0x1cf5   :  { %9187 = vmatpush3.bf16.msra.mxu0 %v4901_v46  ;;  %9188 = vmatprep.mubr.msk.bf16.mxu0 %vm10069_vm0, %v10067_v0 }
0x1cf6   :  { %5123 = vst.msk [vmem:[%s11276_s21 + $0x18] sm:$0xff] %vm280_vm2, %v4685_v14  ;;  %v4693_v47 = vpack.c.bf16 %v4685_v14, %v4685_v14  ;;  %9198 = vmatprep.subr.bf16.mxu0 %v10067_v0 }
0x1cf8   :  { %9183 = vmatmul.mubr.msk.bf16.vlgmr.msra.gmra.mrb[140].mxu1 %vm280_vm2, %v4693_v47 }
0x1cf9   :  { %9193 = vmatpush3.bf16.msra.mxu1 %v4950_v48  ;;  %9194 = vmatprep.mubr.msk.bf16.mxu1 %vm10069_vm0, %v10067_v0 }
0x1cfa   :  { %9204 = vmatprep.subr.bf16.mxu1 %v10067_v0 }
0x1d19   :  { %v4664_v61 = vpop.xlane.xlu1 %4663 }
0x1d1a   :  { %9951 = vrcp.f32 %v4664_v61 }
0x1d1d   :  { %v4667_v4 = vpop.xlane.xlu0 %4666  ;;  %v4670_v62 = vpop.xlane.xlu1 %4669 }
0x1d1e   :  { %9953 = vrcp.f32 %v4667_v4 }
0x1d1f   :  { %9955 = vrcp.f32 %v4670_v62 }
0x1d21   :  { %v4673_v41 = vpop.xlane.xlu0 %4672  ;;  %v5043_v59 = vpop.permute.xlu1 %5042 }
0x1d22   :  { %9957 = vrcp.f32 %v4673_v41  ;;  %v5048_v63 = vsel %vm787_vm3, %v5043_v59, 0  ;;  %v8302_v59 = vld [vmem:[%s11368_s20] ss:$0 sm:$0xff] }
0x1d24   :  { %v9952_v43 = vpop.eup %9951 }
0x1d25   :  { %v4686_v33 = vmul.f32 %v9952_v43, %v11259_v7  ;;  %v4994_v37 = vpop.permute.xlu0 %4993 }
0x1d26   :  { %v4999_v53 = vsel %vm787_vm3, %v4994_v37, 0 }
0x1d27   :  { %5124 = vst.msk [vmem:[%s11276_s21 + $0x20] sm:$0xff] %vm280_vm2, %v4686_v33  ;;  %v4694_v3 = vpack.c.bf16 %v4686_v33, %v4686_v33 }
0x1d28   :  { %v9954_v50 = vpop.eup %9953 }
0x1d29   :  { %v9956_v51 = vpop.eup %9955  ;;  %v4687_v52 = vmul.f32 %v9954_v50, %v11261_v60  ;;  %9189 = vmatmul.mubr.msk.bf16.vlgmr.msra.gmra.mrb[144].mxu0 %vm280_vm2, %v4694_v3 }
0x1d2a   :  { %v4688_v56 = vmul.f32 %v9956_v51, %v11265_v17  ;;  %9199 = vmatpush3.bf16.msra.mxu0 %v4999_v53  ;;  %9200 = vmatprep.mubr.msk.bf16.mxu0 %vm10069_vm0, %v10067_v0 }
0x1d2b   :  { %5125 = vst.msk [vmem:[%s11276_s21 + $0x28] sm:$0xff] %vm280_vm2, %v4687_v52  ;;  %v4695_v55 = vpack.c.bf16 %v4687_v52, %v4687_v52  ;;  %9210 = vmatprep.subr.bf16.mxu0 %v10067_v0 }
0x1d2c   :  { %v9958_v58 = vpop.eup %9957  ;;  %5126 = vst.msk [vmem:[%s11276_s21 + $0x30] sm:$0xff] %vm280_vm2, %v4688_v56  ;;  %v4696_v12 = vpack.c.bf16 %v4688_v56, %v4688_v56 }
0x1d2d   :  { %v4689_v54 = vmul.f32 %v9958_v58, %v11271_v28  ;;  %9195 = vmatmul.mubr.msk.bf16.vlgmr.msra.gmra.mrb[144].mxu1 %vm280_vm2, %v4695_v55  ;;  %v9785_v28 = vld [vmem:[%s11348_s22] sm:$0xff]  }
0x1d2e   :  { %9205 = vmatpush3.bf16.msra.mxu1 %v5048_v63  ;;  %9206 = vmatprep.mubr.msk.bf16.mxu1 %vm10069_vm0, %v10067_v0 }
0x1d2f   :  { %5127 = vst.msk [vmem:[%s11276_s21 + $0x38] sm:$0xff] %vm280_vm2, %v4689_v54  ;;  %9218 = vmatprep.subr.bf16.mxu1 %v10067_v0  ;;  %v4697_v1 = vpack.c.bf16 %v4689_v54, %v4689_v54 }
0x1d31   :  { %9201 = vmatmul.mubr.msk.bf16.vlgmr.msra.gmra.mrb[148].mxu0 %vm280_vm2, %v4696_v12 }
0x1d32   :  { %9214 = vmatprep.mubr.msk.bf16.mxu0 %vm10069_vm0, %v10067_v0  ;;  %9211 = vmatpush3.bf16.msra.mxu0 %v9785_v28 }
0x1d33   :  { %9212 = vmatprep.subr.bf16.mxu0 %v10067_v0 }
0x1d35   :  { %9207 = vmatmul.mubr.msk.bf16.vlgmr.msra.gmra.mrb[148].mxu1 %vm280_vm2, %v4697_v1 }
0x1d36   :  { %9222 = vmatprep.mubr.msk.bf16.mxu1 %vm10069_vm0, %v10067_v0  ;;  %9213 = vmatpush3.bf16.msra.mxu0 %v9786_v31 }
0x1d37   :  { %9226 = vmatprep.subr.bf16.mxu0 %v10067_v0 }
0x1d6e   :  { %v4790_v45 = vpop.f32.mrb[136].mxu1 }
0x1d6f   :  { %v9172_v49 = vpop.f32.mrb[137].mxu1 }
0x1d70   :  { %v4793_v34 = vpop.f32.mrb[138].mxu1 }
0x1d71   :  { %v9173_v9 = vpop.f32.mrb[139].mxu1 }
0x1d72   :  { %v4741_v29 = vpop.f32.mrb[136].mxu0 }
0x1d73   :  { %v9166_v2 = vpop.f32.mrb[137].mxu0 }
0x1d74   :  { %v4744_v11 = vpop.f32.mrb[138].mxu0 }
0x1d75   :  { %v9167_v16 = vpop.f32.mrb[139].mxu0 }
0x1dc7   :  { %v4839_v8 = vpop.f32.mrb[140].mxu0 }
0x1dc8   :  { %v9178_v7 = vpop.f32.mrb[141].mxu0 }
0x1dc9   :  { %v4842_v60 = vpop.f32.mrb[142].mxu0 }
0x1dca   :  { %v9179_v30 = vpop.f32.mrb[143].mxu0 }
0x1dcb   :  { %v4888_v15 = vpop.f32.mrb[140].mxu1 }
0x1dcc   :  { %v9667_v57 = vpack.i.bf16 %v4888_v15, %v4839_v8  ;;  %v9184_v17 = vpop.f32.mrb[141].mxu1 }
0x1dcd   :  { %v4891_v5 = vpop.f32.mrb[142].mxu1 }
0x1dce   :  { %v9185_v6 = vpop.f32.mrb[143].mxu1  ;;  %9668 = vrot.lane.b32.xlu0 %v9667_v57, %s12012_s27  ;;  %v9788_v57 = vld [vmem:[%s11380_s7 + $0x8] sm:$0xff]   ;;  %s10109_s27 = smov 32  }
0x1dcf   :  { %s11417_s6 = sld [smem:[%s12007_s0 + %s10109_s27]]  }
0x1dd0   :  { %s11440_s27 = sld [smem:[%s12007_s0 + %s10111_s30]]   ;;  %s12024_s30 = smov 96  }
0x1dfc   :  { %v4937_v20 = vpop.f32.mrb[144].mxu0 }
0x1dfd   :  { %v9190_v23 = vpop.f32.mrb[145].mxu0 }
0x1dfe   :  { %v4940_v19 = vpop.f32.mrb[146].mxu0 }
0x1dff   :  { %v9191_v25 = vpop.f32.mrb[147].mxu0 }
0x1e00   :  { %v4986_v26 = vpop.f32.mrb[144].mxu1 }
0x1e01   :  { %v9672_v32 = vpack.i.bf16 %v4986_v26, %v4937_v20  ;;  %v9196_v35 = vpop.f32.mrb[145].mxu1 }
0x1e02   :  { %v4989_v38 = vpop.f32.mrb[146].mxu1 }
0x1e03   :  { %v9197_v39 = vpop.f32.mrb[147].mxu1  ;;  %9673 = vrot.lane.b32.xlu1 %v9672_v32, %s12010_s2  ;;  %s11389_s2 = sld [smem:[%s12007_s0 + %s10106_s10]]   ;;  %s10108_s10 = smov 30  }
0x1e04   :  { %v5035_v21 = vpop.f32.mrb[148].mxu0  ;;  %s11403_s18 = sld [smem:[%s12007_s0 + %s10108_s10]]   ;;  %s10110_s10 = smov 34  }
0x1e05   :  { %v9202_v44 = vpop.f32.mrb[149].mxu0 }
0x1e06   :  { %v5038_v13 = vpop.f32.mrb[150].mxu0 }
0x1e07   :  { %v9203_v24 = vpop.f32.mrb[151].mxu0 }
0x1e08   :  { %v5084_v42 = vpop.f32.mrb[148].mxu1 }
0x1e09   :  { %v9677_v36 = vpack.i.bf16 %v5084_v42, %v5035_v21  ;;  %v9208_v40 = vpop.f32.mrb[149].mxu1  ;;  %v9789_v17 = vld [vmem:[%s11389_s2] sm:$0xff]   ;;  %v9790_v5 = vld [vmem:[%s11389_s2 + $0x8] sm:$0xff]  }
0x1e0a   :  { %v5087_v14 = vpop.f32.mrb[150].mxu1  ;;  %v8307_v21 = vld [vmem:[%s11403_s18] ss:$0 sm:$0xff]  ;;  %v9792_v40 = vld [vmem:[%s11389_s2 + $0x18] sm:$0xff]  }
0x1e0b   :  { %v9209_v46 = vpop.f32.mrb[151].mxu1  ;;  %9678 = vrot.lane.b32.xlu0 %v9677_v36, %s12008_s3  ;;  %s10107_s3 = smov 29   ;;  %v9791_v36 = vld [vmem:[%s11389_s2 + $0x10] sm:$0xff]   ;;  %v8308_v14 = vld [vmem:[%s11417_s6] ss:$0 sm:$0xff] }
0x1e0c   :  { %s11398_s8 = sld [smem:[%s12007_s0 + %s10107_s3]]  }
0x1e0d   :  { %s11426_s3 = sld [smem:[%s12007_s0 + %s10110_s10]]   ;;  %s12028_s10 = smov 24  }
0x1e12   :  { %v8306_v31 = vld [vmem:[%s11398_s8] ss:$0 sm:$0xff] }
0x1e40   :  { %v9669_v27 = vpop.permute.xlu0 %9668 }
0x1e41   :  { %v9671_v48 = vunpack.i.h.bf16 %v9669_v27  ;;  %v9670_v61 = vunpack.i.l.bf16 %v9669_v27 }
0x1e43   :  { %v5115_v43 = vsel %vm280_vm2, %v4790_v45, %v9671_v48  ;;  %v5114_v33 = vsel %vm280_vm2, %v4741_v29, %v9670_v61 }
0x1e75   :  { %v9674_v47 = vpop.permute.xlu1 %9673 }
0x1e76   :  { %v9676_v4 = vunpack.i.h.bf16 %v9674_v47  ;;  %v9675_v62 = vunpack.i.l.bf16 %v9674_v47 }
0x1e78   :  { %v5117_v50 = vsel %vm1193_vm4, %v5115_v43, %v9676_v4  ;;  %v5116_v51 = vsel %vm1193_vm4, %v5114_v33, %v9675_v62  ;;  %v8312_v33 = vld [vmem:[%s11426_s3] ss:$0 sm:$0xff] }
0x1e7d   :  { %v9679_v41 = vpop.permute.xlu0 %9678 }
0x1e7e   :  { %v9681_v37 = vunpack.i.h.bf16 %v9679_v41  ;;  %v9680_v3 = vunpack.i.l.bf16 %v9679_v41 }
0x1e80   :  { %v5119_v52 = vsel %vm1196_vm5, %v5117_v50, %v9681_v37  ;;  %v5118_v53 = vsel %vm1196_vm5, %v5116_v51, %v9680_v3 }
0x1e81   :  { %v5132_v56 = vpack.c.bf16 %v5119_v52, %v5118_v53 }
0x1e83   :  { %9215 = vmatmul.mubr.msk.bf16.vlgmr.msra.gmra.mrb[152].mxu0 %vm204_vm1, %v5132_v56 }
0x1e84   :  { %9234 = vmatprep.mubr.msk.bf16.mxu0 %vm10069_vm0, %v10067_v0  ;;  %9227 = vmatpush3.bf16.msra.mxu0 %v9789_v17 }
0x1e85   :  { %9228 = vmatprep.subr.bf16.mxu0 %v10067_v0 }
0x1e88   :  { %9229 = vmatpush3.bf16.msra.mxu0 %v9790_v5 }
0x1e89   :  { %9230 = vmatprep.subr.bf16.mxu0 %v10067_v0 }
0x1e8c   :  { %9231 = vmatpush3.bf16.msra.mxu0 %v9791_v36 }
0x1e8d   :  { %9232 = vmatprep.subr.bf16.mxu0 %v10067_v0 }
0x1e90   :  { %9233 = vmatpush3.bf16.msra.mxu0 %v9792_v40 }
0x1e91   :  { %9252 = vmatprep.subr.bf16.mxu0 %v10067_v0 }
0x1f56   :  { %v5189_v55 = vpop.f32.mrb[152].mxu0 }
0x1f57   :  { %v5190_v58 = vadd.f32 %v8302_v59, %v5189_v55  ;;  %v9216_v54 = vpop.f32.mrb[153].mxu0 }
0x1f58   :  { %v5192_v63 = vpop.f32.mrb[154].mxu0 }
0x1f59   :  { %v5196_v12 = vadd.f32 %v5190_v58, %v11094_v22  ;;  %v5193_v1 = vadd.f32 %v8302_v59, %v5192_v63  ;;  %v9217_v45 = vpop.f32.mrb[155].mxu0 }
0x1f5b   :  { %v5197_v49 = vadd.f32 %v5193_v1, %v11096_v18  ;;  %v5200_v34 = vsel %vm204_vm1, %v5196_v12, 0.0  ;;  %v9787_v18 = vld [vmem:[%s11380_s7] sm:$0xff]  }
0x1f5c   :  { %5201 = vadd.xlane.f32.xlu1 %v5200_v34  ;;  %9219 = vmatpush3.bf16.msra.mxu1 %v9787_v18 }
0x1f5d   :  { %v5203_v9 = vsel %vm204_vm1, %v5197_v49, 0.0  ;;  %9220 = vmatprep.subr.bf16.mxu1 %v10067_v0 }
0x1f5e   :  { %5204 = vadd.xlane.f32.xlu0 %v5203_v9 }
0x1f60   :  { %9221 = vmatpush3.bf16.msra.mxu1 %v9788_v57  ;;  %v8318_v57 = vld [vmem:[%s11440_s27] ss:$0 sm:$0xff] }
0x1f61   :  { %9238 = vmatprep.subr.bf16.mxu1 %v10067_v0 }
0x1fe9   :  { %v5202_v29 = vpop.xlane.xlu1 %5201 }
0x1fea   :  { %v5206_v2 = vmul.f32 0.03125, %v5202_v29 }
0x1feb   :  { %v5205_v11 = vpop.xlane.xlu0 %5204 }
0x1fec   :  { %v5208_v16 = vsub.f32 %v5196_v12, %v5206_v2  ;;  %v5207_v8 = vmul.f32 0.03125, %v5205_v11  ;;  %v9793_v11 = vld [vmem:[%s10735_s1 + $0x10] sm:$0xff]  }
0x1fee   :  { %v5209_v7 = vsub.f32 %v5197_v49, %v5207_v8  ;;  %v5210_v60 = vmul.f32 %v5208_v16, %v5208_v16 }
0x1ff0   :  { %v5212_v30 = vsel %vm204_vm1, %v5210_v60, 0.0  ;;  %v5211_v22 = vmul.f32 %v5209_v7, %v5209_v7 }
0x1ff1   :  { %5213 = vadd.xlane.f32.xlu0 %v5212_v30 }
0x1ff2   :  { %v5215_v15 = vsel %vm204_vm1, %v5211_v22, 0.0 }
0x1ff3   :  { %5216 = vadd.xlane.f32.xlu1 %v5215_v15 }
0x207e   :  { %v5214_v6 = vpop.xlane.xlu0 %5213 }
0x207f   :  { %v5218_v20 = vmul.f32 0.03125, %v5214_v6 }
0x2080   :  { %v5217_v28 = vpop.xlane.xlu1 %5216 }
0x2081   :  { %v5220_v23 = vadd.f32 1e-12, %v5218_v20  ;;  %v5219_v19 = vmul.f32 0.03125, %v5217_v28 }
0x2083   :  { %9959 = vrsqrt.f32 %v5220_v23  ;;  %v5221_v25 = vadd.f32 1e-12, %v5219_v19 }
0x2085   :  { %9961 = vrsqrt.f32 %v5221_v25 }
0x208d   :  { %v9960_v26 = vpop.eup %9959 }
0x208e   :  { %v5224_v32 = vmul.f32 %v9960_v26, %v5208_v16  ;;  %v9794_v16 = vld [vmem:[%s10735_s1 + $0x18] sm:$0xff]   ;;  %s10112_s1 = smov 36  }
0x208f   :  { %v9962_v35 = vpop.eup %9961  ;;  %s11445_s15 = sld [smem:[%s12007_s0 + %s10112_s1]]  }
0x2090   :  { %v5232_v38 = vmul.f32 %v8306_v31, %v5224_v32  ;;  %v5225_v39 = vmul.f32 %v9962_v35, %v5209_v7 }
0x2092   :  { %v5233_v44 = vmul.f32 %v8306_v31, %v5225_v39  ;;  %v5240_v13 = vadd.f32 %v8307_v21, %v5232_v38  ;;  %v8325_v31 = vld [vmem:[%s10778_s23 + $0x1] ss:$0 sm:$0xff]  ;;  %s12025_s23 = smov 64  }
0x2094   :  { %v5241_v24 = vadd.f32 %v8307_v21, %v5233_v44 }
0x2095   :  { %v8319_v28 = vld [vmem:[%s11445_s15] ss:$0 sm:$0xff] }
0x2096   :  { %v5246_v42 = vpack.c.bf16 %v5241_v24, %v5240_v13 }
0x2098   :  { %9223 = vmatmul.mubr.msk.bf16.vlgmr.msra.gmra.mrb[152].mxu1 %vm204_vm1, %v5246_v42 }
0x2099   :  { %9242 = vmatprep.mubr.msk.bf16.mxu1 %vm10069_vm0, %v10067_v0  ;;  %9239 = vmatpush3.bf16.msra.mxu1 %v9793_v11 }
0x209a   :  { %9240 = vmatprep.subr.bf16.mxu1 %v10067_v0 }
0x209d   :  { %9241 = vmatpush3.bf16.msra.mxu1 %v9794_v16 }
0x209e   :  { %9246 = vmatprep.subr.bf16.mxu1 %v10067_v0 }
0x216b   :  { %v5303_v46 = vpop.f32.mrb[152].mxu1 }
0x216c   :  { %v5304_v27 = vadd.f32 %v8308_v14, %v5303_v46  ;;  %v9224_v47 = vpop.f32.mrb[153].mxu1 }
0x216d   :  { %v5306_v48 = vpop.f32.mrb[154].mxu1 }
0x216e   :  { %v5307_v61 = vadd.f32 %v8308_v14, %v5306_v48  ;;  %v9225_v4 = vpop.f32.mrb[155].mxu1  ;;  %v5310_v62 = vmax.f32 %v5304_v27, 0.0 }
0x2170   :  { %v5311_v41 = vmax.f32 %v5307_v61, 0.0 }
0x2172   :  { %v5320_v43 = vpack.c.bf16 %v5311_v41, %v5310_v62 }
0x2174   :  { %9235 = vmatmul.mubr.msk.bf16.vlgmr.msra.gmra.mrb[156].mxu0 %vm1432_vm6, %v5320_v43 }
0x2175   :  { %9254 = vmatprep.mubr.msk.bf16.mxu0 %vm10069_vm0, %v10067_v0 }
0x2247   :  { %v5389_v37 = vpop.f32.mrb[156].mxu0 }
0x2248   :  { %v5390_v3 = vadd.f32 %v8312_v33, %v5389_v37  ;;  %v9236_v50 = vpop.f32.mrb[157].mxu0 }
0x2249   :  { %v5392_v51 = vpop.f32.mrb[158].mxu0 }
0x224a   :  { %v5396_v52 = vadd.f32 %v5390_v3, %v5240_v13  ;;  %v5393_v53 = vadd.f32 %v8312_v33, %v5392_v51  ;;  %v9237_v56 = vpop.f32.mrb[159].mxu0 }
0x224c   :  { %v5397_v59 = vadd.f32 %v5393_v53, %v5241_v24  ;;  %v5400_v55 = vsel %vm204_vm1, %v5396_v52, 0.0 }
0x224d   :  { %5401 = vadd.xlane.f32.xlu0 %v5400_v55 }
0x224e   :  { %v5403_v58 = vsel %vm204_vm1, %v5397_v59, 0.0 }
0x224f   :  { %5404 = vadd.xlane.f32.xlu1 %v5403_v58 }
0x22da   :  { %v5402_v54 = vpop.xlane.xlu0 %5401 }
0x22db   :  { %v5406_v63 = vmul.f32 0.03125, %v5402_v54 }
0x22dc   :  { %v5405_v12 = vpop.xlane.xlu1 %5404 }
0x22dd   :  { %v5408_v1 = vsub.f32 %v5396_v52, %v5406_v63  ;;  %v5407_v45 = vmul.f32 0.03125, %v5405_v12 }
0x22df   :  { %v5409_v49 = vsub.f32 %v5397_v59, %v5407_v45  ;;  %v5410_v34 = vmul.f32 %v5408_v1, %v5408_v1 }
0x22e1   :  { %v5412_v9 = vsel %vm204_vm1, %v5410_v34, 0.0  ;;  %v5411_v29 = vmul.f32 %v5409_v49, %v5409_v49 }
0x22e2   :  { %5413 = vadd.xlane.f32.xlu0 %v5412_v9 }
0x22e3   :  { %v5415_v2 = vsel %vm204_vm1, %v5411_v29, 0.0 }
0x22e4   :  { %5416 = vadd.xlane.f32.xlu1 %v5415_v2 }
0x236f   :  { %v5414_v8 = vpop.xlane.xlu0 %5413 }
0x2370   :  { %v5418_v7 = vmul.f32 0.03125, %v5414_v8 }
0x2371   :  { %v5417_v60 = vpop.xlane.xlu1 %5416 }
0x2372   :  { %v5420_v30 = vadd.f32 1e-12, %v5418_v7  ;;  %v5419_v22 = vmul.f32 0.03125, %v5417_v60  ;;  %v10051_v60 = vld [vmem:[%s10872_s29] sm:$0xff] }
0x2374   :  { %9963 = vrsqrt.f32 %v5420_v30  ;;  %v5421_v15 = vadd.f32 1e-12, %v5419_v22 }
0x2376   :  { %9965 = vrsqrt.f32 %v5421_v15 }
0x237e   :  { %v9964_v18 = vpop.eup %9963 }
0x237f   :  { %v5424_v17 = vmul.f32 %v9964_v18, %v5408_v1 }
0x2380   :  { %v9966_v5 = vpop.eup %9965 }
0x2381   :  { %v5432_v6 = vmul.f32 %v8318_v57, %v5424_v17  ;;  %v5425_v20 = vmul.f32 %v9966_v5, %v5409_v49 }
0x2383   :  { %v5433_v23 = vmul.f32 %v8318_v57, %v5425_v20  ;;  %v11449_v19 = vadd.f32 %v8319_v28, %v5432_v6  ;;  %v10052_v6 = vld [vmem:[%s10872_s29 + $0x8] sm:$0xff] }
0x2385   :  { %v11451_v25 = vadd.f32 %v8319_v28, %v5433_v23 }
0x2387   :  { %v5447_v26 = vpack.c.bf16 %v11451_v25, %v11449_v19 }
0x2389   :  { %9243 = vmatmul.mubr.msk.bf16.vlgmr.msra.gmra.mrb[156].mxu1 %vm204_vm1, %v5447_v26 }
0x238a   :  { %9248 = vmatprep.mubr.msk.bf16.mxu1 %vm10069_vm0, %v10067_v0 }
0x245c   :  { %v5505_v32 = vpop.f32.mrb[156].mxu1 }
0x245d   :  { %v9244_v35 = vpop.f32.mrb[157].mxu1  ;;  %v5506_v39 = vadd.f32 %v8325_v31, %v5505_v32 }
0x245e   :  { %v5508_v38 = vpop.f32.mrb[158].mxu1 }
0x245f   :  { %v5509_v21 = vadd.f32 %v8325_v31, %v5508_v38  ;;  %v9245_v44 = vpop.f32.mrb[159].mxu1  ;;  %v5532_v24 = vpack.c.bf16 %v5506_v39, %v5506_v39 }
0x2461   :  { %v9687_v13 = vpack.i.bf16 %v5509_v21, %v5506_v39  ;;  %v11463_v42 = vpack.c.bf16 %v5509_v21, %v5509_v21 }
0x2463   :  { %9688 = vrot.lane.b32.xlu1 %v9687_v13, %s10074_s17  ;;  %9683 = vrot.lane.b32.xlu0 %v9687_v13, %s12022_s14 }
0x2467   :  { %9693 = vrot.lane.b32.xlu1 %v9687_v13, %s12023_s16  ;;  %5541 = vrot.lane.b32.xlu0 %v5532_v24, %s12024_s30  ;;  %v10053_v13 = vld [vmem:[%s10872_s29 + $0x10] sm:$0xff] }
0x246b   :  { %5590 = vrot.lane.b32.xlu1 %v11463_v42, %s12024_s30 }
0x24d5   :  { %v9689_v36 = vpop.permute.xlu1 %9688  ;;  %v9684_v40 = vpop.permute.xlu0 %9683 }
0x24d6   :  { %v9686_v14 = vunpack.i.h.bf16 %v9684_v40  ;;  %v9685_v46 = vunpack.i.l.bf16 %v9684_v40  ;;  %v9691_v27 = vunpack.i.h.bf16 %v9689_v36  ;;  %v9690_v47 = vunpack.i.l.bf16 %v9689_v36 }
0x24d8   :  { %v11467_v48 = vpack.c.bf16 %v9686_v14, %v9686_v14  ;;  %v11469_v61 = vpack.c.bf16 %v9685_v46, %v9685_v46  ;;  %v11476_v43 = vpack.c.bf16 %v9691_v27, %v9691_v27  ;;  %v11478_v33 = vpack.c.bf16 %v9690_v47, %v9690_v47  ;;  %v10054_v14 = vld [vmem:[%s10872_s29 + $0x18] sm:$0xff] }
0x24d9   :  { %v9694_v4 = vpop.permute.xlu1 %9693  ;;  %v5542_v62 = vpop.permute.xlu0 %5541 }
0x24da   :  { %v5547_v41 = vsel %vm280_vm2, %v5542_v62, 0  ;;  %5639 = vrot.lane.b32.xlu0 %v11469_v61, %s12024_s30  ;;  %5688 = vrot.lane.b32.xlu1 %v11467_v48, %s12024_s30  ;;  %v9695_v37 = vunpack.i.l.bf16 %v9694_v4  ;;  %v9696_v3 = vunpack.i.h.bf16 %v9694_v4 }
0x24db   :  { %9247 = vmatpush3.bf16.xpose.msra.mxu1 %v5547_v41 }
0x24dc   :  { %9258 = vmatprep.subr.bf16.mxu1 %v10067_v0  ;;  %v11486_v52 = vpack.c.bf16 %v9695_v37, %v9695_v37  ;;  %v11489_v53 = vpack.c.bf16 %v9696_v3, %v9696_v3 }
0x24dd   :  { %v5591_v50 = vpop.permute.xlu1 %5590 }
0x24de   :  { %v5596_v51 = vsel %vm280_vm2, %v5591_v50, 0  ;;  %5737 = vrot.lane.b32.xlu0 %v11478_v33, %s12024_s30  ;;  %5786 = vrot.lane.b32.xlu1 %v11476_v43, %s12024_s30 }
0x24df   :  { %9253 = vmatpush3.bf16.xpose.msra.mxu0 %v5596_v51 }
0x24e0   :  { %9264 = vmatprep.subr.bf16.mxu0 %v10067_v0 }
0x24e2   :  { %9249 = vmatmul.mubr.msk.bf16.vlgmr.msra.gmra.mrb[160].mxu1 %vm280_vm2, %v5532_v24  ;;  %5835 = vrot.lane.b32.xlu0 %v11486_v52, %s12024_s30 }
0x24e3   :  { %5884 = vrot.lane.b32.xlu1 %v11489_v53, %s12024_s30  ;;  %9260 = vmatprep.mubr.msk.bf16.mxu1 %vm10069_vm0, %v10067_v0 }
0x24e6   :  { %9255 = vmatmul.mubr.msk.bf16.vlgmr.msra.gmra.mrb[160].mxu0 %vm280_vm2, %v11463_v42 }
0x24e7   :  { %6044 = vrot.lane.b32.xlu1 %v5532_v24, %s12025_s23  ;;  %9266 = vmatprep.mubr.msk.bf16.mxu0 %vm10069_vm0, %v10067_v0 }
0x254c   :  { %v5640_v56 = vpop.permute.xlu0 %5639  ;;  %v5689_v59 = vpop.permute.xlu1 %5688 }
0x254d   :  { %v5645_v55 = vsel %vm280_vm2, %v5640_v56, 0  ;;  %v5694_v58 = vsel %vm280_vm2, %v5689_v59, 0  ;;  %v10055_v59 = vld [vmem:[%s10872_s29 + $0x20] sm:$0xff] }
0x254e   :  { %9259 = vmatpush3.bf16.xpose.msra.mxu1 %v5645_v55  ;;  %9265 = vmatpush3.bf16.xpose.msra.mxu0 %v5694_v58  ;;  %v10056_v58 = vld [vmem:[%s10872_s29 + $0x28] sm:$0xff] }
0x254f   :  { %9270 = vmatprep.subr.bf16.mxu1 %v10067_v0  ;;  %9276 = vmatprep.subr.bf16.mxu0 %v10067_v0 }
0x2550   :  { %v5738_v54 = vpop.permute.xlu0 %5737  ;;  %v5787_v63 = vpop.permute.xlu1 %5786 }
0x2551   :  { %v5743_v12 = vsel %vm280_vm2, %v5738_v54, 0  ;;  %v5792_v1 = vsel %vm280_vm2, %v5787_v63, 0 }
0x2554   :  { %v5836_v45 = vpop.permute.xlu0 %5835 }
0x2555   :  { %9261 = vmatmul.mubr.msk.bf16.vlgmr.msra.gmra.mrb[164].mxu1 %vm280_vm2, %v11469_v61  ;;  %9267 = vmatmul.mubr.msk.bf16.vlgmr.msra.gmra.mrb[164].mxu0 %vm280_vm2, %v11467_v48  ;;  %v5885_v49 = vpop.permute.xlu1 %5884  ;;  %v5841_v34 = vsel %vm280_vm2, %v5836_v45, 0 }
0x2556   :  { %9271 = vmatpush3.bf16.xpose.msra.mxu1 %v5743_v12  ;;  %9277 = vmatpush3.bf16.xpose.msra.mxu0 %v5792_v1  ;;  %v5890_v9 = vsel %vm280_vm2, %v5885_v49, 0 }
0x2557   :  { %9272 = vmatprep.mubr.msk.bf16.mxu1 %vm10069_vm0, %v10067_v0  ;;  %9278 = vmatprep.mubr.msk.bf16.mxu0 %vm10069_vm0, %v10067_v0 }
0x2558   :  { %9282 = vmatprep.subr.bf16.mxu1 %v10067_v0  ;;  %9288 = vmatprep.subr.bf16.mxu0 %v10067_v0 }
0x2559   :  { %v6045_v29 = vpop.permute.xlu1 %6044 }
0x255a   :  { %v6050_v2 = vsel %vm787_vm3, %v6045_v29, 0 }
0x255d   :  { %9273 = vmatmul.mubr.msk.bf16.vlgmr.msra.gmra.mrb[168].mxu1 %vm280_vm2, %v11478_v33  ;;  %9279 = vmatmul.mubr.msk.bf16.vlgmr.msra.gmra.mrb[168].mxu0 %vm280_vm2, %v11476_v43 }
0x255e   :  { %9283 = vmatpush3.bf16.xpose.msra.mxu1 %v5841_v34  ;;  %9289 = vmatpush3.bf16.xpose.msra.mxu0 %v5890_v9 }
0x255f   :  { %9284 = vmatprep.mubr.msk.bf16.mxu1 %vm10069_vm0, %v10067_v0  ;;  %9290 = vmatprep.mubr.msk.bf16.mxu0 %vm10069_vm0, %v10067_v0 }
0x2560   :  { %9294 = vmatprep.subr.bf16.mxu1 %v10067_v0  ;;  %9300 = vmatprep.subr.bf16.mxu0 %v10067_v0 }
0x2565   :  { %9285 = vmatmul.mubr.msk.bf16.vlgmr.msra.gmra.mrb[172].mxu1 %vm280_vm2, %v11486_v52  ;;  %9291 = vmatmul.mubr.msk.bf16.vlgmr.msra.gmra.mrb[172].mxu0 %vm280_vm2, %v11489_v53 }
0x2566   :  { %9295 = vmatpush3.bf16.msra.mxu1 %v6050_v2  ;;  %9302 = vmatprep.mubr.msk.bf16.mxu0 %vm10069_vm0, %v10067_v0 }
0x2567   :  { %9296 = vmatprep.mubr.msk.bf16.mxu1 %vm10069_vm0, %v10067_v0  ;;  %9306 = vmatprep.subr.bf16.mxu1 %v10067_v0 }
0x25b5   :  { %v5583_v11 = vpop.f32.mrb[160].mxu1 }
0x25b6   :  { %v5932_v16 = vmul.f32 0.35355338, %v5583_v11  ;;  %v9250_v8 = vpop.f32.mrb[161].mxu1 }
0x25b7   :  { %v5586_v7 = vpop.f32.mrb[162].mxu1 }
0x25b8   :  { %v11542_v30 = vadd.f32 %v10051_v60, %v5932_v16  ;;  %v9251_v22 = vpop.f32.mrb[163].mxu1  ;;  %v10057_v7 = vld [vmem:[%s10872_s29 + $0x30] sm:$0xff] }
0x25b9   :  { %v5632_v15 = vpop.f32.mrb[160].mxu0  ;;  %v10058_v22 = vld [vmem:[%s10872_s29 + $0x38] sm:$0xff]  ;;  %s12026_s29 = smov 8  }
0x25ba   :  { %v5933_v18 = vmul.f32 0.35355338, %v5632_v15  ;;  %v9256_v57 = vpop.f32.mrb[161].mxu0  ;;  %v5948_v17 = vsel %vm280_vm2, %v11542_v30, -inf }
0x25bb   :  { %5949 = vmax.xlane.f32.xlu0 %v5948_v17  ;;  %v5635_v5 = vpop.f32.mrb[162].mxu0 }
0x25bc   :  { %v11547_v20 = vadd.f32 %v10052_v6, %v5933_v18  ;;  %v9257_v28 = vpop.f32.mrb[163].mxu0 }
0x25be   :  { %v5951_v23 = vsel %vm280_vm2, %v11547_v20, -inf }
0x25bf   :  { %5952 = vmax.xlane.f32.xlu1 %v5951_v23 }
0x2628   :  { %v5681_v26 = vpop.f32.mrb[164].mxu1  ;;  %v5730_v31 = vpop.f32.mrb[164].mxu0 }
0x2629   :  { %v5934_v32 = vmul.f32 0.35355338, %v5681_v26  ;;  %v5935_v35 = vmul.f32 0.35355338, %v5730_v31  ;;  %v9262_v38 = vpop.f32.mrb[165].mxu1  ;;  %v9268_v39 = vpop.f32.mrb[165].mxu0 }
0x262a   :  { %v5684_v21 = vpop.f32.mrb[166].mxu1  ;;  %v5733_v44 = vpop.f32.mrb[166].mxu0 }
0x262b   :  { %v11552_v24 = vadd.f32 %v10053_v13, %v5934_v32  ;;  %v9263_v36 = vpop.f32.mrb[167].mxu1  ;;  %v9269_v40 = vpop.f32.mrb[167].mxu0  ;;  %v11555_v46 = vadd.f32 %v10054_v14, %v5935_v35 }
0x262d   :  { %v5954_v27 = vsel %vm280_vm2, %v11552_v24, -inf  ;;  %v5957_v62 = vsel %vm280_vm2, %v11555_v46, -inf }
0x262e   :  { %5955 = vmax.xlane.f32.xlu0 %v5954_v27 }
0x2630   :  { %v5779_v47 = vpop.f32.mrb[168].mxu1  ;;  %v5828_v4 = vpop.f32.mrb[168].mxu0 }
0x2631   :  { %v5936_v41 = vmul.f32 0.35355338, %v5779_v47  ;;  %v5937_v37 = vmul.f32 0.35355338, %v5828_v4  ;;  %v9274_v3 = vpop.f32.mrb[169].mxu1  ;;  %v9280_v50 = vpop.f32.mrb[169].mxu0 }
0x2632   :  { %v5782_v51 = vpop.f32.mrb[170].mxu1  ;;  %5958 = vmax.xlane.f32.xlu0 %v5957_v62  ;;  %v5831_v56 = vpop.f32.mrb[170].mxu0 }
0x2633   :  { %v11562_v55 = vadd.f32 %v10055_v59, %v5936_v41  ;;  %v11565_v54 = vadd.f32 %v10056_v58, %v5937_v37  ;;  %v9275_v63 = vpop.f32.mrb[171].mxu1  ;;  %v9281_v12 = vpop.f32.mrb[171].mxu0 }
0x2635   :  { %v5960_v1 = vsel %vm280_vm2, %v11562_v55, -inf  ;;  %v5963_v45 = vsel %vm280_vm2, %v11565_v54, -inf }
0x2636   :  { %5961 = vmax.xlane.f32.xlu1 %v5960_v1  ;;  %5964 = vmax.xlane.f32.xlu0 %v5963_v45 }
0x2638   :  { %v5877_v49 = vpop.f32.mrb[172].mxu1  ;;  %v5926_v34 = vpop.f32.mrb[172].mxu0 }
0x2639   :  { %v5938_v9 = vmul.f32 0.35355338, %v5877_v49  ;;  %v5939_v29 = vmul.f32 0.35355338, %v5926_v34  ;;  %v9286_v2 = vpop.f32.mrb[173].mxu1  ;;  %v9292_v11 = vpop.f32.mrb[173].mxu0 }
0x263a   :  { %v5880_v16 = vpop.f32.mrb[174].mxu1  ;;  %v5929_v8 = vpop.f32.mrb[174].mxu0 }
0x263b   :  { %v5946_v60 = vadd.f32 %v10057_v7, %v5938_v9  ;;  %v5947_v15 = vadd.f32 %v10058_v22, %v5939_v29  ;;  %v9287_v18 = vpop.f32.mrb[175].mxu1  ;;  %v9293_v57 = vpop.f32.mrb[175].mxu0 }
0x263d   :  { %v5966_v17 = vsel %vm280_vm2, %v5946_v60, -inf  ;;  %v5969_v5 = vsel %vm280_vm2, %v5947_v15, -inf }
0x263e   :  { %5967 = vmax.xlane.f32.xlu1 %v5966_v17  ;;  %5970 = vmax.xlane.f32.xlu0 %v5969_v5 }
0x2648   :  { %v5950_v23 = vpop.xlane.xlu0 %5949 }
0x2649   :  { %v5972_v26 = vsub.f32 %v11542_v30, %v5950_v23 }
0x264b   :  { %v5980_v32 = vmul.f32 1.442695, %v5972_v26 }
0x264c   :  { %v5953_v6 = vpop.xlane.xlu1 %5952 }
0x264d   :  { %v5973_v28 = vsub.f32 %v11547_v20, %v5953_v6 }
0x264f   :  { %6140 = vrot.lane.b32.xlu1 %v11469_v61, %s12025_s23  ;;  %v5982_v31 = vmul.f32 1.442695, %v5973_v28 }
0x2651   :  { %9967 = vpow2.f32 %v5982_v31 }
0x2652   :  { %9969 = vpow2.f32 %v5980_v32 }
0x2653   :  { %6188 = vrot.lane.b32.xlu1 %v11467_v48, %s12025_s23 }
0x2654   :  { %6092 = vrot.lane.b32.xlu0 %v11463_v42, %s12025_s23 }
0x265b   :  { %v9968_v35 = vpop.eup %9967 }
0x265c   :  { %v5999_v38 = vsel %vm280_vm2, %v9968_v35, 0.0  ;;  %v11584_v61 = vpop.eup %9969 }
0x265d   :  { %v5996_v48 = vsel %vm280_vm2, %v11584_v61, 0.0 }
0x2673   :  { %6000 = vadd.xlane.f32.xlu0 %v5999_v38 }
0x2677   :  { %5997 = vadd.xlane.f32.xlu1 %v5996_v48 }
0x26bb   :  { %v5956_v42 = vpop.xlane.xlu0 %5955 }
0x26bc   :  { %v5974_v20 = vsub.f32 %v11552_v24, %v5956_v42 }
0x26be   :  { %v5984_v39 = vmul.f32 1.442695, %v5974_v20 }
0x26bf   :  { %v5959_v21 = vpop.xlane.xlu0 %5958 }
0x26c0   :  { %9971 = vpow2.f32 %v5984_v39  ;;  %v5975_v30 = vsub.f32 %v11555_v46, %v5959_v21 }
0x26c2   :  { %v5986_v44 = vmul.f32 1.442695, %v5975_v30 }
0x26c3   :  { %v5965_v13 = vpop.xlane.xlu0 %5964  ;;  %v5962_v46 = vpop.xlane.xlu1 %5961 }
0x26c4   :  { %9973 = vpow2.f32 %v5986_v44  ;;  %v5976_v62 = vsub.f32 %v11562_v55, %v5962_v46  ;;  %v5977_v37 = vsub.f32 %v11565_v54, %v5965_v13 }
0x26c6   :  { %v5988_v3 = vmul.f32 1.442695, %v5976_v62  ;;  %v5990_v51 = vmul.f32 1.442695, %v5977_v37 }
0x26c8   :  { %9975 = vpow2.f32 %v5988_v3 }
0x26c9   :  { %9977 = vpow2.f32 %v5990_v51 }
0x26ca   :  { %v11590_v36 = vpop.eup %9971 }
0x26cb   :  { %v5971_v40 = vpop.xlane.xlu0 %5970  ;;  %v6002_v14 = vsel %vm280_vm2, %v11590_v36, 0.0  ;;  %v5968_v41 = vpop.xlane.xlu1 %5967 }
0x26cc   :  { %6003 = vadd.xlane.f32.xlu1 %v6002_v14  ;;  %v5978_v50 = vsub.f32 %v5946_v60, %v5968_v41  ;;  %v5979_v59 = vsub.f32 %v5947_v15, %v5971_v40 }
0x26ce   :  { %v11594_v27 = vpop.eup %9973  ;;  %v5992_v56 = vmul.f32 1.442695, %v5978_v50  ;;  %v5994_v58 = vmul.f32 1.442695, %v5979_v59 }
0x26cf   :  { %v6093_v47 = vpop.permute.xlu0 %6092  ;;  %v6005_v24 = vsel %vm280_vm2, %v11594_v27, 0.0  ;;  %v6141_v63 = vpop.permute.xlu1 %6140 }
0x26d0   :  { %v6098_v4 = vsel %vm787_vm3, %v6093_v47, 0  ;;  %6006 = vadd.xlane.f32.xlu0 %v6005_v24  ;;  %9979 = vpow2.f32 %v5992_v56  ;;  %v6146_v15 = vsel %vm787_vm3, %v6141_v63, 0 }
0x26d1   :  { %9301 = vmatpush3.bf16.msra.mxu0 %v6098_v4  ;;  %9981 = vpow2.f32 %v5994_v58 }
0x26d2   :  { %9312 = vmatprep.subr.bf16.mxu0 %v10067_v0 }
0x26d3   :  { %v6189_v12 = vpop.permute.xlu1 %6188 }
0x26d4   :  { %v6194_v7 = vsel %vm787_vm3, %v6189_v12, 0 }
0x26dd   :  { %6284 = vrot.lane.b32.xlu1 %v11476_v43, %s12025_s23  ;;  %v11606_v43 = vpop.eup %9975 }
0x26de   :  { %v6008_v54 = vsel %vm280_vm2, %v11606_v43, 0.0 }
0x26e6   :  { %6236 = vrot.lane.b32.xlu0 %v11478_v33, %s12025_s23  ;;  %v11608_v33 = vpop.eup %9977 }
0x26e7   :  { %v11612_v1 = vpop.eup %9979  ;;  %v6011_v34 = vsel %vm280_vm2, %v11608_v33, 0.0 }
0x26e8   :  { %v6014_v49 = vsel %vm280_vm2, %v11612_v1, 0.0  ;;  %v11618_v9 = vpop.eup %9981 }
0x26e9   :  { %v6017_v29 = vsel %vm280_vm2, %v11618_v9, 0.0 }
0x2700   :  { %v6001_v55 = vpop.xlane.xlu0 %6000 }
0x2701   :  { %9983 = vrcp.f32 %v6001_v55  ;;  %6009 = vadd.xlane.f32.xlu1 %v6008_v54 }
0x2704   :  { %v5998_v45 = vpop.xlane.xlu1 %5997 }
0x2705   :  { %9985 = vrcp.f32 %v5998_v45  ;;  %6015 = vadd.xlane.f32.xlu1 %v6014_v49  ;;  %6012 = vadd.xlane.f32.xlu0 %v6011_v34  ;;  %v9795_v34 = vld [vmem:[%s11017_s11 + $0x10] sm:$0xff]  }
0x2709   :  { %6018 = vadd.xlane.f32.xlu0 %v6017_v29 }
0x270b   :  { %v9984_v2 = vpop.eup %9983 }
0x270c   :  { %v6029_v11 = vmul.f32 %v9984_v2, %v9968_v35 }
0x270e   :  { %8346 = vst.msk [vmem:[%s10949_s13 + $0x48] sm:$0xff] %vm280_vm2, %v6029_v11  ;;  %v6037_v16 = vpack.c.bf16 %v6029_v11, %v6029_v11 }
0x270f   :  { %v9986_v8 = vpop.eup %9985 }
0x2710   :  { %v6028_v60 = vmul.f32 %v9986_v8, %v11584_v61  ;;  %9303 = vmatmul.mubr.msk.bf16.vlgmr.msra.gmra.mrb[176].mxu0 %vm280_vm2, %v6037_v16  ;;  %v9796_v16 = vld [vmem:[%s11017_s11 + $0x18] sm:$0xff]  }
0x2711   :  { %9313 = vmatpush3.bf16.msra.mxu0 %v6194_v7  ;;  %9314 = vmatprep.mubr.msk.bf16.mxu0 %vm10069_vm0, %v10067_v0 }
0x2712   :  { %8345 = vst.msk [vmem:[%s10949_s13 + $0x40] sm:$0xff] %vm280_vm2, %v6028_v60  ;;  %v6036_v22 = vpack.c.bf16 %v6028_v60, %v6028_v60  ;;  %9324 = vmatprep.subr.bf16.mxu0 %v10067_v0 }
0x2714   :  { %9297 = vmatmul.mubr.msk.bf16.vlgmr.msra.gmra.mrb[176].mxu1 %vm280_vm2, %v6036_v22 }
0x2715   :  { %9307 = vmatpush3.bf16.msra.mxu1 %v6146_v15  ;;  %9308 = vmatprep.mubr.msk.bf16.mxu1 %vm10069_vm0, %v10067_v0 }
0x2716   :  { %6380 = vrot.lane.b32.xlu1 %v11489_v53, %s12025_s23  ;;  %9318 = vmatprep.subr.bf16.mxu1 %v10067_v0 }
0x271f   :  { %6332 = vrot.lane.b32.xlu0 %v11486_v52, %s12025_s23 }
0x2759   :  { %v6004_v18 = vpop.xlane.xlu1 %6003 }
0x275a   :  { %9987 = vrcp.f32 %v6004_v18 }
0x275d   :  { %v6007_v57 = vpop.xlane.xlu0 %6006  ;;  %v6285_v52 = vpop.permute.xlu1 %6284 }
0x275e   :  { %9989 = vrcp.f32 %v6007_v57  ;;  %v6290_v32 = vsel %vm787_vm3, %v6285_v52, 0 }
0x2761   :  { %v6237_v6 = vpop.permute.xlu0 %6236 }
0x2762   :  { %v6242_v26 = vsel %vm787_vm3, %v6237_v6, 0 }
0x2764   :  { %v9988_v17 = vpop.eup %9987 }
0x2765   :  { %v6030_v5 = vmul.f32 %v9988_v17, %v11590_v36 }
0x2767   :  { %8347 = vst.msk [vmem:[%s10949_s13 + $0x50] sm:$0xff] %vm280_vm2, %v6030_v5  ;;  %v6038_v28 = vpack.c.bf16 %v6030_v5, %v6030_v5 }
0x2768   :  { %v9990_v23 = vpop.eup %9989 }
0x2769   :  { %v6031_v53 = vmul.f32 %v9990_v23, %v11594_v27  ;;  %9309 = vmatmul.mubr.msk.bf16.vlgmr.msra.gmra.mrb[180].mxu1 %vm280_vm2, %v6038_v28 }
0x276a   :  { %9319 = vmatpush3.bf16.msra.mxu1 %v6242_v26  ;;  %9320 = vmatprep.mubr.msk.bf16.mxu1 %vm10069_vm0, %v10067_v0 }
0x276b   :  { %8348 = vst.msk [vmem:[%s10949_s13 + $0x58] sm:$0xff] %vm280_vm2, %v6031_v53  ;;  %v6039_v31 = vpack.c.bf16 %v6031_v53, %v6031_v53  ;;  %9330 = vmatprep.subr.bf16.mxu1 %v10067_v0 }
0x276d   :  { %9315 = vmatmul.mubr.msk.bf16.vlgmr.msra.gmra.mrb[180].mxu0 %vm280_vm2, %v6039_v31 }
0x276e   :  { %9325 = vmatpush3.bf16.msra.mxu0 %v6290_v32  ;;  %9326 = vmatprep.mubr.msk.bf16.mxu0 %vm10069_vm0, %v10067_v0 }
0x276f   :  { %9336 = vmatprep.subr.bf16.mxu0 %v10067_v0 }
0x278e   :  { %v6010_v35 = vpop.xlane.xlu1 %6009 }
0x278f   :  { %9991 = vrcp.f32 %v6010_v35 }
0x2792   :  { %v6016_v38 = vpop.xlane.xlu1 %6015  ;;  %v6013_v61 = vpop.xlane.xlu0 %6012 }
0x2793   :  { %9993 = vrcp.f32 %v6016_v38 }
0x2794   :  { %9995 = vrcp.f32 %v6013_v61 }
0x2796   :  { %v6019_v48 = vpop.xlane.xlu0 %6018  ;;  %v6381_v14 = vpop.permute.xlu1 %6380 }
0x2797   :  { %9997 = vrcp.f32 %v6019_v48  ;;  %v6386_v4 = vsel %vm787_vm3, %v6381_v14, 0 }
0x2799   :  { %v9992_v42 = vpop.eup %9991 }
0x279a   :  { %v6032_v20 = vmul.f32 %v9992_v42, %v11606_v43  ;;  %v6333_v39 = vpop.permute.xlu0 %6332 }
0x279b   :  { %v6338_v36 = vsel %vm787_vm3, %v6333_v39, 0 }
0x279c   :  { %8349 = vst.msk [vmem:[%s10949_s13 + $0x60] sm:$0xff] %vm280_vm2, %v6032_v20  ;;  %v6040_v21 = vpack.c.bf16 %v6032_v20, %v6032_v20 }
0x279d   :  { %v9994_v30 = vpop.eup %9993 }
0x279e   :  { %v9996_v44 = vpop.eup %9995  ;;  %v6034_v13 = vmul.f32 %v9994_v30, %v11612_v1  ;;  %9321 = vmatmul.mubr.msk.bf16.vlgmr.msra.gmra.mrb[184].mxu1 %vm280_vm2, %v6040_v21 }
0x279f   :  { %v6033_v40 = vmul.f32 %v9996_v44, %v11608_v33  ;;  %9331 = vmatpush3.bf16.msra.mxu1 %v6338_v36  ;;  %9332 = vmatprep.mubr.msk.bf16.mxu1 %vm10069_vm0, %v10067_v0 }
0x27a0   :  { %8351 = vst.msk [vmem:[%s10949_s13 + $0x70] sm:$0xff] %vm280_vm2, %v6034_v13  ;;  %9342 = vmatprep.subr.bf16.mxu1 %v10067_v0  ;;  %v6042_v46 = vpack.c.bf16 %v6034_v13, %v6034_v13 }
0x27a1   :  { %v9998_v27 = vpop.eup %9997  ;;  %8350 = vst.msk [vmem:[%s10949_s13 + $0x68] sm:$0xff] %vm280_vm2, %v6033_v40  ;;  %v6041_v47 = vpack.c.bf16 %v6033_v40, %v6033_v40  ;;  %v9797_v40 = vld [vmem:[%s11057_s12 + $0x10] sm:$0xff]  }
0x27a2   :  { %v6035_v24 = vmul.f32 %v9998_v27, %v11618_v9  ;;  %v9798_v27 = vld [vmem:[%s11057_s12 + $0x18] sm:$0xff]  }
0x27a3   :  { %9327 = vmatmul.mubr.msk.bf16.vlgmr.msra.gmra.mrb[184].mxu0 %vm280_vm2, %v6041_v47  ;;  %v8358_v47 = vld [vmem:[%s11046_s28 + $0x1] ss:$0 sm:$0xff]  ;;  %s10114_s28 = smov 38  }
0x27a4   :  { %8352 = vst.msk [vmem:[%s10949_s13 + $0x78] sm:$0xff] %vm280_vm2, %v6035_v24  ;;  %9337 = vmatpush3.bf16.msra.mxu0 %v6386_v4  ;;  %9338 = vmatprep.mubr.msk.bf16.mxu0 %vm10069_vm0, %v10067_v0  ;;  %v6043_v62 = vpack.c.bf16 %v6035_v24, %v6035_v24  ;;  %s12027_s13 = smov 16  }
0x27a5   :  { %9350 = vmatprep.subr.bf16.mxu0 %v10067_v0 }
0x27a6   :  { %9333 = vmatmul.mubr.msk.bf16.vlgmr.msra.gmra.mrb[188].mxu1 %vm280_vm2, %v6042_v46 }
0x27a7   :  { %9346 = vmatprep.mubr.msk.bf16.mxu1 %vm10069_vm0, %v10067_v0  ;;  %9343 = vmatpush3.bf16.msra.mxu1 %v9795_v34 }
0x27a8   :  { %9344 = vmatprep.subr.bf16.mxu1 %v10067_v0 }
0x27ab   :  { %9339 = vmatmul.mubr.msk.bf16.vlgmr.msra.gmra.mrb[188].mxu0 %vm280_vm2, %v6043_v62  ;;  %9345 = vmatpush3.bf16.msra.mxu1 %v9796_v16 }
0x27ac   :  { %9354 = vmatprep.mubr.msk.bf16.mxu0 %vm10069_vm0, %v10067_v0  ;;  %9358 = vmatprep.subr.bf16.mxu1 %v10067_v0 }
0x27e3   :  { %v6134_v41 = vpop.f32.mrb[176].mxu0 }
0x27e4   :  { %v9304_v37 = vpop.f32.mrb[177].mxu0 }
0x27e5   :  { %v6137_v3 = vpop.f32.mrb[178].mxu0 }
0x27e6   :  { %v9305_v50 = vpop.f32.mrb[179].mxu0 }
0x27e7   :  { %v6086_v51 = vpop.f32.mrb[176].mxu1 }
0x27e8   :  { %v9298_v56 = vpop.f32.mrb[177].mxu1 }
0x27e9   :  { %v6089_v59 = vpop.f32.mrb[178].mxu1  ;;  %v8380_v56 = vld [vmem:[%s11106_s25 + $0x1] ss:$0 sm:$0xff] }
0x27ea   :  { %v9299_v58 = vpop.f32.mrb[179].mxu1 }
0x283c   :  { %v6182_v63 = vpop.f32.mrb[180].mxu1 }
0x283d   :  { %v9310_v43 = vpop.f32.mrb[181].mxu1 }
0x283e   :  { %v6185_v33 = vpop.f32.mrb[182].mxu1 }
0x283f   :  { %v9311_v12 = vpop.f32.mrb[183].mxu1 }
0x2840   :  { %v6230_v55 = vpop.f32.mrb[180].mxu0 }
0x2841   :  { %v9697_v54 = vpack.i.bf16 %v6230_v55, %v6182_v63  ;;  %v9316_v1 = vpop.f32.mrb[181].mxu0 }
0x2842   :  { %v6233_v45 = vpop.f32.mrb[182].mxu0 }
0x2843   :  { %9698 = vrot.lane.b32.xlu0 %v9697_v54, %s12026_s29  ;;  %v9317_v49 = vpop.f32.mrb[183].mxu0 }
0x2871   :  { %v6278_v9 = vpop.f32.mrb[184].mxu1 }
0x2872   :  { %v9322_v29 = vpop.f32.mrb[185].mxu1 }
0x2873   :  { %v6281_v2 = vpop.f32.mrb[186].mxu1 }
0x2874   :  { %v9323_v11 = vpop.f32.mrb[187].mxu1 }
0x2876   :  { %v6326_v8 = vpop.f32.mrb[184].mxu0 }
0x2877   :  { %v9702_v7 = vpack.i.bf16 %v6326_v8, %v6278_v9  ;;  %v9328_v60 = vpop.f32.mrb[185].mxu0  ;;  %v9799_v8 = vld [vmem:[%s11076_s4 + $0x10] sm:$0xff]  }
0x2878   :  { %v6329_v22 = vpop.f32.mrb[186].mxu0  ;;  %9351 = vmatpush3.bf16.msra.mxu0 %v9799_v8 }
0x2879   :  { %9703 = vrot.lane.b32.xlu1 %v9702_v7, %s12027_s13  ;;  %v9329_v15 = vpop.f32.mrb[187].mxu0  ;;  %v6374_v18 = vpop.f32.mrb[188].mxu1  ;;  %9352 = vmatprep.subr.bf16.mxu0 %v10067_v0  ;;  %v9800_v7 = vld [vmem:[%s11076_s4 + $0x18] sm:$0xff]  }
0x287a   :  { %v9334_v57 = vpop.f32.mrb[189].mxu1 }
0x287b   :  { %v6377_v17 = vpop.f32.mrb[190].mxu1 }
0x287c   :  { %v9335_v5 = vpop.f32.mrb[191].mxu1  ;;  %9353 = vmatpush3.bf16.msra.mxu0 %v9800_v7 }
0x287d   :  { %9366 = vmatprep.subr.bf16.mxu0 %v10067_v0 }
0x287e   :  { %v6422_v6 = vpop.f32.mrb[188].mxu0 }
0x287f   :  { %v9707_v28 = vpack.i.bf16 %v6422_v6, %v6374_v18  ;;  %v9340_v23 = vpop.f32.mrb[189].mxu0  ;;  %v8364_v6 = vld [vmem:[%s11085_s26 + $0x1] ss:$0 sm:$0xff]  ;;  %s8135_s26 = sld [smem:[%s12007_s0 + %s10114_s28]]  }
0x2880   :  { %v6425_v53 = vpop.f32.mrb[190].mxu0 }
0x2881   :  { %9708 = vrot.lane.b32.xlu0 %v9707_v28, %s12028_s10  ;;  %v9341_v26 = vpop.f32.mrb[191].mxu0 }
0x28b5   :  { %v9699_v52 = vpop.permute.xlu0 %9698 }
0x28b6   :  { %v9701_v32 = vunpack.i.h.bf16 %v9699_v52  ;;  %v9700_v35 = vunpack.i.l.bf16 %v9699_v52  ;;  %v8365_v52 = vld [vmem:[%s11090_s19 + $0x1] ss:$0 sm:$0xff]  ;;  %s10115_s19 = smov 39  }
0x28b8   :  { %v6453_v42 = vsel %vm280_vm2, %v6134_v41, %v9701_v32  ;;  %v6452_v20 = vsel %vm280_vm2, %v6086_v51, %v9700_v35 }
0x28eb   :  { %v9704_v31 = vpop.permute.xlu1 %9703 }
0x28ec   :  { %v9706_v38 = vunpack.i.h.bf16 %v9704_v31  ;;  %v9705_v61 = vunpack.i.l.bf16 %v9704_v31 }
0x28ee   :  { %v6455_v30 = vsel %vm1193_vm4, %v6453_v42, %v9706_v38  ;;  %v6454_v44 = vsel %vm1193_vm4, %v6452_v20, %v9705_v61 }
0x28f3   :  { %v9709_v48 = vpop.permute.xlu0 %9708 }
0x28f4   :  { %v9711_v39 = vunpack.i.h.bf16 %v9709_v48  ;;  %v9710_v21 = vunpack.i.l.bf16 %v9709_v48 }
0x28f6   :  { %v6457_v13 = vsel %vm1196_vm5, %v6455_v30, %v9711_v39  ;;  %v6456_v36 = vsel %vm1196_vm5, %v6454_v44, %v9710_v21  ;;  %v8371_v39 = vld [vmem:[%s11122_s9 + $0x1] ss:$0 sm:$0xff] }
0x28f7   :  { %v6472_v14 = vpack.c.bf16 %v6457_v13, %v6456_v36 }
0x28f9   :  { %9347 = vmatmul.mubr.msk.bf16.vlgmr.msra.gmra.mrb[192].mxu1 %vm204_vm1, %v6472_v14 }
0x28fa   :  { %9359 = vmatpush3.bf16.msra.mxu1 %v9797_v40  ;;  %9362 = vmatprep.mubr.msk.bf16.mxu1 %vm10069_vm0, %v10067_v0 }
0x28fb   :  { %9360 = vmatprep.subr.bf16.mxu1 %v10067_v0 }
0x28fe   :  { %9361 = vmatpush3.bf16.msra.mxu1 %v9798_v27 }
0x28ff   :  { %9372 = vmatprep.subr.bf16.mxu1 %v10067_v0 }
0x2901   :  { %9363 = vmatmul.mubr.msk.bf16.vlgmr.msra.gmra.mrb[196].mxu1 %vm204_vm1, %v11067_v10 }
0x2902   :  { %9374 = vmatprep.mubr.msk.bf16.mxu1 %vm10069_vm0, %v10067_v0 }
0x29cc   :  { %v6530_v24 = vpop.f32.mrb[192].mxu1 }
0x29cd   :  { %v6531_v4 = vadd.f32 %v8358_v47, %v6530_v24  ;;  %v9348_v46 = vpop.f32.mrb[193].mxu1 }
0x29ce   :  { %v6533_v62 = vpop.f32.mrb[194].mxu1 }
0x29cf   :  { %v6537_v41 = vadd.f32 %v6531_v4, %v11449_v19  ;;  %v6534_v37 = vadd.f32 %v8358_v47, %v6533_v62  ;;  %v9349_v3 = vpop.f32.mrb[195].mxu1 }
0x29d1   :  { %v6538_v50 = vadd.f32 %v6534_v37, %v11451_v25  ;;  %v6543_v51 = vsel %vm204_vm1, %v6537_v41, 0.0 }
0x29d2   :  { %6544 = vadd.xlane.f32.xlu1 %v6543_v51 }
0x29d3   :  { %v6546_v10 = vsel %vm204_vm1, %v6538_v50, 0.0 }
0x29d4   :  { %6547 = vadd.xlane.f32.xlu0 %v6546_v10  ;;  %v6714_v59 = vpop.f32.mrb[196].mxu1 }
0x29d5   :  { %v6715_v58 = vadd.f32 %v8380_v56, %v6714_v59  ;;  %v9364_v63 = vpop.f32.mrb[197].mxu1 }
0x29d6   :  { %v6717_v43 = vpop.f32.mrb[198].mxu1 }
0x29d7   :  { %v6718_v33 = vadd.f32 %v8380_v56, %v6717_v43  ;;  %v9365_v12 = vpop.f32.mrb[199].mxu1  ;;  %v6769_v38 = vpack.c.bf16 %v6715_v58, %v6715_v58 }
0x29d9   :  { %v11715_v55 = vpack.c.bf16 %v6718_v33, %v6718_v33  ;;  %v11717_v19 = vpack.i.bf16 %v6718_v33, %v6715_v58  ;;  %v6781_v48 = vsel %vm280_vm2, %v6769_v38, 0 }
0x29db   :  { %v6827_v25 = vsel %vm280_vm2, %v11715_v55, 0 }
0x29dc   :  { %9373 = vmatpush3.bf16.xpose.msra.mxu1 %v6827_v25 }
0x29dd   :  { %9384 = vmatprep.subr.bf16.mxu1 %v10067_v0 }
0x2a5f   :  { %v6545_v54 = vpop.xlane.xlu1 %6544 }
0x2a60   :  { %v6549_v1 = vmul.f32 0.03125, %v6545_v54 }
0x2a61   :  { %v6548_v45 = vpop.xlane.xlu0 %6547 }
0x2a62   :  { %v6551_v49 = vsub.f32 %v6537_v41, %v6549_v1  ;;  %v6550_v34 = vmul.f32 0.03125, %v6548_v45 }
0x2a64   :  { %v6552_v9 = vsub.f32 %v6538_v50, %v6550_v34  ;;  %v6553_v29 = vmul.f32 %v6551_v49, %v6551_v49 }
0x2a66   :  { %v6555_v2 = vsel %vm204_vm1, %v6553_v29, 0.0  ;;  %v6554_v11 = vmul.f32 %v6552_v9, %v6552_v9 }
0x2a67   :  { %6556 = vadd.xlane.f32.xlu0 %v6555_v2 }
0x2a68   :  { %v6558_v16 = vsel %vm204_vm1, %v6554_v11, 0.0 }
0x2a69   :  { %6559 = vadd.xlane.f32.xlu1 %v6558_v16 }
0x2a7d   :  { %9713 = vrot.lane.b32.xlu0 %v11717_v19, %s12022_s14 }
0x2af4   :  { %v6557_v60 = vpop.xlane.xlu0 %6556 }
0x2af5   :  { %v6561_v22 = vmul.f32 0.03125, %v6557_v60 }
0x2af6   :  { %v6560_v15 = vpop.xlane.xlu1 %6559 }
0x2af7   :  { %v6563_v18 = vadd.f32 1e-12, %v6561_v22  ;;  %v6562_v57 = vmul.f32 0.03125, %v6560_v15 }
0x2af8   :  { %v9714_v42 = vpop.permute.xlu0 %9713 }
0x2af9   :  { %9999 = vrsqrt.f32 %v6563_v18  ;;  %v6564_v17 = vadd.f32 1e-12, %v6562_v57  ;;  %v9715_v20 = vunpack.i.l.bf16 %v9714_v42  ;;  %v9716_v21 = vunpack.i.h.bf16 %v9714_v42 }
0x2afb   :  { %10001 = vrsqrt.f32 %v6564_v17  ;;  %v11744_v30 = vpack.c.bf16 %v9715_v20, %v9715_v20  ;;  %v11746_v24 = vpack.c.bf16 %v9716_v21, %v9716_v21  ;;  %v10060_v20 = vld [vmem:[%s11189_s24 + $0x8] sm:$0xff] }
0x2afd   :  { %v6873_v4 = vsel %vm280_vm2, %v11744_v30, 0  ;;  %v6919_v41 = vsel %vm280_vm2, %v11746_v24, 0 }
0x2b03   :  { %v10000_v5 = vpop.eup %9999 }
0x2b04   :  { %v6567_v28 = vmul.f32 %v10000_v5, %v6551_v49 }
0x2b05   :  { %v10002_v23 = vpop.eup %10001 }
0x2b06   :  { %v6575_v53 = vmul.f32 %v8364_v6, %v6567_v28  ;;  %v6568_v26 = vmul.f32 %v10002_v23, %v6552_v9 }
0x2b08   :  { %v6576_v31 = vmul.f32 %v8364_v6, %v6568_v26  ;;  %v11732_v32 = vadd.f32 %v8365_v52, %v6575_v53  ;;  %v10059_v53 = vld [vmem:[%s11189_s24] sm:$0xff] }
0x2b0a   :  { %v11734_v35 = vadd.f32 %v8365_v52, %v6576_v31 }
0x2b0c   :  { %v6590_v61 = vpack.c.bf16 %v11734_v35, %v11732_v32 }
0x2b0e   :  { %9355 = vmatmul.mubr.msk.bf16.vlgmr.msra.gmra.mrb[192].mxu0 %vm204_vm1, %v6590_v61 }
0x2b0f   :  { %9367 = vmatpush3.bf16.xpose.msra.mxu0 %v6781_v48  ;;  %9368 = vmatprep.mubr.msk.bf16.mxu0 %vm10069_vm0, %v10067_v0 }
0x2b10   :  { %9378 = vmatprep.subr.bf16.mxu0 %v10067_v0 }
0x2be1   :  { %v6648_v44 = vpop.f32.mrb[192].mxu0 }
0x2be2   :  { %v6649_v13 = vadd.f32 %v8371_v39, %v6648_v44  ;;  %v9356_v36 = vpop.f32.mrb[193].mxu0 }
0x2be3   :  { %v6651_v40 = vpop.f32.mrb[194].mxu0 }
0x2be4   :  { %v6761_v14 = vpack.c.bf16 %v6649_v13, %v6649_v13  ;;  %v6652_v27 = vadd.f32 %v8371_v39, %v6651_v40  ;;  %v9357_v47 = vpop.f32.mrb[195].mxu0 }
0x2be6   :  { %v6762_v46 = vpack.c.bf16 %v6652_v27, %v6652_v27  ;;  %9369 = vmatmul.mubr.msk.bf16.vlgmr.msra.gmra.mrb[196].mxu0 %vm280_vm2, %v6761_v14  ;;  %v9727_v62 = vpack.i.bf16 %v6652_v27, %v6649_v13 }
0x2be7   :  { %9379 = vmatpush3.bf16.xpose.msra.mxu0 %v6873_v4  ;;  %9380 = vmatprep.mubr.msk.bf16.mxu0 %vm10069_vm0, %v10067_v0 }
0x2be8   :  { %9728 = vrot.lane.b32.xlu0 %v9727_v62, %s10074_s17  ;;  %9718 = vrot.lane.b32.xlu1 %v9727_v62, %s12022_s14 }
0x2be9   :  { %9375 = vmatmul.mubr.msk.bf16.vlgmr.msra.gmra.mrb[200].mxu1 %vm280_vm2, %v6762_v46  ;;  %9390 = vmatprep.subr.bf16.mxu0 %v10067_v0 }
0x2bea   :  { %9385 = vmatpush3.bf16.xpose.msra.mxu1 %v6919_v41  ;;  %9386 = vmatprep.mubr.msk.bf16.mxu1 %vm10069_vm0, %v10067_v0 }
0x2beb   :  { %9396 = vmatprep.subr.bf16.mxu1 %v10067_v0 }
0x2bec   :  { %9738 = vrot.lane.b32.xlu0 %v9727_v62, %s12023_s16  ;;  %9723 = vrot.lane.b32.xlu1 %v11717_v19, %s10074_s17  ;;  %v10061_v62 = vld [vmem:[%s11189_s24 + $0x10] sm:$0xff]  ;;  %s10113_s17 = smov 37  }
0x2bed   :  { %s8134_s11 = sld [smem:[%s12007_s0 + %s10113_s17]]  }
0x2bf0   :  { %7258 = vrot.lane.b32.xlu0 %v6769_v38, %s12024_s30  ;;  %9733 = vrot.lane.b32.xlu1 %v11717_v19, %s12023_s16 }
0x2bf4   :  { %7307 = vrot.lane.b32.xlu1 %v11715_v55, %s12024_s30 }
0x2c5a   :  { %v9719_v37 = vpop.permute.xlu1 %9718  ;;  %v9729_v33 = vpop.permute.xlu0 %9728 }
0x2c5b   :  { %v9721_v3 = vunpack.i.h.bf16 %v9719_v37  ;;  %v9720_v50 = vunpack.i.l.bf16 %v9719_v37  ;;  %v9730_v1 = vunpack.i.l.bf16 %v9729_v33  ;;  %v9731_v45 = vunpack.i.h.bf16 %v9729_v33  ;;  %v10062_v37 = vld [vmem:[%s11189_s24 + $0x18] sm:$0xff] }
0x2c5d   :  { %v6764_v51 = vpack.c.bf16 %v9721_v3, %v9721_v3  ;;  %v6763_v56 = vpack.c.bf16 %v9720_v50, %v9720_v50  ;;  %v6765_v9 = vpack.c.bf16 %v9730_v1, %v9730_v1  ;;  %v6766_v29 = vpack.c.bf16 %v9731_v45, %v9731_v45 }
0x2c5e   :  { %v9724_v10 = vpop.permute.xlu1 %9723  ;;  %v9739_v2 = vpop.permute.xlu0 %9738 }
0x2c5f   :  { %v9726_v59 = vunpack.i.h.bf16 %v9724_v10  ;;  %v9725_v58 = vunpack.i.l.bf16 %v9724_v10  ;;  %9381 = vmatmul.mubr.msk.bf16.vlgmr.msra.gmra.mrb[200].mxu0 %vm280_vm2, %v6763_v56  ;;  %9387 = vmatmul.mubr.msk.bf16.vlgmr.msra.gmra.mrb[204].mxu1 %vm280_vm2, %v6764_v51  ;;  %v9740_v8 = vunpack.i.l.bf16 %v9739_v2  ;;  %v9741_v7 = vunpack.i.h.bf16 %v9739_v2 }
0x2c60   :  { %9392 = vmatprep.mubr.msk.bf16.mxu0 %vm10069_vm0, %v10067_v0  ;;  %9398 = vmatprep.mubr.msk.bf16.mxu1 %vm10069_vm0, %v10067_v0 }
0x2c61   :  { %v11776_v63 = vpack.c.bf16 %v9726_v59, %v9726_v59  ;;  %v11778_v43 = vpack.c.bf16 %v9725_v58, %v9725_v58  ;;  %v6767_v22 = vpack.c.bf16 %v9740_v8, %v9740_v8  ;;  %v6768_v18 = vpack.c.bf16 %v9741_v7, %v9741_v7 }
0x2c62   :  { %v9734_v12 = vpop.permute.xlu1 %9733  ;;  %v7259_v60 = vpop.permute.xlu0 %7258 }
0x2c63   :  { %v9735_v55 = vunpack.i.l.bf16 %v9734_v12  ;;  %v6965_v19 = vsel %vm280_vm2, %v11778_v43, 0  ;;  %v9736_v25 = vunpack.i.h.bf16 %v9734_v12  ;;  %v7011_v54 = vsel %vm280_vm2, %v11776_v63, 0 }
0x2c64   :  { %9391 = vmatpush3.bf16.xpose.msra.mxu0 %v6965_v19  ;;  %9397 = vmatpush3.bf16.xpose.msra.mxu1 %v7011_v54  ;;  %v7264_v57 = vsel %vm787_vm3, %v7259_v60, 0  ;;  %v10063_v54 = vld [vmem:[%s11189_s24 + $0x20] sm:$0xff] }
0x2c65   :  { %9402 = vmatprep.subr.bf16.mxu0 %v10067_v0  ;;  %9408 = vmatprep.subr.bf16.mxu1 %v10067_v0  ;;  %v11786_v49 = vpack.c.bf16 %v9735_v55, %v9735_v55  ;;  %v11788_v34 = vpack.c.bf16 %v9736_v25, %v9736_v25 }
0x2c66   :  { %v7308_v15 = vpop.permute.xlu1 %7307 }
0x2c67   :  { %v7057_v11 = vsel %vm280_vm2, %v11786_v49, 0  ;;  %v7103_v16 = vsel %vm280_vm2, %v11788_v34, 0  ;;  %v7313_v17 = vsel %vm787_vm3, %v7308_v15, 0 }
0x2c6b   :  { %9393 = vmatmul.mubr.msk.bf16.vlgmr.msra.gmra.mrb[204].mxu0 %vm280_vm2, %v6765_v9  ;;  %9399 = vmatmul.mubr.msk.bf16.vlgmr.msra.gmra.mrb[208].mxu1 %vm280_vm2, %v6766_v29  ;;  %v10064_v29 = vld [vmem:[%s11189_s24 + $0x28] sm:$0xff] }
0x2c6c   :  { %9403 = vmatpush3.bf16.xpose.msra.mxu0 %v7057_v11  ;;  %9409 = vmatpush3.bf16.xpose.msra.mxu1 %v7103_v16 }
0x2c6d   :  { %9404 = vmatprep.mubr.msk.bf16.mxu0 %vm10069_vm0, %v10067_v0  ;;  %9410 = vmatprep.mubr.msk.bf16.mxu1 %vm10069_vm0, %v10067_v0 }
0x2c6e   :  { %9414 = vmatprep.subr.bf16.mxu0 %v10067_v0  ;;  %9420 = vmatprep.subr.bf16.mxu1 %v10067_v0 }
0x2c73   :  { %9405 = vmatmul.mubr.msk.bf16.vlgmr.msra.gmra.mrb[208].mxu0 %vm280_vm2, %v6767_v22  ;;  %9411 = vmatmul.mubr.msk.bf16.vlgmr.msra.gmra.mrb[212].mxu1 %vm280_vm2, %v6768_v18 }
0x2c74   :  { %9415 = vmatpush3.bf16.msra.mxu0 %v7264_v57  ;;  %9421 = vmatpush3.bf16.msra.mxu1 %v7313_v17 }
0x2c75   :  { %9416 = vmatprep.mubr.msk.bf16.mxu0 %vm10069_vm0, %v10067_v0  ;;  %9422 = vmatprep.mubr.msk.bf16.mxu1 %vm10069_vm0, %v10067_v0 }
0x2c76   :  { %9426 = vmatprep.subr.bf16.mxu0 %v10067_v0  ;;  %9432 = vmatprep.subr.bf16.mxu1 %v10067_v0 }
0x2cb9   :  { %v6817_v5 = vpop.f32.mrb[196].mxu0 }
0x2cba   :  { %v7145_v6 = vmul.f32 0.35355338, %v6817_v5  ;;  %v9370_v28 = vpop.f32.mrb[197].mxu0  ;;  %v10065_v5 = vld [vmem:[%s11189_s24 + $0x30] sm:$0xff] }
0x2cbb   :  { %v6820_v23 = vpop.f32.mrb[198].mxu0 }
0x2cbc   :  { %v11813_v26 = vadd.f32 %v10059_v53, %v7145_v6  ;;  %v6863_v52 = vpop.f32.mrb[200].mxu1  ;;  %v9371_v31 = vpop.f32.mrb[199].mxu0  ;;  %v10066_v53 = vld [vmem:[%s11189_s24 + $0x38] sm:$0xff]  ;;  %s8136_s24 = sld [smem:[%s12007_s0 + %s10115_s19]]  }
0x2cbd   :  { %v7146_v38 = vmul.f32 0.35355338, %v6863_v52  ;;  %v9376_v61 = vpop.f32.mrb[201].mxu1 }
0x2cbe   :  { %v6866_v48 = vpop.f32.mrb[202].mxu1  ;;  %v7161_v42 = vsel %vm280_vm2, %v11813_v26, -inf }
0x2cbf   :  { %v11818_v39 = vadd.f32 %v10060_v20, %v7146_v38  ;;  %v9377_v21 = vpop.f32.mrb[203].mxu1  ;;  %7162 = vmax.xlane.f32.xlu1 %v7161_v42 }
0x2cc1   :  { %v7164_v44 = vsel %vm280_vm2, %v11818_v39, -inf }
0x2cc2   :  { %7165 = vmax.xlane.f32.xlu0 %v7164_v44 }
0x2d32   :  { %v6909_v13 = vpop.f32.mrb[200].mxu0  ;;  %v6955_v36 = vpop.f32.mrb[204].mxu1 }
0x2d33   :  { %v7147_v40 = vmul.f32 0.35355338, %v6909_v13  ;;  %v7148_v14 = vmul.f32 0.35355338, %v6955_v36  ;;  %v9382_v27 = vpop.f32.mrb[201].mxu0  ;;  %v9388_v47 = vpop.f32.mrb[205].mxu1 }
0x2d34   :  { %v6912_v4 = vpop.f32.mrb[202].mxu0  ;;  %v6958_v46 = vpop.f32.mrb[206].mxu1 }
0x2d35   :  { %v11823_v41 = vadd.f32 %v10061_v62, %v7147_v40  ;;  %v11826_v3 = vadd.f32 %v10062_v37, %v7148_v14  ;;  %v9383_v50 = vpop.f32.mrb[203].mxu0  ;;  %v9389_v51 = vpop.f32.mrb[207].mxu1 }
0x2d37   :  { %v7170_v56 = vsel %vm280_vm2, %v11826_v3, -inf  ;;  %v7167_v10 = vsel %vm280_vm2, %v11823_v41, -inf }
0x2d38   :  { %7171 = vmax.xlane.f32.xlu1 %v7170_v56  ;;  %7168 = vmax.xlane.f32.xlu0 %v7167_v10 }
0x2d3e   :  { %v7001_v59 = vpop.f32.mrb[204].mxu0  ;;  %v7047_v33 = vpop.f32.mrb[208].mxu1 }
0x2d3f   :  { %v7149_v58 = vmul.f32 0.35355338, %v7001_v59  ;;  %v9394_v12 = vpop.f32.mrb[205].mxu0  ;;  %v7150_v55 = vmul.f32 0.35355338, %v7047_v33  ;;  %v9400_v19 = vpop.f32.mrb[209].mxu1 }
0x2d40   :  { %v7004_v25 = vpop.f32.mrb[206].mxu0  ;;  %v7050_v45 = vpop.f32.mrb[210].mxu1 }
0x2d41   :  { %v11833_v1 = vadd.f32 %v10063_v54, %v7149_v58  ;;  %v9395_v9 = vpop.f32.mrb[207].mxu0  ;;  %v7158_v2 = vadd.f32 %v10064_v29, %v7150_v55  ;;  %v9401_v11 = vpop.f32.mrb[211].mxu1 }
0x2d43   :  { %v7173_v16 = vsel %vm280_vm2, %v11833_v1, -inf  ;;  %v7176_v8 = vsel %vm280_vm2, %v7158_v2, -inf }
0x2d44   :  { %7174 = vmax.xlane.f32.xlu0 %v7173_v16  ;;  %7177 = vmax.xlane.f32.xlu1 %v7176_v8 }
0x2d46   :  { %v7093_v7 = vpop.f32.mrb[208].mxu0  ;;  %v7139_v22 = vpop.f32.mrb[212].mxu1 }
0x2d47   :  { %v7151_v60 = vmul.f32 0.35355338, %v7093_v7  ;;  %v9406_v15 = vpop.f32.mrb[209].mxu0  ;;  %v7152_v18 = vmul.f32 0.35355338, %v7139_v22  ;;  %v9412_v57 = vpop.f32.mrb[213].mxu1 }
0x2d48   :  { %v7096_v17 = vpop.f32.mrb[210].mxu0  ;;  %v7142_v28 = vpop.f32.mrb[214].mxu1 }
0x2d49   :  { %v11840_v6 = vadd.f32 %v10065_v5, %v7151_v60  ;;  %v9407_v23 = vpop.f32.mrb[211].mxu0  ;;  %v7160_v52 = vadd.f32 %v10066_v53, %v7152_v18  ;;  %v9413_v31 = vpop.f32.mrb[215].mxu1 }
0x2d4b   :  { %v7179_v38 = vsel %vm280_vm2, %v11840_v6, -inf  ;;  %v7182_v61 = vsel %vm280_vm2, %v7160_v52, -inf }
0x2d4c   :  { %7180 = vmax.xlane.f32.xlu0 %v7179_v38  ;;  %7183 = vmax.xlane.f32.xlu1 %v7182_v61  ;;  %v7163_v48 = vpop.xlane.xlu1 %7162 }
0x2d4d   :  { %v7185_v20 = vsub.f32 %v11813_v26, %v7163_v48 }
0x2d4f   :  { %v7166_v42 = vpop.xlane.xlu0 %7165  ;;  %v7193_v44 = vmul.f32 1.442695, %v7185_v20 }
0x2d50   :  { %v7186_v21 = vsub.f32 %v11818_v39, %v7166_v42 }
0x2d51   :  { %10003 = vpow2.f32 %v7193_v44 }
0x2d52   :  { %v7195_v13 = vmul.f32 1.442695, %v7186_v21 }
0x2d54   :  { %10005 = vpow2.f32 %v7195_v13 }
0x2d5b   :  { %v10004_v36 = vpop.eup %10003 }
0x2d5c   :  { %v7209_v14 = vsel %vm280_vm2, %v10004_v36, 0.0 }
0x2d5d   :  { %7356 = vrot.lane.b32.xlu1 %v11744_v30, %s12024_s30 }
0x2d5e   :  { %v10006_v40 = vpop.eup %10005 }
0x2d5f   :  { %v7212_v27 = vsel %vm280_vm2, %v10006_v40, 0.0 }
0x2d62   :  { %7405 = vrot.lane.b32.xlu0 %v11746_v24, %s12024_s30 }
0x2d81   :  { %7210 = vadd.xlane.f32.xlu0 %v7209_v14  ;;  %7213 = vadd.xlane.f32.xlu1 %v7212_v27 }
0x2d92   :  { %7454 = vrot.lane.b32.xlu1 %v11778_v43, %s12024_s30 }
0x2dc5   :  { %v7172_v30 = vpop.xlane.xlu1 %7171  ;;  %v7169_v24 = vpop.xlane.xlu0 %7168 }
0x2dc6   :  { %v7188_v26 = vsub.f32 %v11826_v3, %v7172_v30  ;;  %v7187_v39 = vsub.f32 %v11823_v41, %v7169_v24 }
0x2dc8   :  { %v7199_v47 = vmul.f32 1.442695, %v7188_v26  ;;  %v7197_v4 = vmul.f32 1.442695, %v7187_v39 }
0x2dca   :  { %10007 = vpow2.f32 %v7199_v47 }
0x2dcb   :  { %10009 = vpow2.f32 %v7197_v4 }
0x2dd1   :  { %v7178_v46 = vpop.xlane.xlu1 %7177  ;;  %v7175_v55 = vpop.xlane.xlu0 %7174 }
0x2dd2   :  { %v7190_v62 = vsub.f32 %v7158_v2, %v7178_v46  ;;  %v7189_v19 = vsub.f32 %v11833_v1, %v7175_v55 }
0x2dd4   :  { %v11858_v37 = vpop.eup %10007  ;;  %v7203_v51 = vmul.f32 1.442695, %v7190_v62  ;;  %v7201_v54 = vmul.f32 1.442695, %v7189_v19 }
0x2dd5   :  { %v11860_v50 = vpop.eup %10009  ;;  %v7218_v43 = vsel %vm280_vm2, %v11858_v37, 0.0 }
0x2dd6   :  { %7219 = vadd.xlane.f32.xlu1 %v7218_v43  ;;  %v7215_v3 = vsel %vm280_vm2, %v11860_v50, 0.0  ;;  %10011 = vpow2.f32 %v7203_v51 }
0x2dd7   :  { %7216 = vadd.xlane.f32.xlu0 %v7215_v3 }
0x2dd9   :  { %v7184_v41 = vpop.xlane.xlu1 %7183  ;;  %v7181_v25 = vpop.xlane.xlu0 %7180 }
0x2dda   :  { %v7192_v56 = vsub.f32 %v7160_v52, %v7184_v41  ;;  %v7191_v45 = vsub.f32 %v11840_v6, %v7181_v25 }
0x2ddc   :  { %v7207_v10 = vmul.f32 1.442695, %v7192_v56  ;;  %v7205_v9 = vmul.f32 1.442695, %v7191_v45 }
0x2ddd   :  { %v7406_v2 = vpop.permute.xlu0 %7405  ;;  %v7357_v11 = vpop.permute.xlu1 %7356 }
0x2dde   :  { %10013 = vpow2.f32 %v7207_v10  ;;  %v7362_v17 = vsel %vm787_vm3, %v7357_v11, 0  ;;  %v7411_v5 = vsel %vm787_vm3, %v7406_v2, 0 }
0x2ddf   :  { %10015 = vpow2.f32 %v7201_v54 }
0x2de0   :  { %v11866_v59 = vpop.eup %10011  ;;  %10017 = vpow2.f32 %v7205_v9 }
0x2de1   :  { %v7224_v58 = vsel %vm280_vm2, %v11866_v59, 0.0 }
0x2de2   :  { %7225 = vadd.xlane.f32.xlu1 %v7224_v58 }
0x2de8   :  { %v11870_v33 = vpop.eup %10013 }
0x2de9   :  { %v7230_v12 = vsel %vm280_vm2, %v11870_v33, 0.0  ;;  %v11880_v29 = vpop.eup %10015 }
0x2dea   :  { %7231 = vadd.xlane.f32.xlu1 %v7230_v12  ;;  %v11884_v1 = vpop.eup %10017 }
0x2ded   :  { %7503 = vrot.lane.b32.xlu0 %v11776_v63, %s12024_s30  ;;  %v7221_v63 = vsel %vm280_vm2, %v11880_v29, 0.0 }
0x2dfb   :  { %7552 = vrot.lane.b32.xlu1 %v11786_v49, %s12024_s30  ;;  %v7227_v49 = vsel %vm280_vm2, %v11884_v1, 0.0 }
0x2e0c   :  { %7222 = vadd.xlane.f32.xlu0 %v7221_v63 }
0x2e0e   :  { %v7211_v16 = vpop.xlane.xlu0 %7210  ;;  %v7214_v8 = vpop.xlane.xlu1 %7213 }
0x2e0f   :  { %10019 = vrcp.f32 %v7211_v16 }
0x2e10   :  { %10021 = vrcp.f32 %v7214_v8  ;;  %7228 = vadd.xlane.f32.xlu0 %v7227_v49 }
0x2e12   :  { %v7455_v6 = vpop.permute.xlu1 %7454 }
0x2e13   :  { %v7460_v21 = vsel %vm787_vm3, %v7455_v6, 0 }
0x2e19   :  { %v10020_v7 = vpop.eup %10019 }
0x2e1a   :  { %v10022_v60 = vpop.eup %10021  ;;  %v7241_v22 = vmul.f32 %v10020_v7, %v10004_v36  ;;  %v9801_v7 = vld [vmem:[%s11348_s22 + $0x10] sm:$0xff]  }
0x2e1b   :  { %v7242_v15 = vmul.f32 %v10022_v60, %v10006_v40 }
0x2e1c   :  { %8400 = vst.msk [vmem:[%s11276_s21 + $0x40] sm:$0xff] %vm280_vm2, %v7241_v22  ;;  %v7249_v18 = vpack.c.bf16 %v7241_v22, %v7241_v22 }
0x2e1d   :  { %8401 = vst.msk [vmem:[%s11276_s21 + $0x48] sm:$0xff] %vm280_vm2, %v7242_v15  ;;  %v7250_v57 = vpack.c.bf16 %v7242_v15, %v7242_v15 }
0x2e1e   :  { %9417 = vmatmul.mubr.msk.bf16.vlgmr.msra.gmra.mrb[212].mxu0 %vm280_vm2, %v7249_v18  ;;  %v9802_v18 = vld [vmem:[%s11348_s22 + $0x18] sm:$0xff]  }
0x2e1f   :  { %9423 = vmatmul.mubr.msk.bf16.vlgmr.msra.gmra.mrb[216].mxu1 %vm280_vm2, %v7250_v57  ;;  %9427 = vmatpush3.bf16.msra.mxu0 %v7362_v17 }
0x2e20   :  { %9433 = vmatpush3.bf16.msra.mxu1 %v7411_v5  ;;  %9428 = vmatprep.mubr.msk.bf16.mxu0 %vm10069_vm0, %v10067_v0 }
0x2e21   :  { %9434 = vmatprep.mubr.msk.bf16.mxu1 %vm10069_vm0, %v10067_v0  ;;  %9438 = vmatprep.subr.bf16.mxu0 %v10067_v0 }
0x2e22   :  { %9444 = vmatprep.subr.bf16.mxu1 %v10067_v0 }
0x2e26   :  { %7601 = vrot.lane.b32.xlu0 %v11788_v34, %s12024_s30 }
0x2e63   :  { %v7220_v28 = vpop.xlane.xlu1 %7219 }
0x2e64   :  { %10023 = vrcp.f32 %v7220_v28  ;;  %v7217_v23 = vpop.xlane.xlu0 %7216 }
0x2e65   :  { %10025 = vrcp.f32 %v7217_v23 }
0x2e68   :  { %v7504_v61 = vpop.permute.xlu0 %7503 }
0x2e69   :  { %v7509_v20 = vsel %vm787_vm3, %v7504_v61, 0 }
0x2e6e   :  { %v10024_v53 = vpop.eup %10023 }
0x2e6f   :  { %v10026_v52 = vpop.eup %10025  ;;  %v7244_v31 = vmul.f32 %v10024_v53, %v11858_v37  ;;  %v7226_v48 = vpop.xlane.xlu1 %7225 }
0x2e70   :  { %v7243_v38 = vmul.f32 %v10026_v52, %v11860_v50  ;;  %10027 = vrcp.f32 %v7226_v48 }
0x2e71   :  { %8403 = vst.msk [vmem:[%s11276_s21 + $0x58] sm:$0xff] %vm280_vm2, %v7244_v31  ;;  %v7252_v42 = vpack.c.bf16 %v7244_v31, %v7244_v31 }
0x2e72   :  { %8402 = vst.msk [vmem:[%s11276_s21 + $0x50] sm:$0xff] %vm280_vm2, %v7243_v38  ;;  %v7251_v34 = vpack.c.bf16 %v7243_v38, %v7243_v38 }
0x2e73   :  { %9435 = vmatmul.mubr.msk.bf16.vlgmr.msra.gmra.mrb[220].mxu1 %vm280_vm2, %v7252_v42 }
0x2e74   :  { %9429 = vmatmul.mubr.msk.bf16.vlgmr.msra.gmra.mrb[216].mxu0 %vm280_vm2, %v7251_v34  ;;  %9445 = vmatpush3.bf16.msra.mxu1 %v7509_v20 }
0x2e75   :  { %9439 = vmatpush3.bf16.msra.mxu0 %v7460_v21  ;;  %9446 = vmatprep.mubr.msk.bf16.mxu1 %vm10069_vm0, %v10067_v0 }
0x2e76   :  { %9456 = vmatprep.subr.bf16.mxu1 %v10067_v0  ;;  %9440 = vmatprep.mubr.msk.bf16.mxu0 %vm10069_vm0, %v10067_v0 }
0x2e77   :  { %9450 = vmatprep.subr.bf16.mxu0 %v10067_v0  ;;  %v7232_v44 = vpop.xlane.xlu1 %7231 }
0x2e78   :  { %10029 = vrcp.f32 %v7232_v44 }
0x2e7a   :  { %v10028_v13 = vpop.eup %10027 }
0x2e7b   :  { %v7246_v36 = vmul.f32 %v10028_v13, %v11866_v59  ;;  %v7553_v62 = vpop.permute.xlu1 %7552 }
0x2e7c   :  { %v7558_v51 = vsel %vm787_vm3, %v7553_v62, 0 }
0x2e7d   :  { %8405 = vst.msk [vmem:[%s11276_s21 + $0x68] sm:$0xff] %vm280_vm2, %v7246_v36  ;;  %v7254_v40 = vpack.c.bf16 %v7246_v36, %v7246_v36 }
0x2e7f   :  { %9447 = vmatmul.mubr.msk.bf16.vlgmr.msra.gmra.mrb[224].mxu1 %vm280_vm2, %v7254_v40 }
0x2e80   :  { %9458 = vmatprep.mubr.msk.bf16.mxu1 %vm10069_vm0, %v10067_v0 }
0x2e82   :  { %v10030_v14 = vpop.eup %10029 }
0x2e83   :  { %v7248_v27 = vmul.f32 %v10030_v14, %v11870_v33 }
0x2e85   :  { %8407 = vst.msk [vmem:[%s11276_s21 + $0x78] sm:$0xff] %vm280_vm2, %v7248_v27  ;;  %v7256_v4 = vpack.c.bf16 %v7248_v27, %v7248_v27 }
0x2e99   :  { %v7223_v30 = vpop.xlane.xlu0 %7222 }
0x2e9a   :  { %10031 = vrcp.f32 %v7223_v30 }
0x2e9d   :  { %v7229_v24 = vpop.xlane.xlu0 %7228 }
0x2e9e   :  { %10033 = vrcp.f32 %v7229_v24 }
0x2ea1   :  { %v7602_v26 = vpop.permute.xlu0 %7601 }
0x2ea2   :  { %v7607_v39 = vsel %vm787_vm3, %v7602_v26, 0 }
0x2ea3   :  { %9457 = vmatpush3.bf16.msra.mxu1 %v7607_v39 }
0x2ea4   :  { %v10032_v47 = vpop.eup %10031  ;;  %9470 = vmatprep.subr.bf16.mxu1 %v10067_v0 }
0x2ea5   :  { %v7245_v46 = vmul.f32 %v10032_v47, %v11880_v29 }
0x2ea6   :  { %9459 = vmatmul.mubr.msk.bf16.vlgmr.msra.gmra.mrb[228].mxu1 %vm280_vm2, %v7256_v4  ;;  %v8413_v4 = vld [vmem:[%s11368_s20 + $0x1] ss:$0 sm:$0xff] }
0x2ea7   :  { %8404 = vst.msk [vmem:[%s11276_s21 + $0x60] sm:$0xff] %vm280_vm2, %v7245_v46  ;;  %v7253_v37 = vpack.c.bf16 %v7245_v46, %v7245_v46  ;;  %9474 = vmatprep.mubr.msk.bf16.mxu1 %vm10069_vm0, %v10067_v0 }
0x2ea8   :  { %v10034_v50 = vpop.eup %10033 }
0x2ea9   :  { %v7247_v43 = vmul.f32 %v10034_v50, %v11884_v1  ;;  %9441 = vmatmul.mubr.msk.bf16.vlgmr.msra.gmra.mrb[220].mxu0 %vm280_vm2, %v7253_v37 }
0x2eaa   :  { %9451 = vmatpush3.bf16.msra.mxu0 %v7558_v51  ;;  %9452 = vmatprep.mubr.msk.bf16.mxu0 %vm10069_vm0, %v10067_v0 }
0x2eab   :  { %8406 = vst.msk [vmem:[%s11276_s21 + $0x70] sm:$0xff] %vm280_vm2, %v7247_v43  ;;  %9462 = vmatprep.subr.bf16.mxu0 %v10067_v0  ;;  %v7255_v3 = vpack.c.bf16 %v7247_v43, %v7247_v43 }
0x2eb1   :  { %9453 = vmatmul.mubr.msk.bf16.vlgmr.msra.gmra.mrb[224].mxu0 %vm280_vm2, %v7255_v3 }
0x2eb2   :  { %9466 = vmatprep.mubr.msk.bf16.mxu0 %vm10069_vm0, %v10067_v0  ;;  %9463 = vmatpush3.bf16.msra.mxu0 %v9801_v7 }
0x2eb3   :  { %9464 = vmatprep.subr.bf16.mxu0 %v10067_v0 }
0x2eb6   :  { %9465 = vmatpush3.bf16.msra.mxu0 %v9802_v18 }
0x2eb7   :  { %9478 = vmatprep.subr.bf16.mxu0 %v10067_v0 }
0x2ef1   :  { %v7300_v41 = vpop.f32.mrb[212].mxu0 }
0x2ef2   :  { %v7349_v56 = vpop.f32.mrb[216].mxu1  ;;  %v9418_v10 = vpop.f32.mrb[213].mxu0 }
0x2ef3   :  { %v9424_v59 = vpop.f32.mrb[217].mxu1  ;;  %v7303_v58 = vpop.f32.mrb[214].mxu0 }
0x2ef4   :  { %v7352_v33 = vpop.f32.mrb[218].mxu1  ;;  %v9419_v12 = vpop.f32.mrb[215].mxu0 }
0x2ef5   :  { %v9425_v55 = vpop.f32.mrb[219].mxu1 }
0x2f46   :  { %v7447_v19 = vpop.f32.mrb[220].mxu1 }
0x2f47   :  { %v7398_v25 = vpop.f32.mrb[216].mxu0  ;;  %v9436_v54 = vpop.f32.mrb[221].mxu1 }
0x2f48   :  { %v9742_v45 = vpack.i.bf16 %v7447_v19, %v7398_v25  ;;  %v9430_v9 = vpop.f32.mrb[217].mxu0  ;;  %v7450_v29 = vpop.f32.mrb[222].mxu1 }
0x2f49   :  { %v7401_v2 = vpop.f32.mrb[218].mxu0  ;;  %v9437_v11 = vpop.f32.mrb[223].mxu1  ;;  %v9804_v9 = vld [vmem:[%s11380_s7 + $0x18] sm:$0xff]   ;;  %v9805_v29 = vld [vmem:[%s11389_s2 + $0x20] sm:$0xff]  }
0x2f4a   :  { %9743 = vrot.lane.b32.xlu1 %v9742_v45, %s12026_s29  ;;  %v9431_v63 = vpop.f32.mrb[219].mxu0  ;;  %v9803_v45 = vld [vmem:[%s11380_s7 + $0x10] sm:$0xff]   ;;  %v9806_v2 = vld [vmem:[%s11389_s2 + $0x28] sm:$0xff]  }
0x2f4b   :  { %9471 = vmatpush3.bf16.msra.mxu1 %v9803_v45  ;;  %v8447_v45 = vld [vmem:[%s11440_s27 + $0x1] ss:$0 sm:$0xff] }
0x2f4c   :  { %9472 = vmatprep.subr.bf16.mxu1 %v10067_v0 }
0x2f4f   :  { %9473 = vmatpush3.bf16.msra.mxu1 %v9804_v9 }
0x2f50   :  { %9490 = vmatprep.subr.bf16.mxu1 %v10067_v0 }
0x2f52   :  { %v7545_v1 = vpop.f32.mrb[224].mxu1 }
0x2f53   :  { %v9448_v16 = vpop.f32.mrb[225].mxu1 }
0x2f54   :  { %v7548_v8 = vpop.f32.mrb[226].mxu1 }
0x2f55   :  { %v9449_v49 = vpop.f32.mrb[227].mxu1 }
0x2f79   :  { %v7643_v60 = vpop.f32.mrb[228].mxu1 }
0x2f7a   :  { %v9460_v22 = vpop.f32.mrb[229].mxu1 }
0x2f7b   :  { %v7646_v15 = vpop.f32.mrb[230].mxu1  ;;  %v8419_v22 = vld [vmem:[%s11398_s8 + $0x1] ss:$0 sm:$0xff] }
0x2f7c   :  { %v7496_v57 = vpop.f32.mrb[220].mxu0  ;;  %v9461_v17 = vpop.f32.mrb[231].mxu1 }
0x2f7d   :  { %v9747_v5 = vpack.i.bf16 %v7545_v1, %v7496_v57  ;;  %v9442_v6 = vpop.f32.mrb[221].mxu0  ;;  %v8420_v17 = vld [vmem:[%s11403_s18 + $0x1] ss:$0 sm:$0xff] }
0x2f7e   :  { %v7499_v28 = vpop.f32.mrb[222].mxu0 }
0x2f7f   :  { %9748 = vrot.lane.b32.xlu0 %v9747_v5, %s12027_s13  ;;  %v9443_v23 = vpop.f32.mrb[223].mxu0 }
0x2f84   :  { %v7594_v53 = vpop.f32.mrb[224].mxu0 }
0x2f85   :  { %v9752_v52 = vpack.i.bf16 %v7643_v60, %v7594_v53  ;;  %v9454_v31 = vpop.f32.mrb[225].mxu0  ;;  %v9807_v53 = vld [vmem:[%s11389_s2 + $0x30] sm:$0xff]  }
0x2f86   :  { %v7597_v38 = vpop.f32.mrb[226].mxu0  ;;  %v8426_v31 = vld [vmem:[%s11417_s6 + $0x1] ss:$0 sm:$0xff] }
0x2f87   :  { %9753 = vrot.lane.b32.xlu1 %v9752_v52, %s12028_s10  ;;  %v9455_v61 = vpop.f32.mrb[227].mxu0  ;;  %v9808_v52 = vld [vmem:[%s11389_s2 + $0x38] sm:$0xff]  }
0x2fbc   :  { %v9744_v48 = vpop.permute.xlu1 %9743 }
0x2fbd   :  { %v9746_v34 = vunpack.i.h.bf16 %v9744_v48  ;;  %v9745_v20 = vunpack.i.l.bf16 %v9744_v48 }
0x2fbf   :  { %v7674_v36 = vsel %vm280_vm2, %v7349_v56, %v9746_v34  ;;  %v7673_v40 = vsel %vm280_vm2, %v7300_v41, %v9745_v20 }
0x2ff1   :  { %v9749_v42 = vpop.permute.xlu0 %9748 }
0x2ff2   :  { %v9751_v21 = vunpack.i.h.bf16 %v9749_v42  ;;  %v9750_v44 = vunpack.i.l.bf16 %v9749_v42 }
0x2ff4   :  { %v7676_v30 = vsel %vm1193_vm4, %v7674_v36, %v9751_v21  ;;  %v7675_v24 = vsel %vm1193_vm4, %v7673_v40, %v9750_v44  ;;  %v8439_v36 = vld [vmem:[%s11426_s3 + $0x1] ss:$0 sm:$0xff] }
0x2ff9   :  { %v9754_v13 = vpop.permute.xlu1 %9753 }
0x2ffa   :  { %v9756_v14 = vunpack.i.h.bf16 %v9754_v13  ;;  %v9755_v27 = vunpack.i.l.bf16 %v9754_v13 }
0x2ffc   :  { %v7678_v26 = vsel %vm1196_vm5, %v7676_v30, %v9756_v14  ;;  %v7677_v39 = vsel %vm1196_vm5, %v7675_v24, %v9755_v27 }
0x2ffd   :  { %v7693_v47 = vpack.c.bf16 %v7678_v26, %v7677_v39 }
0x2fff   :  { %9467 = vmatmul.mubr.msk.bf16.vlgmr.msra.gmra.mrb[228].mxu0 %vm204_vm1, %v7693_v47 }
0x3000   :  { %9486 = vmatprep.mubr.msk.bf16.mxu0 %vm10069_vm0, %v10067_v0  ;;  %9479 = vmatpush3.bf16.msra.mxu0 %v9805_v29 }
0x3001   :  { %9480 = vmatprep.subr.bf16.mxu0 %v10067_v0 }
0x3004   :  { %9481 = vmatpush3.bf16.msra.mxu0 %v9806_v2 }
0x3005   :  { %9482 = vmatprep.subr.bf16.mxu0 %v10067_v0 }
0x3008   :  { %9483 = vmatpush3.bf16.msra.mxu0 %v9807_v53 }
0x3009   :  { %9484 = vmatprep.subr.bf16.mxu0 %v10067_v0 }
0x300c   :  { %9485 = vmatpush3.bf16.msra.mxu0 %v9808_v52 }
0x30d2   :  { %v7751_v46 = vpop.f32.mrb[228].mxu0 }
0x30d3   :  { %v7752_v62 = vadd.f32 %v8413_v4, %v7751_v46  ;;  %v9468_v37 = vpop.f32.mrb[229].mxu0 }
0x30d4   :  { %v7754_v50 = vpop.f32.mrb[230].mxu0 }
0x30d5   :  { %v7758_v51 = vadd.f32 %v7752_v62, %v11732_v32  ;;  %v7755_v43 = vadd.f32 %v8413_v4, %v7754_v50  ;;  %v9469_v3 = vpop.f32.mrb[231].mxu0 }
0x30d7   :  { %v7759_v41 = vadd.f32 %v7755_v43, %v11734_v35  ;;  %v7764_v56 = vsel %vm204_vm1, %v7758_v51, 0.0 }
0x30d8   :  { %7765 = vadd.xlane.f32.xlu0 %v7764_v56 }
0x30d9   :  { %v7767_v10 = vsel %vm204_vm1, %v7759_v41, 0.0 }
0x30da   :  { %7768 = vadd.xlane.f32.xlu1 %v7767_v10 }
0x3165   :  { %v7766_v59 = vpop.xlane.xlu0 %7765 }
0x3166   :  { %v7770_v58 = vmul.f32 0.03125, %v7766_v59 }
0x3167   :  { %v7769_v33 = vpop.xlane.xlu1 %7768 }
0x3168   :  { %v7772_v12 = vsub.f32 %v7758_v51, %v7770_v58  ;;  %v7771_v55 = vmul.f32 0.03125, %v7769_v33  ;;  %v9809_v58 = vld [vmem:[%s8134_s11] sm:$0xff]   ;;  %v9810_v33 = vld [vmem:[%s8134_s11 + $0x8] sm:$0xff]  }
0x316a   :  { %v7773_v32 = vsub.f32 %v7759_v41, %v7771_v55  ;;  %v7774_v19 = vmul.f32 %v7772_v12, %v7772_v12 }
0x316c   :  { %v7776_v25 = vsel %vm204_vm1, %v7774_v19, 0.0  ;;  %v7775_v35 = vmul.f32 %v7773_v32, %v7773_v32 }
0x316d   :  { %7777 = vadd.xlane.f32.xlu0 %v7776_v25 }
0x316e   :  { %v7779_v54 = vsel %vm204_vm1, %v7775_v35, 0.0 }
0x3171   :  { %7780 = vadd.xlane.f32.xlu0 %v7779_v54 }
0x31fa   :  { %v7778_v11 = vpop.xlane.xlu0 %7777 }
0x31fb   :  { %v7782_v63 = vmul.f32 0.03125, %v7778_v11 }
0x31fd   :  { %v7784_v1 = vadd.f32 1e-12, %v7782_v63  ;;  %v8448_v63 = vld [vmem:[%s11445_s15 + $0x1] ss:$0 sm:$0xff] }
0x31fe   :  { %v7781_v16 = vpop.xlane.xlu0 %7780 }
0x31ff   :  { %10035 = vrsqrt.f32 %v7784_v1  ;;  %v7783_v8 = vmul.f32 0.03125, %v7781_v16 }
0x3201   :  { %v7785_v49 = vadd.f32 1e-12, %v7783_v8 }
0x3203   :  { %10037 = vrsqrt.f32 %v7785_v49  ;;  %v8449_v49 = vld [vmem:[%s8135_s26] ss:$0 sm:$0xff] }
0x3209   :  { %v10036_v7 = vpop.eup %10035 }
0x320a   :  { %v7788_v60 = vmul.f32 %v10036_v7, %v7772_v12 }
0x320c   :  { %v7796_v18 = vmul.f32 %v8419_v22, %v7788_v60 }
0x320d   :  { %v10038_v15 = vpop.eup %10037 }
0x320e   :  { %v7789_v57 = vmul.f32 %v10038_v15, %v7773_v32  ;;  %v7804_v6 = vadd.f32 %v8420_v17, %v7796_v18 }
0x3210   :  { %v7797_v5 = vmul.f32 %v8419_v22, %v7789_v57 }
0x3212   :  { %v7805_v28 = vadd.f32 %v8420_v17, %v7797_v5 }
0x3214   :  { %v7811_v23 = vpack.c.bf16 %v7805_v28, %v7804_v6 }
0x3216   :  { %9475 = vmatmul.mubr.msk.bf16.vlgmr.msra.gmra.mrb[232].mxu1 %vm204_vm1, %v7811_v23 }
0x3217   :  { %9494 = vmatprep.mubr.msk.bf16.mxu1 %vm10069_vm0, %v10067_v0  ;;  %9491 = vmatpush3.bf16.msra.mxu1 %v9809_v58 }
0x3218   :  { %9492 = vmatprep.subr.bf16.mxu1 %v10067_v0 }
0x321b   :  { %9493 = vmatpush3.bf16.msra.mxu1 %v9810_v33 }
0x32e9   :  { %v7869_v38 = vpop.f32.mrb[232].mxu1 }
0x32ea   :  { %v7870_v61 = vadd.f32 %v8426_v31, %v7869_v38  ;;  %v9476_v48 = vpop.f32.mrb[233].mxu1 }
0x32eb   :  { %v7872_v42 = vpop.f32.mrb[234].mxu1 }
0x32ec   :  { %v7873_v34 = vadd.f32 %v8426_v31, %v7872_v42  ;;  %v9477_v20 = vpop.f32.mrb[235].mxu1  ;;  %v7876_v21 = vmax.f32 %v7870_v61, 0.0 }
0x32ee   :  { %v7877_v44 = vmax.f32 %v7873_v34, 0.0 }
0x32f0   :  { %v7887_v13 = vpack.c.bf16 %v7877_v44, %v7876_v21 }
0x32f2   :  { %9487 = vmatmul.mubr.msk.bf16.vlgmr.msra.gmra.mrb[232].mxu0 %vm1432_vm6, %v7887_v13 }
0x33c5   :  { %v7957_v40 = vpop.f32.mrb[232].mxu0 }
0x33c6   :  { %v7958_v14 = vadd.f32 %v8439_v36, %v7957_v40  ;;  %v9488_v27 = vpop.f32.mrb[233].mxu0 }
0x33c7   :  { %v7960_v30 = vpop.f32.mrb[234].mxu0 }
0x33c8   :  { %v7964_v24 = vadd.f32 %v7958_v14, %v7804_v6  ;;  %v7961_v26 = vadd.f32 %v8439_v36, %v7960_v30  ;;  %v9489_v39 = vpop.f32.mrb[235].mxu0 }
0x33ca   :  { %v7965_v47 = vadd.f32 %v7961_v26, %v7805_v28  ;;  %v7970_v4 = vsel %vm204_vm1, %v7964_v24, 0.0 }
0x33cb   :  { %7971 = vadd.xlane.f32.xlu1 %v7970_v4 }
0x33cc   :  { %v7973_v46 = vsel %vm204_vm1, %v7965_v47, 0.0 }
0x33cd   :  { %7974 = vadd.xlane.f32.xlu0 %v7973_v46 }
0x3458   :  { %v7972_v62 = vpop.xlane.xlu1 %7971 }
0x3459   :  { %v7976_v37 = vmul.f32 0.03125, %v7972_v62 }
0x345a   :  { %v7975_v50 = vpop.xlane.xlu0 %7974 }
0x345b   :  { %v7978_v51 = vsub.f32 %v7964_v24, %v7976_v37  ;;  %v7977_v43 = vmul.f32 0.03125, %v7975_v50 }
0x345d   :  { %v7979_v3 = vsub.f32 %v7965_v47, %v7977_v43  ;;  %v7980_v41 = vmul.f32 %v7978_v51, %v7978_v51 }
0x345f   :  { %v7982_v56 = vsel %vm204_vm1, %v7980_v41, 0.0  ;;  %v7981_v10 = vmul.f32 %v7979_v3, %v7979_v3 }
0x3460   :  { %7983 = vadd.xlane.f32.xlu1 %v7982_v56 }
0x3461   :  { %v7985_v59 = vsel %vm204_vm1, %v7981_v10, 0.0 }
0x3462   :  { %7986 = vadd.xlane.f32.xlu0 %v7985_v59 }
0x34ed   :  { %v7984_v12 = vpop.xlane.xlu1 %7983 }
0x34ee   :  { %v7988_v55 = vmul.f32 0.03125, %v7984_v12 }
0x34ef   :  { %v7987_v32 = vpop.xlane.xlu0 %7986 }
0x34f0   :  { %v7990_v19 = vadd.f32 1e-12, %v7988_v55  ;;  %v7989_v25 = vmul.f32 0.03125, %v7987_v32 }
0x34f2   :  { %10039 = vrsqrt.f32 %v7990_v19  ;;  %v7991_v35 = vadd.f32 1e-12, %v7989_v25 }
0x34f4   :  { %10041 = vrsqrt.f32 %v7991_v35 }
0x34fc   :  { %v10040_v54 = vpop.eup %10039 }
0x34fd   :  { %v7994_v9 = vmul.f32 %v10040_v54, %v7978_v51 }
0x34fe   :  { %v10042_v29 = vpop.eup %10041 }
0x34ff   :  { %v8002_v2 = vmul.f32 %v8447_v45, %v7994_v9  ;;  %v7995_v11 = vmul.f32 %v10042_v29, %v7979_v3 }
0x3501   :  { %v8003_v1 = vmul.f32 %v8447_v45, %v7995_v11  ;;  %v8010_v16 = vadd.f32 %v8448_v63, %v8002_v2 }
0x3503   :  { %v8011_v0 = vadd.f32 %v8448_v63, %v8003_v1 }
0x3505   :  { %v8016_v8 = vpack.c.bf16 %v8011_v0, %v8010_v16 }
0x3507   :  { %9495 = vmatmul.mubr.msk.bf16.vlgmr.msra.gmra.mrb[236].mxu1 %vm204_vm1, %v8016_v8 }
0x35da   :  { %v8073_v7 = vpop.f32.mrb[236].mxu1 }
0x35db   :  { %v8074_v60 = vadd.f32 %v8449_v49, %v8073_v7  ;;  %v9496_v22 = vpop.f32.mrb[237].mxu1 }
0x35dc   :  { %v8076_v15 = vpop.f32.mrb[238].mxu1 }
0x35dd   :  { %8080 = vst [vmem:[%s8136_s24] sm:$0xff] %v8074_v60  ;;  %v8077_v18 = vadd.f32 %v8449_v49, %v8076_v15  ;;  %v9497_v57 = vpop.f32.mrb[239].mxu1 }
0x35df   :  { %8081 = vst [vmem:[%s8136_s24 + $0x8] sm:$0xff] %v8077_v18 }

</bundles_post_ra>
